<compile_context>
chip_gen: v5e
topology: v5e:2x2
jax: 0.10.0
libtpu: 0.0.40
codegen_flags: <defaults>
</compile_context>

<pallas_src>
import functools

import jax
import jax.numpy as jnp
from jax.experimental import pallas as pl
from jax.experimental.pallas import tpu as pltpu


def _round_up(x, m):
    return (x + m - 1) // m * m


# ----------------------------------------------------------------------------
# Pallas kernels
# ----------------------------------------------------------------------------
def _matmul_bias_act_kernel(a_ref, b_ref, bias_ref, o_ref, *, act):
    # bf16 x bf16 -> f32 accumulate on the MXU; epilogue stays in f32.
    acc = jnp.dot(a_ref[...], b_ref[...], preferred_element_type=jnp.float32)
    acc = acc + bias_ref[...]  # (1, bn) broadcasts over rows
    if act == "relu":
        acc = jnp.maximum(acc, 0.0)
    elif act == "sigmoid":
        acc = 1.0 / (1.0 + jnp.exp(-acc))
    o_ref[...] = acc


def _latent_kernel(x_ref, wmu_ref, bmu_ref, wsg_ref, bsg_ref, eps_ref,
                   mu_ref, sg_ref, lat_ref):
    """Fused linear_mu + linear_sigma + reparameterize (single pallas_call)."""
    x = x_ref[...]
    mu = jnp.dot(x, wmu_ref[...], preferred_element_type=jnp.float32) + bmu_ref[...]
    sg = jnp.dot(x, wsg_ref[...], preferred_element_type=jnp.float32) + bsg_ref[...]
    mu_ref[...] = mu
    sg_ref[...] = sg
    lat_ref[...] = mu + eps_ref[...] * jnp.exp(0.5 * sg)   # exp -> EUP slot


# ----------------------------------------------------------------------------
# Pre-padded matmul layers (weights prepared once, activations padded per call)
# ----------------------------------------------------------------------------
def _prep_matmul(wmat, bias, act, dtype=jnp.bfloat16):
    """wmat: (K, N) logical weight. Pads once to TPU-friendly (Kp, Np)."""
    K, N = wmat.shape
    Kp = _round_up(K, 128)
    bn = 256 if N >= 256 else _round_up(N, 128)
    Np = _round_up(N, bn)
    w_p = jnp.zeros((Kp, Np), dtype).at[:K, :N].set(wmat.astype(dtype))
    b_p = jnp.zeros((1, Np), jnp.float32).at[0, :N].set(bias.astype(jnp.float32))
    return {"w": w_p, "bias": b_p, "n": N, "bn": bn, "act": act, "dtype": dtype}


def matmul_prepared(a, layer):
    """act(A @ W + bias) using a pre-padded weight/bias; returns (M, n) f32."""
    M, K = a.shape
    Kp, Np = layer["w"].shape
    bn = layer["bn"]
    bm = 512 if M >= 512 else _round_up(M, 16)
    Mp = _round_up(M, bm)
    a_p = jnp.zeros((Mp, Kp), layer["dtype"]).at[:M, :K].set(a.astype(layer["dtype"]))

    grid = (Mp // bm, Np // bn)
    out = pl.pallas_call(
        functools.partial(_matmul_bias_act_kernel, act=layer["act"]),
        out_shape=jax.ShapeDtypeStruct((Mp, Np), jnp.float32),
        grid_spec=pltpu.PrefetchScalarGridSpec(
            num_scalar_prefetch=0,
            grid=grid,
            in_specs=[
                pl.BlockSpec((bm, Kp), lambda i, j: (i, 0)),
                pl.BlockSpec((Kp, bn), lambda i, j: (0, j)),
                pl.BlockSpec((1, bn), lambda i, j: (0, j)),
            ],
            out_specs=pl.BlockSpec((bm, bn), lambda i, j: (i, j)),
        ),
        compiler_params=pltpu.CompilerParams(
            dimension_semantics=("parallel", "parallel"),
            vmem_limit_bytes=32 * 1024 * 1024,
        ),
    )(a_p, layer["w"], layer["bias"])
    return out[:M, :layer["n"]]


# ----------------------------------------------------------------------------
# conv / deconv lowering (NHWC; im2col / col2im glue in plain JAX)
# ----------------------------------------------------------------------------
def _im2col_nhwc(x, k, stride):
    N, H, W, C = x.shape
    Ho = (H - k) // stride + 1
    Wo = (W - k) // stride + 1
    cols = []
    for kh in range(k):
        for kw in range(k):
            cols.append(x[:, kh:kh + stride * Ho:stride,
                             kw:kw + stride * Wo:stride, :])
    patches = jnp.stack(cols, axis=3)                # (N, Ho, Wo, k*k, C)
    return patches.reshape(N * Ho * Wo, k * k * C), Ho, Wo


def conv2d_nhwc(x, layer, stride):
    """x: (N,H,W,Ci) -> (N,Ho,Wo,Co). Weight columns ordered (kh, kw, ci)."""
    N = x.shape[0]
    a, Ho, Wo = _im2col_nhwc(x, layer["k"], stride)
    out = matmul_prepared(a, layer)                  # (N*Ho*Wo, Co)
    return out.reshape(N, Ho, Wo, layer["co"])


def conv_transpose2d_nhwc(x, layer, stride):
    """PyTorch ConvTranspose2d(pad=0) via matmul + col2im overlap-add.

    x: (N,H,W,Ci) -> (N, (H-1)*s+k, (W-1)*s+k, Co)."""
    N, H, W, Ci = x.shape
    k, Co = layer["k"], layer["co"]
    patches = matmul_prepared(x.reshape(N * H * W, Ci), layer)   # (N*H*W, k*k*Co)
    patches = patches.reshape(N, H, W, k, k, Co)
    Ho = (H - 1) * stride + k
    Wo = (W - 1) * stride + k
    out = jnp.zeros((N, Ho, Wo, Co), jnp.float32)
    for kh in range(k):
        for kw in range(k):
            out = out.at[:, kh:kh + stride * H:stride,
                            kw:kw + stride * W:stride, :].add(patches[:, :, :, kh, kw, :])
    out = out + layer["out_bias"]
    if layer["out_act"] == "relu":
        out = jnp.maximum(out, 0.0)
    elif layer["out_act"] == "sigmoid":
        out = jax.nn.sigmoid(out)
    return out


# ----------------------------------------------------------------------------
# Parameters (deterministic synthetic init) and one-time preparation
# ----------------------------------------------------------------------------
def init_params(key, content_latent_size=32, input_channel=3, flatten_size=1024):
    def w(key, shape, fan_in):
        return (jax.random.normal(key, shape, jnp.float32) / jnp.sqrt(fan_in)).astype(jnp.float32)

    ks = jax.random.split(key, 11)
    p = {}
    # encoder convs (Conv2d weight layout: (Co, Ci, k, k))
    p["e1w"] = w(ks[0], (32, input_channel, 4, 4), input_channel * 16); p["e1b"] = jnp.zeros((32,), jnp.float32)
    p["e2w"] = w(ks[1], (64, 32, 4, 4), 32 * 16);    p["e2b"] = jnp.zeros((64,), jnp.float32)
    p["e3w"] = w(ks[2], (128, 64, 4, 4), 64 * 16);   p["e3b"] = jnp.zeros((128,), jnp.float32)
    p["e4w"] = w(ks[3], (256, 128, 4, 4), 128 * 16); p["e4b"] = jnp.zeros((256,), jnp.float32)
    # linear heads (Linear weight layout: (out, in))
    p["muw"] = w(ks[4], (content_latent_size, flatten_size), flatten_size); p["mub"] = jnp.zeros((content_latent_size,), jnp.float32)
    p["sgw"] = w(ks[5], (content_latent_size, flatten_size), flatten_size); p["sgb"] = jnp.zeros((content_latent_size,), jnp.float32)
    p["fc1w"] = w(ks[6], (flatten_size, content_latent_size), content_latent_size); p["fc1b"] = jnp.zeros((flatten_size,), jnp.float32)
    # decoder deconvs (ConvTranspose2d weight layout: (Ci, Co, k, k))
    p["d1w"] = w(ks[7], (flatten_size, 128, 5, 5), flatten_size); p["d1b"] = jnp.zeros((128,), jnp.float32)
    p["d2w"] = w(ks[8], (128, 64, 5, 5), 128 * 25);  p["d2b"] = jnp.zeros((64,), jnp.float32)
    p["d3w"] = w(ks[9], (64, 32, 6, 6), 64 * 36);    p["d3b"] = jnp.zeros((32,), jnp.float32)
    p["d4w"] = w(ks[10], (32, 3, 6, 6), 32 * 36);    p["d4b"] = jnp.zeros((3,), jnp.float32)
    return p


def prepare_params(p, content_latent_size=32):
    """Transpose / reshape / pad all weights once (not per forward)."""
    prep = {}
    # encoder convs: columns ordered (kh, kw, ci) to match NHWC im2col
    for name, kw_, kb in [("e1", "e1w", "e1b"), ("e2", "e2w", "e2b"),
                          ("e3", "e3w", "e3b"), ("e4", "e4w", "e4b")]:
        wgt, b = p[kw_], p[kb]
        Co, Ci, k, _ = wgt.shape
        wmat = jnp.transpose(wgt, (2, 3, 1, 0)).reshape(k * k * Ci, Co)
        layer = _prep_matmul(wmat, b, "relu", jnp.bfloat16)
        layer.update(k=k, co=Co)
        prep[name] = layer

    # latent heads (kept f32: tiny, fused with reparameterize)
    L = content_latent_size
    Lp = _round_up(L, 128)
    prep["L"], prep["Lp"] = L, Lp
    prep["muw"] = jnp.zeros((p["muw"].shape[1], Lp), jnp.float32).at[:, :L].set(p["muw"].T)
    prep["mub"] = jnp.zeros((1, Lp), jnp.float32).at[0, :L].set(p["mub"])
    prep["sgw"] = jnp.zeros((p["sgw"].shape[1], Lp), jnp.float32).at[:, :L].set(p["sgw"].T)
    prep["sgb"] = jnp.zeros((1, Lp), jnp.float32).at[0, :L].set(p["sgb"])

    # decoder fc1
    prep["fc1"] = _prep_matmul(p["fc1w"].T, p["fc1b"], "none", jnp.bfloat16)

    # d1: ConvTranspose on a 1x1 input is a pure matmul; cols ordered (kh, kw, co)
    d1w = p["d1w"]
    Ci, Co, k, _ = d1w.shape
    d1mat = jnp.transpose(d1w, (0, 2, 3, 1)).reshape(Ci, k * k * Co)
    d1bias = jnp.tile(p["d1b"], k * k)               # co varies fastest in columns
    layer = _prep_matmul(d1mat, d1bias, "relu", jnp.bfloat16)
    layer.update(k=k, co=Co)
    prep["d1"] = layer

    # d2-d4: matmul (Ci -> k*k*Co), bias + activation applied after col2im
    for name, kw_, kb, act in [("d2", "d2w", "d2b", "relu"),
                               ("d3", "d3w", "d3b", "relu"),
                               ("d4", "d4w", "d4b", "sigmoid")]:
        wgt, b = p[kw_], p[kb]
        Ci, Co, k, _ = wgt.shape
        wmat = jnp.transpose(wgt, (0, 2, 3, 1)).reshape(Ci, k * k * Co)
        layer = _prep_matmul(wmat, jnp.zeros((k * k * Co,), jnp.float32),
                             "none", jnp.bfloat16)
        layer.update(k=k, co=Co, out_bias=b.astype(jnp.float32), out_act=act)
        prep[name] = layer
    return prep


# ----------------------------------------------------------------------------
# Forward pass
# ----------------------------------------------------------------------------
def latent_heads(x_flat, prep, eps):
    """mu, sigma, latent = reparameterize(mu, sigma) in one pallas_call."""
    Nb, K = x_flat.shape
    L, Lp = prep["L"], prep["Lp"]
    Mp = _round_up(Nb, 8)
    x_p = jnp.zeros((Mp, K), jnp.float32).at[:Nb].set(x_flat.astype(jnp.float32))
    eps_p = jnp.zeros((Mp, Lp), jnp.float32).at[:Nb, :L].set(eps.astype(jnp.float32))
    mu, sg, lat = pl.pallas_call(
        _latent_kernel,
        out_shape=(jax.ShapeDtypeStruct((Mp, Lp), jnp.float32),
                   jax.ShapeDtypeStruct((Mp, Lp), jnp.float32),
                   jax.ShapeDtypeStruct((Mp, Lp), jnp.float32)),
    )(x_p, prep["muw"], prep["mub"], prep["sgw"], prep["sgb"], eps_p)
    return mu[:Nb, :L], sg[:Nb, :L], lat[:Nb, :L]


def vae64_forward(prep, x, eps):
    """x: (N, 3, 64, 64) NCHW f32, eps: (N, L). Returns (mu, sigma, recon_x)."""
    N = x.shape[0]
    h = jnp.transpose(x, (0, 2, 3, 1))                       # NHWC at the boundary
    # ---- encoder ----
    h = conv2d_nhwc(h, prep["e1"], 2)                        # (N,31,31,32)
    h = conv2d_nhwc(h, prep["e2"], 2)                        # (N,14,14,64)
    h = conv2d_nhwc(h, prep["e3"], 2)                        # (N,6,6,128)
    h = conv2d_nhwc(h, prep["e4"], 2)                        # (N,2,2,256)
    # PyTorch .view flattens NCHW order -> transpose the tiny 2x2x256 tensor
    x_flat = jnp.transpose(h, (0, 3, 1, 2)).reshape(N, -1)   # (N,1024)
    mu, sigma, latent = latent_heads(x_flat, prep, eps)
    # ---- decoder ----
    lat1 = matmul_prepared(latent, prep["fc1"])              # (N,1024)
    h = matmul_prepared(lat1, prep["d1"])                    # (N, 5*5*128)
    h = h.reshape(N, prep["d1"]["k"], prep["d1"]["k"], prep["d1"]["co"])  # (N,5,5,128)
    h = conv_transpose2d_nhwc(h, prep["d2"], 2)              # (N,13,13,64)
    h = conv_transpose2d_nhwc(h, prep["d3"], 2)              # (N,30,30,32)
    recon = conv_transpose2d_nhwc(h, prep["d4"], 2)          # (N,64,64,3)
    return mu, sigma, jnp.transpose(recon, (0, 3, 1, 2))     # back to NCHW


if __name__ == "__main__":
    key = jax.random.PRNGKey(0)
    k_param, k_x, k_eps = jax.random.split(key, 3)

    N, C, H, W = 2, 3, 64, 64  # flatten_size=1024 requires 64x64 input ("VAE_64")
    content_latent = 32

    params = init_params(k_param, content_latent_size=content_latent,
                         input_channel=C, flatten_size=1024)
    prep = prepare_params(params, content_latent_size=content_latent)

    x = jax.random.normal(k_x, (N, C, H, W), jnp.float32)
    # TODO(synk): torch.randn_like inside reparameterize is replaced by a
    # deterministic jax.random.normal eps supplied from outside the kernel.
    eps = jax.random.normal(k_eps, (N, content_latent), jnp.float32)

    fwd = jax.jit(lambda xx, ee: vae64_forward(prep, xx, ee))
    mu, sigma, recon = fwd(x, eps)
    jax.block_until_ready((mu, sigma, recon))

    assert mu.shape == (N, content_latent)
    assert sigma.shape == (N, content_latent)
    assert recon.shape == (N, C, H, W)
    assert bool(jnp.all(jnp.isfinite(mu)))
    assert bool(jnp.all(jnp.isfinite(sigma)))
    assert bool(jnp.all(jnp.isfinite(recon)))
    print("KERNEL_OK")
</pallas_src>

<mosaic_0001>
module attributes {stable_mosaic.version = 11 : i64} {
  func.func @_matmul_bias_act_kernel(%arg0: i32, %arg1: i32, %arg2: memref<512x128xbf16, #tpu.memory_space<vmem>>, %arg3: memref<128x128xbf16, #tpu.memory_space<vmem>>, %arg4: memref<1x128xf32, #tpu.memory_space<vmem>>, %arg5: memref<512x128xf32, #tpu.memory_space<vmem>>) attributes {dimension_semantics = [#tpu.dimension_semantics<parallel>, #tpu.dimension_semantics<parallel>], iteration_bounds = array<i64: 4, 1>, scalar_prefetch = 0 : i64, scratch_operands = 0 : i64, tpu.core_type = #tpu.core_type<tc>, window_params = [{transform_indices = @transform_0, window_bounds = array<i64: 512, 128>}, {transform_indices = @transform_1, window_bounds = array<i64: 128, 128>}, {transform_indices = @transform_2, window_bounds = array<i64: 1, 128>}, {transform_indices = @transform_3, window_bounds = array<i64: 512, 128>}]} {
    %c0 = arith.constant 0 : index
    %c0_0 = arith.constant 0 : index
    %0 = vector.load %arg2[%c0, %c0_0] : memref<512x128xbf16, #tpu.memory_space<vmem>>, vector<512x128xbf16>
    %c0_1 = arith.constant 0 : index
    %c0_2 = arith.constant 0 : index
    %1 = vector.load %arg3[%c0_1, %c0_2] : memref<128x128xbf16, #tpu.memory_space<vmem>>, vector<128x128xbf16>
    %cst = arith.constant dense<0.000000e+00> : vector<512x128xf32>
    %2 = tpu.matmul %0, %1, %cst {dimension_numbers = #tpu.dot_dimension_numbers<[1], [0], [0], [1], [0, 0, 1, 1], [], []>} : vector<512x128xbf16>, vector<128x128xbf16>, vector<512x128xf32> -> vector<512x128xf32>
    %c0_3 = arith.constant 0 : index
    %c0_4 = arith.constant 0 : index
    %3 = vector.load %arg4[%c0_3, %c0_4] : memref<1x128xf32, #tpu.memory_space<vmem>>, vector<1x128xf32>
    %4 = vector.broadcast %3 : vector<1x128xf32> to vector<512x128xf32>
    %5 = arith.addf %2, %4 : vector<512x128xf32>
    %cst_5 = arith.constant 0.000000e+00 : f32
    %6 = vector.broadcast %cst_5 : f32 to vector<512x128xf32>
    %7 = arith.maximumf %5, %6 : vector<512x128xf32>
    %c0_6 = arith.constant 0 : index
    %c0_7 = arith.constant 0 : index
    %8 = vector.load %arg5[%c0_6, %c0_7] : memref<512x128xf32, #tpu.memory_space<vmem>>, vector<512x128xf32>
    tpu.vector_store %arg5[%c0_6, %c0_7], %7 {strides = array<i32>} : memref<512x128xf32, #tpu.memory_space<vmem>>, vector<512x128xf32>,
    return
  }
  func.func @transform_0(%arg0: i32, %arg1: i32) -> (i32, i32) {
    %c0_i32 = arith.constant 0 : i32
    %c0_i32_0 = arith.constant 0 : i32
    return %arg0, %c0_i32 : i32, i32
  }
  func.func @transform_1(%arg0: i32, %arg1: i32) -> (i32, i32) {
    %c0_i32 = arith.constant 0 : i32
    %c0_i32_0 = arith.constant 0 : i32
    return %c0_i32, %arg1 : i32, i32
  }
  func.func @transform_2(%arg0: i32, %arg1: i32) -> (i32, i32) {
    %c0_i32 = arith.constant 0 : i32
    %c0_i32_0 = arith.constant 0 : i32
    return %c0_i32, %arg1 : i32, i32
  }
  func.func @transform_3(%arg0: i32, %arg1: i32) -> (i32, i32) {
    %c0_i32 = arith.constant 0 : i32
    return %arg0, %arg1 : i32, i32
  }
}

module attributes {stable_mosaic.version = 11 : i64} {
  func.func @_matmul_bias_act_kernel(%arg0: i32, %arg1: i32, %arg2: memref<400x512xbf16, #tpu.memory_space<vmem>>, %arg3: memref<512x128xbf16, #tpu.memory_space<vmem>>, %arg4: memref<1x128xf32, #tpu.memory_space<vmem>>, %arg5: memref<400x128xf32, #tpu.memory_space<vmem>>) attributes {dimension_semantics = [#tpu.dimension_semantics<parallel>, #tpu.dimension_semantics<parallel>], iteration_bounds = array<i64: 1, 1>, scalar_prefetch = 0 : i64, scratch_operands = 0 : i64, tpu.core_type = #tpu.core_type<tc>, window_params = [{transform_indices = @transform_0, window_bounds = array<i64: 400, 512>}, {transform_indices = @transform_1, window_bounds = array<i64: 512, 128>}, {transform_indices = @transform_2, window_bounds = array<i64: 1, 128>}, {transform_indices = @transform_3, window_bounds = array<i64: 400, 128>}]} {
    %c0 = arith.constant 0 : index
    %c0_0 = arith.constant 0 : index
    %0 = vector.load %arg2[%c0, %c0_0] : memref<400x512xbf16, #tpu.memory_space<vmem>>, vector<400x512xbf16>
    %c0_1 = arith.constant 0 : index
    %c0_2 = arith.constant 0 : index
    %1 = vector.load %arg3[%c0_1, %c0_2] : memref<512x128xbf16, #tpu.memory_space<vmem>>, vector<512x128xbf16>
    %cst = arith.constant dense<0.000000e+00> : vector<400x128xf32>
    %2 = tpu.matmul %0, %1, %cst {dimension_numbers = #tpu.dot_dimension_numbers<[1], [0], [0], [1], [0, 0, 1, 1], [], []>} : vector<400x512xbf16>, vector<512x128xbf16>, vector<400x128xf32> -> vector<400x128xf32>
    %c0_3 = arith.constant 0 : index
    %c0_4 = arith.constant 0 : index
    %3 = vector.load %arg4[%c0_3, %c0_4] : memref<1x128xf32, #tpu.memory_space<vmem>>, vector<1x128xf32>
    %4 = vector.broadcast %3 : vector<1x128xf32> to vector<400x128xf32>
    %5 = arith.addf %2, %4 : vector<400x128xf32>
    %cst_5 = arith.constant 0.000000e+00 : f32
    %6 = vector.broadcast %cst_5 : f32 to vector<400x128xf32>
    %7 = arith.maximumf %5, %6 : vector<400x128xf32>
    %c0_6 = arith.constant 0 : index
    %c0_7 = arith.constant 0 : index
    %8 = vector.load %arg5[%c0_6, %c0_7] : memref<400x128xf32, #tpu.memory_space<vmem>>, vector<400x128xf32>
    tpu.vector_store %arg5[%c0_6, %c0_7], %7 {strides = array<i32>} : memref<400x128xf32, #tpu.memory_space<vmem>>, vector<400x128xf32>,
    return
  }
  func.func @transform_0(%arg0: i32, %arg1: i32) -> (i32, i32) {
    %c0_i32 = arith.constant 0 : i32
    %c0_i32_0 = arith.constant 0 : i32
    return %arg0, %c0_i32 : i32, i32
  }
  func.func @transform_1(%arg0: i32, %arg1: i32) -> (i32, i32) {
    %c0_i32 = arith.constant 0 : i32
    %c0_i32_0 = arith.constant 0 : i32
    return %c0_i32, %arg1 : i32, i32
  }
  func.func @transform_2(%arg0: i32, %arg1: i32) -> (i32, i32) {
    %c0_i32 = arith.constant 0 : i32
    %c0_i32_0 = arith.constant 0 : i32
    return %c0_i32, %arg1 : i32, i32
  }
  func.func @transform_3(%arg0: i32, %arg1: i32) -> (i32, i32) {
    %c0_i32 = arith.constant 0 : i32
    return %arg0, %arg1 : i32, i32
  }
}

module attributes {stable_mosaic.version = 11 : i64} {
  func.func @_matmul_bias_act_kernel(%arg0: i32, %arg1: i32, %arg2: memref<80x1024xbf16, #tpu.memory_space<vmem>>, %arg3: memref<1024x128xbf16, #tpu.memory_space<vmem>>, %arg4: memref<1x128xf32, #tpu.memory_space<vmem>>, %arg5: memref<80x128xf32, #tpu.memory_space<vmem>>) attributes {dimension_semantics = [#tpu.dimension_semantics<parallel>, #tpu.dimension_semantics<parallel>], iteration_bounds = array<i64: 1, 1>, scalar_prefetch = 0 : i64, scratch_operands = 0 : i64, tpu.core_type = #tpu.core_type<tc>, window_params = [{transform_indices = @transform_0, window_bounds = array<i64: 80, 1024>}, {transform_indices = @transform_1, window_bounds = array<i64: 1024, 128>}, {transform_indices = @transform_2, window_bounds = array<i64: 1, 128>}, {transform_indices = @transform_3, window_bounds = array<i64: 80, 128>}]} {
    %c0 = arith.constant 0 : index
    %c0_0 = arith.constant 0 : index
    %0 = vector.load %arg2[%c0, %c0_0] : memref<80x1024xbf16, #tpu.memory_space<vmem>>, vector<80x1024xbf16>
    %c0_1 = arith.constant 0 : index
    %c0_2 = arith.constant 0 : index
    %1 = vector.load %arg3[%c0_1, %c0_2] : memref<1024x128xbf16, #tpu.memory_space<vmem>>, vector<1024x128xbf16>
    %cst = arith.constant dense<0.000000e+00> : vector<80x128xf32>
    %2 = tpu.matmul %0, %1, %cst {dimension_numbers = #tpu.dot_dimension_numbers<[1], [0], [0], [1], [0, 0, 1, 1], [], []>} : vector<80x1024xbf16>, vector<1024x128xbf16>, vector<80x128xf32> -> vector<80x128xf32>
    %c0_3 = arith.constant 0 : index
    %c0_4 = arith.constant 0 : index
    %3 = vector.load %arg4[%c0_3, %c0_4] : memref<1x128xf32, #tpu.memory_space<vmem>>, vector<1x128xf32>
    %4 = vector.broadcast %3 : vector<1x128xf32> to vector<80x128xf32>
    %5 = arith.addf %2, %4 : vector<80x128xf32>
    %cst_5 = arith.constant 0.000000e+00 : f32
    %6 = vector.broadcast %cst_5 : f32 to vector<80x128xf32>
    %7 = arith.maximumf %5, %6 : vector<80x128xf32>
    %c0_6 = arith.constant 0 : index
    %c0_7 = arith.constant 0 : index
    %8 = vector.load %arg5[%c0_6, %c0_7] : memref<80x128xf32, #tpu.memory_space<vmem>>, vector<80x128xf32>
    tpu.vector_store %arg5[%c0_6, %c0_7], %7 {strides = array<i32>} : memref<80x128xf32, #tpu.memory_space<vmem>>, vector<80x128xf32>,
    return
  }
  func.func @transform_0(%arg0: i32, %arg1: i32) -> (i32, i32) {
    %c0_i32 = arith.constant 0 : i32
    %c0_i32_0 = arith.constant 0 : i32
    return %arg0, %c0_i32 : i32, i32
  }
  func.func @transform_1(%arg0: i32, %arg1: i32) -> (i32, i32) {
    %c0_i32 = arith.constant 0 : i32
    %c0_i32_0 = arith.constant 0 : i32
    return %c0_i32, %arg1 : i32, i32
  }
  func.func @transform_2(%arg0: i32, %arg1: i32) -> (i32, i32) {
    %c0_i32 = arith.constant 0 : i32
    %c0_i32_0 = arith.constant 0 : i32
    return %c0_i32, %arg1 : i32, i32
  }
  func.func @transform_3(%arg0: i32, %arg1: i32) -> (i32, i32) {
    %c0_i32 = arith.constant 0 : i32
    return %arg0, %arg1 : i32, i32
  }
}

module attributes {stable_mosaic.version = 11 : i64} {
  func.func @_matmul_bias_act_kernel(%arg0: i32, %arg1: i32, %arg2: memref<16x2048xbf16, #tpu.memory_space<vmem>>, %arg3: memref<2048x256xbf16, #tpu.memory_space<vmem>>, %arg4: memref<1x256xf32, #tpu.memory_space<vmem>>, %arg5: memref<16x256xf32, #tpu.memory_space<vmem>>) attributes {dimension_semantics = [#tpu.dimension_semantics<parallel>, #tpu.dimension_semantics<parallel>], iteration_bounds = array<i64: 1, 1>, scalar_prefetch = 0 : i64, scratch_operands = 0 : i64, tpu.core_type = #tpu.core_type<tc>, window_params = [{transform_indices = @transform_0, window_bounds = array<i64: 16, 2048>}, {transform_indices = @transform_1, window_bounds = array<i64: 2048, 256>}, {transform_indices = @transform_2, window_bounds = array<i64: 1, 256>}, {transform_indices = @transform_3, window_bounds = array<i64: 16, 256>}]} {
    %c0 = arith.constant 0 : index
    %c0_0 = arith.constant 0 : index
    %0 = vector.load %arg2[%c0, %c0_0] : memref<16x2048xbf16, #tpu.memory_space<vmem>>, vector<16x2048xbf16>
    %c0_1 = arith.constant 0 : index
    %c0_2 = arith.constant 0 : index
    %1 = vector.load %arg3[%c0_1, %c0_2] : memref<2048x256xbf16, #tpu.memory_space<vmem>>, vector<2048x256xbf16>
    %cst = arith.constant dense<0.000000e+00> : vector<16x256xf32>
    %2 = tpu.matmul %0, %1, %cst {dimension_numbers = #tpu.dot_dimension_numbers<[1], [0], [0], [1], [0, 0, 1, 1], [], []>} : vector<16x2048xbf16>, vector<2048x256xbf16>, vector<16x256xf32> -> vector<16x256xf32>
    %c0_3 = arith.constant 0 : index
    %c0_4 = arith.constant 0 : index
    %3 = vector.load %arg4[%c0_3, %c0_4] : memref<1x256xf32, #tpu.memory_space<vmem>>, vector<1x256xf32>
    %4 = vector.broadcast %3 : vector<1x256xf32> to vector<16x256xf32>
    %5 = arith.addf %2, %4 : vector<16x256xf32>
    %cst_5 = arith.constant 0.000000e+00 : f32
    %6 = vector.broadcast %cst_5 : f32 to vector<16x256xf32>
    %7 = arith.maximumf %5, %6 : vector<16x256xf32>
    %c0_6 = arith.constant 0 : index
    %c0_7 = arith.constant 0 : index
    %8 = vector.load %arg5[%c0_6, %c0_7] : memref<16x256xf32, #tpu.memory_space<vmem>>, vector<16x256xf32>
    tpu.vector_store %arg5[%c0_6, %c0_7], %7 {strides = array<i32>} : memref<16x256xf32, #tpu.memory_space<vmem>>, vector<16x256xf32>,
    return
  }
  func.func @transform_0(%arg0: i32, %arg1: i32) -> (i32, i32) {
    %c0_i32 = arith.constant 0 : i32
    %c0_i32_0 = arith.constant 0 : i32
    return %arg0, %c0_i32 : i32, i32
  }
  func.func @transform_1(%arg0: i32, %arg1: i32) -> (i32, i32) {
    %c0_i32 = arith.constant 0 : i32
    %c0_i32_0 = arith.constant 0 : i32
    return %c0_i32, %arg1 : i32, i32
  }
  func.func @transform_2(%arg0: i32, %arg1: i32) -> (i32, i32) {
    %c0_i32 = arith.constant 0 : i32
    %c0_i32_0 = arith.constant 0 : i32
    return %c0_i32, %arg1 : i32, i32
  }
  func.func @transform_3(%arg0: i32, %arg1: i32) -> (i32, i32) {
    %c0_i32 = arith.constant 0 : i32
    return %arg0, %arg1 : i32, i32
  }
}

module attributes {stable_mosaic.version = 11 : i64} {
  func.func @_latent_kernel(%arg0: memref<8x1024xf32, #tpu.memory_space<vmem>>, %arg1: memref<1024x128xf32, #tpu.memory_space<vmem>>, %arg2: memref<1x128xf32, #tpu.memory_space<vmem>>, %arg3: memref<1024x128xf32, #tpu.memory_space<vmem>>, %arg4: memref<1x128xf32, #tpu.memory_space<vmem>>, %arg5: memref<8x128xf32, #tpu.memory_space<vmem>>, %arg6: memref<8x128xf32, #tpu.memory_space<vmem>>, %arg7: memref<8x128xf32, #tpu.memory_space<vmem>>, %arg8: memref<8x128xf32, #tpu.memory_space<vmem>>) attributes {dimension_semantics = [], scalar_prefetch = 0 : i64, scratch_operands = 0 : i64, tpu.core_type = #tpu.core_type<tc>} {
    %c0 = arith.constant 0 : index
    %c0_0 = arith.constant 0 : index
    %0 = vector.load %arg0[%c0, %c0_0] : memref<8x1024xf32, #tpu.memory_space<vmem>>, vector<8x1024xf32>
    %c0_1 = arith.constant 0 : index
    %c0_2 = arith.constant 0 : index
    %1 = vector.load %arg1[%c0_1, %c0_2] : memref<1024x128xf32, #tpu.memory_space<vmem>>, vector<1024x128xf32>
    %cst = arith.constant dense<0.000000e+00> : vector<8x128xf32>
    %2 = tpu.matmul %0, %1, %cst {dimension_numbers = #tpu.dot_dimension_numbers<[1], [0], [0], [1], [0, 0, 1, 1], [], []>} : vector<8x1024xf32>, vector<1024x128xf32>, vector<8x128xf32> -> vector<8x128xf32>
    %c0_3 = arith.constant 0 : index
    %c0_4 = arith.constant 0 : index
    %3 = vector.load %arg2[%c0_3, %c0_4] : memref<1x128xf32, #tpu.memory_space<vmem>>, vector<1x128xf32>
    %4 = vector.broadcast %3 : vector<1x128xf32> to vector<8x128xf32>
    %5 = arith.addf %2, %4 : vector<8x128xf32>
    %c0_5 = arith.constant 0 : index
    %c0_6 = arith.constant 0 : index
    %6 = vector.load %arg3[%c0_5, %c0_6] : memref<1024x128xf32, #tpu.memory_space<vmem>>, vector<1024x128xf32>
    %cst_7 = arith.constant dense<0.000000e+00> : vector<8x128xf32>
    %7 = tpu.matmul %0, %6, %cst_7 {dimension_numbers = #tpu.dot_dimension_numbers<[1], [0], [0], [1], [0, 0, 1, 1], [], []>} : vector<8x1024xf32>, vector<1024x128xf32>, vector<8x128xf32> -> vector<8x128xf32>
    %c0_8 = arith.constant 0 : index
    %c0_9 = arith.constant 0 : index
    %8 = vector.load %arg4[%c0_8, %c0_9] : memref<1x128xf32, #tpu.memory_space<vmem>>, vector<1x128xf32>
    %9 = vector.broadcast %8 : vector<1x128xf32> to vector<8x128xf32>
    %10 = arith.addf %7, %9 : vector<8x128xf32>
    %c0_10 = arith.constant 0 : index
    %c0_11 = arith.constant 0 : index
    %11 = vector.load %arg6[%c0_10, %c0_11] : memref<8x128xf32, #tpu.memory_space<vmem>>, vector<8x128xf32>
    tpu.vector_store %arg6[%c0_10, %c0_11], %5 {strides = array<i32>} : memref<8x128xf32, #tpu.memory_space<vmem>>, vector<8x128xf32>,
    %c0_12 = arith.constant 0 : index
    %c0_13 = arith.constant 0 : index
    %12 = vector.load %arg7[%c0_12, %c0_13] : memref<8x128xf32, #tpu.memory_space<vmem>>, vector<8x128xf32>
    tpu.vector_store %arg7[%c0_12, %c0_13], %10 {strides = array<i32>} : memref<8x128xf32, #tpu.memory_space<vmem>>, vector<8x128xf32>,
    %c0_14 = arith.constant 0 : index
    %c0_15 = arith.constant 0 : index
    %13 = vector.load %arg5[%c0_14, %c0_15] : memref<8x128xf32, #tpu.memory_space<vmem>>, vector<8x128xf32>
    %cst_16 = arith.constant 5.000000e-01 : f32
    %14 = vector.broadcast %cst_16 : f32 to vector<8x128xf32>
    %15 = arith.mulf %14, %10 : vector<8x128xf32>
    %16 = math.exp %15 : vector<8x128xf32>
    %17 = arith.mulf %13, %16 : vector<8x128xf32>
    %18 = arith.addf %5, %17 : vector<8x128xf32>
    %c0_17 = arith.constant 0 : index
    %c0_18 = arith.constant 0 : index
    %19 = vector.load %arg8[%c0_17, %c0_18] : memref<8x128xf32, #tpu.memory_space<vmem>>, vector<8x128xf32>
    tpu.vector_store %arg8[%c0_17, %c0_18], %18 {strides = array<i32>} : memref<8x128xf32, #tpu.memory_space<vmem>>, vector<8x128xf32>,
    return
  }
}

module attributes {stable_mosaic.version = 11 : i64} {
  func.func @_matmul_bias_act_kernel(%arg0: i32, %arg1: i32, %arg2: memref<16x128xbf16, #tpu.memory_space<vmem>>, %arg3: memref<128x256xbf16, #tpu.memory_space<vmem>>, %arg4: memref<1x256xf32, #tpu.memory_space<vmem>>, %arg5: memref<16x256xf32, #tpu.memory_space<vmem>>) attributes {dimension_semantics = [#tpu.dimension_semantics<parallel>, #tpu.dimension_semantics<parallel>], iteration_bounds = array<i64: 1, 4>, scalar_prefetch = 0 : i64, scratch_operands = 0 : i64, tpu.core_type = #tpu.core_type<tc>, window_params = [{transform_indices = @transform_0, window_bounds = array<i64: 16, 128>}, {transform_indices = @transform_1, window_bounds = array<i64: 128, 256>}, {transform_indices = @transform_2, window_bounds = array<i64: 1, 256>}, {transform_indices = @transform_3, window_bounds = array<i64: 16, 256>}]} {
    %c0 = arith.constant 0 : index
    %c0_0 = arith.constant 0 : index
    %0 = vector.load %arg2[%c0, %c0_0] : memref<16x128xbf16, #tpu.memory_space<vmem>>, vector<16x128xbf16>
    %c0_1 = arith.constant 0 : index
    %c0_2 = arith.constant 0 : index
    %1 = vector.load %arg3[%c0_1, %c0_2] : memref<128x256xbf16, #tpu.memory_space<vmem>>, vector<128x256xbf16>
    %cst = arith.constant dense<0.000000e+00> : vector<16x256xf32>
    %2 = tpu.matmul %0, %1, %cst {dimension_numbers = #tpu.dot_dimension_numbers<[1], [0], [0], [1], [0, 0, 1, 1], [], []>} : vector<16x128xbf16>, vector<128x256xbf16>, vector<16x256xf32> -> vector<16x256xf32>
    %c0_3 = arith.constant 0 : index
    %c0_4 = arith.constant 0 : index
    %3 = vector.load %arg4[%c0_3, %c0_4] : memref<1x256xf32, #tpu.memory_space<vmem>>, vector<1x256xf32>
    %4 = vector.broadcast %3 : vector<1x256xf32> to vector<16x256xf32>
    %5 = arith.addf %2, %4 : vector<16x256xf32>
    %c0_5 = arith.constant 0 : index
    %c0_6 = arith.constant 0 : index
    %6 = vector.load %arg5[%c0_5, %c0_6] : memref<16x256xf32, #tpu.memory_space<vmem>>, vector<16x256xf32>
    tpu.vector_store %arg5[%c0_5, %c0_6], %5 {strides = array<i32>} : memref<16x256xf32, #tpu.memory_space<vmem>>, vector<16x256xf32>,
    return
  }
  func.func @transform_0(%arg0: i32, %arg1: i32) -> (i32, i32) {
    %c0_i32 = arith.constant 0 : i32
    %c0_i32_0 = arith.constant 0 : i32
    return %arg0, %c0_i32 : i32, i32
  }
  func.func @transform_1(%arg0: i32, %arg1: i32) -> (i32, i32) {
    %c0_i32 = arith.constant 0 : i32
    %c0_i32_0 = arith.constant 0 : i32
    return %c0_i32, %arg1 : i32, i32
  }
  func.func @transform_2(%arg0: i32, %arg1: i32) -> (i32, i32) {
    %c0_i32 = arith.constant 0 : i32
    %c0_i32_0 = arith.constant 0 : i32
    return %c0_i32, %arg1 : i32, i32
  }
  func.func @transform_3(%arg0: i32, %arg1: i32) -> (i32, i32) {
    %c0_i32 = arith.constant 0 : i32
    return %arg0, %arg1 : i32, i32
  }
}

module attributes {stable_mosaic.version = 11 : i64} {
  func.func @_matmul_bias_act_kernel(%arg0: i32, %arg1: i32, %arg2: memref<16x1024xbf16, #tpu.memory_space<vmem>>, %arg3: memref<1024x256xbf16, #tpu.memory_space<vmem>>, %arg4: memref<1x256xf32, #tpu.memory_space<vmem>>, %arg5: memref<16x256xf32, #tpu.memory_space<vmem>>) attributes {dimension_semantics = [#tpu.dimension_semantics<parallel>, #tpu.dimension_semantics<parallel>], iteration_bounds = array<i64: 1, 13>, scalar_prefetch = 0 : i64, scratch_operands = 0 : i64, tpu.core_type = #tpu.core_type<tc>, window_params = [{transform_indices = @transform_0, window_bounds = array<i64: 16, 1024>}, {transform_indices = @transform_1, window_bounds = array<i64: 1024, 256>}, {transform_indices = @transform_2, window_bounds = array<i64: 1, 256>}, {transform_indices = @transform_3, window_bounds = array<i64: 16, 256>}]} {
    %c0 = arith.constant 0 : index
    %c0_0 = arith.constant 0 : index
    %0 = vector.load %arg2[%c0, %c0_0] : memref<16x1024xbf16, #tpu.memory_space<vmem>>, vector<16x1024xbf16>
    %c0_1 = arith.constant 0 : index
    %c0_2 = arith.constant 0 : index
    %1 = vector.load %arg3[%c0_1, %c0_2] : memref<1024x256xbf16, #tpu.memory_space<vmem>>, vector<1024x256xbf16>
    %cst = arith.constant dense<0.000000e+00> : vector<16x256xf32>
    %2 = tpu.matmul %0, %1, %cst {dimension_numbers = #tpu.dot_dimension_numbers<[1], [0], [0], [1], [0, 0, 1, 1], [], []>} : vector<16x1024xbf16>, vector<1024x256xbf16>, vector<16x256xf32> -> vector<16x256xf32>
    %c0_3 = arith.constant 0 : index
    %c0_4 = arith.constant 0 : index
    %3 = vector.load %arg4[%c0_3, %c0_4] : memref<1x256xf32, #tpu.memory_space<vmem>>, vector<1x256xf32>
    %4 = vector.broadcast %3 : vector<1x256xf32> to vector<16x256xf32>
    %5 = arith.addf %2, %4 : vector<16x256xf32>
    %cst_5 = arith.constant 0.000000e+00 : f32
    %6 = vector.broadcast %cst_5 : f32 to vector<16x256xf32>
    %7 = arith.maximumf %5, %6 : vector<16x256xf32>
    %c0_6 = arith.constant 0 : index
    %c0_7 = arith.constant 0 : index
    %8 = vector.load %arg5[%c0_6, %c0_7] : memref<16x256xf32, #tpu.memory_space<vmem>>, vector<16x256xf32>
    tpu.vector_store %arg5[%c0_6, %c0_7], %7 {strides = array<i32>} : memref<16x256xf32, #tpu.memory_space<vmem>>, vector<16x256xf32>,
    return
  }
  func.func @transform_0(%arg0: i32, %arg1: i32) -> (i32, i32) {
    %c0_i32 = arith.constant 0 : i32
    %c0_i32_0 = arith.constant 0 : i32
    return %arg0, %c0_i32 : i32, i32
  }
  func.func @transform_1(%arg0: i32, %arg1: i32) -> (i32, i32) {
    %c0_i32 = arith.constant 0 : i32
    %c0_i32_0 = arith.constant 0 : i32
    return %c0_i32, %arg1 : i32, i32
  }
  func.func @transform_2(%arg0: i32, %arg1: i32) -> (i32, i32) {
    %c0_i32 = arith.constant 0 : i32
    %c0_i32_0 = arith.constant 0 : i32
    return %c0_i32, %arg1 : i32, i32
  }
  func.func @transform_3(%arg0: i32, %arg1: i32) -> (i32, i32) {
    %c0_i32 = arith.constant 0 : i32
    return %arg0, %arg1 : i32, i32
  }
}

module attributes {stable_mosaic.version = 11 : i64} {
  func.func @_matmul_bias_act_kernel(%arg0: i32, %arg1: i32, %arg2: memref<64x128xbf16, #tpu.memory_space<vmem>>, %arg3: memref<128x256xbf16, #tpu.memory_space<vmem>>, %arg4: memref<1x256xf32, #tpu.memory_space<vmem>>, %arg5: memref<64x256xf32, #tpu.memory_space<vmem>>) attributes {dimension_semantics = [#tpu.dimension_semantics<parallel>, #tpu.dimension_semantics<parallel>], iteration_bounds = array<i64: 1, 7>, scalar_prefetch = 0 : i64, scratch_operands = 0 : i64, tpu.core_type = #tpu.core_type<tc>, window_params = [{transform_indices = @transform_0, window_bounds = array<i64: 64, 128>}, {transform_indices = @transform_1, window_bounds = array<i64: 128, 256>}, {transform_indices = @transform_2, window_bounds = array<i64: 1, 256>}, {transform_indices = @transform_3, window_bounds = array<i64: 64, 256>}]} {
    %c0 = arith.constant 0 : index
    %c0_0 = arith.constant 0 : index
    %0 = vector.load %arg2[%c0, %c0_0] : memref<64x128xbf16, #tpu.memory_space<vmem>>, vector<64x128xbf16>
    %c0_1 = arith.constant 0 : index
    %c0_2 = arith.constant 0 : index
    %1 = vector.load %arg3[%c0_1, %c0_2] : memref<128x256xbf16, #tpu.memory_space<vmem>>, vector<128x256xbf16>
    %cst = arith.constant dense<0.000000e+00> : vector<64x256xf32>
    %2 = tpu.matmul %0, %1, %cst {dimension_numbers = #tpu.dot_dimension_numbers<[1], [0], [0], [1], [0, 0, 1, 1], [], []>} : vector<64x128xbf16>, vector<128x256xbf16>, vector<64x256xf32> -> vector<64x256xf32>
    %c0_3 = arith.constant 0 : index
    %c0_4 = arith.constant 0 : index
    %3 = vector.load %arg4[%c0_3, %c0_4] : memref<1x256xf32, #tpu.memory_space<vmem>>, vector<1x256xf32>
    %4 = vector.broadcast %3 : vector<1x256xf32> to vector<64x256xf32>
    %5 = arith.addf %2, %4 : vector<64x256xf32>
    %c0_5 = arith.constant 0 : index
    %c0_6 = arith.constant 0 : index
    %6 = vector.load %arg5[%c0_5, %c0_6] : memref<64x256xf32, #tpu.memory_space<vmem>>, vector<64x256xf32>
    tpu.vector_store %arg5[%c0_5, %c0_6], %5 {strides = array<i32>} : memref<64x256xf32, #tpu.memory_space<vmem>>, vector<64x256xf32>,
    return
  }
  func.func @transform_0(%arg0: i32, %arg1: i32) -> (i32, i32) {
    %c0_i32 = arith.constant 0 : i32
    %c0_i32_0 = arith.constant 0 : i32
    return %arg0, %c0_i32 : i32, i32
  }
  func.func @transform_1(%arg0: i32, %arg1: i32) -> (i32, i32) {
    %c0_i32 = arith.constant 0 : i32
    %c0_i32_0 = arith.constant 0 : i32
    return %c0_i32, %arg1 : i32, i32
  }
  func.func @transform_2(%arg0: i32, %arg1: i32) -> (i32, i32) {
    %c0_i32 = arith.constant 0 : i32
    %c0_i32_0 = arith.constant 0 : i32
    return %c0_i32, %arg1 : i32, i32
  }
  func.func @transform_3(%arg0: i32, %arg1: i32) -> (i32, i32) {
    %c0_i32 = arith.constant 0 : i32
    return %arg0, %arg1 : i32, i32
  }
}

module attributes {stable_mosaic.version = 11 : i64} {
  func.func @_matmul_bias_act_kernel(%arg0: i32, %arg1: i32, %arg2: memref<352x128xbf16, #tpu.memory_space<vmem>>, %arg3: memref<128x256xbf16, #tpu.memory_space<vmem>>, %arg4: memref<1x256xf32, #tpu.memory_space<vmem>>, %arg5: memref<352x256xf32, #tpu.memory_space<vmem>>) attributes {dimension_semantics = [#tpu.dimension_semantics<parallel>, #tpu.dimension_semantics<parallel>], iteration_bounds = array<i64: 1, 5>, scalar_prefetch = 0 : i64, scratch_operands = 0 : i64, tpu.core_type = #tpu.core_type<tc>, window_params = [{transform_indices = @transform_0, window_bounds = array<i64: 352, 128>}, {transform_indices = @transform_1, window_bounds = array<i64: 128, 256>}, {transform_indices = @transform_2, window_bounds = array<i64: 1, 256>}, {transform_indices = @transform_3, window_bounds = array<i64: 352, 256>}]} {
    %c0 = arith.constant 0 : index
    %c0_0 = arith.constant 0 : index
    %0 = vector.load %arg2[%c0, %c0_0] : memref<352x128xbf16, #tpu.memory_space<vmem>>, vector<352x128xbf16>
    %c0_1 = arith.constant 0 : index
    %c0_2 = arith.constant 0 : index
    %1 = vector.load %arg3[%c0_1, %c0_2] : memref<128x256xbf16, #tpu.memory_space<vmem>>, vector<128x256xbf16>
    %cst = arith.constant dense<0.000000e+00> : vector<352x256xf32>
    %2 = tpu.matmul %0, %1, %cst {dimension_numbers = #tpu.dot_dimension_numbers<[1], [0], [0], [1], [0, 0, 1, 1], [], []>} : vector<352x128xbf16>, vector<128x256xbf16>, vector<352x256xf32> -> vector<352x256xf32>
    %c0_3 = arith.constant 0 : index
    %c0_4 = arith.constant 0 : index
    %3 = vector.load %arg4[%c0_3, %c0_4] : memref<1x256xf32, #tpu.memory_space<vmem>>, vector<1x256xf32>
    %4 = vector.broadcast %3 : vector<1x256xf32> to vector<352x256xf32>
    %5 = arith.addf %2, %4 : vector<352x256xf32>
    %c0_5 = arith.constant 0 : index
    %c0_6 = arith.constant 0 : index
    %6 = vector.load %arg5[%c0_5, %c0_6] : memref<352x256xf32, #tpu.memory_space<vmem>>, vector<352x256xf32>
    tpu.vector_store %arg5[%c0_5, %c0_6], %5 {strides = array<i32>} : memref<352x256xf32, #tpu.memory_space<vmem>>, vector<352x256xf32>,
    return
  }
  func.func @transform_0(%arg0: i32, %arg1: i32) -> (i32, i32) {
    %c0_i32 = arith.constant 0 : i32
    %c0_i32_0 = arith.constant 0 : i32
    return %arg0, %c0_i32 : i32, i32
  }
  func.func @transform_1(%arg0: i32, %arg1: i32) -> (i32, i32) {
    %c0_i32 = arith.constant 0 : i32
    %c0_i32_0 = arith.constant 0 : i32
    return %c0_i32, %arg1 : i32, i32
  }
  func.func @transform_2(%arg0: i32, %arg1: i32) -> (i32, i32) {
    %c0_i32 = arith.constant 0 : i32
    %c0_i32_0 = arith.constant 0 : i32
    return %c0_i32, %arg1 : i32, i32
  }
  func.func @transform_3(%arg0: i32, %arg1: i32) -> (i32, i32) {
    %c0_i32 = arith.constant 0 : i32
    return %arg0, %arg1 : i32, i32
  }
}

module attributes {stable_mosaic.version = 11 : i64} {
  func.func @_matmul_bias_act_kernel(%arg0: i32, %arg1: i32, %arg2: memref<512x128xbf16, #tpu.memory_space<vmem>>, %arg3: memref<128x128xbf16, #tpu.memory_space<vmem>>, %arg4: memref<1x128xf32, #tpu.memory_space<vmem>>, %arg5: memref<512x128xf32, #tpu.memory_space<vmem>>) attributes {dimension_semantics = [#tpu.dimension_semantics<parallel>, #tpu.dimension_semantics<parallel>], iteration_bounds = array<i64: 4, 1>, scalar_prefetch = 0 : i64, scratch_operands = 0 : i64, tpu.core_type = #tpu.core_type<tc>, window_params = [{transform_indices = @transform_0, window_bounds = array<i64: 512, 128>}, {transform_indices = @transform_1, window_bounds = array<i64: 128, 128>}, {transform_indices = @transform_2, window_bounds = array<i64: 1, 128>}, {transform_indices = @transform_3, window_bounds = array<i64: 512, 128>}]} {
    %c0 = arith.constant 0 : index
    %c0_0 = arith.constant 0 : index
    %0 = vector.load %arg2[%c0, %c0_0] : memref<512x128xbf16, #tpu.memory_space<vmem>>, vector<512x128xbf16>
    %c0_1 = arith.constant 0 : index
    %c0_2 = arith.constant 0 : index
    %1 = vector.load %arg3[%c0_1, %c0_2] : memref<128x128xbf16, #tpu.memory_space<vmem>>, vector<128x128xbf16>
    %cst = arith.constant dense<0.000000e+00> : vector<512x128xf32>
    %2 = tpu.matmul %0, %1, %cst {dimension_numbers = #tpu.dot_dimension_numbers<[1], [0], [0], [1], [0, 0, 1, 1], [], []>} : vector<512x128xbf16>, vector<128x128xbf16>, vector<512x128xf32> -> vector<512x128xf32>
    %c0_3 = arith.constant 0 : index
    %c0_4 = arith.constant 0 : index
    %3 = vector.load %arg4[%c0_3, %c0_4] : memref<1x128xf32, #tpu.memory_space<vmem>>, vector<1x128xf32>
    %4 = vector.broadcast %3 : vector<1x128xf32> to vector<512x128xf32>
    %5 = arith.addf %2, %4 : vector<512x128xf32>
    %c0_5 = arith.constant 0 : index
    %c0_6 = arith.constant 0 : index
    %6 = vector.load %arg5[%c0_5, %c0_6] : memref<512x128xf32, #tpu.memory_space<vmem>>, vector<512x128xf32>
    tpu.vector_store %arg5[%c0_5, %c0_6], %5 {strides = array<i32>} : memref<512x128xf32, #tpu.memory_space<vmem>>, vector<512x128xf32>,
    return
  }
  func.func @transform_0(%arg0: i32, %arg1: i32) -> (i32, i32) {
    %c0_i32 = arith.constant 0 : i32
    %c0_i32_0 = arith.constant 0 : i32
    return %arg0, %c0_i32 : i32, i32
  }
  func.func @transform_1(%arg0: i32, %arg1: i32) -> (i32, i32) {
    %c0_i32 = arith.constant 0 : i32
    %c0_i32_0 = arith.constant 0 : i32
    return %c0_i32, %arg1 : i32, i32
  }
  func.func @transform_2(%arg0: i32, %arg1: i32) -> (i32, i32) {
    %c0_i32 = arith.constant 0 : i32
    %c0_i32_0 = arith.constant 0 : i32
    return %c0_i32, %arg1 : i32, i32
  }
  func.func @transform_3(%arg0: i32, %arg1: i32) -> (i32, i32) {
    %c0_i32 = arith.constant 0 : i32
    return %arg0, %arg1 : i32, i32
  }
}

</mosaic_0001>

<bundles_post_ra>
// kernel: _lambda_.10
= control target key start
LH: loop header
LB: loop body
LE: loop exit
PB: predicated region body
PF: predicated region fallthrough
CT: control target
= control target key end

     0   :  { %s1254_s12 = smov 0   ;;  %s1256_s13 = smov 0   ;;  %s1487_s0 = inlined_call_operand.vmem [shape: bf16[2048,128], index: 0, kind: input, shape index: {}]   ;;  %s1488_s1 = inlined_call_operand.vmem [shape: bf16[128,128], index: 1, kind: input, shape index: {}]   ;;  %s1489_s2 = inlined_call_operand.vmem [shape: f32[1,128], index: 2, kind: input, shape index: {}]   ;;  %s1490_s3 = inlined_call_operand.vmem [shape: f32[2048,128], index: 3, kind: output, shape index: {}]  }
   0x1   :  { %s1258_s14 = smov 0  }
   0x2 LB: > { %s25_s15 = sadd.s32 1, %s1228_s13  ;;  %p954_p0 = scmp.ge.s32.totalorder %s1232_s14, 1  ;;  %s1232_s14 = sphi %s1258_s14, %s13_s14   ;;  %s1228_s13 = sphi %s1256_s13, %s1492_s13   ;;  %s1224_s12 = sphi %s1254_s12, %s1491_s12  }
   0x3   : > { %p27_p1 = scmp.ge.s32.totalorder %s25_s15, 4  ;;  %p169_p2 = scmp.lt.s32.totalorder %s1232_s14, 5 }
   0x5   : > { %s1494_s15 = smov (%p27_p1, %s25_s15), 0  ;;  %p170_p3 = pnand %p954_p0, %p169_p2 }
   0x6   : > { %s955_s24 = sshll.u32 (!%p170_p3), %s1224_s12, 6 }
   0x7   : > { %173 = sbr.rel (%p170_p3) target bundleno = 303 (0x12f), region = 32  ;;  %p204_p4 = scmp.lt.s32.totalorder (!%p170_p3), %s955_s24, 255 }
   0xc   : > { %v1160_v0 = vld [vmem:[%s1488_s1 + $0x38] sm:$0xff]  ;;  %v1159_v1 = vld [vmem:[%s1488_s1 + $0x30] sm:$0xff]  ;;  %v1158_v2 = vld [vmem:[%s1488_s1 + $0x28] sm:$0xff]  ;;  %s1496_s24 = smov (!%p204_p4, %s955_s24), 255 }
   0xd   : > { %549 = vmatpush.bf16.msra.mxu0 %v1160_v0  ;;  %1161 = vmatpush.bf16.msra.mxu1 %v1160_v0  ;;  %v1157_v3 = vld [vmem:[%s1488_s1 + $0x20] sm:$0xff]  ;;  %v1156_v4 = vld [vmem:[%s1488_s1 + $0x18] sm:$0xff]  ;;  %v1155_v5 = vld [vmem:[%s1488_s1 + $0x10] sm:$0xff]  ;;  %s956_s4 = sshll.u32 %s1496_s24, 2  ;;  %s958_s12 = sshll.u32 %s1496_s24, 3 }
   0xe   : > { %1162 = vmatpush.bf16.msra.mxu2 %v1160_v0  ;;  %1163 = vmatpush.bf16.msra.mxu3 %v1160_v0  ;;  %v1154_v6 = vld [vmem:[%s1488_s1 + $0x8] sm:$0xff]  ;;  %v1153_v7 = vld [vmem:[%s1488_s1] sm:$0xff]  ;;  %s1305_s9 = scalar_lea.vmem %s1487_s0, %s956_s4  ;;  %s1350_s18 = scalar_lea.vmem %s1490_s3, %s958_s12 }
   0xf   : > { %v1121_v8 = vld [vmem:[%s1305_s9] sm:$0xff]  ;;  %v1122_v12 = vld [vmem:[%s1305_s9 + $0x8] sm:$0xff]  ;;  %v1123_v16 = vld [vmem:[%s1305_s9 + $0x10] sm:$0xff] }
  0x10   : > { %v1129_v9 = vld [vmem:[%s1305_s9 + $0x40] sm:$0xff]  ;;  %v1130_v13 = vld [vmem:[%s1305_s9 + $0x48] sm:$0xff]  ;;  %v1131_v17 = vld [vmem:[%s1305_s9 + $0x50] sm:$0xff] }
  0x11   : > { %550 = vmatpush.bf16.msra.mxu0 %v1159_v1  ;;  %1164 = vmatpush.bf16.msra.mxu1 %v1159_v1  ;;  %v1137_v10 = vld [vmem:[%s1305_s9 + $0x80] sm:$0xff]  ;;  %v1138_v14 = vld [vmem:[%s1305_s9 + $0x88] sm:$0xff]  ;;  %v1139_v18 = vld [vmem:[%s1305_s9 + $0x90] sm:$0xff] }
  0x12   : > { %1165 = vmatpush.bf16.msra.mxu2 %v1159_v1  ;;  %1166 = vmatpush.bf16.msra.mxu3 %v1159_v1  ;;  %v1145_v11 = vld [vmem:[%s1305_s9 + $0xc0] sm:$0xff]  ;;  %v1146_v15 = vld [vmem:[%s1305_s9 + $0xc8] sm:$0xff]  ;;  %v1147_v19 = vld [vmem:[%s1305_s9 + $0xd0] sm:$0xff] }
  0x13   : > { %v1124_v20 = vld [vmem:[%s1305_s9 + $0x18] sm:$0xff]  ;;  %v1125_v24 = vld [vmem:[%s1305_s9 + $0x20] sm:$0xff]  ;;  %v1126_v28 = vld [vmem:[%s1305_s9 + $0x28] sm:$0xff] }
  0x14   : > { %v1132_v21 = vld [vmem:[%s1305_s9 + $0x58] sm:$0xff]  ;;  %v1133_v25 = vld [vmem:[%s1305_s9 + $0x60] sm:$0xff]  ;;  %v1134_v29 = vld [vmem:[%s1305_s9 + $0x68] sm:$0xff] }
  0x15   : > { %551 = vmatpush.bf16.msra.mxu0 %v1158_v2  ;;  %1167 = vmatpush.bf16.msra.mxu1 %v1158_v2  ;;  %v1140_v22 = vld [vmem:[%s1305_s9 + $0x98] sm:$0xff]  ;;  %v1141_v26 = vld [vmem:[%s1305_s9 + $0xa0] sm:$0xff]  ;;  %v1142_v30 = vld [vmem:[%s1305_s9 + $0xa8] sm:$0xff] }
  0x16   : > { %1168 = vmatpush.bf16.msra.mxu2 %v1158_v2  ;;  %1169 = vmatpush.bf16.msra.mxu3 %v1158_v2  ;;  %v1148_v23 = vld [vmem:[%s1305_s9 + $0xd8] sm:$0xff]  ;;  %v1149_v27 = vld [vmem:[%s1305_s9 + $0xe0] sm:$0xff]  ;;  %v1150_v31 = vld [vmem:[%s1305_s9 + $0xe8] sm:$0xff] }
  0x17   : > { %v1127_v32 = vld [vmem:[%s1305_s9 + $0x30] sm:$0xff]  ;;  %v1128_v36 = vld [vmem:[%s1305_s9 + $0x38] sm:$0xff]  ;;  %v1342_v40 = vld [vmem:[%s1489_s2] ss:$0 sm:$0xff] }
  0x18   : > { %v1135_v33 = vld [vmem:[%s1305_s9 + $0x70] sm:$0xff]  ;;  %v1136_v37 = vld [vmem:[%s1305_s9 + $0x78] sm:$0xff] }
  0x19   : > { %552 = vmatpush.bf16.msra.mxu0 %v1157_v3  ;;  %1170 = vmatpush.bf16.msra.mxu1 %v1157_v3  ;;  %v1143_v34 = vld [vmem:[%s1305_s9 + $0xb0] sm:$0xff]  ;;  %v1144_v38 = vld [vmem:[%s1305_s9 + $0xb8] sm:$0xff] }
  0x1a   : > { %1171 = vmatpush.bf16.msra.mxu2 %v1157_v3  ;;  %1172 = vmatpush.bf16.msra.mxu3 %v1157_v3  ;;  %v1151_v35 = vld [vmem:[%s1305_s9 + $0xf0] sm:$0xff]  ;;  %v1152_v39 = vld [vmem:[%s1305_s9 + $0xf8] sm:$0xff] }
  0x1d   : > { %553 = vmatpush.bf16.msra.mxu0 %v1156_v4  ;;  %1173 = vmatpush.bf16.msra.mxu1 %v1156_v4 }
  0x1e   : > { %1174 = vmatpush.bf16.msra.mxu2 %v1156_v4  ;;  %1175 = vmatpush.bf16.msra.mxu3 %v1156_v4 }
  0x21   : > { %554 = vmatpush.bf16.msra.mxu0 %v1155_v5  ;;  %1176 = vmatpush.bf16.msra.mxu1 %v1155_v5 }
  0x22   : > { %1177 = vmatpush.bf16.msra.mxu2 %v1155_v5  ;;  %1178 = vmatpush.bf16.msra.mxu3 %v1155_v5 }
  0x25   : > { %555 = vmatpush.bf16.msra.mxu0 %v1154_v6  ;;  %1179 = vmatpush.bf16.msra.mxu1 %v1154_v6 }
  0x26   : > { %1180 = vmatpush.bf16.msra.mxu2 %v1154_v6  ;;  %1181 = vmatpush.bf16.msra.mxu3 %v1154_v6 }
  0x29   : > { %556 = vmatpush.bf16.msra.mxu0 %v1153_v7  ;;  %1182 = vmatpush.bf16.msra.mxu1 %v1153_v7 }
  0x2a   : > { %1183 = vmatpush.bf16.msra.mxu2 %v1153_v7  ;;  %1184 = vmatpush.bf16.msra.mxu3 %v1153_v7 }
  0x2c   : > { %557 = vmatmul.bf16.vlgmr.msra.gmra.mxu0 %v1121_v8  ;;  %597 = vmatmul.bf16.vlgmr.msra.gmra.mxu1 %v1129_v9 }
  0x2d   : > { %637 = vmatmul.bf16.vlgmr.msra.gmra.mxu2 %v1137_v10  ;;  %677 = vmatmul.bf16.vlgmr.msra.gmra.mxu3 %v1145_v11 }
  0x3c   : > { %562 = vmatmul.bf16.gmra.mxu0 %v1122_v12  ;;  %602 = vmatmul.bf16.gmra.mxu1 %v1130_v13 }
  0x3d   : > { %642 = vmatmul.bf16.gmra.mxu2 %v1138_v14  ;;  %682 = vmatmul.bf16.gmra.mxu3 %v1146_v15 }
  0x4c   : > { %567 = vmatmul.bf16.gmra.mxu0 %v1123_v16  ;;  %607 = vmatmul.bf16.gmra.mxu1 %v1131_v17 }
  0x4d   : > { %647 = vmatmul.bf16.gmra.mxu2 %v1139_v18  ;;  %687 = vmatmul.bf16.gmra.mxu3 %v1147_v19 }
  0x5c   : > { %572 = vmatmul.bf16.gmra.mxu0 %v1124_v20  ;;  %612 = vmatmul.bf16.gmra.mxu1 %v1132_v21 }
  0x5d   : > { %652 = vmatmul.bf16.gmra.mxu2 %v1140_v22  ;;  %692 = vmatmul.bf16.gmra.mxu3 %v1148_v23 }
  0x6c   : > { %577 = vmatmul.bf16.gmra.mxu0 %v1125_v24  ;;  %617 = vmatmul.bf16.gmra.mxu1 %v1133_v25 }
  0x6d   : > { %657 = vmatmul.bf16.gmra.mxu2 %v1141_v26  ;;  %697 = vmatmul.bf16.gmra.mxu3 %v1149_v27 }
  0x7c   : > { %582 = vmatmul.bf16.gmra.mxu0 %v1126_v28  ;;  %622 = vmatmul.bf16.gmra.mxu1 %v1134_v29 }
  0x7d   : > { %662 = vmatmul.bf16.gmra.mxu2 %v1142_v30  ;;  %702 = vmatmul.bf16.gmra.mxu3 %v1150_v31 }
  0x8c   : > { %587 = vmatmul.bf16.gmra.mxu0 %v1127_v32  ;;  %627 = vmatmul.bf16.gmra.mxu1 %v1135_v33 }
  0x8d   : > { %667 = vmatmul.bf16.gmra.mxu2 %v1143_v34  ;;  %707 = vmatmul.bf16.gmra.mxu3 %v1151_v35 }
  0x9c   : > { %592 = vmatmul.bf16.gmra.mxu0 %v1128_v36  ;;  %632 = vmatmul.bf16.gmra.mxu1 %v1136_v37 }
  0x9d   : > { %672 = vmatmul.bf16.gmra.mxu2 %v1144_v38  ;;  %712 = vmatmul.bf16.gmra.mxu3 %v1152_v39 }
  0xa9   : > { %v558_v41 = vpop.f32.mrf.mxu0  ;;  %v598_v42 = vpop.f32.mrf.mxu1 }
  0xaa   : > { %v559_v43 = vadd.f32 %v1342_v40, %v558_v41  ;;  %v599_v44 = vadd.f32 %v1342_v40, %v598_v42 }
  0xac   : > { %v718_v45 = vmax.f32 %v559_v43, 0.0  ;;  %v734_v46 = vmax.f32 %v599_v44, 0.0 }
  0xae   : > { %782 = vst [vmem:[%s1350_s18] sm:$0xff] %v718_v45 }
  0xaf   : > { %798 = vst [vmem:[%s1350_s18 + $0x80] sm:$0xff] %v734_v46 }
  0xb0   : > { %v638_v47 = vpop.f32.mrf.mxu2  ;;  %v678_v48 = vpop.f32.mrf.mxu3 }
  0xb1   : > { %v639_v49 = vadd.f32 %v1342_v40, %v638_v47  ;;  %v679_v50 = vadd.f32 %v1342_v40, %v678_v48  ;;  %v560_v51 = vpop.f32.mrf.mxu0  ;;  %v600_v52 = vpop.f32.mrf.mxu1 }
  0xb2   : > { %v561_v53 = vadd.f32 %v1342_v40, %v560_v51  ;;  %v601_v54 = vadd.f32 %v1342_v40, %v600_v52 }
  0xb3   : > { %v750_v55 = vmax.f32 %v639_v49, 0.0  ;;  %v766_v56 = vmax.f32 %v679_v50, 0.0 }
  0xb4   : > { %v719_v57 = vmax.f32 %v561_v53, 0.0  ;;  %v735_v58 = vmax.f32 %v601_v54, 0.0 }
  0xb5   : > { %814 = vst [vmem:[%s1350_s18 + $0x100] sm:$0xff] %v750_v55 }
  0xb6   : > { %830 = vst [vmem:[%s1350_s18 + $0x180] sm:$0xff] %v766_v56 }
  0xb7   : > { %783 = vst [vmem:[%s1350_s18 + $0x8] sm:$0xff] %v719_v57 }
  0xb8   : > { %799 = vst [vmem:[%s1350_s18 + $0x88] sm:$0xff] %v735_v58  ;;  %v640_v59 = vpop.f32.mrf.mxu2  ;;  %v680_v60 = vpop.f32.mrf.mxu3 }
  0xb9   : > { %v641_v61 = vadd.f32 %v1342_v40, %v640_v59  ;;  %v681_v62 = vadd.f32 %v1342_v40, %v680_v60  ;;  %v563_v63 = vpop.f32.mrf.mxu0  ;;  %v603_v0 = vpop.f32.mrf.mxu1 }
  0xba   : > { %v564_v1 = vadd.f32 %v1342_v40, %v563_v63  ;;  %v604_v2 = vadd.f32 %v1342_v40, %v603_v0 }
  0xbb   : > { %v751_v3 = vmax.f32 %v641_v61, 0.0  ;;  %v767_v4 = vmax.f32 %v681_v62, 0.0 }
  0xbc   : > { %v720_v5 = vmax.f32 %v564_v1, 0.0  ;;  %v736_v6 = vmax.f32 %v604_v2, 0.0 }
  0xbd   : > { %815 = vst [vmem:[%s1350_s18 + $0x108] sm:$0xff] %v751_v3 }
  0xbe   : > { %831 = vst [vmem:[%s1350_s18 + $0x188] sm:$0xff] %v767_v4 }
  0xbf   : > { %784 = vst [vmem:[%s1350_s18 + $0x10] sm:$0xff] %v720_v5 }
  0xc0   : > { %800 = vst [vmem:[%s1350_s18 + $0x90] sm:$0xff] %v736_v6  ;;  %v643_v7 = vpop.f32.mrf.mxu2  ;;  %v683_v8 = vpop.f32.mrf.mxu3 }
  0xc1   : > { %v644_v9 = vadd.f32 %v1342_v40, %v643_v7  ;;  %v684_v10 = vadd.f32 %v1342_v40, %v683_v8  ;;  %v565_v11 = vpop.f32.mrf.mxu0  ;;  %v605_v12 = vpop.f32.mrf.mxu1 }
  0xc2   : > { %v566_v13 = vadd.f32 %v1342_v40, %v565_v11  ;;  %v606_v14 = vadd.f32 %v1342_v40, %v605_v12 }
  0xc3   : > { %v752_v15 = vmax.f32 %v644_v9, 0.0  ;;  %v768_v16 = vmax.f32 %v684_v10, 0.0 }
  0xc4   : > { %v721_v17 = vmax.f32 %v566_v13, 0.0  ;;  %v737_v18 = vmax.f32 %v606_v14, 0.0 }
  0xc5   : > { %816 = vst [vmem:[%s1350_s18 + $0x110] sm:$0xff] %v752_v15 }
  0xc6   : > { %832 = vst [vmem:[%s1350_s18 + $0x190] sm:$0xff] %v768_v16 }
  0xc7   : > { %785 = vst [vmem:[%s1350_s18 + $0x18] sm:$0xff] %v721_v17 }
  0xc8   : > { %801 = vst [vmem:[%s1350_s18 + $0x98] sm:$0xff] %v737_v18  ;;  %v645_v19 = vpop.f32.mrf.mxu2  ;;  %v685_v20 = vpop.f32.mrf.mxu3 }
  0xc9   : > { %v646_v21 = vadd.f32 %v1342_v40, %v645_v19  ;;  %v686_v22 = vadd.f32 %v1342_v40, %v685_v20  ;;  %v568_v23 = vpop.f32.mrf.mxu0  ;;  %v608_v24 = vpop.f32.mrf.mxu1 }
  0xca   : > { %v569_v25 = vadd.f32 %v1342_v40, %v568_v23  ;;  %v609_v26 = vadd.f32 %v1342_v40, %v608_v24 }
  0xcb   : > { %v753_v27 = vmax.f32 %v646_v21, 0.0  ;;  %v769_v28 = vmax.f32 %v686_v22, 0.0 }
  0xcc   : > { %v722_v29 = vmax.f32 %v569_v25, 0.0  ;;  %v738_v30 = vmax.f32 %v609_v26, 0.0 }
  0xcd   : > { %817 = vst [vmem:[%s1350_s18 + $0x118] sm:$0xff] %v753_v27 }
  0xce   : > { %833 = vst [vmem:[%s1350_s18 + $0x198] sm:$0xff] %v769_v28 }
  0xcf   : > { %786 = vst [vmem:[%s1350_s18 + $0x20] sm:$0xff] %v722_v29 }
  0xd0   : > { %802 = vst [vmem:[%s1350_s18 + $0xa0] sm:$0xff] %v738_v30  ;;  %v648_v31 = vpop.f32.mrf.mxu2  ;;  %v688_v32 = vpop.f32.mrf.mxu3 }
  0xd1   : > { %v649_v33 = vadd.f32 %v1342_v40, %v648_v31  ;;  %v689_v34 = vadd.f32 %v1342_v40, %v688_v32  ;;  %v570_v35 = vpop.f32.mrf.mxu0  ;;  %v610_v36 = vpop.f32.mrf.mxu1 }
  0xd2   : > { %v571_v37 = vadd.f32 %v1342_v40, %v570_v35  ;;  %v611_v38 = vadd.f32 %v1342_v40, %v610_v36 }
  0xd3   : > { %v754_v39 = vmax.f32 %v649_v33, 0.0  ;;  %v770_v41 = vmax.f32 %v689_v34, 0.0 }
  0xd4   : > { %v723_v42 = vmax.f32 %v571_v37, 0.0  ;;  %v739_v43 = vmax.f32 %v611_v38, 0.0 }
  0xd5   : > { %818 = vst [vmem:[%s1350_s18 + $0x120] sm:$0xff] %v754_v39 }
  0xd6   : > { %834 = vst [vmem:[%s1350_s18 + $0x1a0] sm:$0xff] %v770_v41 }
  0xd7   : > { %787 = vst [vmem:[%s1350_s18 + $0x28] sm:$0xff] %v723_v42 }
  0xd8   : > { %803 = vst [vmem:[%s1350_s18 + $0xa8] sm:$0xff] %v739_v43  ;;  %v650_v44 = vpop.f32.mrf.mxu2  ;;  %v690_v45 = vpop.f32.mrf.mxu3 }
  0xd9   : > { %v651_v46 = vadd.f32 %v1342_v40, %v650_v44  ;;  %v691_v47 = vadd.f32 %v1342_v40, %v690_v45  ;;  %v573_v48 = vpop.f32.mrf.mxu0  ;;  %v613_v49 = vpop.f32.mrf.mxu1 }
  0xda   : > { %v574_v50 = vadd.f32 %v1342_v40, %v573_v48  ;;  %v614_v51 = vadd.f32 %v1342_v40, %v613_v49 }
  0xdb   : > { %v755_v52 = vmax.f32 %v651_v46, 0.0  ;;  %v771_v53 = vmax.f32 %v691_v47, 0.0 }
  0xdc   : > { %v724_v54 = vmax.f32 %v574_v50, 0.0  ;;  %v740_v55 = vmax.f32 %v614_v51, 0.0 }
  0xdd   : > { %819 = vst [vmem:[%s1350_s18 + $0x128] sm:$0xff] %v755_v52 }
  0xde   : > { %835 = vst [vmem:[%s1350_s18 + $0x1a8] sm:$0xff] %v771_v53 }
  0xdf   : > { %788 = vst [vmem:[%s1350_s18 + $0x30] sm:$0xff] %v724_v54 }
  0xe0   : > { %804 = vst [vmem:[%s1350_s18 + $0xb0] sm:$0xff] %v740_v55  ;;  %v653_v56 = vpop.f32.mrf.mxu2  ;;  %v693_v57 = vpop.f32.mrf.mxu3 }
  0xe1   : > { %v654_v58 = vadd.f32 %v1342_v40, %v653_v56  ;;  %v694_v59 = vadd.f32 %v1342_v40, %v693_v57  ;;  %v575_v60 = vpop.f32.mrf.mxu0  ;;  %v615_v61 = vpop.f32.mrf.mxu1 }
  0xe2   : > { %v576_v62 = vadd.f32 %v1342_v40, %v575_v60  ;;  %v616_v63 = vadd.f32 %v1342_v40, %v615_v61 }
  0xe3   : > { %v756_v0 = vmax.f32 %v654_v58, 0.0  ;;  %v772_v1 = vmax.f32 %v694_v59, 0.0 }
  0xe4   : > { %v725_v2 = vmax.f32 %v576_v62, 0.0  ;;  %v741_v3 = vmax.f32 %v616_v63, 0.0 }
  0xe5   : > { %820 = vst [vmem:[%s1350_s18 + $0x130] sm:$0xff] %v756_v0 }
  0xe6   : > { %836 = vst [vmem:[%s1350_s18 + $0x1b0] sm:$0xff] %v772_v1 }
  0xe7   : > { %789 = vst [vmem:[%s1350_s18 + $0x38] sm:$0xff] %v725_v2 }
  0xe8   : > { %805 = vst [vmem:[%s1350_s18 + $0xb8] sm:$0xff] %v741_v3  ;;  %v655_v4 = vpop.f32.mrf.mxu2  ;;  %v695_v5 = vpop.f32.mrf.mxu3 }
  0xe9   : > { %v656_v6 = vadd.f32 %v1342_v40, %v655_v4  ;;  %v696_v7 = vadd.f32 %v1342_v40, %v695_v5  ;;  %v578_v8 = vpop.f32.mrf.mxu0  ;;  %v618_v9 = vpop.f32.mrf.mxu1 }
  0xea   : > { %v579_v10 = vadd.f32 %v1342_v40, %v578_v8  ;;  %v619_v11 = vadd.f32 %v1342_v40, %v618_v9 }
  0xeb   : > { %v757_v12 = vmax.f32 %v656_v6, 0.0  ;;  %v773_v13 = vmax.f32 %v696_v7, 0.0 }
  0xec   : > { %v726_v14 = vmax.f32 %v579_v10, 0.0  ;;  %v742_v15 = vmax.f32 %v619_v11, 0.0 }
  0xed   : > { %821 = vst [vmem:[%s1350_s18 + $0x138] sm:$0xff] %v757_v12 }
  0xee   : > { %837 = vst [vmem:[%s1350_s18 + $0x1b8] sm:$0xff] %v773_v13 }
  0xef   : > { %790 = vst [vmem:[%s1350_s18 + $0x40] sm:$0xff] %v726_v14 }
  0xf0   : > { %806 = vst [vmem:[%s1350_s18 + $0xc0] sm:$0xff] %v742_v15  ;;  %v658_v16 = vpop.f32.mrf.mxu2  ;;  %v698_v17 = vpop.f32.mrf.mxu3 }
  0xf1   : > { %v659_v18 = vadd.f32 %v1342_v40, %v658_v16  ;;  %v699_v19 = vadd.f32 %v1342_v40, %v698_v17  ;;  %v580_v20 = vpop.f32.mrf.mxu0  ;;  %v620_v21 = vpop.f32.mrf.mxu1 }
  0xf2   : > { %v581_v22 = vadd.f32 %v1342_v40, %v580_v20  ;;  %v621_v23 = vadd.f32 %v1342_v40, %v620_v21 }
  0xf3   : > { %v758_v24 = vmax.f32 %v659_v18, 0.0  ;;  %v774_v25 = vmax.f32 %v699_v19, 0.0 }
  0xf4   : > { %v727_v26 = vmax.f32 %v581_v22, 0.0  ;;  %v743_v27 = vmax.f32 %v621_v23, 0.0 }
  0xf5   : > { %822 = vst [vmem:[%s1350_s18 + $0x140] sm:$0xff] %v758_v24 }
  0xf6   : > { %838 = vst [vmem:[%s1350_s18 + $0x1c0] sm:$0xff] %v774_v25 }
  0xf7   : > { %791 = vst [vmem:[%s1350_s18 + $0x48] sm:$0xff] %v727_v26 }
  0xf8   : > { %807 = vst [vmem:[%s1350_s18 + $0xc8] sm:$0xff] %v743_v27  ;;  %v660_v28 = vpop.f32.mrf.mxu2  ;;  %v700_v29 = vpop.f32.mrf.mxu3 }
  0xf9   : > { %v661_v30 = vadd.f32 %v1342_v40, %v660_v28  ;;  %v701_v31 = vadd.f32 %v1342_v40, %v700_v29  ;;  %v583_v32 = vpop.f32.mrf.mxu0  ;;  %v623_v33 = vpop.f32.mrf.mxu1 }
  0xfa   : > { %v584_v34 = vadd.f32 %v1342_v40, %v583_v32  ;;  %v624_v35 = vadd.f32 %v1342_v40, %v623_v33 }
  0xfb   : > { %v759_v36 = vmax.f32 %v661_v30, 0.0  ;;  %v775_v37 = vmax.f32 %v701_v31, 0.0 }
  0xfc   : > { %v728_v38 = vmax.f32 %v584_v34, 0.0  ;;  %v744_v39 = vmax.f32 %v624_v35, 0.0 }
  0xfd   : > { %823 = vst [vmem:[%s1350_s18 + $0x148] sm:$0xff] %v759_v36 }
  0xfe   : > { %839 = vst [vmem:[%s1350_s18 + $0x1c8] sm:$0xff] %v775_v37 }
  0xff   : > { %792 = vst [vmem:[%s1350_s18 + $0x50] sm:$0xff] %v728_v38 }
 0x100   : > { %808 = vst [vmem:[%s1350_s18 + $0xd0] sm:$0xff] %v744_v39  ;;  %v663_v41 = vpop.f32.mrf.mxu2  ;;  %v703_v42 = vpop.f32.mrf.mxu3 }
 0x101   : > { %v664_v43 = vadd.f32 %v1342_v40, %v663_v41  ;;  %v704_v44 = vadd.f32 %v1342_v40, %v703_v42  ;;  %v585_v45 = vpop.f32.mrf.mxu0  ;;  %v625_v46 = vpop.f32.mrf.mxu1 }
 0x102   : > { %v586_v47 = vadd.f32 %v1342_v40, %v585_v45  ;;  %v626_v48 = vadd.f32 %v1342_v40, %v625_v46 }
 0x103   : > { %v760_v49 = vmax.f32 %v664_v43, 0.0  ;;  %v776_v50 = vmax.f32 %v704_v44, 0.0 }
 0x104   : > { %v729_v51 = vmax.f32 %v586_v47, 0.0  ;;  %v745_v52 = vmax.f32 %v626_v48, 0.0 }
 0x105   : > { %824 = vst [vmem:[%s1350_s18 + $0x150] sm:$0xff] %v760_v49 }
 0x106   : > { %840 = vst [vmem:[%s1350_s18 + $0x1d0] sm:$0xff] %v776_v50 }
 0x107   : > { %793 = vst [vmem:[%s1350_s18 + $0x58] sm:$0xff] %v729_v51 }
 0x108   : > { %809 = vst [vmem:[%s1350_s18 + $0xd8] sm:$0xff] %v745_v52  ;;  %v665_v53 = vpop.f32.mrf.mxu2  ;;  %v705_v54 = vpop.f32.mrf.mxu3 }
 0x109   : > { %v666_v55 = vadd.f32 %v1342_v40, %v665_v53  ;;  %v706_v56 = vadd.f32 %v1342_v40, %v705_v54  ;;  %v588_v57 = vpop.f32.mrf.mxu0  ;;  %v628_v58 = vpop.f32.mrf.mxu1 }
 0x10a   : > { %v589_v59 = vadd.f32 %v1342_v40, %v588_v57  ;;  %v629_v60 = vadd.f32 %v1342_v40, %v628_v58 }
 0x10b   : > { %v761_v61 = vmax.f32 %v666_v55, 0.0  ;;  %v777_v62 = vmax.f32 %v706_v56, 0.0 }
 0x10c   : > { %v730_v63 = vmax.f32 %v589_v59, 0.0  ;;  %v746_v0 = vmax.f32 %v629_v60, 0.0 }
 0x10d   : > { %825 = vst [vmem:[%s1350_s18 + $0x158] sm:$0xff] %v761_v61 }
 0x10e   : > { %841 = vst [vmem:[%s1350_s18 + $0x1d8] sm:$0xff] %v777_v62 }
 0x10f   : > { %794 = vst [vmem:[%s1350_s18 + $0x60] sm:$0xff] %v730_v63 }
 0x110   : > { %810 = vst [vmem:[%s1350_s18 + $0xe0] sm:$0xff] %v746_v0  ;;  %v668_v1 = vpop.f32.mrf.mxu2  ;;  %v708_v2 = vpop.f32.mrf.mxu3 }
 0x111   : > { %v669_v3 = vadd.f32 %v1342_v40, %v668_v1  ;;  %v709_v4 = vadd.f32 %v1342_v40, %v708_v2  ;;  %v590_v5 = vpop.f32.mrf.mxu0  ;;  %v630_v6 = vpop.f32.mrf.mxu1 }
 0x112   : > { %v591_v7 = vadd.f32 %v1342_v40, %v590_v5  ;;  %v631_v8 = vadd.f32 %v1342_v40, %v630_v6 }
 0x113   : > { %v762_v9 = vmax.f32 %v669_v3, 0.0  ;;  %v778_v10 = vmax.f32 %v709_v4, 0.0 }
 0x114   : > { %v731_v11 = vmax.f32 %v591_v7, 0.0  ;;  %v747_v12 = vmax.f32 %v631_v8, 0.0 }
 0x115   : > { %826 = vst [vmem:[%s1350_s18 + $0x160] sm:$0xff] %v762_v9 }
 0x116   : > { %842 = vst [vmem:[%s1350_s18 + $0x1e0] sm:$0xff] %v778_v10 }
 0x117   : > { %795 = vst [vmem:[%s1350_s18 + $0x68] sm:$0xff] %v731_v11 }
 0x118   : > { %811 = vst [vmem:[%s1350_s18 + $0xe8] sm:$0xff] %v747_v12  ;;  %v670_v13 = vpop.f32.mrf.mxu2  ;;  %v710_v14 = vpop.f32.mrf.mxu3 }
 0x119   : > { %v671_v15 = vadd.f32 %v1342_v40, %v670_v13  ;;  %v711_v16 = vadd.f32 %v1342_v40, %v710_v14  ;;  %v593_v17 = vpop.f32.mrf.mxu0  ;;  %v633_v18 = vpop.f32.mrf.mxu1 }
 0x11a   : > { %v594_v19 = vadd.f32 %v1342_v40, %v593_v17  ;;  %v634_v20 = vadd.f32 %v1342_v40, %v633_v18 }
 0x11b   : > { %v763_v21 = vmax.f32 %v671_v15, 0.0  ;;  %v779_v22 = vmax.f32 %v711_v16, 0.0 }
 0x11c   : > { %v732_v23 = vmax.f32 %v594_v19, 0.0  ;;  %v748_v24 = vmax.f32 %v634_v20, 0.0 }
 0x11d   : > { %827 = vst [vmem:[%s1350_s18 + $0x168] sm:$0xff] %v763_v21 }
 0x11e   : > { %843 = vst [vmem:[%s1350_s18 + $0x1e8] sm:$0xff] %v779_v22 }
 0x11f   : > { %796 = vst [vmem:[%s1350_s18 + $0x70] sm:$0xff] %v732_v23 }
 0x120   : > { %812 = vst [vmem:[%s1350_s18 + $0xf0] sm:$0xff] %v748_v24  ;;  %v673_v25 = vpop.f32.mrf.mxu2  ;;  %v713_v26 = vpop.f32.mrf.mxu3 }
 0x121   : > { %v674_v27 = vadd.f32 %v1342_v40, %v673_v25  ;;  %v714_v28 = vadd.f32 %v1342_v40, %v713_v26  ;;  %v595_v29 = vpop.f32.mrf.mxu0  ;;  %v635_v30 = vpop.f32.mrf.mxu1 }
 0x122   : > { %v596_v31 = vadd.f32 %v1342_v40, %v595_v29  ;;  %v636_v32 = vadd.f32 %v1342_v40, %v635_v30 }
 0x123   : > { %v764_v33 = vmax.f32 %v674_v27, 0.0  ;;  %v780_v34 = vmax.f32 %v714_v28, 0.0 }
 0x124   : > { %v733_v35 = vmax.f32 %v596_v31, 0.0  ;;  %v749_v36 = vmax.f32 %v636_v32, 0.0 }
 0x125   : > { %828 = vst [vmem:[%s1350_s18 + $0x170] sm:$0xff] %v764_v33 }
 0x126   : > { %844 = vst [vmem:[%s1350_s18 + $0x1f0] sm:$0xff] %v780_v34 }
 0x127   : > { %797 = vst [vmem:[%s1350_s18 + $0x78] sm:$0xff] %v733_v35 }
 0x128   : > { %813 = vst [vmem:[%s1350_s18 + $0xf8] sm:$0xff] %v749_v36  ;;  %v675_v37 = vpop.f32.mrf.mxu2  ;;  %v715_v38 = vpop.f32.mrf.mxu3 }
 0x129   : > { %v676_v39 = vadd.f32 %v1342_v40, %v675_v37  ;;  %v716_v41 = vadd.f32 %v1342_v40, %v715_v38 }
 0x12b   : > { %v765_v42 = vmax.f32 %v676_v39, 0.0  ;;  %v781_v43 = vmax.f32 %v716_v41, 0.0 }
 0x12d   : > { %829 = vst [vmem:[%s1350_s18 + $0x178] sm:$0xff] %v765_v42 }
 0x12e   : > { %845 = vst [vmem:[%s1350_s18 + $0x1f8] sm:$0xff] %v781_v43 }
 0x12f PF: > { %s13_s14 = sadd.s32 1, %s1232_s14   ;;  %s1491_s12 = smov %s1228_s13 }
 0x130   : > { %p10_p5 = scmp.ge.s32.totalorder %s13_s14, 6   ;;  %s1492_s13 = smov %s1494_s15 }
 0x132   :  { %12 = sbr.rel (!%p10_p5) target bundleno = 2 (0x2), region = 68 }

// kernel: _lambda_.11
= control target key start
LH: loop header
LB: loop body
LE: loop exit
PB: predicated region body
PF: predicated region fallthrough
CT: control target
= control target key end

     0   :  { %s3102_s1 = inlined_call_operand.vmem [shape: bf16[512,128], index: 1, kind: input, shape index: {}]   ;;  %s3103_s2 = inlined_call_operand.vmem [shape: f32[1,128], index: 2, kind: input, shape index: {}]   ;;  %s3104_s0 = inlined_call_operand.vmem [shape: bf16[400,512], index: 0, kind: input, shape index: {}]   ;;  %s3105_s3 = inlined_call_operand.vmem [shape: f32[400,128], index: 3, kind: output, shape index: {}]  }
   0x1   :  { %v2149_v0 = vld [vmem:[%s3102_s1 + $0x38] sm:$0xff]  ;;  %v2148_v4 = vld [vmem:[%s3102_s1 + $0x30] sm:$0xff]  ;;  %v2147_v8 = vld [vmem:[%s3102_s1 + $0x28] sm:$0xff] }
   0x2   :  { %v2157_v1 = vld [vmem:[%s3102_s1 + $0x78] sm:$0xff]  ;;  %874 = vmatpush.bf16.msra.mxu0 %v2149_v0  ;;  %v2156_v5 = vld [vmem:[%s3102_s1 + $0x70] sm:$0xff]  ;;  %v2155_v9 = vld [vmem:[%s3102_s1 + $0x68] sm:$0xff] }
   0x3   :  { %v2165_v2 = vld [vmem:[%s3102_s1 + $0xb8] sm:$0xff]  ;;  %1008 = vmatpush.bf16.msra.mxu1 %v2157_v1  ;;  %v2164_v6 = vld [vmem:[%s3102_s1 + $0xb0] sm:$0xff]  ;;  %v2163_v10 = vld [vmem:[%s3102_s1 + $0xa8] sm:$0xff] }
   0x4   :  { %v2173_v3 = vld [vmem:[%s3102_s1 + $0xf8] sm:$0xff]  ;;  %1142 = vmatpush.bf16.msra.mxu2 %v2165_v2  ;;  %v2172_v7 = vld [vmem:[%s3102_s1 + $0xf0] sm:$0xff]  ;;  %v2171_v11 = vld [vmem:[%s3102_s1 + $0xe8] sm:$0xff] }
   0x5   :  { %1276 = vmatpush.bf16.msra.mxu3 %v2173_v3  ;;  %v2146_v12 = vld [vmem:[%s3102_s1 + $0x20] sm:$0xff]  ;;  %v2145_v16 = vld [vmem:[%s3102_s1 + $0x18] sm:$0xff]  ;;  %v2144_v20 = vld [vmem:[%s3102_s1 + $0x10] sm:$0xff] }
   0x6   :  { %875 = vmatpush.bf16.msra.mxu0 %v2148_v4  ;;  %v2154_v13 = vld [vmem:[%s3102_s1 + $0x60] sm:$0xff]  ;;  %v2153_v17 = vld [vmem:[%s3102_s1 + $0x58] sm:$0xff]  ;;  %v2152_v21 = vld [vmem:[%s3102_s1 + $0x50] sm:$0xff] }
   0x7   :  { %1009 = vmatpush.bf16.msra.mxu1 %v2156_v5  ;;  %v2162_v14 = vld [vmem:[%s3102_s1 + $0xa0] sm:$0xff]  ;;  %v2161_v18 = vld [vmem:[%s3102_s1 + $0x98] sm:$0xff]  ;;  %v2160_v22 = vld [vmem:[%s3102_s1 + $0x90] sm:$0xff] }
   0x8   :  { %1143 = vmatpush.bf16.msra.mxu2 %v2164_v6  ;;  %v2170_v15 = vld [vmem:[%s3102_s1 + $0xe0] sm:$0xff]  ;;  %v2169_v19 = vld [vmem:[%s3102_s1 + $0xd8] sm:$0xff]  ;;  %v2168_v23 = vld [vmem:[%s3102_s1 + $0xd0] sm:$0xff] }
   0x9   :  { %1277 = vmatpush.bf16.msra.mxu3 %v2172_v7  ;;  %v2143_v24 = vld [vmem:[%s3102_s1 + $0x8] sm:$0xff]  ;;  %v2142_v28 = vld [vmem:[%s3102_s1] sm:$0xff]  ;;  %v2044_v33 = vld [vmem:[%s3104_s0 + $0xc] sm:$0xf0] }
   0xa   :  { %876 = vmatpush.bf16.msra.mxu0 %v2147_v8  ;;  %v2151_v25 = vld [vmem:[%s3102_s1 + $0x48] sm:$0xff]  ;;  %v2150_v29 = vld [vmem:[%s3102_s1 + $0x40] sm:$0xff]  ;;  %v1518_v35 = vld [vmem:[%s3104_s0 + $0x10] sm:$0xf0] }
   0xb   :  { %1010 = vmatpush.bf16.msra.mxu1 %v2155_v9  ;;  %v2159_v26 = vld [vmem:[%s3102_s1 + $0x88] sm:$0xff]  ;;  %v2158_v30 = vld [vmem:[%s3102_s1 + $0x80] sm:$0xff]  ;;  %v2045_v37 = vld [vmem:[%s3104_s0 + $0x14] sm:$0xf0] }
   0xc   :  { %1144 = vmatpush.bf16.msra.mxu2 %v2163_v10  ;;  %v2167_v27 = vld [vmem:[%s3102_s1 + $0xc8] sm:$0xff]  ;;  %v2166_v31 = vld [vmem:[%s3102_s1 + $0xc0] sm:$0xff]  ;;  %v1526_v39 = vld [vmem:[%s3104_s0 + $0x18] sm:$0xf0] }
   0xd   :  { %1278 = vmatpush.bf16.msra.mxu3 %v2171_v11  ;;  %v1516_v32 = vld [vmem:[%s3104_s0] sm:$0xf]  ;;  %v2042_v34 = vld [vmem:[%s3104_s0 + $0x4] sm:$0xf]  ;;  %v1524_v36 = vld [vmem:[%s3104_s0 + $0x8] sm:$0xf] }
   0xe   :  { %877 = vmatpush.bf16.msra.mxu0 %v2146_v12  ;;  %v2043_v38 = vld [vmem:[%s3104_s0 + $0xc] sm:$0xf]  ;;  %v1517_v40 = vor.u32 %v2044_v33, %v1516_v32  ;;  %v1521_v41 = vor.u32 %v2042_v34, %v1518_v35  ;;  %v1525_v42 = vor.u32 %v2045_v37, %v1524_v36  ;;  %v1532_v44 = vld [vmem:[%s3104_s0 + $0x20] sm:$0xf]  ;;  %v2048_v45 = vld [vmem:[%s3104_s0 + $0x2c] sm:$0xf0] }
   0xf   :  { %1011 = vmatpush.bf16.msra.mxu1 %v2154_v13  ;;  %v1529_v43 = vor.u32 %v2043_v38, %v1526_v39  ;;  %v2046_v46 = vld [vmem:[%s3104_s0 + $0x24] sm:$0xf]  ;;  %v1534_v47 = vld [vmem:[%s3104_s0 + $0x30] sm:$0xf0]  ;;  %v1540_v48 = vld [vmem:[%s3104_s0 + $0x28] sm:$0xf]  ;;  %v1533_v52 = vor.u32 %v2048_v45, %v1532_v44 }
  0x10   :  { %1145 = vmatpush.bf16.msra.mxu2 %v2162_v14  ;;  %v2049_v49 = vld [vmem:[%s3104_s0 + $0x34] sm:$0xf0]  ;;  %v2047_v50 = vld [vmem:[%s3104_s0 + $0x2c] sm:$0xf]  ;;  %v1542_v51 = vld [vmem:[%s3104_s0 + $0x38] sm:$0xf0]  ;;  %v1537_v53 = vor.u32 %v2046_v46, %v1534_v47 }
  0x11   :  { %1279 = vmatpush.bf16.msra.mxu3 %v2170_v15  ;;  %v1541_v54 = vor.u32 %v2049_v49, %v1540_v48  ;;  %v1545_v55 = vor.u32 %v2047_v50, %v1542_v51  ;;  %v1548_v56 = vld [vmem:[%s3104_s0 + $0x40] sm:$0xf]  ;;  %v2052_v57 = vld [vmem:[%s3104_s0 + $0x4c] sm:$0xf0]  ;;  %v2050_v58 = vld [vmem:[%s3104_s0 + $0x44] sm:$0xf] }
  0x12   :  { %878 = vmatpush.bf16.msra.mxu0 %v2145_v16  ;;  %v1550_v59 = vld [vmem:[%s3104_s0 + $0x50] sm:$0xf0]  ;;  %v1556_v60 = vld [vmem:[%s3104_s0 + $0x48] sm:$0xf]  ;;  %v2053_v61 = vld [vmem:[%s3104_s0 + $0x54] sm:$0xf0]  ;;  %v1549_v0 = vor.u32 %v2052_v57, %v1548_v56 }
  0x13   :  { %1012 = vmatpush.bf16.msra.mxu1 %v2153_v17  ;;  %v2051_v62 = vld [vmem:[%s3104_s0 + $0x4c] sm:$0xf]  ;;  %v1558_v63 = vld [vmem:[%s3104_s0 + $0x58] sm:$0xf0]  ;;  %v1553_v1 = vor.u32 %v2050_v58, %v1550_v59  ;;  %v1557_v2 = vor.u32 %v2053_v61, %v1556_v60  ;;  %v1564_v4 = vld [vmem:[%s3104_s0 + $0x60] sm:$0xf] }
  0x14   :  { %1146 = vmatpush.bf16.msra.mxu2 %v2161_v18  ;;  %v1561_v3 = vor.u32 %v2051_v62, %v1558_v63  ;;  %v2056_v5 = vld [vmem:[%s3104_s0 + $0x6c] sm:$0xf0]  ;;  %v2054_v6 = vld [vmem:[%s3104_s0 + $0x64] sm:$0xf]  ;;  %v1566_v7 = vld [vmem:[%s3104_s0 + $0x70] sm:$0xf0] }
  0x15   :  { %1280 = vmatpush.bf16.msra.mxu3 %v2169_v19  ;;  %v1572_v8 = vld [vmem:[%s3104_s0 + $0x68] sm:$0xf]  ;;  %v2057_v9 = vld [vmem:[%s3104_s0 + $0x74] sm:$0xf0]  ;;  %v2055_v10 = vld [vmem:[%s3104_s0 + $0x6c] sm:$0xf]  ;;  %v1565_v12 = vor.u32 %v2056_v5, %v1564_v4  ;;  %v1569_v13 = vor.u32 %v2054_v6, %v1566_v7 }
  0x16   :  { %879 = vmatpush.bf16.msra.mxu0 %v2144_v20  ;;  %v1574_v11 = vld [vmem:[%s3104_s0 + $0x78] sm:$0xf0]  ;;  %v1573_v14 = vor.u32 %v2057_v9, %v1572_v8  ;;  %v1580_v16 = vld [vmem:[%s3104_s0 + $0x80] sm:$0xf]  ;;  %v2060_v17 = vld [vmem:[%s3104_s0 + $0x8c] sm:$0xf0] }
  0x17   :  { %1013 = vmatpush.bf16.msra.mxu1 %v2152_v21  ;;  %v1577_v15 = vor.u32 %v2055_v10, %v1574_v11  ;;  %v2058_v18 = vld [vmem:[%s3104_s0 + $0x84] sm:$0xf]  ;;  %v1582_v19 = vld [vmem:[%s3104_s0 + $0x90] sm:$0xf0]  ;;  %v1588_v20 = vld [vmem:[%s3104_s0 + $0x88] sm:$0xf] }
  0x18   :  { %1147 = vmatpush.bf16.msra.mxu2 %v2160_v22  ;;  %v2061_v21 = vld [vmem:[%s3104_s0 + $0x94] sm:$0xf0]  ;;  %v2059_v22 = vld [vmem:[%s3104_s0 + $0x8c] sm:$0xf]  ;;  %v1604_v32 = vld [vmem:[%s3104_s0 + $0xa8] sm:$0xf] }
  0x19   :  { %1281 = vmatpush.bf16.msra.mxu3 %v2168_v23  ;;  %v1590_v23 = vld [vmem:[%s3104_s0 + $0x98] sm:$0xf0]  ;;  %v2065_v33 = vld [vmem:[%s3104_s0 + $0xb4] sm:$0xf0]  ;;  %v2063_v34 = vld [vmem:[%s3104_s0 + $0xac] sm:$0xf] }
  0x1a   :  { %880 = vmatpush.bf16.msra.mxu0 %v2143_v24  ;;  %v1581_v24 = vor.u32 %v2060_v17, %v1580_v16  ;;  %v1606_v35 = vld [vmem:[%s3104_s0 + $0xb8] sm:$0xf0]  ;;  %v1605_v38 = vor.u32 %v2065_v33, %v1604_v32  ;;  %v1620_v44 = vld [vmem:[%s3104_s0 + $0xc8] sm:$0xf]  ;;  %v2069_v45 = vld [vmem:[%s3104_s0 + $0xd4] sm:$0xf0] }
  0x1b   :  { %1014 = vmatpush.bf16.msra.mxu1 %v2151_v25  ;;  %v1585_v25 = vor.u32 %v2058_v18, %v1582_v19  ;;  %v1609_v39 = vor.u32 %v2063_v34, %v1606_v35  ;;  %v2067_v46 = vld [vmem:[%s3104_s0 + $0xcc] sm:$0xf]  ;;  %v1622_v47 = vld [vmem:[%s3104_s0 + $0xd8] sm:$0xf0]  ;;  %v1621_v50 = vor.u32 %v2069_v45, %v1620_v44  ;;  %v1636_v56 = vld [vmem:[%s3104_s0 + $0xe8] sm:$0xf] }
  0x1c   :  { %1148 = vmatpush.bf16.msra.mxu2 %v2159_v26  ;;  %v1589_v26 = vor.u32 %v2061_v21, %v1588_v20  ;;  %v1625_v51 = vor.u32 %v2067_v46, %v1622_v47  ;;  %v2073_v57 = vld [vmem:[%s3104_s0 + $0xf4] sm:$0xf0]  ;;  %v2071_v58 = vld [vmem:[%s3104_s0 + $0xec] sm:$0xf]  ;;  %v1638_v59 = vld [vmem:[%s3104_s0 + $0xf8] sm:$0xf0] }
  0x1d   :  { %1282 = vmatpush.bf16.msra.mxu3 %v2167_v27  ;;  %v1593_v27 = vor.u32 %v2059_v22, %v1590_v23  ;;  %v1637_v62 = vor.u32 %v2073_v57, %v1636_v56  ;;  %v1641_v63 = vor.u32 %v2071_v58, %v1638_v59  ;;  %v1646_v4 = vld [vmem:[%s3104_s0 + $0x110] sm:$0xf0]  ;;  %v1652_v5 = vld [vmem:[%s3104_s0 + $0x108] sm:$0xf]  ;;  %v2077_v6 = vld [vmem:[%s3104_s0 + $0x114] sm:$0xf0] }
  0x1e   :  { %881 = vmatpush.bf16.msra.mxu0 %v2142_v28  ;;  %v1596_v28 = vld [vmem:[%s3104_s0 + $0xa0] sm:$0xf]  ;;  %v2075_v7 = vld [vmem:[%s3104_s0 + $0x10c] sm:$0xf]  ;;  %v1654_v8 = vld [vmem:[%s3104_s0 + $0x118] sm:$0xf0] }
  0x1f   :  { %1015 = vmatpush.bf16.msra.mxu1 %v2150_v29  ;;  %v2064_v29 = vld [vmem:[%s3104_s0 + $0xac] sm:$0xf0]  ;;  %v1670_v32 = vld [vmem:[%s3104_s0 + $0x138] sm:$0xf0]  ;;  %v2082_v56 = vld [vmem:[%s3104_s0 + $0x144] sm:$0xf] }
  0x20   :  { %1149 = vmatpush.bf16.msra.mxu2 %v2158_v30  ;;  %v2062_v30 = vld [vmem:[%s3104_s0 + $0xa4] sm:$0xf]  ;;  %v1597_v36 = vor.u32 %v2064_v29, %v1596_v28  ;;  %v1662_v28 = vld [vmem:[%s3104_s0 + $0x130] sm:$0xf0]  ;;  %v1668_v29 = vld [vmem:[%s3104_s0 + $0x128] sm:$0xf] }
  0x21   :  { %1283 = vmatpush.bf16.msra.mxu3 %v2166_v31  ;;  %882 = vmatmul.bf16.vlgmr.msra.gmra.mxu0 %v1517_v40  ;;  %v1598_v31 = vld [vmem:[%s3104_s0 + $0xb0] sm:$0xf0]  ;;  %v1612_v40 = vld [vmem:[%s3104_s0 + $0xc0] sm:$0xf]  ;;  %v1684_v59 = vld [vmem:[%s3104_s0 + $0x148] sm:$0xf] }
  0x22   :  { %1016 = vmatmul.bf16.vlgmr.msra.gmra.mxu1 %v1521_v41  ;;  %v1601_v37 = vor.u32 %v2062_v30, %v1598_v31  ;;  %v2068_v41 = vld [vmem:[%s3104_s0 + $0xcc] sm:$0xf0]  ;;  %v2081_v30 = vld [vmem:[%s3104_s0 + $0x134] sm:$0xf0]  ;;  %v2079_v31 = vld [vmem:[%s3104_s0 + $0x12c] sm:$0xf] }
  0x23   :  { %1150 = vmatmul.bf16.vlgmr.msra.gmra.mxu2 %v1525_v42  ;;  %v2066_v42 = vld [vmem:[%s3104_s0 + $0xc4] sm:$0xf]  ;;  %v1613_v48 = vor.u32 %v2068_v41, %v1612_v40  ;;  %v1669_v41 = vor.u32 %v2081_v30, %v1668_v29  ;;  %v1678_v58 = vld [vmem:[%s3104_s0 + $0x150] sm:$0xf0]  ;;  %v1702_v29 = vld [vmem:[%s3104_s0 + $0x178] sm:$0xf0] }
  0x24   :  { %1284 = vmatmul.bf16.vlgmr.msra.gmra.mxu3 %v1529_v43  ;;  %v1614_v43 = vld [vmem:[%s3104_s0 + $0xd0] sm:$0xf0] }
  0x25   :  { %v1617_v49 = vor.u32 %v2066_v42, %v1614_v43  ;;  %v1673_v42 = vor.u32 %v2079_v31, %v1670_v32 }
  0x31   :  { %887 = vmatmul.bf16.gmra.mxu0 %v1533_v52  ;;  %v1628_v52 = vld [vmem:[%s3104_s0 + $0xe0] sm:$0xf] }
  0x32   :  { %1021 = vmatmul.bf16.gmra.mxu1 %v1537_v53  ;;  %v2072_v53 = vld [vmem:[%s3104_s0 + $0xec] sm:$0xf0] }
  0x33   :  { %1155 = vmatmul.bf16.gmra.mxu2 %v1541_v54  ;;  %v2070_v54 = vld [vmem:[%s3104_s0 + $0xe4] sm:$0xf]  ;;  %v1629_v60 = vor.u32 %v2072_v53, %v1628_v52 }
  0x34   :  { %1289 = vmatmul.bf16.gmra.mxu3 %v1545_v55  ;;  %v1630_v55 = vld [vmem:[%s3104_s0 + $0xf0] sm:$0xf0] }
  0x35   :  { %v1633_v61 = vor.u32 %v2070_v54, %v1630_v55  ;;  %v1676_v54 = vld [vmem:[%s3104_s0 + $0x140] sm:$0xf]  ;;  %v2084_v55 = vld [vmem:[%s3104_s0 + $0x14c] sm:$0xf0] }
  0x41   :  { %892 = vmatmul.bf16.gmra.mxu0 %v1549_v0  ;;  %v2487_v0 = vld [vmem:[%s3103_s2] ss:$0 sm:$0xff] }
  0x42   :  { %1026 = vmatmul.bf16.gmra.mxu1 %v1553_v1  ;;  %v1644_v1 = vld [vmem:[%s3104_s0 + $0x100] sm:$0xf] }
  0x43   :  { %1160 = vmatmul.bf16.gmra.mxu2 %v1557_v2  ;;  %v2076_v2 = vld [vmem:[%s3104_s0 + $0x10c] sm:$0xf0] }
  0x44   :  { %1294 = vmatmul.bf16.gmra.mxu3 %v1561_v3  ;;  %v2074_v3 = vld [vmem:[%s3104_s0 + $0x104] sm:$0xf]  ;;  %v1645_v9 = vor.u32 %v2076_v2, %v1644_v1 }
  0x45   :  { %v1649_v10 = vor.u32 %v2074_v3, %v1646_v4  ;;  %v1677_v3 = vor.u32 %v2084_v55, %v1676_v54  ;;  %v1681_v4 = vor.u32 %v2082_v56, %v1678_v58  ;;  %v1710_v55 = vld [vmem:[%s3104_s0 + $0x190] sm:$0xf0]  ;;  %v1716_v56 = vld [vmem:[%s3104_s0 + $0x188] sm:$0xf]  ;;  %v2091_v58 = vld [vmem:[%s3104_s0 + $0x18c] sm:$0xf] }
  0x51   :  { %897 = vmatmul.bf16.gmra.mxu0 %v1565_v12 }
  0x52   :  { %1031 = vmatmul.bf16.gmra.mxu1 %v1569_v13  ;;  %v1653_v13 = vor.u32 %v2077_v6, %v1652_v5 }
  0x53   :  { %1165 = vmatmul.bf16.gmra.mxu2 %v1573_v14  ;;  %v1657_v14 = vor.u32 %v2075_v7, %v1654_v8 }
  0x54   :  { %1299 = vmatmul.bf16.gmra.mxu3 %v1577_v15 }
  0x61   :  { %902 = vmatmul.bf16.gmra.mxu0 %v1581_v24  ;;  %v1660_v24 = vld [vmem:[%s3104_s0 + $0x120] sm:$0xf] }
  0x62   :  { %1036 = vmatmul.bf16.gmra.mxu1 %v1585_v25  ;;  %v2080_v25 = vld [vmem:[%s3104_s0 + $0x12c] sm:$0xf0] }
  0x63   :  { %1170 = vmatmul.bf16.gmra.mxu2 %v1589_v26  ;;  %v2078_v26 = vld [vmem:[%s3104_s0 + $0x124] sm:$0xf] }
  0x64   :  { %1304 = vmatmul.bf16.gmra.mxu3 %v1593_v27 }
  0x71   :  { %907 = vmatmul.bf16.gmra.mxu0 %v1597_v36  ;;  %v1661_v36 = vor.u32 %v2080_v25, %v1660_v24  ;;  %v1694_v25 = vld [vmem:[%s3104_s0 + $0x170] sm:$0xf0] }
  0x72   :  { %1041 = vmatmul.bf16.gmra.mxu1 %v1601_v37  ;;  %v1665_v37 = vor.u32 %v2078_v26, %v1662_v28  ;;  %v1700_v26 = vld [vmem:[%s3104_s0 + $0x168] sm:$0xf]  ;;  %v2087_v28 = vld [vmem:[%s3104_s0 + $0x16c] sm:$0xf] }
  0x73   :  { %1175 = vmatmul.bf16.gmra.mxu2 %v1605_v38 }
  0x74   :  { %1309 = vmatmul.bf16.gmra.mxu3 %v1609_v39 }
  0x81   :  { %912 = vmatmul.bf16.gmra.mxu0 %v1613_v48 }
  0x82   :  { %1046 = vmatmul.bf16.gmra.mxu1 %v1617_v49 }
  0x83   :  { %1180 = vmatmul.bf16.gmra.mxu2 %v1621_v50 }
  0x84   :  { %1314 = vmatmul.bf16.gmra.mxu3 %v1625_v51 }
  0x91   :  { %917 = vmatmul.bf16.gmra.mxu0 %v1629_v60  ;;  %v2085_v60 = vld [vmem:[%s3104_s0 + $0x154] sm:$0xf0] }
  0x92   :  { %1051 = vmatmul.bf16.gmra.mxu1 %v1633_v61  ;;  %v2083_v61 = vld [vmem:[%s3104_s0 + $0x14c] sm:$0xf]  ;;  %v1685_v8 = vor.u32 %v2085_v60, %v1684_v59  ;;  %v1718_v59 = vld [vmem:[%s3104_s0 + $0x198] sm:$0xf0] }
  0x93   :  { %1185 = vmatmul.bf16.gmra.mxu2 %v1637_v62  ;;  %v1686_v62 = vld [vmem:[%s3104_s0 + $0x158] sm:$0xf0] }
  0x94   :  { %1319 = vmatmul.bf16.gmra.mxu3 %v1641_v63 }
  0x9e   :  { %v883_v11 = vpop.f32.mrf.mxu0 }
  0x9f   :  { %v1017_v12 = vpop.f32.mrf.mxu1  ;;  %v884_v15 = vadd.f32 %v2487_v0, %v883_v11 }
  0xa1   :  { %922 = vmatmul.bf16.gmra.mxu0 %v1645_v9  ;;  %v1018_v16 = vadd.f32 %v1017_v12, %v884_v15  ;;  %v1689_v9 = vor.u32 %v2083_v61, %v1686_v62 }
  0xa2   :  { %1056 = vmatmul.bf16.gmra.mxu1 %v1649_v10 }
  0xa3   :  { %1190 = vmatmul.bf16.gmra.mxu2 %v1653_v13 }
  0xa4   :  { %1324 = vmatmul.bf16.gmra.mxu3 %v1657_v14 }
  0xa6   :  { %v1151_v17 = vpop.f32.mrf.mxu2  ;;  %v885_v20 = vpop.f32.mrf.mxu0 }
  0xa7   :  { %v1285_v18 = vpop.f32.mrf.mxu3  ;;  %v1152_v19 = vadd.f32 %v1151_v17, %v1018_v16  ;;  %v1019_v21 = vpop.f32.mrf.mxu1  ;;  %v886_v23 = vadd.f32 %v2487_v0, %v885_v20 }
  0xa9   :  { %v1286_v22 = vadd.f32 %v1285_v18, %v1152_v19  ;;  %v1020_v33 = vadd.f32 %v1019_v21, %v886_v23  ;;  %v1692_v21 = vld [vmem:[%s3104_s0 + $0x160] sm:$0xf]  ;;  %v2086_v23 = vld [vmem:[%s3104_s0 + $0x164] sm:$0xf] }
  0xab   :  { %v1410_v27 = vmax.f32 %v1286_v22, 0.0  ;;  %v2088_v22 = vld [vmem:[%s3104_s0 + $0x16c] sm:$0xf0] }
  0xad   :  { %1460 = vst [vmem:[%s3105_s3] sm:$0xff] %v1410_v27  ;;  %v2089_v27 = vld [vmem:[%s3104_s0 + $0x174] sm:$0xf0] }
  0xae   :  { %v1153_v34 = vpop.f32.mrf.mxu2  ;;  %v888_v39 = vpop.f32.mrf.mxu0 }
  0xaf   :  { %v1287_v35 = vpop.f32.mrf.mxu3  ;;  %v1154_v38 = vadd.f32 %v1153_v34, %v1020_v33  ;;  %v1022_v40 = vpop.f32.mrf.mxu1  ;;  %v889_v43 = vadd.f32 %v2487_v0, %v888_v39  ;;  %v1693_v33 = vor.u32 %v2088_v22, %v1692_v21  ;;  %v1697_v34 = vor.u32 %v2086_v23, %v1694_v25  ;;  %v1726_v22 = vld [vmem:[%s3104_s0 + $0x1b0] sm:$0xf0]  ;;  %v1732_v23 = vld [vmem:[%s3104_s0 + $0x1a8] sm:$0xf]  ;;  %v2095_v25 = vld [vmem:[%s3104_s0 + $0x1ac] sm:$0xf] }
  0xb0   :  { %v1705_v39 = vor.u32 %v2087_v28, %v1702_v29 }
  0xb1   :  { %v1288_v44 = vadd.f32 %v1287_v35, %v1154_v38  ;;  %927 = vmatmul.bf16.gmra.mxu0 %v1661_v36  ;;  %v1023_v46 = vadd.f32 %v1022_v40, %v889_v43  ;;  %v1701_v38 = vor.u32 %v2089_v27, %v1700_v26  ;;  %v1734_v26 = vld [vmem:[%s3104_s0 + $0x1b8] sm:$0xf0] }
  0xb2   :  { %1061 = vmatmul.bf16.gmra.mxu1 %v1665_v37 }
  0xb3   :  { %v1411_v45 = vmax.f32 %v1288_v44, 0.0  ;;  %1195 = vmatmul.bf16.gmra.mxu2 %v1669_v41 }
  0xb4   :  { %1329 = vmatmul.bf16.gmra.mxu3 %v1673_v42 }
  0xb5   :  { %1461 = vst [vmem:[%s3105_s3 + $0x8] sm:$0xff] %v1411_v45 }
  0xb6   :  { %v1156_v47 = vpop.f32.mrf.mxu2  ;;  %v890_v50 = vpop.f32.mrf.mxu0 }
  0xb7   :  { %v1290_v48 = vpop.f32.mrf.mxu3  ;;  %v1157_v49 = vadd.f32 %v1156_v47, %v1023_v46  ;;  %v1024_v51 = vpop.f32.mrf.mxu1  ;;  %v891_v53 = vadd.f32 %v2487_v0, %v890_v50 }
  0xb9   :  { %v1291_v52 = vadd.f32 %v1290_v48, %v1157_v49  ;;  %v1025_v63 = vadd.f32 %v1024_v51, %v891_v53  ;;  %v1708_v51 = vld [vmem:[%s3104_s0 + $0x180] sm:$0xf]  ;;  %v2090_v53 = vld [vmem:[%s3104_s0 + $0x184] sm:$0xf] }
  0xbb   :  { %v1412_v57 = vmax.f32 %v1291_v52, 0.0  ;;  %v2092_v52 = vld [vmem:[%s3104_s0 + $0x18c] sm:$0xf0] }
  0xbd   :  { %1462 = vst [vmem:[%s3105_s3 + $0x10] sm:$0xff] %v1412_v57  ;;  %v2093_v57 = vld [vmem:[%s3104_s0 + $0x194] sm:$0xf0] }
  0xbe   :  { %v1158_v1 = vpop.f32.mrf.mxu2  ;;  %v893_v6 = vpop.f32.mrf.mxu0 }
  0xbf   :  { %v1292_v2 = vpop.f32.mrf.mxu3  ;;  %v1159_v5 = vadd.f32 %v1158_v1, %v1025_v63  ;;  %v1027_v7 = vpop.f32.mrf.mxu1  ;;  %v894_v10 = vadd.f32 %v2487_v0, %v893_v6  ;;  %v1709_v63 = vor.u32 %v2092_v52, %v1708_v51  ;;  %v1713_v1 = vor.u32 %v2090_v53, %v1710_v55  ;;  %v1742_v52 = vld [vmem:[%s3104_s0 + $0x1d0] sm:$0xf0]  ;;  %v1748_v53 = vld [vmem:[%s3104_s0 + $0x1c8] sm:$0xf]  ;;  %v2099_v55 = vld [vmem:[%s3104_s0 + $0x1cc] sm:$0xf] }
  0xc0   :  { %v1721_v6 = vor.u32 %v2091_v58, %v1718_v59 }
  0xc1   :  { %v1293_v11 = vadd.f32 %v1292_v2, %v1159_v5  ;;  %932 = vmatmul.bf16.gmra.mxu0 %v1677_v3  ;;  %v1028_v13 = vadd.f32 %v1027_v7, %v894_v10  ;;  %v1717_v5 = vor.u32 %v2093_v57, %v1716_v56  ;;  %v1750_v56 = vld [vmem:[%s3104_s0 + $0x1d8] sm:$0xf0] }
  0xc2   :  { %1066 = vmatmul.bf16.gmra.mxu1 %v1681_v4 }
  0xc3   :  { %v1413_v12 = vmax.f32 %v1293_v11, 0.0  ;;  %1200 = vmatmul.bf16.gmra.mxu2 %v1685_v8 }
  0xc4   :  { %1334 = vmatmul.bf16.gmra.mxu3 %v1689_v9 }
  0xc5   :  { %1463 = vst [vmem:[%s3105_s3 + $0x18] sm:$0xff] %v1413_v12 }
  0xc6   :  { %v1161_v14 = vpop.f32.mrf.mxu2  ;;  %v895_v17 = vpop.f32.mrf.mxu0 }
  0xc7   :  { %v1295_v15 = vpop.f32.mrf.mxu3  ;;  %v1162_v16 = vadd.f32 %v1161_v14, %v1028_v13  ;;  %v1029_v18 = vpop.f32.mrf.mxu1  ;;  %v896_v20 = vadd.f32 %v2487_v0, %v895_v17 }
  0xc9   :  { %v1296_v19 = vadd.f32 %v1295_v15, %v1162_v16  ;;  %v1030_v30 = vadd.f32 %v1029_v18, %v896_v20  ;;  %v1724_v18 = vld [vmem:[%s3104_s0 + $0x1a0] sm:$0xf]  ;;  %v2094_v20 = vld [vmem:[%s3104_s0 + $0x1a4] sm:$0xf] }
  0xcb   :  { %v1414_v24 = vmax.f32 %v1296_v19, 0.0  ;;  %v2096_v19 = vld [vmem:[%s3104_s0 + $0x1ac] sm:$0xf0] }
  0xcd   :  { %1464 = vst [vmem:[%s3105_s3 + $0x20] sm:$0xff] %v1414_v24  ;;  %v2097_v24 = vld [vmem:[%s3104_s0 + $0x1b4] sm:$0xf0] }
  0xce   :  { %v1163_v31 = vpop.f32.mrf.mxu2  ;;  %v898_v36 = vpop.f32.mrf.mxu0 }
  0xcf   :  { %v1297_v32 = vpop.f32.mrf.mxu3  ;;  %v1164_v35 = vadd.f32 %v1163_v31, %v1030_v30  ;;  %v1032_v37 = vpop.f32.mrf.mxu1  ;;  %v899_v40 = vadd.f32 %v2487_v0, %v898_v36  ;;  %v1725_v30 = vor.u32 %v2096_v19, %v1724_v18  ;;  %v1729_v31 = vor.u32 %v2094_v20, %v1726_v22  ;;  %v1758_v19 = vld [vmem:[%s3104_s0 + $0x1f0] sm:$0xf0]  ;;  %v1764_v20 = vld [vmem:[%s3104_s0 + $0x1e8] sm:$0xf]  ;;  %v2103_v22 = vld [vmem:[%s3104_s0 + $0x1ec] sm:$0xf] }
  0xd0   :  { %v1737_v36 = vor.u32 %v2095_v25, %v1734_v26 }
  0xd1   :  { %v1298_v41 = vadd.f32 %v1297_v32, %v1164_v35  ;;  %937 = vmatmul.bf16.gmra.mxu0 %v1693_v33  ;;  %v1033_v43 = vadd.f32 %v1032_v37, %v899_v40  ;;  %v1733_v35 = vor.u32 %v2097_v24, %v1732_v23  ;;  %v1766_v23 = vld [vmem:[%s3104_s0 + $0x1f8] sm:$0xf0] }
  0xd2   :  { %1071 = vmatmul.bf16.gmra.mxu1 %v1697_v34 }
  0xd3   :  { %v1415_v42 = vmax.f32 %v1298_v41, 0.0  ;;  %1205 = vmatmul.bf16.gmra.mxu2 %v1701_v38 }
  0xd4   :  { %1339 = vmatmul.bf16.gmra.mxu3 %v1705_v39 }
  0xd5   :  { %1465 = vst [vmem:[%s3105_s3 + $0x28] sm:$0xff] %v1415_v42 }
  0xd6   :  { %v1166_v44 = vpop.f32.mrf.mxu2  ;;  %v900_v47 = vpop.f32.mrf.mxu0 }
  0xd7   :  { %v1300_v45 = vpop.f32.mrf.mxu3  ;;  %v1167_v46 = vadd.f32 %v1166_v44, %v1033_v43  ;;  %v1034_v48 = vpop.f32.mrf.mxu1  ;;  %v901_v50 = vadd.f32 %v2487_v0, %v900_v47 }
  0xd9   :  { %v1301_v49 = vadd.f32 %v1300_v45, %v1167_v46  ;;  %v1035_v60 = vadd.f32 %v1034_v48, %v901_v50  ;;  %v1740_v48 = vld [vmem:[%s3104_s0 + $0x1c0] sm:$0xf]  ;;  %v2098_v50 = vld [vmem:[%s3104_s0 + $0x1c4] sm:$0xf] }
  0xdb   :  { %v1416_v54 = vmax.f32 %v1301_v49, 0.0  ;;  %v2100_v49 = vld [vmem:[%s3104_s0 + $0x1cc] sm:$0xf0] }
  0xdd   :  { %1466 = vst [vmem:[%s3105_s3 + $0x30] sm:$0xff] %v1416_v54  ;;  %v2101_v54 = vld [vmem:[%s3104_s0 + $0x1d4] sm:$0xf0] }
  0xde   :  { %v1168_v61 = vpop.f32.mrf.mxu2  ;;  %v903_v3 = vpop.f32.mrf.mxu0 }
  0xdf   :  { %v1302_v62 = vpop.f32.mrf.mxu3  ;;  %v1169_v2 = vadd.f32 %v1168_v61, %v1035_v60  ;;  %v1037_v4 = vpop.f32.mrf.mxu1  ;;  %v904_v7 = vadd.f32 %v2487_v0, %v903_v3  ;;  %v1741_v60 = vor.u32 %v2100_v49, %v1740_v48  ;;  %v1745_v61 = vor.u32 %v2098_v50, %v1742_v52  ;;  %v1774_v49 = vld [vmem:[%s3104_s0 + $0x210] sm:$0xf0]  ;;  %v1780_v50 = vld [vmem:[%s3104_s0 + $0x208] sm:$0xf]  ;;  %v2107_v52 = vld [vmem:[%s3104_s0 + $0x20c] sm:$0xf] }
  0xe0   :  { %v1753_v3 = vor.u32 %v2099_v55, %v1750_v56 }
  0xe1   :  { %v1303_v8 = vadd.f32 %v1302_v62, %v1169_v2  ;;  %942 = vmatmul.bf16.gmra.mxu0 %v1709_v63  ;;  %v1038_v10 = vadd.f32 %v1037_v4, %v904_v7  ;;  %v1749_v2 = vor.u32 %v2101_v54, %v1748_v53  ;;  %v1782_v53 = vld [vmem:[%s3104_s0 + $0x218] sm:$0xf0] }
  0xe2   :  { %1076 = vmatmul.bf16.gmra.mxu1 %v1713_v1 }
  0xe3   :  { %v1417_v9 = vmax.f32 %v1303_v8, 0.0  ;;  %1210 = vmatmul.bf16.gmra.mxu2 %v1717_v5 }
  0xe4   :  { %1344 = vmatmul.bf16.gmra.mxu3 %v1721_v6 }
  0xe5   :  { %1467 = vst [vmem:[%s3105_s3 + $0x38] sm:$0xff] %v1417_v9 }
  0xe6   :  { %v1171_v11 = vpop.f32.mrf.mxu2  ;;  %v905_v14 = vpop.f32.mrf.mxu0 }
  0xe7   :  { %v1305_v12 = vpop.f32.mrf.mxu3  ;;  %v1172_v13 = vadd.f32 %v1171_v11, %v1038_v10  ;;  %v1039_v15 = vpop.f32.mrf.mxu1  ;;  %v906_v17 = vadd.f32 %v2487_v0, %v905_v14 }
  0xe9   :  { %v1306_v16 = vadd.f32 %v1305_v12, %v1172_v13  ;;  %v1040_v27 = vadd.f32 %v1039_v15, %v906_v17  ;;  %v1756_v15 = vld [vmem:[%s3104_s0 + $0x1e0] sm:$0xf]  ;;  %v2102_v17 = vld [vmem:[%s3104_s0 + $0x1e4] sm:$0xf] }
  0xeb   :  { %v1418_v21 = vmax.f32 %v1306_v16, 0.0  ;;  %v2104_v16 = vld [vmem:[%s3104_s0 + $0x1ec] sm:$0xf0] }
  0xed   :  { %1468 = vst [vmem:[%s3105_s3 + $0x40] sm:$0xff] %v1418_v21  ;;  %v2105_v21 = vld [vmem:[%s3104_s0 + $0x1f4] sm:$0xf0] }
  0xee   :  { %v1173_v28 = vpop.f32.mrf.mxu2  ;;  %v908_v33 = vpop.f32.mrf.mxu0 }
  0xef   :  { %v1307_v29 = vpop.f32.mrf.mxu3  ;;  %v1174_v32 = vadd.f32 %v1173_v28, %v1040_v27  ;;  %v1042_v34 = vpop.f32.mrf.mxu1  ;;  %v909_v37 = vadd.f32 %v2487_v0, %v908_v33  ;;  %v1757_v27 = vor.u32 %v2104_v16, %v1756_v15  ;;  %v1761_v28 = vor.u32 %v2102_v17, %v1758_v19  ;;  %v1790_v16 = vld [vmem:[%s3104_s0 + $0x230] sm:$0xf0]  ;;  %v1796_v17 = vld [vmem:[%s3104_s0 + $0x228] sm:$0xf]  ;;  %v2111_v19 = vld [vmem:[%s3104_s0 + $0x22c] sm:$0xf] }
  0xf0   :  { %v1769_v33 = vor.u32 %v2103_v22, %v1766_v23 }
  0xf1   :  { %v1308_v38 = vadd.f32 %v1307_v29, %v1174_v32  ;;  %947 = vmatmul.bf16.gmra.mxu0 %v1725_v30  ;;  %v1043_v40 = vadd.f32 %v1042_v34, %v909_v37  ;;  %v1765_v32 = vor.u32 %v2105_v21, %v1764_v20  ;;  %v1798_v20 = vld [vmem:[%s3104_s0 + $0x238] sm:$0xf0] }
  0xf2   :  { %1081 = vmatmul.bf16.gmra.mxu1 %v1729_v31 }
  0xf3   :  { %v1419_v39 = vmax.f32 %v1308_v38, 0.0  ;;  %1215 = vmatmul.bf16.gmra.mxu2 %v1733_v35 }
  0xf4   :  { %1349 = vmatmul.bf16.gmra.mxu3 %v1737_v36 }
  0xf5   :  { %1469 = vst [vmem:[%s3105_s3 + $0x48] sm:$0xff] %v1419_v39 }
  0xf6   :  { %v1176_v41 = vpop.f32.mrf.mxu2  ;;  %v910_v44 = vpop.f32.mrf.mxu0 }
  0xf7   :  { %v1310_v42 = vpop.f32.mrf.mxu3  ;;  %v1177_v43 = vadd.f32 %v1176_v41, %v1043_v40  ;;  %v1044_v45 = vpop.f32.mrf.mxu1  ;;  %v911_v47 = vadd.f32 %v2487_v0, %v910_v44 }
  0xf9   :  { %v1311_v46 = vadd.f32 %v1310_v42, %v1177_v43  ;;  %v1045_v57 = vadd.f32 %v1044_v45, %v911_v47  ;;  %v1772_v45 = vld [vmem:[%s3104_s0 + $0x200] sm:$0xf]  ;;  %v2106_v47 = vld [vmem:[%s3104_s0 + $0x204] sm:$0xf] }
  0xfb   :  { %v1420_v51 = vmax.f32 %v1311_v46, 0.0  ;;  %v2108_v46 = vld [vmem:[%s3104_s0 + $0x20c] sm:$0xf0] }
  0xfd   :  { %1470 = vst [vmem:[%s3105_s3 + $0x50] sm:$0xff] %v1420_v51  ;;  %v2109_v51 = vld [vmem:[%s3104_s0 + $0x214] sm:$0xf0] }
  0xfe   :  { %v1178_v58 = vpop.f32.mrf.mxu2  ;;  %v913_v63 = vpop.f32.mrf.mxu0 }
  0xff   :  { %v1312_v59 = vpop.f32.mrf.mxu3  ;;  %v1179_v62 = vadd.f32 %v1178_v58, %v1045_v57  ;;  %v1047_v1 = vpop.f32.mrf.mxu1  ;;  %v914_v4 = vadd.f32 %v2487_v0, %v913_v63  ;;  %v1773_v57 = vor.u32 %v2108_v46, %v1772_v45  ;;  %v1777_v58 = vor.u32 %v2106_v47, %v1774_v49  ;;  %v1806_v46 = vld [vmem:[%s3104_s0 + $0x250] sm:$0xf0]  ;;  %v1812_v47 = vld [vmem:[%s3104_s0 + $0x248] sm:$0xf]  ;;  %v2115_v49 = vld [vmem:[%s3104_s0 + $0x24c] sm:$0xf] }
 0x100   :  { %v1785_v63 = vor.u32 %v2107_v52, %v1782_v53 }
 0x101   :  { %v1313_v5 = vadd.f32 %v1312_v59, %v1179_v62  ;;  %952 = vmatmul.bf16.gmra.mxu0 %v1741_v60  ;;  %v1048_v7 = vadd.f32 %v1047_v1, %v914_v4  ;;  %v1781_v62 = vor.u32 %v2109_v51, %v1780_v50  ;;  %v1814_v50 = vld [vmem:[%s3104_s0 + $0x258] sm:$0xf0] }
 0x102   :  { %1086 = vmatmul.bf16.gmra.mxu1 %v1745_v61 }
 0x103   :  { %v1421_v6 = vmax.f32 %v1313_v5, 0.0  ;;  %1220 = vmatmul.bf16.gmra.mxu2 %v1749_v2 }
 0x104   :  { %1354 = vmatmul.bf16.gmra.mxu3 %v1753_v3 }
 0x105   :  { %1471 = vst [vmem:[%s3105_s3 + $0x58] sm:$0xff] %v1421_v6 }
 0x106   :  { %v1181_v8 = vpop.f32.mrf.mxu2  ;;  %v915_v11 = vpop.f32.mrf.mxu0 }
 0x107   :  { %v1315_v9 = vpop.f32.mrf.mxu3  ;;  %v1182_v10 = vadd.f32 %v1181_v8, %v1048_v7  ;;  %v1049_v12 = vpop.f32.mrf.mxu1  ;;  %v916_v14 = vadd.f32 %v2487_v0, %v915_v11 }
 0x109   :  { %v1316_v13 = vadd.f32 %v1315_v9, %v1182_v10  ;;  %v1050_v24 = vadd.f32 %v1049_v12, %v916_v14  ;;  %v1788_v12 = vld [vmem:[%s3104_s0 + $0x220] sm:$0xf]  ;;  %v2110_v14 = vld [vmem:[%s3104_s0 + $0x224] sm:$0xf] }
 0x10b   :  { %v1422_v18 = vmax.f32 %v1316_v13, 0.0  ;;  %v2112_v13 = vld [vmem:[%s3104_s0 + $0x22c] sm:$0xf0] }
 0x10d   :  { %1472 = vst [vmem:[%s3105_s3 + $0x60] sm:$0xff] %v1422_v18  ;;  %v2113_v18 = vld [vmem:[%s3104_s0 + $0x234] sm:$0xf0] }
 0x10e   :  { %v1183_v25 = vpop.f32.mrf.mxu2  ;;  %v918_v30 = vpop.f32.mrf.mxu0 }
 0x10f   :  { %v1317_v26 = vpop.f32.mrf.mxu3  ;;  %v1184_v29 = vadd.f32 %v1183_v25, %v1050_v24  ;;  %v1052_v31 = vpop.f32.mrf.mxu1  ;;  %v919_v34 = vadd.f32 %v2487_v0, %v918_v30  ;;  %v1789_v24 = vor.u32 %v2112_v13, %v1788_v12  ;;  %v1793_v25 = vor.u32 %v2110_v14, %v1790_v16  ;;  %v1822_v13 = vld [vmem:[%s3104_s0 + $0x270] sm:$0xf0]  ;;  %v1828_v14 = vld [vmem:[%s3104_s0 + $0x268] sm:$0xf]  ;;  %v2119_v16 = vld [vmem:[%s3104_s0 + $0x26c] sm:$0xf] }
 0x110   :  { %v1801_v30 = vor.u32 %v2111_v19, %v1798_v20 }
 0x111   :  { %v1318_v35 = vadd.f32 %v1317_v26, %v1184_v29  ;;  %957 = vmatmul.bf16.gmra.mxu0 %v1757_v27  ;;  %v1053_v37 = vadd.f32 %v1052_v31, %v919_v34  ;;  %v1797_v29 = vor.u32 %v2113_v18, %v1796_v17  ;;  %v1830_v17 = vld [vmem:[%s3104_s0 + $0x278] sm:$0xf0] }
 0x112   :  { %1091 = vmatmul.bf16.gmra.mxu1 %v1761_v28 }
 0x113   :  { %v1423_v36 = vmax.f32 %v1318_v35, 0.0  ;;  %1225 = vmatmul.bf16.gmra.mxu2 %v1765_v32 }
 0x114   :  { %1359 = vmatmul.bf16.gmra.mxu3 %v1769_v33 }
 0x115   :  { %1473 = vst [vmem:[%s3105_s3 + $0x68] sm:$0xff] %v1423_v36 }
 0x116   :  { %v1186_v38 = vpop.f32.mrf.mxu2  ;;  %v920_v41 = vpop.f32.mrf.mxu0 }
 0x117   :  { %v1320_v39 = vpop.f32.mrf.mxu3  ;;  %v1187_v40 = vadd.f32 %v1186_v38, %v1053_v37  ;;  %v1054_v42 = vpop.f32.mrf.mxu1  ;;  %v921_v44 = vadd.f32 %v2487_v0, %v920_v41 }
 0x119   :  { %v1321_v43 = vadd.f32 %v1320_v39, %v1187_v40  ;;  %v1055_v54 = vadd.f32 %v1054_v42, %v921_v44  ;;  %v1804_v42 = vld [vmem:[%s3104_s0 + $0x240] sm:$0xf]  ;;  %v2114_v44 = vld [vmem:[%s3104_s0 + $0x244] sm:$0xf] }
 0x11b   :  { %v1424_v48 = vmax.f32 %v1321_v43, 0.0  ;;  %v2116_v43 = vld [vmem:[%s3104_s0 + $0x24c] sm:$0xf0] }
 0x11d   :  { %1474 = vst [vmem:[%s3105_s3 + $0x70] sm:$0xff] %v1424_v48  ;;  %v2117_v48 = vld [vmem:[%s3104_s0 + $0x254] sm:$0xf0] }
 0x11e   :  { %v1188_v55 = vpop.f32.mrf.mxu2  ;;  %v923_v60 = vpop.f32.mrf.mxu0 }
 0x11f   :  { %v1322_v56 = vpop.f32.mrf.mxu3  ;;  %v1189_v59 = vadd.f32 %v1188_v55, %v1055_v54  ;;  %v1057_v61 = vpop.f32.mrf.mxu1  ;;  %v924_v1 = vadd.f32 %v2487_v0, %v923_v60  ;;  %v1805_v54 = vor.u32 %v2116_v43, %v1804_v42  ;;  %v1809_v55 = vor.u32 %v2114_v44, %v1806_v46  ;;  %v1838_v43 = vld [vmem:[%s3104_s0 + $0x290] sm:$0xf0]  ;;  %v1844_v44 = vld [vmem:[%s3104_s0 + $0x288] sm:$0xf]  ;;  %v2123_v46 = vld [vmem:[%s3104_s0 + $0x28c] sm:$0xf] }
 0x120   :  { %v1817_v60 = vor.u32 %v2115_v49, %v1814_v50 }
 0x121   :  { %v1323_v2 = vadd.f32 %v1322_v56, %v1189_v59  ;;  %962 = vmatmul.bf16.gmra.mxu0 %v1773_v57  ;;  %v1058_v4 = vadd.f32 %v1057_v61, %v924_v1  ;;  %v1813_v59 = vor.u32 %v2117_v48, %v1812_v47  ;;  %v1846_v47 = vld [vmem:[%s3104_s0 + $0x298] sm:$0xf0] }
 0x122   :  { %1096 = vmatmul.bf16.gmra.mxu1 %v1777_v58 }
 0x123   :  { %v1425_v3 = vmax.f32 %v1323_v2, 0.0  ;;  %1230 = vmatmul.bf16.gmra.mxu2 %v1781_v62 }
 0x124   :  { %1364 = vmatmul.bf16.gmra.mxu3 %v1785_v63 }
 0x125   :  { %1475 = vst [vmem:[%s3105_s3 + $0x78] sm:$0xff] %v1425_v3 }
 0x126   :  { %v1191_v5 = vpop.f32.mrf.mxu2  ;;  %v925_v8 = vpop.f32.mrf.mxu0 }
 0x127   :  { %v1325_v6 = vpop.f32.mrf.mxu3  ;;  %v1192_v7 = vadd.f32 %v1191_v5, %v1058_v4  ;;  %v1059_v9 = vpop.f32.mrf.mxu1  ;;  %v926_v11 = vadd.f32 %v2487_v0, %v925_v8 }
 0x129   :  { %v1326_v10 = vadd.f32 %v1325_v6, %v1192_v7  ;;  %v1060_v21 = vadd.f32 %v1059_v9, %v926_v11  ;;  %v1820_v9 = vld [vmem:[%s3104_s0 + $0x260] sm:$0xf]  ;;  %v2118_v11 = vld [vmem:[%s3104_s0 + $0x264] sm:$0xf] }
 0x12b   :  { %v1426_v15 = vmax.f32 %v1326_v10, 0.0  ;;  %v2120_v10 = vld [vmem:[%s3104_s0 + $0x26c] sm:$0xf0] }
 0x12d   :  { %1476 = vst [vmem:[%s3105_s3 + $0x80] sm:$0xff] %v1426_v15  ;;  %v2121_v15 = vld [vmem:[%s3104_s0 + $0x274] sm:$0xf0] }
 0x12e   :  { %v1193_v22 = vpop.f32.mrf.mxu2  ;;  %v928_v27 = vpop.f32.mrf.mxu0 }
 0x12f   :  { %v1327_v23 = vpop.f32.mrf.mxu3  ;;  %v1194_v26 = vadd.f32 %v1193_v22, %v1060_v21  ;;  %v1062_v28 = vpop.f32.mrf.mxu1  ;;  %v929_v31 = vadd.f32 %v2487_v0, %v928_v27  ;;  %v1821_v21 = vor.u32 %v2120_v10, %v1820_v9  ;;  %v1825_v22 = vor.u32 %v2118_v11, %v1822_v13  ;;  %v1854_v10 = vld [vmem:[%s3104_s0 + $0x2b0] sm:$0xf0]  ;;  %v1860_v11 = vld [vmem:[%s3104_s0 + $0x2a8] sm:$0xf]  ;;  %v2127_v13 = vld [vmem:[%s3104_s0 + $0x2ac] sm:$0xf] }
 0x130   :  { %v1833_v27 = vor.u32 %v2119_v16, %v1830_v17 }
 0x131   :  { %v1328_v32 = vadd.f32 %v1327_v23, %v1194_v26  ;;  %967 = vmatmul.bf16.gmra.mxu0 %v1789_v24  ;;  %v1063_v34 = vadd.f32 %v1062_v28, %v929_v31  ;;  %v1829_v26 = vor.u32 %v2121_v15, %v1828_v14  ;;  %v1862_v14 = vld [vmem:[%s3104_s0 + $0x2b8] sm:$0xf0] }
 0x132   :  { %1101 = vmatmul.bf16.gmra.mxu1 %v1793_v25 }
 0x133   :  { %v1427_v33 = vmax.f32 %v1328_v32, 0.0  ;;  %1235 = vmatmul.bf16.gmra.mxu2 %v1797_v29 }
 0x134   :  { %1369 = vmatmul.bf16.gmra.mxu3 %v1801_v30 }
 0x135   :  { %1477 = vst [vmem:[%s3105_s3 + $0x88] sm:$0xff] %v1427_v33 }
 0x136   :  { %v1196_v35 = vpop.f32.mrf.mxu2  ;;  %v930_v38 = vpop.f32.mrf.mxu0 }
 0x137   :  { %v1330_v36 = vpop.f32.mrf.mxu3  ;;  %v1197_v37 = vadd.f32 %v1196_v35, %v1063_v34  ;;  %v1064_v39 = vpop.f32.mrf.mxu1  ;;  %v931_v41 = vadd.f32 %v2487_v0, %v930_v38 }
 0x139   :  { %v1331_v40 = vadd.f32 %v1330_v36, %v1197_v37  ;;  %v1065_v51 = vadd.f32 %v1064_v39, %v931_v41  ;;  %v1836_v39 = vld [vmem:[%s3104_s0 + $0x280] sm:$0xf]  ;;  %v2122_v41 = vld [vmem:[%s3104_s0 + $0x284] sm:$0xf] }
 0x13b   :  { %v1428_v45 = vmax.f32 %v1331_v40, 0.0  ;;  %v2124_v40 = vld [vmem:[%s3104_s0 + $0x28c] sm:$0xf0] }
 0x13d   :  { %1478 = vst [vmem:[%s3105_s3 + $0x90] sm:$0xff] %v1428_v45  ;;  %v2125_v45 = vld [vmem:[%s3104_s0 + $0x294] sm:$0xf0] }
 0x13e   :  { %v1198_v52 = vpop.f32.mrf.mxu2  ;;  %v933_v57 = vpop.f32.mrf.mxu0 }
 0x13f   :  { %v1332_v53 = vpop.f32.mrf.mxu3  ;;  %v1199_v56 = vadd.f32 %v1198_v52, %v1065_v51  ;;  %v1067_v58 = vpop.f32.mrf.mxu1  ;;  %v934_v61 = vadd.f32 %v2487_v0, %v933_v57  ;;  %v1837_v51 = vor.u32 %v2124_v40, %v1836_v39  ;;  %v1841_v52 = vor.u32 %v2122_v41, %v1838_v43  ;;  %v1870_v40 = vld [vmem:[%s3104_s0 + $0x2d0] sm:$0xf0]  ;;  %v2133_v41 = vld [vmem:[%s3104_s0 + $0x2d4] sm:$0xf0]  ;;  %v1878_v43 = vld [vmem:[%s3104_s0 + $0x2d8] sm:$0xf0] }
 0x140   :  { %v1849_v57 = vor.u32 %v2123_v46, %v1846_v47 }
 0x141   :  { %v1333_v62 = vadd.f32 %v1332_v53, %v1199_v56  ;;  %972 = vmatmul.bf16.gmra.mxu0 %v1805_v54  ;;  %v1068_v1 = vadd.f32 %v1067_v58, %v934_v61  ;;  %v1845_v56 = vor.u32 %v2125_v45, %v1844_v44 }
 0x142   :  { %1106 = vmatmul.bf16.gmra.mxu1 %v1809_v55 }
 0x143   :  { %v1429_v63 = vmax.f32 %v1333_v62, 0.0  ;;  %1240 = vmatmul.bf16.gmra.mxu2 %v1813_v59 }
 0x144   :  { %1374 = vmatmul.bf16.gmra.mxu3 %v1817_v60 }
 0x145   :  { %1479 = vst [vmem:[%s3105_s3 + $0x98] sm:$0xff] %v1429_v63 }
 0x146   :  { %v1201_v2 = vpop.f32.mrf.mxu2  ;;  %v935_v5 = vpop.f32.mrf.mxu0 }
 0x147   :  { %v1335_v3 = vpop.f32.mrf.mxu3  ;;  %v1202_v4 = vadd.f32 %v1201_v2, %v1068_v1  ;;  %v1069_v6 = vpop.f32.mrf.mxu1  ;;  %v936_v8 = vadd.f32 %v2487_v0, %v935_v5 }
 0x149   :  { %v1336_v7 = vadd.f32 %v1335_v3, %v1202_v4  ;;  %v1070_v18 = vadd.f32 %v1069_v6, %v936_v8  ;;  %v1852_v6 = vld [vmem:[%s3104_s0 + $0x2a0] sm:$0xf]  ;;  %v2126_v8 = vld [vmem:[%s3104_s0 + $0x2a4] sm:$0xf] }
 0x14b   :  { %v1430_v12 = vmax.f32 %v1336_v7, 0.0  ;;  %v2128_v7 = vld [vmem:[%s3104_s0 + $0x2ac] sm:$0xf0] }
 0x14d   :  { %1480 = vst [vmem:[%s3105_s3 + $0xa0] sm:$0xff] %v1430_v12  ;;  %v2129_v12 = vld [vmem:[%s3104_s0 + $0x2b4] sm:$0xf0] }
 0x14e   :  { %v1203_v19 = vpop.f32.mrf.mxu2  ;;  %v938_v24 = vpop.f32.mrf.mxu0 }
 0x14f   :  { %v1337_v20 = vpop.f32.mrf.mxu3  ;;  %v1204_v23 = vadd.f32 %v1203_v19, %v1070_v18  ;;  %v1072_v25 = vpop.f32.mrf.mxu1  ;;  %v939_v28 = vadd.f32 %v2487_v0, %v938_v24  ;;  %v1853_v18 = vor.u32 %v2128_v7, %v1852_v6  ;;  %v1857_v19 = vor.u32 %v2126_v8, %v1854_v10  ;;  %v1886_v7 = vld [vmem:[%s3104_s0 + $0x2f0] sm:$0xf0]  ;;  %v1892_v8 = vld [vmem:[%s3104_s0 + $0x2e8] sm:$0xf]  ;;  %v2135_v10 = vld [vmem:[%s3104_s0 + $0x2ec] sm:$0xf] }
 0x150   :  { %v1865_v24 = vor.u32 %v2127_v13, %v1862_v14 }
 0x151   :  { %v1338_v29 = vadd.f32 %v1337_v20, %v1204_v23  ;;  %977 = vmatmul.bf16.gmra.mxu0 %v1821_v21  ;;  %v1073_v31 = vadd.f32 %v1072_v25, %v939_v28  ;;  %v1861_v23 = vor.u32 %v2129_v12, %v1860_v11  ;;  %v1894_v11 = vld [vmem:[%s3104_s0 + $0x2f8] sm:$0xf0] }
 0x152   :  { %1111 = vmatmul.bf16.gmra.mxu1 %v1825_v22 }
 0x153   :  { %v1431_v30 = vmax.f32 %v1338_v29, 0.0  ;;  %1245 = vmatmul.bf16.gmra.mxu2 %v1829_v26 }
 0x154   :  { %1379 = vmatmul.bf16.gmra.mxu3 %v1833_v27 }
 0x155   :  { %1481 = vst [vmem:[%s3105_s3 + $0xa8] sm:$0xff] %v1431_v30 }
 0x156   :  { %v1206_v32 = vpop.f32.mrf.mxu2  ;;  %v940_v35 = vpop.f32.mrf.mxu0 }
 0x157   :  { %v1340_v33 = vpop.f32.mrf.mxu3  ;;  %v1207_v34 = vadd.f32 %v1206_v32, %v1073_v31  ;;  %v1074_v36 = vpop.f32.mrf.mxu1  ;;  %v941_v38 = vadd.f32 %v2487_v0, %v940_v35 }
 0x159   :  { %v1341_v37 = vadd.f32 %v1340_v33, %v1207_v34  ;;  %v1075_v48 = vadd.f32 %v1074_v36, %v941_v38  ;;  %v1868_v36 = vld [vmem:[%s3104_s0 + $0x2c0] sm:$0xf]  ;;  %v2130_v38 = vld [vmem:[%s3104_s0 + $0x2c4] sm:$0xf] }
 0x15b   :  { %v1432_v42 = vmax.f32 %v1341_v37, 0.0  ;;  %v2132_v37 = vld [vmem:[%s3104_s0 + $0x2cc] sm:$0xf0] }
 0x15c   :  { %v1869_v47 = vor.u32 %v2132_v37, %v1868_v36  ;;  %v1902_v37 = vld [vmem:[%s3104_s0 + $0x310] sm:$0xf0] }
 0x15d   :  { %1482 = vst [vmem:[%s3105_s3 + $0xb0] sm:$0xff] %v1432_v42  ;;  %v2131_v42 = vld [vmem:[%s3104_s0 + $0x2cc] sm:$0xf] }
 0x15e   :  { %v1208_v49 = vpop.f32.mrf.mxu2  ;;  %v943_v54 = vpop.f32.mrf.mxu0 }
 0x15f   :  { %v1342_v50 = vpop.f32.mrf.mxu3  ;;  %v1209_v53 = vadd.f32 %v1208_v49, %v1075_v48  ;;  %v1077_v55 = vpop.f32.mrf.mxu1  ;;  %v944_v58 = vadd.f32 %v2487_v0, %v943_v54  ;;  %v1873_v48 = vor.u32 %v2130_v38, %v1870_v40  ;;  %v2961_v54 = vld [vmem:[%s3103_s2] ss:$0 sm:$0xff]  ;;  %v1908_v38 = vld [vmem:[%s3104_s0 + $0x308] sm:$0xf]  ;;  %v2139_v40 = vld [vmem:[%s3104_s0 + $0x30c] sm:$0xf] }
 0x161   :  { %v1343_v59 = vadd.f32 %v1342_v50, %v1209_v53  ;;  %982 = vmatmul.bf16.gmra.mxu0 %v1837_v51  ;;  %v1078_v61 = vadd.f32 %v1077_v55, %v944_v58  ;;  %v1881_v53 = vor.u32 %v2131_v42, %v1878_v43 }
 0x162   :  { %1116 = vmatmul.bf16.gmra.mxu1 %v1841_v52 }
 0x163   :  { %v1433_v60 = vmax.f32 %v1343_v59, 0.0  ;;  %1250 = vmatmul.bf16.gmra.mxu2 %v1845_v56 }
 0x164   :  { %1384 = vmatmul.bf16.gmra.mxu3 %v1849_v57 }
 0x165   :  { %1483 = vst [vmem:[%s3105_s3 + $0xb8] sm:$0xff] %v1433_v60 }
 0x166   :  { %v1211_v62 = vpop.f32.mrf.mxu2  ;;  %v945_v2 = vpop.f32.mrf.mxu0 }
 0x167   :  { %v1345_v63 = vpop.f32.mrf.mxu3  ;;  %v1212_v1 = vadd.f32 %v1211_v62, %v1078_v61  ;;  %v1079_v3 = vpop.f32.mrf.mxu1  ;;  %v946_v5 = vadd.f32 %v2487_v0, %v945_v2 }
 0x169   :  { %v1346_v4 = vadd.f32 %v1345_v63, %v1212_v1  ;;  %v1080_v15 = vadd.f32 %v1079_v3, %v946_v5  ;;  %v1884_v3 = vld [vmem:[%s3104_s0 + $0x2e0] sm:$0xf]  ;;  %v2134_v5 = vld [vmem:[%s3104_s0 + $0x2e4] sm:$0xf] }
 0x16b   :  { %v1434_v9 = vmax.f32 %v1346_v4, 0.0  ;;  %v2136_v4 = vld [vmem:[%s3104_s0 + $0x2ec] sm:$0xf0] }
 0x16d   :  { %1484 = vst [vmem:[%s3105_s3 + $0xc0] sm:$0xff] %v1434_v9  ;;  %v2137_v9 = vld [vmem:[%s3104_s0 + $0x2f4] sm:$0xf0] }
 0x16e   :  { %v1213_v16 = vpop.f32.mrf.mxu2  ;;  %v948_v21 = vpop.f32.mrf.mxu0 }
 0x16f   :  { %v1347_v17 = vpop.f32.mrf.mxu3  ;;  %v1214_v20 = vadd.f32 %v1213_v16, %v1080_v15  ;;  %v1082_v22 = vpop.f32.mrf.mxu1  ;;  %v949_v25 = vadd.f32 %v2487_v0, %v948_v21  ;;  %v1885_v15 = vor.u32 %v2136_v4, %v1884_v3  ;;  %v1889_v16 = vor.u32 %v2134_v5, %v1886_v7 }
 0x170   :  { %v1897_v21 = vor.u32 %v2135_v10, %v1894_v11 }
 0x171   :  { %v1348_v26 = vadd.f32 %v1347_v17, %v1214_v20  ;;  %987 = vmatmul.bf16.gmra.mxu0 %v1853_v18  ;;  %v1083_v28 = vadd.f32 %v1082_v22, %v949_v25  ;;  %v1893_v20 = vor.u32 %v2137_v9, %v1892_v8 }
 0x172   :  { %1121 = vmatmul.bf16.gmra.mxu1 %v1857_v19 }
 0x173   :  { %v1435_v27 = vmax.f32 %v1348_v26, 0.0  ;;  %1255 = vmatmul.bf16.gmra.mxu2 %v1861_v23 }
 0x174   :  { %1389 = vmatmul.bf16.gmra.mxu3 %v1865_v24 }
 0x175   :  { %1485 = vst [vmem:[%s3105_s3 + $0xc8] sm:$0xff] %v1435_v27 }
 0x176   :  { %v1216_v29 = vpop.f32.mrf.mxu2  ;;  %v950_v32 = vpop.f32.mrf.mxu0 }
 0x177   :  { %v1350_v30 = vpop.f32.mrf.mxu3  ;;  %v1217_v31 = vadd.f32 %v1216_v29, %v1083_v28  ;;  %v1084_v33 = vpop.f32.mrf.mxu1  ;;  %v951_v35 = vadd.f32 %v2487_v0, %v950_v32  ;;  %v1876_v0 = vld [vmem:[%s3104_s0 + $0x2c8] sm:$0xf] }
 0x178   :  { %v1877_v52 = vor.u32 %v2133_v41, %v1876_v0  ;;  %v1910_v0 = vld [vmem:[%s3104_s0 + $0x318] sm:$0xf0] }
 0x179   :  { %v1351_v34 = vadd.f32 %v1350_v30, %v1217_v31  ;;  %v1085_v44 = vadd.f32 %v1084_v33, %v951_v35  ;;  %v1900_v33 = vld [vmem:[%s3104_s0 + $0x300] sm:$0xf]  ;;  %v2138_v35 = vld [vmem:[%s3104_s0 + $0x304] sm:$0xf] }
 0x17b   :  { %v1436_v39 = vmax.f32 %v1351_v34, 0.0  ;;  %v2140_v34 = vld [vmem:[%s3104_s0 + $0x30c] sm:$0xf0] }
 0x17d   :  { %1486 = vst [vmem:[%s3105_s3 + $0xd0] sm:$0xff] %v1436_v39  ;;  %v2141_v39 = vld [vmem:[%s3104_s0 + $0x314] sm:$0xf0] }
 0x17e   :  { %v1218_v45 = vpop.f32.mrf.mxu2  ;;  %v953_v50 = vpop.f32.mrf.mxu0 }
 0x17f   :  { %v1352_v46 = vpop.f32.mrf.mxu3  ;;  %v1219_v49 = vadd.f32 %v1218_v45, %v1085_v44  ;;  %v1087_v51 = vpop.f32.mrf.mxu1  ;;  %v954_v55 = vadd.f32 %v2961_v54, %v953_v50  ;;  %v1901_v44 = vor.u32 %v2140_v34, %v1900_v33  ;;  %v1905_v45 = vor.u32 %v2138_v35, %v1902_v37 }
 0x180   :  { %v1913_v50 = vor.u32 %v2139_v40, %v1910_v0 }
 0x181   :  { %v1353_v56 = vadd.f32 %v1352_v46, %v1219_v49  ;;  %992 = vmatmul.bf16.gmra.mxu0 %v1869_v47  ;;  %v1088_v58 = vadd.f32 %v1087_v51, %v954_v55  ;;  %v1909_v49 = vor.u32 %v2141_v39, %v1908_v38 }
 0x182   :  { %1126 = vmatmul.bf16.gmra.mxu1 %v1873_v48 }
 0x183   :  { %v1437_v57 = vmax.f32 %v1353_v56, 0.0  ;;  %1260 = vmatmul.bf16.gmra.mxu2 %v1877_v52 }
 0x184   :  { %1394 = vmatmul.bf16.gmra.mxu3 %v1881_v53 }
 0x185   :  { %1487 = vst [vmem:[%s3105_s3 + $0xd8] sm:$0xff] %v1437_v57 }
 0x186   :  { %v1221_v59 = vpop.f32.mrf.mxu2  ;;  %v955_v62 = vpop.f32.mrf.mxu0 }
 0x187   :  { %v1355_v60 = vpop.f32.mrf.mxu3  ;;  %v1222_v61 = vadd.f32 %v1221_v59, %v1088_v58  ;;  %v1089_v63 = vpop.f32.mrf.mxu1  ;;  %v956_v2 = vadd.f32 %v2961_v54, %v955_v62 }
 0x189   :  { %v1356_v1 = vadd.f32 %v1355_v60, %v1222_v61  ;;  %v1090_v12 = vadd.f32 %v1089_v63, %v956_v2 }
 0x18b   :  { %v1438_v6 = vmax.f32 %v1356_v1, 0.0 }
 0x18d   :  { %1488 = vst [vmem:[%s3105_s3 + $0xe0] sm:$0xff] %v1438_v6 }
 0x18e   :  { %v1223_v13 = vpop.f32.mrf.mxu2  ;;  %v958_v18 = vpop.f32.mrf.mxu0 }
 0x18f   :  { %v1357_v14 = vpop.f32.mrf.mxu3  ;;  %v1224_v17 = vadd.f32 %v1223_v13, %v1090_v12  ;;  %v1092_v19 = vpop.f32.mrf.mxu1  ;;  %v959_v22 = vadd.f32 %v2961_v54, %v958_v18 }
 0x191   :  { %v1358_v23 = vadd.f32 %v1357_v14, %v1224_v17  ;;  %997 = vmatmul.bf16.gmra.mxu0 %v1885_v15  ;;  %v1093_v25 = vadd.f32 %v1092_v19, %v959_v22 }
 0x192   :  { %1131 = vmatmul.bf16.gmra.mxu1 %v1889_v16 }
 0x193   :  { %v1439_v24 = vmax.f32 %v1358_v23, 0.0  ;;  %1265 = vmatmul.bf16.gmra.mxu2 %v1893_v20 }
 0x194   :  { %1399 = vmatmul.bf16.gmra.mxu3 %v1897_v21 }
 0x195   :  { %1489 = vst [vmem:[%s3105_s3 + $0xe8] sm:$0xff] %v1439_v24 }
 0x196   :  { %v1226_v26 = vpop.f32.mrf.mxu2  ;;  %v960_v29 = vpop.f32.mrf.mxu0 }
 0x197   :  { %v1360_v27 = vpop.f32.mrf.mxu3  ;;  %v1227_v28 = vadd.f32 %v1226_v26, %v1093_v25  ;;  %v1094_v30 = vpop.f32.mrf.mxu1  ;;  %v961_v32 = vadd.f32 %v2961_v54, %v960_v29 }
 0x199   :  { %v1361_v31 = vadd.f32 %v1360_v27, %v1227_v28  ;;  %v1095_v41 = vadd.f32 %v1094_v30, %v961_v32 }
 0x19b   :  { %v1440_v36 = vmax.f32 %v1361_v31, 0.0 }
 0x19d   :  { %1490 = vst [vmem:[%s3105_s3 + $0xf0] sm:$0xff] %v1440_v36 }
 0x19e   :  { %v1228_v42 = vpop.f32.mrf.mxu2  ;;  %v963_v47 = vpop.f32.mrf.mxu0 }
 0x19f   :  { %v1362_v43 = vpop.f32.mrf.mxu3  ;;  %v1229_v46 = vadd.f32 %v1228_v42, %v1095_v41  ;;  %v1097_v48 = vpop.f32.mrf.mxu1  ;;  %v964_v51 = vadd.f32 %v2961_v54, %v963_v47 }
 0x1a1   :  { %v1363_v52 = vadd.f32 %v1362_v43, %v1229_v46  ;;  %1002 = vmatmul.bf16.gmra.mxu0 %v1901_v44  ;;  %v1098_v55 = vadd.f32 %v1097_v48, %v964_v51 }
 0x1a2   :  { %1136 = vmatmul.bf16.gmra.mxu1 %v1905_v45 }
 0x1a3   :  { %v1441_v53 = vmax.f32 %v1363_v52, 0.0  ;;  %1270 = vmatmul.bf16.gmra.mxu2 %v1909_v49 }
 0x1a4   :  { %1404 = vmatmul.bf16.gmra.mxu3 %v1913_v50 }
 0x1a5   :  { %1491 = vst [vmem:[%s3105_s3 + $0xf8] sm:$0xff] %v1441_v53 }
 0x1a6   :  { %v1231_v56 = vpop.f32.mrf.mxu2  ;;  %v965_v59 = vpop.f32.mrf.mxu0 }
 0x1a7   :  { %v1365_v57 = vpop.f32.mrf.mxu3  ;;  %v1232_v58 = vadd.f32 %v1231_v56, %v1098_v55  ;;  %v1099_v60 = vpop.f32.mrf.mxu1  ;;  %v966_v62 = vadd.f32 %v2961_v54, %v965_v59 }
 0x1a9   :  { %v1366_v61 = vadd.f32 %v1365_v57, %v1232_v58  ;;  %v1100_v1 = vadd.f32 %v1099_v60, %v966_v62 }
 0x1ab   :  { %v1442_v63 = vmax.f32 %v1366_v61, 0.0 }
 0x1ad   :  { %1492 = vst [vmem:[%s3105_s3 + $0x100] sm:$0xff] %v1442_v63 }
 0x1ae   :  { %v1233_v2 = vpop.f32.mrf.mxu2  ;;  %v968_v5 = vpop.f32.mrf.mxu0 }
 0x1af   :  { %v1367_v3 = vpop.f32.mrf.mxu3  ;;  %v1234_v4 = vadd.f32 %v1233_v2, %v1100_v1  ;;  %v1102_v6 = vpop.f32.mrf.mxu1  ;;  %v969_v7 = vadd.f32 %v2961_v54, %v968_v5 }
 0x1b1   :  { %v1368_v8 = vadd.f32 %v1367_v3, %v1234_v4  ;;  %v1103_v10 = vadd.f32 %v1102_v6, %v969_v7 }
 0x1b3   :  { %v1443_v9 = vmax.f32 %v1368_v8, 0.0 }
 0x1b5   :  { %1493 = vst [vmem:[%s3105_s3 + $0x108] sm:$0xff] %v1443_v9 }
 0x1b6   :  { %v1236_v11 = vpop.f32.mrf.mxu2  ;;  %v970_v14 = vpop.f32.mrf.mxu0 }
 0x1b7   :  { %v1370_v12 = vpop.f32.mrf.mxu3  ;;  %v1237_v13 = vadd.f32 %v1236_v11, %v1103_v10  ;;  %v1104_v15 = vpop.f32.mrf.mxu1  ;;  %v971_v17 = vadd.f32 %v2961_v54, %v970_v14 }
 0x1b9   :  { %v1371_v16 = vadd.f32 %v1370_v12, %v1237_v13  ;;  %v1105_v19 = vadd.f32 %v1104_v15, %v971_v17 }
 0x1bb   :  { %v1444_v18 = vmax.f32 %v1371_v16, 0.0 }
 0x1bd   :  { %1494 = vst [vmem:[%s3105_s3 + $0x110] sm:$0xff] %v1444_v18 }
 0x1be   :  { %v1238_v20 = vpop.f32.mrf.mxu2  ;;  %v973_v23 = vpop.f32.mrf.mxu0 }
 0x1bf   :  { %v1372_v21 = vpop.f32.mrf.mxu3  ;;  %v1239_v22 = vadd.f32 %v1238_v20, %v1105_v19  ;;  %v1107_v24 = vpop.f32.mrf.mxu1  ;;  %v974_v25 = vadd.f32 %v2961_v54, %v973_v23 }
 0x1c1   :  { %v1373_v26 = vadd.f32 %v1372_v21, %v1239_v22  ;;  %v1108_v28 = vadd.f32 %v1107_v24, %v974_v25 }
 0x1c3   :  { %v1445_v27 = vmax.f32 %v1373_v26, 0.0 }
 0x1c5   :  { %1495 = vst [vmem:[%s3105_s3 + $0x118] sm:$0xff] %v1445_v27 }
 0x1c6   :  { %v1241_v29 = vpop.f32.mrf.mxu2  ;;  %v975_v32 = vpop.f32.mrf.mxu0 }
 0x1c7   :  { %v1375_v30 = vpop.f32.mrf.mxu3  ;;  %v1242_v31 = vadd.f32 %v1241_v29, %v1108_v28  ;;  %v1109_v33 = vpop.f32.mrf.mxu1  ;;  %v976_v35 = vadd.f32 %v2961_v54, %v975_v32 }
 0x1c9   :  { %v1376_v34 = vadd.f32 %v1375_v30, %v1242_v31  ;;  %v1110_v37 = vadd.f32 %v1109_v33, %v976_v35 }
 0x1cb   :  { %v1446_v36 = vmax.f32 %v1376_v34, 0.0 }
 0x1cd   :  { %1496 = vst [vmem:[%s3105_s3 + $0x120] sm:$0xff] %v1446_v36 }
 0x1ce   :  { %v1243_v38 = vpop.f32.mrf.mxu2  ;;  %v978_v0 = vpop.f32.mrf.mxu0 }
 0x1cf   :  { %v1377_v39 = vpop.f32.mrf.mxu3  ;;  %v1244_v40 = vadd.f32 %v1243_v38, %v1110_v37  ;;  %v1112_v41 = vpop.f32.mrf.mxu1  ;;  %v979_v42 = vadd.f32 %v2961_v54, %v978_v0 }
 0x1d1   :  { %v1378_v43 = vadd.f32 %v1377_v39, %v1244_v40  ;;  %v1113_v45 = vadd.f32 %v1112_v41, %v979_v42 }
 0x1d3   :  { %v1447_v44 = vmax.f32 %v1378_v43, 0.0 }
 0x1d5   :  { %1497 = vst [vmem:[%s3105_s3 + $0x128] sm:$0xff] %v1447_v44 }
 0x1d6   :  { %v1246_v46 = vpop.f32.mrf.mxu2  ;;  %v980_v49 = vpop.f32.mrf.mxu0 }
 0x1d7   :  { %v1380_v47 = vpop.f32.mrf.mxu3  ;;  %v1247_v48 = vadd.f32 %v1246_v46, %v1113_v45  ;;  %v1114_v50 = vpop.f32.mrf.mxu1  ;;  %v981_v52 = vadd.f32 %v2961_v54, %v980_v49 }
 0x1d9   :  { %v1381_v51 = vadd.f32 %v1380_v47, %v1247_v48  ;;  %v1115_v55 = vadd.f32 %v1114_v50, %v981_v52 }
 0x1db   :  { %v1448_v53 = vmax.f32 %v1381_v51, 0.0 }
 0x1dd   :  { %1498 = vst [vmem:[%s3105_s3 + $0x130] sm:$0xff] %v1448_v53 }
 0x1de   :  { %v1248_v56 = vpop.f32.mrf.mxu2  ;;  %v983_v59 = vpop.f32.mrf.mxu0 }
 0x1df   :  { %v1382_v57 = vpop.f32.mrf.mxu3  ;;  %v1249_v58 = vadd.f32 %v1248_v56, %v1115_v55  ;;  %v1117_v60 = vpop.f32.mrf.mxu1  ;;  %v984_v61 = vadd.f32 %v2961_v54, %v983_v59 }
 0x1e1   :  { %v1383_v62 = vadd.f32 %v1382_v57, %v1249_v58  ;;  %v1118_v1 = vadd.f32 %v1117_v60, %v984_v61 }
 0x1e3   :  { %v1449_v63 = vmax.f32 %v1383_v62, 0.0 }
 0x1e5   :  { %1499 = vst [vmem:[%s3105_s3 + $0x138] sm:$0xff] %v1449_v63 }
 0x1e6   :  { %v1251_v2 = vpop.f32.mrf.mxu2  ;;  %v985_v5 = vpop.f32.mrf.mxu0 }
 0x1e7   :  { %v1385_v3 = vpop.f32.mrf.mxu3  ;;  %v1252_v4 = vadd.f32 %v1251_v2, %v1118_v1  ;;  %v1119_v6 = vpop.f32.mrf.mxu1  ;;  %v986_v8 = vadd.f32 %v2961_v54, %v985_v5 }
 0x1e9   :  { %v1386_v7 = vadd.f32 %v1385_v3, %v1252_v4  ;;  %v1120_v10 = vadd.f32 %v1119_v6, %v986_v8 }
 0x1eb   :  { %v1450_v9 = vmax.f32 %v1386_v7, 0.0 }
 0x1ed   :  { %1500 = vst [vmem:[%s3105_s3 + $0x140] sm:$0xff] %v1450_v9 }
 0x1ee   :  { %v1253_v11 = vpop.f32.mrf.mxu2  ;;  %v988_v14 = vpop.f32.mrf.mxu0 }
 0x1ef   :  { %v1387_v12 = vpop.f32.mrf.mxu3  ;;  %v1254_v13 = vadd.f32 %v1253_v11, %v1120_v10  ;;  %v1122_v15 = vpop.f32.mrf.mxu1  ;;  %v989_v16 = vadd.f32 %v2961_v54, %v988_v14 }
 0x1f1   :  { %v1388_v17 = vadd.f32 %v1387_v12, %v1254_v13  ;;  %v1123_v19 = vadd.f32 %v1122_v15, %v989_v16 }
 0x1f3   :  { %v1451_v18 = vmax.f32 %v1388_v17, 0.0 }
 0x1f5   :  { %1501 = vst [vmem:[%s3105_s3 + $0x148] sm:$0xff] %v1451_v18 }
 0x1f6   :  { %v1256_v20 = vpop.f32.mrf.mxu2  ;;  %v990_v23 = vpop.f32.mrf.mxu0 }
 0x1f7   :  { %v1390_v21 = vpop.f32.mrf.mxu3  ;;  %v1257_v22 = vadd.f32 %v1256_v20, %v1123_v19  ;;  %v1124_v24 = vpop.f32.mrf.mxu1  ;;  %v991_v26 = vadd.f32 %v2961_v54, %v990_v23 }
 0x1f9   :  { %v1391_v25 = vadd.f32 %v1390_v21, %v1257_v22  ;;  %v1125_v28 = vadd.f32 %v1124_v24, %v991_v26 }
 0x1fb   :  { %v1452_v27 = vmax.f32 %v1391_v25, 0.0 }
 0x1fd   :  { %1502 = vst [vmem:[%s3105_s3 + $0x150] sm:$0xff] %v1452_v27 }
 0x1fe   :  { %v1258_v29 = vpop.f32.mrf.mxu2  ;;  %v993_v32 = vpop.f32.mrf.mxu0 }
 0x1ff   :  { %v1392_v30 = vpop.f32.mrf.mxu3  ;;  %v1259_v31 = vadd.f32 %v1258_v29, %v1125_v28  ;;  %v1127_v33 = vpop.f32.mrf.mxu1  ;;  %v994_v34 = vadd.f32 %v2961_v54, %v993_v32 }
 0x201   :  { %v1393_v35 = vadd.f32 %v1392_v30, %v1259_v31  ;;  %v1128_v37 = vadd.f32 %v1127_v33, %v994_v34 }
 0x203   :  { %v1453_v36 = vmax.f32 %v1393_v35, 0.0 }
 0x205   :  { %1503 = vst [vmem:[%s3105_s3 + $0x158] sm:$0xff] %v1453_v36 }
 0x206   :  { %v1261_v38 = vpop.f32.mrf.mxu2  ;;  %v995_v0 = vpop.f32.mrf.mxu0 }
 0x207   :  { %v1395_v39 = vpop.f32.mrf.mxu3  ;;  %v1262_v40 = vadd.f32 %v1261_v38, %v1128_v37  ;;  %v1129_v41 = vpop.f32.mrf.mxu1  ;;  %v996_v43 = vadd.f32 %v2961_v54, %v995_v0 }
 0x209   :  { %v1396_v42 = vadd.f32 %v1395_v39, %v1262_v40  ;;  %v1130_v45 = vadd.f32 %v1129_v41, %v996_v43 }
 0x20b   :  { %v1454_v44 = vmax.f32 %v1396_v42, 0.0 }
 0x20d   :  { %1504 = vst [vmem:[%s3105_s3 + $0x160] sm:$0xff] %v1454_v44 }
 0x20e   :  { %v1263_v46 = vpop.f32.mrf.mxu2  ;;  %v998_v49 = vpop.f32.mrf.mxu0 }
 0x20f   :  { %v1397_v47 = vpop.f32.mrf.mxu3  ;;  %v1264_v48 = vadd.f32 %v1263_v46, %v1130_v45  ;;  %v1132_v50 = vpop.f32.mrf.mxu1  ;;  %v999_v51 = vadd.f32 %v2961_v54, %v998_v49 }
 0x211   :  { %v1398_v52 = vadd.f32 %v1397_v47, %v1264_v48  ;;  %v1133_v55 = vadd.f32 %v1132_v50, %v999_v51 }
 0x213   :  { %v1455_v53 = vmax.f32 %v1398_v52, 0.0 }
 0x215   :  { %1505 = vst [vmem:[%s3105_s3 + $0x168] sm:$0xff] %v1455_v53 }
 0x216   :  { %v1266_v56 = vpop.f32.mrf.mxu2  ;;  %v1000_v59 = vpop.f32.mrf.mxu0 }
 0x217   :  { %v1400_v57 = vpop.f32.mrf.mxu3  ;;  %v1267_v58 = vadd.f32 %v1266_v56, %v1133_v55  ;;  %v1134_v60 = vpop.f32.mrf.mxu1  ;;  %v1001_v62 = vadd.f32 %v2961_v54, %v1000_v59 }
 0x219   :  { %v1401_v61 = vadd.f32 %v1400_v57, %v1267_v58  ;;  %v1135_v1 = vadd.f32 %v1134_v60, %v1001_v62 }
 0x21b   :  { %v1456_v63 = vmax.f32 %v1401_v61, 0.0 }
 0x21d   :  { %1506 = vst [vmem:[%s3105_s3 + $0x170] sm:$0xff] %v1456_v63 }
 0x21e   :  { %v1268_v2 = vpop.f32.mrf.mxu2  ;;  %v1003_v5 = vpop.f32.mrf.mxu0 }
 0x21f   :  { %v1402_v3 = vpop.f32.mrf.mxu3  ;;  %v1269_v4 = vadd.f32 %v1268_v2, %v1135_v1  ;;  %v1004_v6 = vadd.f32 %v2961_v54, %v1003_v5  ;;  %v1137_v8 = vpop.f32.mrf.mxu1 }
 0x221   :  { %v1403_v7 = vadd.f32 %v1402_v3, %v1269_v4  ;;  %v1138_v10 = vadd.f32 %v1137_v8, %v1004_v6 }
 0x223   :  { %v1457_v9 = vmax.f32 %v1403_v7, 0.0 }
 0x225   :  { %1507 = vst [vmem:[%s3105_s3 + $0x178] sm:$0xff] %v1457_v9 }
 0x226   :  { %v1271_v11 = vpop.f32.mrf.mxu2  ;;  %v1005_v14 = vpop.f32.mrf.mxu0 }
 0x227   :  { %v1405_v12 = vpop.f32.mrf.mxu3  ;;  %v1272_v13 = vadd.f32 %v1271_v11, %v1138_v10  ;;  %v1006_v16 = vadd.f32 %v2961_v54, %v1005_v14  ;;  %v1139_v18 = vpop.f32.mrf.mxu1 }
 0x229   :  { %v1406_v15 = vadd.f32 %v1405_v12, %v1272_v13  ;;  %v1140_v19 = vadd.f32 %v1139_v18, %v1006_v16 }
 0x22b   :  { %v1458_v17 = vmax.f32 %v1406_v15, 0.0 }
 0x22d   :  { %1508 = vst [vmem:[%s3105_s3 + $0x180] sm:$0xff] %v1458_v17 }
 0x22e   :  { %v1273_v20 = vpop.f32.mrf.mxu2 }
 0x22f   :  { %v1274_v21 = vadd.f32 %v1273_v20, %v1140_v19  ;;  %v1407_v22 = vpop.f32.mrf.mxu3 }
 0x231   :  { %v1408_v23 = vadd.f32 %v1407_v22, %v1274_v21 }
 0x233   :  { %v1459_v24 = vmax.f32 %v1408_v23, 0.0 }
 0x235   :  { %1509 = vst [vmem:[%s3105_s3 + $0x188] sm:$0xff] %v1459_v24 }

// kernel: _lambda_.12
= control target key start
LH: loop header
LB: loop body
LE: loop exit
PB: predicated region body
PF: predicated region fallthrough
CT: control target
= control target key end

     0   :  { %s2114_s1 = inlined_call_operand.vmem [shape: bf16[1024,128], index: 1, kind: input, shape index: {}]   ;;  %s2115_s2 = inlined_call_operand.vmem [shape: f32[1,128], index: 2, kind: input, shape index: {}]   ;;  %s2116_s0 = inlined_call_operand.vmem [shape: bf16[80,1024], index: 0, kind: input, shape index: {}]   ;;  %s2117_s3 = inlined_call_operand.vmem [shape: f32[80,128], index: 3, kind: output, shape index: {}]  }
   0x1   :  { %v1529_v0 = vld [vmem:[%s2114_s1 + $0x38] sm:$0xff]  ;;  %v1528_v4 = vld [vmem:[%s2114_s1 + $0x30] sm:$0xff]  ;;  %v1527_v8 = vld [vmem:[%s2114_s1 + $0x28] sm:$0xff] }
   0x2   :  { %v1537_v1 = vld [vmem:[%s2114_s1 + $0x78] sm:$0xff]  ;;  %770 = vmatpush.bf16.msra.mxu0 %v1529_v0  ;;  %v1536_v5 = vld [vmem:[%s2114_s1 + $0x70] sm:$0xff]  ;;  %v1535_v9 = vld [vmem:[%s2114_s1 + $0x68] sm:$0xff] }
   0x3   :  { %v1545_v2 = vld [vmem:[%s2114_s1 + $0xb8] sm:$0xff]  ;;  %804 = vmatpush.bf16.msra.mxu1 %v1537_v1  ;;  %v1544_v6 = vld [vmem:[%s2114_s1 + $0xb0] sm:$0xff]  ;;  %v1543_v10 = vld [vmem:[%s2114_s1 + $0xa8] sm:$0xff] }
   0x4   :  { %v1553_v3 = vld [vmem:[%s2114_s1 + $0xf8] sm:$0xff]  ;;  %838 = vmatpush.bf16.msra.mxu2 %v1545_v2  ;;  %v1552_v7 = vld [vmem:[%s2114_s1 + $0xf0] sm:$0xff]  ;;  %v1551_v11 = vld [vmem:[%s2114_s1 + $0xe8] sm:$0xff] }
   0x5   :  { %872 = vmatpush.bf16.msra.mxu3 %v1553_v3  ;;  %v1526_v12 = vld [vmem:[%s2114_s1 + $0x20] sm:$0xff]  ;;  %v1525_v16 = vld [vmem:[%s2114_s1 + $0x18] sm:$0xff]  ;;  %v1524_v20 = vld [vmem:[%s2114_s1 + $0x10] sm:$0xff] }
   0x6   :  { %771 = vmatpush.bf16.msra.mxu0 %v1528_v4  ;;  %v1534_v13 = vld [vmem:[%s2114_s1 + $0x60] sm:$0xff]  ;;  %v1533_v17 = vld [vmem:[%s2114_s1 + $0x58] sm:$0xff]  ;;  %v1532_v21 = vld [vmem:[%s2114_s1 + $0x50] sm:$0xff] }
   0x7   :  { %805 = vmatpush.bf16.msra.mxu1 %v1536_v5  ;;  %v1542_v14 = vld [vmem:[%s2114_s1 + $0xa0] sm:$0xff]  ;;  %v1541_v18 = vld [vmem:[%s2114_s1 + $0x98] sm:$0xff]  ;;  %v1540_v22 = vld [vmem:[%s2114_s1 + $0x90] sm:$0xff] }
   0x8   :  { %839 = vmatpush.bf16.msra.mxu2 %v1544_v6  ;;  %v1550_v15 = vld [vmem:[%s2114_s1 + $0xe0] sm:$0xff]  ;;  %v1549_v19 = vld [vmem:[%s2114_s1 + $0xd8] sm:$0xff]  ;;  %v1548_v23 = vld [vmem:[%s2114_s1 + $0xd0] sm:$0xff] }
   0x9   :  { %873 = vmatpush.bf16.msra.mxu3 %v1552_v7  ;;  %v1523_v24 = vld [vmem:[%s2114_s1 + $0x8] sm:$0xff]  ;;  %v1522_v28 = vld [vmem:[%s2114_s1] sm:$0xff]  ;;  %v1577_v40 = vld [vmem:[%s2114_s1 + $0x1b8] sm:$0xff] }
   0xa   :  { %772 = vmatpush.bf16.msra.mxu0 %v1527_v8  ;;  %v1531_v25 = vld [vmem:[%s2114_s1 + $0x48] sm:$0xff]  ;;  %v1530_v29 = vld [vmem:[%s2114_s1 + $0x40] sm:$0xff]  ;;  %v1561_v41 = vld [vmem:[%s2114_s1 + $0x138] sm:$0xff] }
   0xb   :  { %806 = vmatpush.bf16.msra.mxu1 %v1535_v9  ;;  %v1539_v26 = vld [vmem:[%s2114_s1 + $0x88] sm:$0xff]  ;;  %v1538_v30 = vld [vmem:[%s2114_s1 + $0x80] sm:$0xff]  ;;  %v1585_v46 = vld [vmem:[%s2114_s1 + $0x1f8] sm:$0xff] }
   0xc   :  { %840 = vmatpush.bf16.msra.mxu2 %v1543_v10  ;;  %v1547_v27 = vld [vmem:[%s2114_s1 + $0xc8] sm:$0xff]  ;;  %v1546_v31 = vld [vmem:[%s2114_s1 + $0xc0] sm:$0xff]  ;;  %v1569_v47 = vld [vmem:[%s2114_s1 + $0x178] sm:$0xff] }
   0xd   :  { %874 = vmatpush.bf16.msra.mxu3 %v1551_v11  ;;  %v1068_v32 = vld [vmem:[%s2116_s0] sm:$0xf]  ;;  %v1482_v34 = vld [vmem:[%s2116_s0 + $0x4] sm:$0xf]  ;;  %v1076_v36 = vld [vmem:[%s2116_s0 + $0x8] sm:$0xf] }
   0xe   :  { %773 = vmatpush.bf16.msra.mxu0 %v1526_v12  ;;  %v1486_v33 = vld [vmem:[%s2116_s0 + $0x1c] sm:$0xf0]  ;;  %v1070_v35 = vld [vmem:[%s2116_s0 + $0x20] sm:$0xf0]  ;;  %v1487_v37 = vld [vmem:[%s2116_s0 + $0x24] sm:$0xf0] }
   0xf   :  { %807 = vmatpush.bf16.msra.mxu1 %v1534_v13  ;;  %v1483_v38 = vld [vmem:[%s2116_s0 + $0xc] sm:$0xf]  ;;  %v1069_v42 = vor.u32 %v1486_v33, %v1068_v32  ;;  %v1073_v43 = vor.u32 %v1482_v34, %v1070_v35  ;;  %v1077_v44 = vor.u32 %v1487_v37, %v1076_v36  ;;  %v1576_v48 = vld [vmem:[%s2114_s1 + $0x1b0] sm:$0xff]  ;;  %v1100_v56 = vld [vmem:[%s2116_s0 + $0x40] sm:$0xf] }
  0x10   :  { %841 = vmatpush.bf16.msra.mxu2 %v1542_v14  ;;  %v1078_v39 = vld [vmem:[%s2116_s0 + $0x28] sm:$0xf0]  ;;  %v1560_v49 = vld [vmem:[%s2114_s1 + $0x130] sm:$0xff]  ;;  %v1574_v57 = vld [vmem:[%s2114_s1 + $0x1a0] sm:$0xff] }
  0x11   :  { %875 = vmatpush.bf16.msra.mxu3 %v1550_v15  ;;  %v1081_v45 = vor.u32 %v1483_v38, %v1078_v39  ;;  %v1584_v50 = vld [vmem:[%s2114_s1 + $0x1f0] sm:$0xff]  ;;  %v1575_v52 = vld [vmem:[%s2114_s1 + $0x1a8] sm:$0xff]  ;;  %v1558_v58 = vld [vmem:[%s2114_s1 + $0x120] sm:$0xff] }
  0x12   :  { %774 = vmatpush.bf16.msra.mxu0 %v1525_v16  ;;  %v1568_v51 = vld [vmem:[%s2114_s1 + $0x170] sm:$0xff]  ;;  %v1559_v53 = vld [vmem:[%s2114_s1 + $0x128] sm:$0xff]  ;;  %v1494_v59 = vld [vmem:[%s2116_s0 + $0x5c] sm:$0xf0] }
  0x13   :  { %808 = vmatpush.bf16.msra.mxu1 %v1533_v17  ;;  %v1583_v54 = vld [vmem:[%s2114_s1 + $0x1e8] sm:$0xff]  ;;  %v1490_v60 = vld [vmem:[%s2116_s0 + $0x44] sm:$0xf]  ;;  %v1573_v4 = vld [vmem:[%s2114_s1 + $0x198] sm:$0xff]  ;;  %v1101_v6 = vor.u32 %v1494_v59, %v1100_v56 }
  0x14   :  { %842 = vmatpush.bf16.msra.mxu2 %v1541_v18  ;;  %v1567_v55 = vld [vmem:[%s2114_s1 + $0x168] sm:$0xff]  ;;  %v1102_v61 = vld [vmem:[%s2116_s0 + $0x60] sm:$0xf0]  ;;  %v1557_v5 = vld [vmem:[%s2114_s1 + $0x118] sm:$0xff] }
  0x15   :  { %876 = vmatpush.bf16.msra.mxu3 %v1549_v19  ;;  %v1108_v62 = vld [vmem:[%s2116_s0 + $0x48] sm:$0xf]  ;;  %v1491_v0 = vld [vmem:[%s2116_s0 + $0x4c] sm:$0xf]  ;;  %v1582_v2 = vld [vmem:[%s2114_s1 + $0x1e0] sm:$0xff]  ;;  %v1105_v7 = vor.u32 %v1490_v60, %v1102_v61 }
  0x16   :  { %775 = vmatpush.bf16.msra.mxu0 %v1524_v20  ;;  %v1495_v63 = vld [vmem:[%s2116_s0 + $0x64] sm:$0xf0]  ;;  %v1110_v1 = vld [vmem:[%s2116_s0 + $0x68] sm:$0xf0]  ;;  %v1566_v3 = vld [vmem:[%s2114_s1 + $0x160] sm:$0xff] }
  0x17   :  { %809 = vmatpush.bf16.msra.mxu1 %v1532_v21  ;;  %v1109_v8 = vor.u32 %v1495_v63, %v1108_v62  ;;  %v1113_v9 = vor.u32 %v1491_v0, %v1110_v1  ;;  %v1581_v10 = vld [vmem:[%s2114_s1 + $0x1d8] sm:$0xff]  ;;  %v1572_v12 = vld [vmem:[%s2114_s1 + $0x190] sm:$0xff]  ;;  %v1571_v16 = vld [vmem:[%s2114_s1 + $0x188] sm:$0xff] }
  0x18   :  { %843 = vmatpush.bf16.msra.mxu2 %v1540_v22  ;;  %v1565_v11 = vld [vmem:[%s2114_s1 + $0x158] sm:$0xff]  ;;  %v1556_v13 = vld [vmem:[%s2114_s1 + $0x110] sm:$0xff]  ;;  %v1555_v17 = vld [vmem:[%s2114_s1 + $0x108] sm:$0xff] }
  0x19   :  { %877 = vmatpush.bf16.msra.mxu3 %v1548_v23  ;;  %v1580_v14 = vld [vmem:[%s2114_s1 + $0x1d0] sm:$0xff]  ;;  %v1579_v18 = vld [vmem:[%s2114_s1 + $0x1c8] sm:$0xff]  ;;  %v1132_v19 = vld [vmem:[%s2116_s0 + $0x80] sm:$0xf] }
  0x1a   :  { %776 = vmatpush.bf16.msra.mxu0 %v1523_v24  ;;  %v1564_v15 = vld [vmem:[%s2114_s1 + $0x150] sm:$0xff]  ;;  %v1502_v20 = vld [vmem:[%s2116_s0 + $0x9c] sm:$0xf0]  ;;  %v1498_v21 = vld [vmem:[%s2116_s0 + $0x84] sm:$0xf] }
  0x1b   :  { %810 = vmatpush.bf16.msra.mxu1 %v1531_v25  ;;  %v1134_v22 = vld [vmem:[%s2116_s0 + $0xa0] sm:$0xf0]  ;;  %v1140_v23 = vld [vmem:[%s2116_s0 + $0x88] sm:$0xf]  ;;  %v1499_v25 = vld [vmem:[%s2116_s0 + $0x8c] sm:$0xf] }
  0x1c   :  { %844 = vmatpush.bf16.msra.mxu2 %v1539_v26  ;;  %v1503_v24 = vld [vmem:[%s2116_s0 + $0xa4] sm:$0xf0]  ;;  %v1142_v26 = vld [vmem:[%s2116_s0 + $0xa8] sm:$0xf0]  ;;  %v1570_v32 = vld [vmem:[%s2114_s1 + $0x180] sm:$0xff] }
  0x1d   :  { %878 = vmatpush.bf16.msra.mxu3 %v1547_v27  ;;  %v1133_v27 = vor.u32 %v1502_v20, %v1132_v19  ;;  %v1554_v33 = vld [vmem:[%s2114_s1 + $0x100] sm:$0xff]  ;;  %v1084_v60 = vld [vmem:[%s2116_s0 + $0x10] sm:$0xf]  ;;  %v1484_v62 = vld [vmem:[%s2116_s0 + $0x14] sm:$0xf] }
  0x1e   :  { %777 = vmatpush.bf16.msra.mxu0 %v1522_v28  ;;  %v1137_v28 = vor.u32 %v1498_v21, %v1134_v22  ;;  %v1578_v34 = vld [vmem:[%s2114_s1 + $0x1c0] sm:$0xff]  ;;  %v1488_v61 = vld [vmem:[%s2116_s0 + $0x2c] sm:$0xf0]  ;;  %v1086_v63 = vld [vmem:[%s2116_s0 + $0x30] sm:$0xf0] }
  0x1f   :  { %811 = vmatpush.bf16.msra.mxu1 %v1530_v29  ;;  %v1141_v29 = vor.u32 %v1503_v24, %v1140_v23  ;;  %v1562_v35 = vld [vmem:[%s2114_s1 + $0x140] sm:$0xff]  ;;  %v1092_v0 = vld [vmem:[%s2116_s0 + $0x18] sm:$0xf]  ;;  %v1148_v20 = vld [vmem:[%s2116_s0 + $0x90] sm:$0xf] }
  0x20   :  { %845 = vmatpush.bf16.msra.mxu2 %v1538_v30  ;;  %v1145_v30 = vor.u32 %v1499_v25, %v1142_v26  ;;  %v1164_v36 = vld [vmem:[%s2116_s0 + $0xc0] sm:$0xf]  ;;  %v1506_v38 = vld [vmem:[%s2116_s0 + $0xc4] sm:$0xf]  ;;  %v1489_v1 = vld [vmem:[%s2116_s0 + $0x34] sm:$0xf0] }
  0x21   :  { %879 = vmatpush.bf16.msra.mxu3 %v1546_v31  ;;  %778 = vmatmul.bf16.vlgmr.msra.gmra.mxu0 %v1069_v42  ;;  %v1563_v31 = vld [vmem:[%s2114_s1 + $0x148] sm:$0xff]  ;;  %v1510_v37 = vld [vmem:[%s2116_s0 + $0xdc] sm:$0xf0]  ;;  %v1166_v39 = vld [vmem:[%s2116_s0 + $0xe0] sm:$0xf0] }
  0x22   :  { %906 = vmatpush.bf16.msrb.mxu0 %v1561_v41  ;;  %812 = vmatmul.bf16.vlgmr.msra.gmra.mxu1 %v1073_v43  ;;  %v1511_v41 = vld [vmem:[%s2116_s0 + $0xe4] sm:$0xf0]  ;;  %v1507_v42 = vld [vmem:[%s2116_s0 + $0xcc] sm:$0xf]  ;;  %v1504_v21 = vld [vmem:[%s2116_s0 + $0xac] sm:$0xf0] }
  0x23   :  { %846 = vmatmul.bf16.vlgmr.msra.gmra.mxu2 %v1077_v44  ;;  %940 = vmatpush.bf16.msrb.mxu1 %v1569_v47  ;;  %v1174_v43 = vld [vmem:[%s2116_s0 + $0xe8] sm:$0xf0]  ;;  %v1165_v44 = vor.u32 %v1510_v37, %v1164_v36  ;;  %v1500_v22 = vld [vmem:[%s2116_s0 + $0x94] sm:$0xf]  ;;  %v1156_v24 = vld [vmem:[%s2116_s0 + $0x98] sm:$0xf] }
  0x24   :  { %974 = vmatpush.bf16.msrb.mxu2 %v1577_v40  ;;  %880 = vmatmul.bf16.vlgmr.msra.gmra.mxu3 %v1081_v45  ;;  %v1172_v40 = vld [vmem:[%s2116_s0 + $0xc8] sm:$0xf]  ;;  %v1169_v45 = vor.u32 %v1506_v38, %v1166_v39  ;;  %v1177_v47 = vor.u32 %v1507_v42, %v1174_v43  ;;  %v1150_v23 = vld [vmem:[%s2116_s0 + $0xb0] sm:$0xf0]  ;;  %v1505_v25 = vld [vmem:[%s2116_s0 + $0xb4] sm:$0xf0] }
  0x25   :  { %1008 = vmatpush.bf16.msrb.mxu3 %v1585_v46  ;;  %v1173_v46 = vor.u32 %v1511_v41, %v1172_v40  ;;  %v1501_v26 = vld [vmem:[%s2116_s0 + $0x9c] sm:$0xf]  ;;  %v1182_v36 = vld [vmem:[%s2116_s0 + $0xf0] sm:$0xf0]  ;;  %v1188_v37 = vld [vmem:[%s2116_s0 + $0xd8] sm:$0xf] }
  0x26   :  { %907 = vmatpush.bf16.msrb.mxu0 %v1560_v49  ;;  %v1518_v49 = vld [vmem:[%s2116_s0 + $0x11c] sm:$0xf0]  ;;  %v1513_v38 = vld [vmem:[%s2116_s0 + $0xf4] sm:$0xf0]  ;;  %v1509_v39 = vld [vmem:[%s2116_s0 + $0xdc] sm:$0xf] }
  0x27   :  { %941 = vmatpush.bf16.msrb.mxu1 %v1568_v51  ;;  %v1198_v51 = vld [vmem:[%s2116_s0 + $0x120] sm:$0xf0]  ;;  %v1190_v40 = vld [vmem:[%s2116_s0 + $0xf8] sm:$0xf0] }
  0x28   :  { %975 = vmatpush.bf16.msrb.mxu2 %v1576_v48  ;;  %v1196_v48 = vld [vmem:[%s2116_s0 + $0x100] sm:$0xf] }
  0x29   :  { %1009 = vmatpush.bf16.msrb.mxu3 %v1584_v50  ;;  %v1514_v50 = vld [vmem:[%s2116_s0 + $0x104] sm:$0xf]  ;;  %v1197_v56 = vor.u32 %v1518_v49, %v1196_v48 }
  0x2a   :  { %908 = vmatpush.bf16.msrb.mxu0 %v1559_v53  ;;  %v1519_v53 = vld [vmem:[%s2116_s0 + $0x124] sm:$0xf0] }
  0x2b   :  { %942 = vmatpush.bf16.msrb.mxu1 %v1567_v55  ;;  %v1206_v55 = vld [vmem:[%s2116_s0 + $0x128] sm:$0xf0] }
  0x2c   :  { %976 = vmatpush.bf16.msrb.mxu2 %v1575_v52  ;;  %v1204_v52 = vld [vmem:[%s2116_s0 + $0x108] sm:$0xf] }
  0x2d   :  { %1010 = vmatpush.bf16.msrb.mxu3 %v1583_v54  ;;  %v1515_v54 = vld [vmem:[%s2116_s0 + $0x10c] sm:$0xf] }
  0x2e   :  { %909 = vmatpush.bf16.msrb.mxu0 %v1558_v58  ;;  %v1205_v58 = vor.u32 %v1519_v53, %v1204_v52  ;;  %v1209_v59 = vor.u32 %v1515_v54, %v1206_v55 }
  0x2f   :  { %943 = vmatpush.bf16.msrb.mxu1 %v1566_v3  ;;  %v1094_v3 = vld [vmem:[%s2116_s0 + $0x38] sm:$0xf0] }
  0x30   :  { %977 = vmatpush.bf16.msrb.mxu2 %v1574_v57  ;;  %v1201_v57 = vor.u32 %v1514_v50, %v1198_v51 }
  0x31   :  { %1011 = vmatpush.bf16.msrb.mxu3 %v1582_v2  ;;  %783 = vmatmul.bf16.gmra.mxu0 %v1101_v6  ;;  %v1485_v2 = vld [vmem:[%s2116_s0 + $0x1c] sm:$0xf]  ;;  %v1093_v6 = vor.u32 %v1489_v1, %v1092_v0 }
  0x32   :  { %910 = vmatpush.bf16.msrb.mxu0 %v1557_v5  ;;  %817 = vmatmul.bf16.gmra.mxu1 %v1105_v7  ;;  %v1089_v5 = vor.u32 %v1484_v62, %v1086_v63  ;;  %v1097_v7 = vor.u32 %v1485_v2, %v1094_v3  ;;  %v1521_v62 = vld [vmem:[%s2116_s0 + $0x134] sm:$0xf0]  ;;  %v1517_v63 = vld [vmem:[%s2116_s0 + $0x11c] sm:$0xf] }
  0x33   :  { %851 = vmatmul.bf16.gmra.mxu2 %v1109_v8  ;;  %944 = vmatpush.bf16.msrb.mxu1 %v1565_v11  ;;  %v1116_v8 = vld [vmem:[%s2116_s0 + $0x50] sm:$0xf]  ;;  %v1118_v11 = vld [vmem:[%s2116_s0 + $0x70] sm:$0xf0]  ;;  %v1222_v0 = vld [vmem:[%s2116_s0 + $0x138] sm:$0xf0] }
  0x34   :  { %978 = vmatpush.bf16.msrb.mxu2 %v1573_v4  ;;  %885 = vmatmul.bf16.gmra.mxu3 %v1113_v9  ;;  %v1085_v4 = vor.u32 %v1488_v61, %v1084_v60  ;;  %v1496_v9 = vld [vmem:[%s2116_s0 + $0x6c] sm:$0xf0]  ;;  %v1214_v60 = vld [vmem:[%s2116_s0 + $0x130] sm:$0xf0]  ;;  %v1220_v61 = vld [vmem:[%s2116_s0 + $0x118] sm:$0xf] }
  0x35   :  { %1012 = vmatpush.bf16.msrb.mxu3 %v1581_v10  ;;  %v1492_v10 = vld [vmem:[%s2116_s0 + $0x54] sm:$0xf] }
  0x36   :  { %911 = vmatpush.bf16.msrb.mxu0 %v1556_v13  ;;  %v1497_v13 = vld [vmem:[%s2116_s0 + $0x74] sm:$0xf0] }
  0x37   :  { %945 = vmatpush.bf16.msrb.mxu1 %v1564_v15  ;;  %v1126_v15 = vld [vmem:[%s2116_s0 + $0x78] sm:$0xf0] }
  0x38   :  { %979 = vmatpush.bf16.msrb.mxu2 %v1572_v12  ;;  %v1124_v12 = vld [vmem:[%s2116_s0 + $0x58] sm:$0xf] }
  0x39   :  { %1013 = vmatpush.bf16.msrb.mxu3 %v1580_v14  ;;  %v1493_v14 = vld [vmem:[%s2116_s0 + $0x5c] sm:$0xf] }
  0x3a   :  { %912 = vmatpush.bf16.msrb.mxu0 %v1555_v17  ;;  %v1121_v17 = vor.u32 %v1492_v10, %v1118_v11  ;;  %v1129_v19 = vor.u32 %v1493_v14, %v1126_v15 }
  0x3b   :  { %946 = vmatpush.bf16.msrb.mxu1 %v1563_v31 }
  0x3c   :  { %980 = vmatpush.bf16.msrb.mxu2 %v1571_v16  ;;  %v1117_v16 = vor.u32 %v1496_v9, %v1116_v8  ;;  %v1221_v8 = vor.u32 %v1521_v62, %v1220_v61  ;;  %v1225_v9 = vor.u32 %v1517_v63, %v1222_v0 }
  0x3d   :  { %1014 = vmatpush.bf16.msrb.mxu3 %v1579_v18  ;;  %v1125_v18 = vor.u32 %v1497_v13, %v1124_v12 }
  0x3e   :  { %913 = vmatpush.bf16.msrb.mxu0 %v1554_v33  ;;  %v1180_v33 = vld [vmem:[%s2116_s0 + $0xd0] sm:$0xf] }
  0x3f   :  { %947 = vmatpush.bf16.msrb.mxu1 %v1562_v35  ;;  %v1508_v35 = vld [vmem:[%s2116_s0 + $0xd4] sm:$0xf] }
  0x40   :  { %981 = vmatpush.bf16.msrb.mxu2 %v1570_v32  ;;  %v1994_v32 = vld [vmem:[%s2115_s2] ss:$0 sm:$0xff]  ;;  %v1185_v42 = vor.u32 %v1508_v35, %v1182_v36 }
  0x41   :  { %788 = vmatmul.bf16.gmra.mxu0 %v1133_v27  ;;  %1015 = vmatpush.bf16.msrb.mxu3 %v1578_v34  ;;  %v1158_v27 = vld [vmem:[%s2116_s0 + $0xb8] sm:$0xf0]  ;;  %v1512_v34 = vld [vmem:[%s2116_s0 + $0xec] sm:$0xf0] }
  0x42   :  { %822 = vmatmul.bf16.gmra.mxu1 %v1137_v28  ;;  %v1149_v28 = vor.u32 %v1504_v21, %v1148_v20  ;;  %v1161_v31 = vor.u32 %v1501_v26, %v1158_v27  ;;  %v1181_v41 = vor.u32 %v1512_v34, %v1180_v33 }
  0x43   :  { %856 = vmatmul.bf16.gmra.mxu2 %v1141_v29  ;;  %v1153_v29 = vor.u32 %v1500_v22, %v1150_v23 }
  0x44   :  { %890 = vmatmul.bf16.gmra.mxu3 %v1145_v30  ;;  %v1157_v30 = vor.u32 %v1505_v25, %v1156_v24 }
  0x51   :  { %793 = vmatmul.bf16.gmra.mxu0 %v1165_v44 }
  0x52   :  { %827 = vmatmul.bf16.gmra.mxu1 %v1169_v45  ;;  %v1189_v45 = vor.u32 %v1513_v38, %v1188_v37 }
  0x53   :  { %861 = vmatmul.bf16.gmra.mxu2 %v1173_v46  ;;  %v1193_v46 = vor.u32 %v1509_v39, %v1190_v40 }
  0x54   :  { %895 = vmatmul.bf16.gmra.mxu3 %v1177_v47 }
  0x61   :  { %798 = vmatmul.bf16.gmra.mxu0 %v1197_v56 }
  0x62   :  { %832 = vmatmul.bf16.gmra.mxu1 %v1201_v57  ;;  %v1212_v57 = vld [vmem:[%s2116_s0 + $0x110] sm:$0xf] }
  0x63   :  { %866 = vmatmul.bf16.gmra.mxu2 %v1205_v58  ;;  %v1520_v58 = vld [vmem:[%s2116_s0 + $0x12c] sm:$0xf0] }
  0x64   :  { %900 = vmatmul.bf16.gmra.mxu3 %v1209_v59  ;;  %v1516_v59 = vld [vmem:[%s2116_s0 + $0x114] sm:$0xf]  ;;  %v1213_v3 = vor.u32 %v1520_v58, %v1212_v57 }
  0x71   :  { %914 = vmatmul.bf16.vlgmr.msrb.gmra.mxu0 %v1085_v4  ;;  %v1217_v4 = vor.u32 %v1516_v59, %v1214_v60 }
  0x72   :  { %948 = vmatmul.bf16.vlgmr.msrb.gmra.mxu1 %v1089_v5 }
  0x73   :  { %982 = vmatmul.bf16.vlgmr.msrb.gmra.mxu2 %v1093_v6 }
  0x74   :  { %1016 = vmatmul.bf16.vlgmr.msrb.gmra.mxu3 %v1097_v7 }
  0x81   :  { %919 = vmatmul.bf16.gmra.mxu0 %v1117_v16 }
  0x82   :  { %953 = vmatmul.bf16.gmra.mxu1 %v1121_v17 }
  0x83   :  { %987 = vmatmul.bf16.gmra.mxu2 %v1125_v18 }
  0x84   :  { %1021 = vmatmul.bf16.gmra.mxu3 %v1129_v19 }
  0x91   :  { %924 = vmatmul.bf16.gmra.mxu0 %v1149_v28 }
  0x92   :  { %958 = vmatmul.bf16.gmra.mxu1 %v1153_v29 }
  0x93   :  { %992 = vmatmul.bf16.gmra.mxu2 %v1157_v30 }
  0x94   :  { %1026 = vmatmul.bf16.gmra.mxu3 %v1161_v31 }
  0x9e   :  { %v779_v43 = vpop.f32.mrf.mxu0 }
  0x9f   :  { %v813_v44 = vpop.f32.mrf.mxu1  ;;  %v780_v47 = vadd.f32 %v1994_v32, %v779_v43 }
  0xa1   :  { %v814_v48 = vadd.f32 %v813_v44, %v780_v47  ;;  %929 = vmatmul.bf16.gmra.mxu0 %v1181_v41 }
  0xa2   :  { %963 = vmatmul.bf16.gmra.mxu1 %v1185_v42 }
  0xa3   :  { %997 = vmatmul.bf16.gmra.mxu2 %v1189_v45 }
  0xa4   :  { %1031 = vmatmul.bf16.gmra.mxu3 %v1193_v46 }
  0xa6   :  { %v847_v49 = vpop.f32.mrf.mxu2  ;;  %v781_v52 = vpop.f32.mrf.mxu0 }
  0xa7   :  { %v881_v50 = vpop.f32.mrf.mxu3  ;;  %v848_v51 = vadd.f32 %v847_v49, %v814_v48  ;;  %v815_v53 = vpop.f32.mrf.mxu1  ;;  %v782_v54 = vadd.f32 %v1994_v32, %v781_v52 }
  0xa9   :  { %v2022_v55 = vadd.f32 %v881_v50, %v848_v51  ;;  %v816_v56 = vadd.f32 %v815_v53, %v782_v54 }
  0xae   :  { %v849_v1 = vpop.f32.mrf.mxu2  ;;  %v784_v6 = vpop.f32.mrf.mxu0 }
  0xaf   :  { %v883_v2 = vpop.f32.mrf.mxu3  ;;  %v850_v5 = vadd.f32 %v849_v1, %v816_v56  ;;  %v818_v7 = vpop.f32.mrf.mxu1  ;;  %v785_v10 = vadd.f32 %v1994_v32, %v784_v6 }
  0xb1   :  { %v2049_v11 = vadd.f32 %v883_v2, %v850_v5  ;;  %v819_v12 = vadd.f32 %v818_v7, %v785_v10  ;;  %934 = vmatmul.bf16.gmra.mxu0 %v1213_v3 }
  0xb2   :  { %968 = vmatmul.bf16.gmra.mxu1 %v1217_v4 }
  0xb3   :  { %1002 = vmatmul.bf16.gmra.mxu2 %v1221_v8 }
  0xb4   :  { %1036 = vmatmul.bf16.gmra.mxu3 %v1225_v9 }
  0xb6   :  { %v852_v13 = vpop.f32.mrf.mxu2  ;;  %v786_v16 = vpop.f32.mrf.mxu0 }
  0xb7   :  { %v886_v14 = vpop.f32.mrf.mxu3  ;;  %v853_v15 = vadd.f32 %v852_v13, %v819_v12  ;;  %v820_v17 = vpop.f32.mrf.mxu1  ;;  %v787_v18 = vadd.f32 %v1994_v32, %v786_v16 }
  0xb9   :  { %v2052_v19 = vadd.f32 %v886_v14, %v853_v15  ;;  %v821_v20 = vadd.f32 %v820_v17, %v787_v18 }
  0xbe   :  { %v854_v21 = vpop.f32.mrf.mxu2  ;;  %v789_v24 = vpop.f32.mrf.mxu0 }
  0xbf   :  { %v888_v22 = vpop.f32.mrf.mxu3  ;;  %v855_v23 = vadd.f32 %v854_v21, %v821_v20  ;;  %v823_v25 = vpop.f32.mrf.mxu1  ;;  %v790_v26 = vadd.f32 %v1994_v32, %v789_v24 }
  0xc1   :  { %v2055_v27 = vadd.f32 %v888_v22, %v855_v23  ;;  %v824_v28 = vadd.f32 %v823_v25, %v790_v26 }
  0xc6   :  { %v857_v29 = vpop.f32.mrf.mxu2  ;;  %v791_v33 = vpop.f32.mrf.mxu0 }
  0xc7   :  { %v891_v30 = vpop.f32.mrf.mxu3  ;;  %v858_v31 = vadd.f32 %v857_v29, %v824_v28  ;;  %v825_v34 = vpop.f32.mrf.mxu1  ;;  %v792_v35 = vadd.f32 %v1994_v32, %v791_v33 }
  0xc9   :  { %v2058_v36 = vadd.f32 %v891_v30, %v858_v31  ;;  %v826_v37 = vadd.f32 %v825_v34, %v792_v35 }
  0xce   :  { %v859_v38 = vpop.f32.mrf.mxu2  ;;  %v794_v41 = vpop.f32.mrf.mxu0 }
  0xcf   :  { %v893_v39 = vpop.f32.mrf.mxu3  ;;  %v860_v40 = vadd.f32 %v859_v38, %v826_v37  ;;  %v828_v42 = vpop.f32.mrf.mxu1  ;;  %v795_v43 = vadd.f32 %v1994_v32, %v794_v41 }
  0xd1   :  { %v2061_v44 = vadd.f32 %v893_v39, %v860_v40  ;;  %v829_v45 = vadd.f32 %v828_v42, %v795_v43 }
  0xd6   :  { %v862_v46 = vpop.f32.mrf.mxu2  ;;  %v796_v49 = vpop.f32.mrf.mxu0 }
  0xd7   :  { %v896_v47 = vpop.f32.mrf.mxu3  ;;  %v863_v48 = vadd.f32 %v862_v46, %v829_v45  ;;  %v830_v50 = vpop.f32.mrf.mxu1  ;;  %v797_v51 = vadd.f32 %v1994_v32, %v796_v49 }
  0xd9   :  { %v2064_v52 = vadd.f32 %v896_v47, %v863_v48  ;;  %v831_v53 = vadd.f32 %v830_v50, %v797_v51 }
  0xde   :  { %v864_v54 = vpop.f32.mrf.mxu2  ;;  %v799_v58 = vpop.f32.mrf.mxu0 }
  0xdf   :  { %v898_v56 = vpop.f32.mrf.mxu3  ;;  %v865_v57 = vadd.f32 %v864_v54, %v831_v53  ;;  %v833_v59 = vpop.f32.mrf.mxu1  ;;  %v800_v60 = vadd.f32 %v1994_v32, %v799_v58 }
  0xe1   :  { %v2067_v61 = vadd.f32 %v898_v56, %v865_v57  ;;  %v834_v62 = vadd.f32 %v833_v59, %v800_v60 }
  0xe6   :  { %v867_v63 = vpop.f32.mrf.mxu2  ;;  %v801_v2 = vpop.f32.mrf.mxu0 }
  0xe7   :  { %v901_v0 = vpop.f32.mrf.mxu3  ;;  %v868_v1 = vadd.f32 %v867_v63, %v834_v62  ;;  %v835_v3 = vpop.f32.mrf.mxu1  ;;  %v802_v4 = vadd.f32 %v1994_v32, %v801_v2 }
  0xe9   :  { %v2070_v5 = vadd.f32 %v901_v0, %v868_v1  ;;  %v836_v6 = vadd.f32 %v835_v3, %v802_v4 }
  0xee   :  { %v869_v7 = vpop.f32.mrf.mxu2  ;;  %v915_v10 = vpop.f32.mrf.mxu0 }
  0xef   :  { %v903_v8 = vpop.f32.mrf.mxu3  ;;  %v870_v9 = vadd.f32 %v869_v7, %v836_v6  ;;  %v949_v12 = vpop.f32.mrf.mxu1  ;;  %v916_v14 = vadd.f32 %v915_v10, %v2022_v55 }
  0xf1   :  { %v2072_v13 = vadd.f32 %v903_v8, %v870_v9  ;;  %v950_v15 = vadd.f32 %v949_v12, %v916_v14 }
  0xf6   :  { %v983_v16 = vpop.f32.mrf.mxu2  ;;  %v917_v20 = vpop.f32.mrf.mxu0 }
  0xf7   :  { %v1017_v17 = vpop.f32.mrf.mxu3  ;;  %v984_v18 = vadd.f32 %v983_v16, %v950_v15  ;;  %v951_v21 = vpop.f32.mrf.mxu1  ;;  %v918_v32 = vadd.f32 %v917_v20, %v2049_v11 }
  0xf9   :  { %v1018_v22 = vadd.f32 %v1017_v17, %v984_v18  ;;  %v952_v24 = vadd.f32 %v951_v21, %v918_v32 }
  0xfb   :  { %v1042_v23 = vmax.f32 %v1018_v22, 0.0 }
  0xfd   :  { %1052 = vst [vmem:[%s2117_s3] sm:$0xff] %v1042_v23 }
  0xfe   :  { %v985_v25 = vpop.f32.mrf.mxu2  ;;  %v920_v29 = vpop.f32.mrf.mxu0 }
  0xff   :  { %v1019_v26 = vpop.f32.mrf.mxu3  ;;  %v986_v28 = vadd.f32 %v985_v25, %v952_v24  ;;  %v954_v55 = vpop.f32.mrf.mxu1  ;;  %v921_v31 = vadd.f32 %v920_v29, %v2052_v19 }
 0x101   :  { %v1020_v30 = vadd.f32 %v1019_v26, %v986_v28  ;;  %v955_v11 = vadd.f32 %v954_v55, %v921_v31 }
 0x103   :  { %v1043_v33 = vmax.f32 %v1020_v30, 0.0 }
 0x105   :  { %1053 = vst [vmem:[%s2117_s3 + $0x8] sm:$0xff] %v1043_v33 }
 0x106   :  { %v988_v34 = vpop.f32.mrf.mxu2  ;;  %v922_v38 = vpop.f32.mrf.mxu0 }
 0x107   :  { %v1022_v35 = vpop.f32.mrf.mxu3  ;;  %v989_v37 = vadd.f32 %v988_v34, %v955_v11  ;;  %v956_v39 = vpop.f32.mrf.mxu1  ;;  %v923_v41 = vadd.f32 %v922_v38, %v2055_v27 }
 0x109   :  { %v1023_v40 = vadd.f32 %v1022_v35, %v989_v37  ;;  %v957_v19 = vadd.f32 %v956_v39, %v923_v41 }
 0x10b   :  { %v1044_v42 = vmax.f32 %v1023_v40, 0.0 }
 0x10d   :  { %1054 = vst [vmem:[%s2117_s3 + $0x10] sm:$0xff] %v1044_v42 }
 0x10e   :  { %v990_v43 = vpop.f32.mrf.mxu2  ;;  %v925_v47 = vpop.f32.mrf.mxu0 }
 0x10f   :  { %v1024_v45 = vpop.f32.mrf.mxu3  ;;  %v991_v46 = vadd.f32 %v990_v43, %v957_v19  ;;  %v959_v48 = vpop.f32.mrf.mxu1  ;;  %v926_v50 = vadd.f32 %v925_v47, %v2058_v36 }
 0x111   :  { %v1025_v49 = vadd.f32 %v1024_v45, %v991_v46  ;;  %v960_v27 = vadd.f32 %v959_v48, %v926_v50 }
 0x113   :  { %v1045_v51 = vmax.f32 %v1025_v49, 0.0 }
 0x115   :  { %1055 = vst [vmem:[%s2117_s3 + $0x18] sm:$0xff] %v1045_v51 }
 0x116   :  { %v993_v53 = vpop.f32.mrf.mxu2  ;;  %v927_v57 = vpop.f32.mrf.mxu0 }
 0x117   :  { %v1027_v54 = vpop.f32.mrf.mxu3  ;;  %v994_v56 = vadd.f32 %v993_v53, %v960_v27  ;;  %v961_v58 = vpop.f32.mrf.mxu1  ;;  %v928_v60 = vadd.f32 %v927_v57, %v2061_v44 }
 0x119   :  { %v1028_v59 = vadd.f32 %v1027_v54, %v994_v56  ;;  %v962_v36 = vadd.f32 %v961_v58, %v928_v60 }
 0x11b   :  { %v1046_v62 = vmax.f32 %v1028_v59, 0.0 }
 0x11d   :  { %1056 = vst [vmem:[%s2117_s3 + $0x20] sm:$0xff] %v1046_v62 }
 0x11e   :  { %v995_v63 = vpop.f32.mrf.mxu2  ;;  %v930_v2 = vpop.f32.mrf.mxu0 }
 0x11f   :  { %v1029_v0 = vpop.f32.mrf.mxu3  ;;  %v996_v1 = vadd.f32 %v995_v63, %v962_v36  ;;  %v964_v3 = vpop.f32.mrf.mxu1  ;;  %v931_v6 = vadd.f32 %v930_v2, %v2064_v52 }
 0x121   :  { %v1030_v4 = vadd.f32 %v1029_v0, %v996_v1  ;;  %v965_v44 = vadd.f32 %v964_v3, %v931_v6 }
 0x123   :  { %v1047_v7 = vmax.f32 %v1030_v4, 0.0 }
 0x125   :  { %1057 = vst [vmem:[%s2117_s3 + $0x28] sm:$0xff] %v1047_v7 }
 0x126   :  { %v998_v8 = vpop.f32.mrf.mxu2  ;;  %v932_v12 = vpop.f32.mrf.mxu0 }
 0x127   :  { %v1032_v9 = vpop.f32.mrf.mxu3  ;;  %v999_v10 = vadd.f32 %v998_v8, %v965_v44  ;;  %v966_v14 = vpop.f32.mrf.mxu1  ;;  %v933_v16 = vadd.f32 %v932_v12, %v2067_v61 }
 0x129   :  { %v1033_v15 = vadd.f32 %v1032_v9, %v999_v10  ;;  %v967_v52 = vadd.f32 %v966_v14, %v933_v16 }
 0x12b   :  { %v1048_v17 = vmax.f32 %v1033_v15, 0.0 }
 0x12d   :  { %1058 = vst [vmem:[%s2117_s3 + $0x30] sm:$0xff] %v1048_v17 }
 0x12e   :  { %v1000_v18 = vpop.f32.mrf.mxu2  ;;  %v935_v22 = vpop.f32.mrf.mxu0 }
 0x12f   :  { %v1034_v20 = vpop.f32.mrf.mxu3  ;;  %v1001_v21 = vadd.f32 %v1000_v18, %v967_v52  ;;  %v936_v23 = vadd.f32 %v935_v22, %v2070_v5  ;;  %v969_v24 = vpop.f32.mrf.mxu1 }
 0x131   :  { %v1035_v32 = vadd.f32 %v1034_v20, %v1001_v21  ;;  %v970_v61 = vadd.f32 %v969_v24, %v936_v23 }
 0x133   :  { %v1049_v25 = vmax.f32 %v1035_v32, 0.0 }
 0x135   :  { %1059 = vst [vmem:[%s2117_s3 + $0x38] sm:$0xff] %v1049_v25 }
 0x136   :  { %v1003_v26 = vpop.f32.mrf.mxu2  ;;  %v937_v55 = vpop.f32.mrf.mxu0 }
 0x137   :  { %v1037_v28 = vpop.f32.mrf.mxu3  ;;  %v1004_v29 = vadd.f32 %v1003_v26, %v970_v61  ;;  %v938_v31 = vadd.f32 %v937_v55, %v2072_v13  ;;  %v971_v11 = vpop.f32.mrf.mxu1 }
 0x139   :  { %v1038_v30 = vadd.f32 %v1037_v28, %v1004_v29  ;;  %v972_v5 = vadd.f32 %v971_v11, %v938_v31 }
 0x13b   :  { %v1050_v33 = vmax.f32 %v1038_v30, 0.0 }
 0x13d   :  { %1060 = vst [vmem:[%s2117_s3 + $0x40] sm:$0xff] %v1050_v33 }
 0x13e   :  { %v1005_v34 = vpop.f32.mrf.mxu2 }
 0x13f   :  { %v1006_v35 = vadd.f32 %v1005_v34, %v972_v5  ;;  %v1039_v37 = vpop.f32.mrf.mxu3 }
 0x141   :  { %v1040_v38 = vadd.f32 %v1039_v37, %v1006_v35 }
 0x143   :  { %v1051_v39 = vmax.f32 %v1040_v38, 0.0 }
 0x145   :  { %1061 = vst [vmem:[%s2117_s3 + $0x48] sm:$0xff] %v1051_v39 }

// kernel: _lambda_.13
= control target key start
LH: loop header
LB: loop body
LE: loop exit
PB: predicated region body
PF: predicated region fallthrough
CT: control target
= control target key end

     0   :  { %s5247_s1 = inlined_call_operand.vmem [shape: bf16[2048,256], index: 1, kind: input, shape index: {}]   ;;  %s5248_s0 = inlined_call_operand.vmem [shape: bf16[16,2048], index: 0, kind: input, shape index: {}]   ;;  %s5249_s2 = inlined_call_operand.vmem [shape: f32[1,256], index: 2, kind: input, shape index: {}]   ;;  %s5250_s3 = inlined_call_operand.vmem [shape: f32[16,256], index: 3, kind: output, shape index: {}]  }
   0x1   :  { %v2234_v0 = vld [vmem:[%s5247_s1 + $0x70] sm:$0xf]  ;;  %v3231_v1 = vld [vmem:[%s5247_s1 + $0x74] sm:$0xf0]  ;;  %v2226_v11 = vld [vmem:[%s5247_s1 + $0x60] sm:$0xf] }
   0x2   :  { %v2298_v2 = vld [vmem:[%s5247_s1 + $0xf0] sm:$0xf]  ;;  %v2235_v3 = vor.u32 %v3231_v1, %v2234_v0  ;;  %v3247_v4 = vld [vmem:[%s5247_s1 + $0xf4] sm:$0xf0]  ;;  %v3229_v13 = vld [vmem:[%s5247_s1 + $0x64] sm:$0xf0] }
   0x3   :  { %v2362_v5 = vld [vmem:[%s5247_s1 + $0x170] sm:$0xf]  ;;  %v3263_v6 = vld [vmem:[%s5247_s1 + $0x174] sm:$0xf0]  ;;  %v2299_v7 = vor.u32 %v3247_v4, %v2298_v2  ;;  %v2290_v14 = vld [vmem:[%s5247_s1 + $0xe0] sm:$0xf]  ;;  %v2227_v16 = vor.u32 %v3229_v13, %v2226_v11 }
   0x4   :  { %v2363_v8 = vor.u32 %v3263_v6, %v2362_v5  ;;  %v2426_v9 = vld [vmem:[%s5247_s1 + $0x1f0] sm:$0xf]  ;;  %v3279_v10 = vld [vmem:[%s5247_s1 + $0x1f4] sm:$0xf0]  ;;  %1652 = vmatpush.bf16.msra.mxu0 %v2235_v3  ;;  %v3245_v15 = vld [vmem:[%s5247_s1 + $0xe4] sm:$0xf0] }
   0x5   :  { %v2427_v12 = vor.u32 %v3279_v10, %v2426_v9  ;;  %1666 = vmatpush.bf16.msra.mxu1 %v2299_v7  ;;  %v2291_v17 = vor.u32 %v3245_v15, %v2290_v14  ;;  %v2354_v18 = vld [vmem:[%s5247_s1 + $0x160] sm:$0xf]  ;;  %v3261_v19 = vld [vmem:[%s5247_s1 + $0x164] sm:$0xf0]  ;;  %v2218_v23 = vld [vmem:[%s5247_s1 + $0x50] sm:$0xf] }
   0x6   :  { %1680 = vmatpush.bf16.msra.mxu2 %v2363_v8  ;;  %v2418_v20 = vld [vmem:[%s5247_s1 + $0x1e0] sm:$0xf]  ;;  %v2355_v21 = vor.u32 %v3261_v19, %v2354_v18  ;;  %v3277_v22 = vld [vmem:[%s5247_s1 + $0x1e4] sm:$0xf0]  ;;  %v3227_v24 = vld [vmem:[%s5247_s1 + $0x54] sm:$0xf0] }
   0x7   :  { %1694 = vmatpush.bf16.msra.mxu3 %v2427_v12  ;;  %v2419_v25 = vor.u32 %v3277_v22, %v2418_v20  ;;  %v2282_v26 = vld [vmem:[%s5247_s1 + $0xd0] sm:$0xf]  ;;  %v3243_v27 = vld [vmem:[%s5247_s1 + $0xd4] sm:$0xf0]  ;;  %v2219_v29 = vor.u32 %v3227_v24, %v2218_v23  ;;  %v2210_v35 = vld [vmem:[%s5247_s1 + $0x40] sm:$0xf] }
   0x8   :  { %v2346_v28 = vld [vmem:[%s5247_s1 + $0x150] sm:$0xf]  ;;  %1653 = vmatpush.bf16.msra.mxu0 %v2227_v16  ;;  %v3259_v30 = vld [vmem:[%s5247_s1 + $0x154] sm:$0xf0]  ;;  %v2283_v33 = vor.u32 %v3243_v27, %v2282_v26  ;;  %v3225_v36 = vld [vmem:[%s5247_s1 + $0x44] sm:$0xf0] }
   0x9   :  { %v2410_v31 = vld [vmem:[%s5247_s1 + $0x1d0] sm:$0xf]  ;;  %v3275_v32 = vld [vmem:[%s5247_s1 + $0x1d4] sm:$0xf0]  ;;  %1667 = vmatpush.bf16.msra.mxu1 %v2291_v17  ;;  %v2347_v34 = vor.u32 %v3259_v30, %v2346_v28  ;;  %v2274_v37 = vld [vmem:[%s5247_s1 + $0xc0] sm:$0xf]  ;;  %v2211_v44 = vor.u32 %v3225_v36, %v2210_v35 }
   0xa   :  { %1681 = vmatpush.bf16.msra.mxu2 %v2355_v21  ;;  %v2411_v38 = vor.u32 %v3275_v32, %v2410_v31  ;;  %v3241_v39 = vld [vmem:[%s5247_s1 + $0xc4] sm:$0xf0]  ;;  %v2338_v40 = vld [vmem:[%s5247_s1 + $0x140] sm:$0xf]  ;;  %v2202_v47 = vld [vmem:[%s5247_s1 + $0x30] sm:$0xf] }
   0xb   :  { %1695 = vmatpush.bf16.msra.mxu3 %v2419_v25  ;;  %v3257_v41 = vld [vmem:[%s5247_s1 + $0x144] sm:$0xf0]  ;;  %v2402_v42 = vld [vmem:[%s5247_s1 + $0x1c0] sm:$0xf]  ;;  %v2275_v45 = vor.u32 %v3241_v39, %v2274_v37  ;;  %v3223_v48 = vld [vmem:[%s5247_s1 + $0x34] sm:$0xf0] }
   0xc   :  { %v3273_v43 = vld [vmem:[%s5247_s1 + $0x1c4] sm:$0xf0]  ;;  %1654 = vmatpush.bf16.msra.mxu0 %v2219_v29  ;;  %v2339_v46 = vor.u32 %v3257_v41, %v2338_v40  ;;  %v2266_v49 = vld [vmem:[%s5247_s1 + $0xb0] sm:$0xf]  ;;  %v3239_v51 = vld [vmem:[%s5247_s1 + $0xb4] sm:$0xf0]  ;;  %v2203_v56 = vor.u32 %v3223_v48, %v2202_v47 }
   0xd   :  { %1668 = vmatpush.bf16.msra.mxu1 %v2283_v33  ;;  %v2403_v50 = vor.u32 %v3273_v43, %v2402_v42  ;;  %v2330_v52 = vld [vmem:[%s5247_s1 + $0x130] sm:$0xf]  ;;  %v3255_v53 = vld [vmem:[%s5247_s1 + $0x134] sm:$0xf0]  ;;  %v2267_v57 = vor.u32 %v3239_v51, %v2266_v49  ;;  %v2194_v59 = vld [vmem:[%s5247_s1 + $0x20] sm:$0xf] }
   0xe   :  { %1682 = vmatpush.bf16.msra.mxu2 %v2347_v34  ;;  %v2394_v54 = vld [vmem:[%s5247_s1 + $0x1b0] sm:$0xf]  ;;  %v3271_v55 = vld [vmem:[%s5247_s1 + $0x1b4] sm:$0xf0]  ;;  %v2331_v58 = vor.u32 %v3255_v53, %v2330_v52  ;;  %v3221_v60 = vld [vmem:[%s5247_s1 + $0x24] sm:$0xf0] }
   0xf   :  { %1696 = vmatpush.bf16.msra.mxu3 %v2411_v38  ;;  %v2258_v61 = vld [vmem:[%s5247_s1 + $0xa0] sm:$0xf]  ;;  %v2395_v62 = vor.u32 %v3271_v55, %v2394_v54  ;;  %v3237_v63 = vld [vmem:[%s5247_s1 + $0xa4] sm:$0xf0]  ;;  %v2195_v4 = vor.u32 %v3221_v60, %v2194_v59  ;;  %v2186_v7 = vld [vmem:[%s5247_s1 + $0x10] sm:$0xf] }
  0x10   :  { %1655 = vmatpush.bf16.msra.mxu0 %v2211_v44  ;;  %v2322_v0 = vld [vmem:[%s5247_s1 + $0x120] sm:$0xf]  ;;  %v3253_v1 = vld [vmem:[%s5247_s1 + $0x124] sm:$0xf0]  ;;  %v2259_v5 = vor.u32 %v3237_v63, %v2258_v61  ;;  %v3219_v8 = vld [vmem:[%s5247_s1 + $0x14] sm:$0xf0] }
  0x11   :  { %1669 = vmatpush.bf16.msra.mxu1 %v2275_v45  ;;  %v2386_v2 = vld [vmem:[%s5247_s1 + $0x1a0] sm:$0xf]  ;;  %v3269_v3 = vld [vmem:[%s5247_s1 + $0x1a4] sm:$0xf0]  ;;  %v2323_v6 = vor.u32 %v3253_v1, %v2322_v0  ;;  %v2250_v9 = vld [vmem:[%s5247_s1 + $0x90] sm:$0xf]  ;;  %v2187_v16 = vor.u32 %v3219_v8, %v2186_v7 }
  0x12   :  { %1683 = vmatpush.bf16.msra.mxu2 %v2339_v46  ;;  %v2387_v10 = vor.u32 %v3269_v3, %v2386_v2  ;;  %v3235_v11 = vld [vmem:[%s5247_s1 + $0x94] sm:$0xf0]  ;;  %v2314_v12 = vld [vmem:[%s5247_s1 + $0x110] sm:$0xf]  ;;  %v2178_v17 = vld [vmem:[%s5247_s1] sm:$0xf] }
  0x13   :  { %1697 = vmatpush.bf16.msra.mxu3 %v2403_v50  ;;  %v3251_v13 = vld [vmem:[%s5247_s1 + $0x114] sm:$0xf0]  ;;  %v2378_v14 = vld [vmem:[%s5247_s1 + $0x190] sm:$0xf]  ;;  %v3217_v18 = vld [vmem:[%s5247_s1 + $0x4] sm:$0xf0]  ;;  %v2251_v19 = vor.u32 %v3235_v11, %v2250_v9 }
  0x14   :  { %1656 = vmatpush.bf16.msra.mxu0 %v2203_v56  ;;  %v3267_v15 = vld [vmem:[%s5247_s1 + $0x194] sm:$0xf0]  ;;  %v2315_v20 = vor.u32 %v3251_v13, %v2314_v12  ;;  %v2242_v21 = vld [vmem:[%s5247_s1 + $0x80] sm:$0xf]  ;;  %v3233_v22 = vld [vmem:[%s5247_s1 + $0x84] sm:$0xf0]  ;;  %v2179_v31 = vor.u32 %v3217_v18, %v2178_v17 }
  0x15   :  { %1670 = vmatpush.bf16.msra.mxu1 %v2267_v57  ;;  %v2306_v23 = vld [vmem:[%s5247_s1 + $0x100] sm:$0xf]  ;;  %v2379_v24 = vor.u32 %v3267_v15, %v2378_v14  ;;  %v3249_v25 = vld [vmem:[%s5247_s1 + $0x104] sm:$0xf0]  ;;  %v2490_v28 = vld [vmem:[%s5247_s1 + $0x270] sm:$0xf]  ;;  %v2243_v35 = vor.u32 %v3233_v22, %v2242_v21 }
  0x16   :  { %1684 = vmatpush.bf16.msra.mxu2 %v2331_v58  ;;  %v2370_v26 = vld [vmem:[%s5247_s1 + $0x180] sm:$0xf]  ;;  %v3265_v27 = vld [vmem:[%s5247_s1 + $0x184] sm:$0xf0]  ;;  %v3295_v29 = vld [vmem:[%s5247_s1 + $0x274] sm:$0xf0]  ;;  %v2307_v36 = vor.u32 %v3249_v25, %v2306_v23 }
  0x17   :  { %1698 = vmatpush.bf16.msra.mxu3 %v2395_v62  ;;  %v2554_v30 = vld [vmem:[%s5247_s1 + $0x2f0] sm:$0xf]  ;;  %v3311_v32 = vld [vmem:[%s5247_s1 + $0x2f4] sm:$0xf0]  ;;  %v2371_v39 = vor.u32 %v3265_v27, %v2370_v26  ;;  %v2491_v40 = vor.u32 %v3295_v29, %v2490_v28  ;;  %v2482_v41 = vld [vmem:[%s5247_s1 + $0x260] sm:$0xf] }
  0x18   :  { %1657 = vmatpush.bf16.msra.mxu0 %v2195_v4  ;;  %v2618_v33 = vld [vmem:[%s5247_s1 + $0x370] sm:$0xf]  ;;  %v3327_v34 = vld [vmem:[%s5247_s1 + $0x374] sm:$0xf0]  ;;  %v3293_v42 = vld [vmem:[%s5247_s1 + $0x264] sm:$0xf0]  ;;  %v2555_v43 = vor.u32 %v3311_v32, %v2554_v30 }
  0x19   :  { %1671 = vmatpush.bf16.msra.mxu1 %v2259_v5  ;;  %v2682_v37 = vld [vmem:[%s5247_s1 + $0x3f0] sm:$0xf]  ;;  %v3343_v38 = vld [vmem:[%s5247_s1 + $0x3f4] sm:$0xf0]  ;;  %v2619_v44 = vor.u32 %v3327_v34, %v2618_v33  ;;  %v2546_v45 = vld [vmem:[%s5247_s1 + $0x2e0] sm:$0xf]  ;;  %v2483_v55 = vor.u32 %v3293_v42, %v2482_v41 }
  0x1a   :  { %1685 = vmatpush.bf16.msra.mxu2 %v2323_v6  ;;  %v3309_v46 = vld [vmem:[%s5247_s1 + $0x2e4] sm:$0xf0]  ;;  %v2610_v47 = vld [vmem:[%s5247_s1 + $0x360] sm:$0xf]  ;;  %v2683_v48 = vor.u32 %v3343_v38, %v2682_v37  ;;  %v2474_v56 = vld [vmem:[%s5247_s1 + $0x250] sm:$0xf] }
  0x1b   :  { %1699 = vmatpush.bf16.msra.mxu3 %v2387_v10  ;;  %v3325_v49 = vld [vmem:[%s5247_s1 + $0x364] sm:$0xf0]  ;;  %v2674_v50 = vld [vmem:[%s5247_s1 + $0x3e0] sm:$0xf]  ;;  %v3291_v57 = vld [vmem:[%s5247_s1 + $0x254] sm:$0xf0]  ;;  %v2547_v60 = vor.u32 %v3309_v46, %v2546_v45 }
  0x1c   :  { %1658 = vmatpush.bf16.msra.mxu0 %v2187_v16  ;;  %v3341_v51 = vld [vmem:[%s5247_s1 + $0x3e4] sm:$0xf0]  ;;  %v2114_v52 = vld [vmem:[%s5248_s0] sm:$0xf]  ;;  %v2611_v61 = vor.u32 %v3325_v49, %v2610_v47  ;;  %v2538_v62 = vld [vmem:[%s5247_s1 + $0x2d0] sm:$0xf]  ;;  %v2475_v9 = vor.u32 %v3291_v57, %v2474_v56 }
  0x1d   :  { %1672 = vmatpush.bf16.msra.mxu1 %v2251_v19  ;;  %v3208_v53 = vld [vmem:[%s5248_s0 + $0x3c] sm:$0xf0]  ;;  %v2122_v54 = vld [vmem:[%s5248_s0 + $0x8] sm:$0xf]  ;;  %v3307_v63 = vld [vmem:[%s5247_s1 + $0x2d4] sm:$0xf0]  ;;  %v2675_v2 = vor.u32 %v3341_v51, %v2674_v50 }
  0x1e   :  { %1686 = vmatpush.bf16.msra.mxu2 %v2315_v20  ;;  %v3747_v58 = vor.u32 %v3208_v53, %v2114_v52  ;;  %v3209_v59 = vld [vmem:[%s5248_s0 + $0x44] sm:$0xf0]  ;;  %v2602_v0 = vld [vmem:[%s5247_s1 + $0x350] sm:$0xf]  ;;  %v3323_v3 = vld [vmem:[%s5247_s1 + $0x354] sm:$0xf0]  ;;  %v2539_v12 = vor.u32 %v3307_v63, %v2538_v62 }
  0x1f   :  { %1700 = vmatpush.bf16.msra.mxu3 %v2379_v24  ;;  %v3761_v1 = vor.u32 %v3209_v59, %v2122_v54  ;;  %v2666_v4 = vld [vmem:[%s5247_s1 + $0x3d0] sm:$0xf]  ;;  %v3339_v5 = vld [vmem:[%s5247_s1 + $0x3d4] sm:$0xf0]  ;;  %v3200_v6 = vld [vmem:[%s5248_s0 + $0x4] sm:$0xf]  ;;  %v2603_v13 = vor.u32 %v3323_v3, %v2602_v0 }
  0x20   :  { %1659 = vmatpush.bf16.msra.mxu0 %v2179_v31  ;;  %v2116_v7 = vld [vmem:[%s5248_s0 + $0x40] sm:$0xf0]  ;;  %v3201_v8 = vld [vmem:[%s5248_s0 + $0xc] sm:$0xf]  ;;  %v2466_v14 = vld [vmem:[%s5247_s1 + $0x240] sm:$0xf]  ;;  %v2667_v18 = vor.u32 %v3339_v5, %v2666_v4 }
  0x21   :  { %1673 = vmatpush.bf16.msra.mxu1 %v2243_v35  ;;  %v3783_v10 = vor.u32 %v3200_v6, %v2116_v7  ;;  %v2124_v11 = vld [vmem:[%s5248_s0 + $0x48] sm:$0xf0]  ;;  %v3289_v15 = vld [vmem:[%s5247_s1 + $0x244] sm:$0xf0]  ;;  %v2530_v16 = vld [vmem:[%s5247_s1 + $0x2c0] sm:$0xf] }
  0x22   :  { %1687 = vmatpush.bf16.msra.mxu2 %v2307_v36  ;;  %v3797_v17 = vor.u32 %v3201_v8, %v2124_v11  ;;  %v3305_v19 = vld [vmem:[%s5247_s1 + $0x2c4] sm:$0xf0]  ;;  %v2594_v20 = vld [vmem:[%s5247_s1 + $0x340] sm:$0xf]  ;;  %v2467_v24 = vor.u32 %v3289_v15, %v2466_v14  ;;  %v2458_v27 = vld [vmem:[%s5247_s1 + $0x230] sm:$0xf] }
  0x23   :  { %1701 = vmatpush.bf16.msra.mxu3 %v2371_v39  ;;  %1660 = vmatmul.bf16.vlgmr.msra.gmra.mxu0 %v3747_v58  ;;  %v3321_v21 = vld [vmem:[%s5247_s1 + $0x344] sm:$0xf0]  ;;  %v2658_v22 = vld [vmem:[%s5247_s1 + $0x3c0] sm:$0xf]  ;;  %v2531_v25 = vor.u32 %v3305_v19, %v2530_v16  ;;  %v3287_v28 = vld [vmem:[%s5247_s1 + $0x234] sm:$0xf0] }
  0x24   :  { %1708 = vmatpush.bf16.msrb.mxu0 %v2491_v40  ;;  %1674 = vmatmul.bf16.vlgmr.msra.gmra.mxu1 %v3783_v10  ;;  %v3337_v23 = vld [vmem:[%s5247_s1 + $0x3c4] sm:$0xf0]  ;;  %v2595_v26 = vor.u32 %v3321_v21, %v2594_v20  ;;  %v2522_v29 = vld [vmem:[%s5247_s1 + $0x2b0] sm:$0xf]  ;;  %v3303_v31 = vld [vmem:[%s5247_s1 + $0x2b4] sm:$0xf0]  ;;  %v2459_v36 = vor.u32 %v3287_v28, %v2458_v27 }
  0x25   :  { %1722 = vmatpush.bf16.msrb.mxu1 %v2555_v43  ;;  %1688 = vmatmul.bf16.vlgmr.msra.gmra.mxu2 %v3761_v1  ;;  %v2659_v30 = vor.u32 %v3337_v23, %v2658_v22  ;;  %v2586_v32 = vld [vmem:[%s5247_s1 + $0x330] sm:$0xf]  ;;  %v3319_v33 = vld [vmem:[%s5247_s1 + $0x334] sm:$0xf0]  ;;  %v2523_v37 = vor.u32 %v3303_v31, %v2522_v29  ;;  %v2450_v39 = vld [vmem:[%s5247_s1 + $0x220] sm:$0xf] }
  0x26   :  { %1736 = vmatpush.bf16.msrb.mxu2 %v2619_v44  ;;  %1702 = vmatmul.bf16.vlgmr.msra.gmra.mxu3 %v3797_v17  ;;  %v2650_v34 = vld [vmem:[%s5247_s1 + $0x3b0] sm:$0xf]  ;;  %v3335_v35 = vld [vmem:[%s5247_s1 + $0x3b4] sm:$0xf0]  ;;  %v2587_v38 = vor.u32 %v3319_v33, %v2586_v32  ;;  %v3285_v40 = vld [vmem:[%s5247_s1 + $0x224] sm:$0xf0] }
  0x27   :  { %1750 = vmatpush.bf16.msrb.mxu3 %v2683_v48  ;;  %v2514_v41 = vld [vmem:[%s5247_s1 + $0x2a0] sm:$0xf]  ;;  %v2651_v42 = vor.u32 %v3335_v35, %v2650_v34  ;;  %v3301_v43 = vld [vmem:[%s5247_s1 + $0x2a4] sm:$0xf0]  ;;  %v2451_v48 = vor.u32 %v3285_v40, %v2450_v39  ;;  %v2442_v49 = vld [vmem:[%s5247_s1 + $0x210] sm:$0xf] }
  0x28   :  { %1709 = vmatpush.bf16.msrb.mxu0 %v2483_v55  ;;  %v2578_v44 = vld [vmem:[%s5247_s1 + $0x320] sm:$0xf]  ;;  %v3317_v45 = vld [vmem:[%s5247_s1 + $0x324] sm:$0xf0]  ;;  %v2515_v50 = vor.u32 %v3301_v43, %v2514_v41  ;;  %v3283_v52 = vld [vmem:[%s5247_s1 + $0x214] sm:$0xf0] }
  0x29   :  { %1723 = vmatpush.bf16.msrb.mxu1 %v2547_v60  ;;  %v2642_v46 = vld [vmem:[%s5247_s1 + $0x3a0] sm:$0xf]  ;;  %v3333_v47 = vld [vmem:[%s5247_s1 + $0x3a4] sm:$0xf0]  ;;  %v2579_v51 = vor.u32 %v3317_v45, %v2578_v44  ;;  %v2506_v53 = vld [vmem:[%s5247_s1 + $0x290] sm:$0xf]  ;;  %v2443_v63 = vor.u32 %v3283_v52, %v2442_v49 }
  0x2a   :  { %1737 = vmatpush.bf16.msrb.mxu2 %v2611_v61  ;;  %v3299_v54 = vld [vmem:[%s5247_s1 + $0x294] sm:$0xf0]  ;;  %v2643_v55 = vor.u32 %v3333_v47, %v2642_v46  ;;  %v2570_v56 = vld [vmem:[%s5247_s1 + $0x310] sm:$0xf]  ;;  %v2434_v61 = vld [vmem:[%s5247_s1 + $0x200] sm:$0xf] }
  0x2b   :  { %1751 = vmatpush.bf16.msrb.mxu3 %v2675_v2  ;;  %v3315_v57 = vld [vmem:[%s5247_s1 + $0x314] sm:$0xf0]  ;;  %v2634_v59 = vld [vmem:[%s5247_s1 + $0x390] sm:$0xf]  ;;  %v3281_v62 = vld [vmem:[%s5247_s1 + $0x204] sm:$0xf0]  ;;  %v2507_v5 = vor.u32 %v3299_v54, %v2506_v53 }
  0x2c   :  { %1710 = vmatpush.bf16.msrb.mxu0 %v2475_v9  ;;  %v3331_v60 = vld [vmem:[%s5247_s1 + $0x394] sm:$0xf0]  ;;  %v2498_v0 = vld [vmem:[%s5247_s1 + $0x280] sm:$0xf]  ;;  %v3297_v2 = vld [vmem:[%s5247_s1 + $0x284] sm:$0xf0]  ;;  %v2571_v6 = vor.u32 %v3315_v57, %v2570_v56  ;;  %v2435_v19 = vor.u32 %v3281_v62, %v2434_v61 }
  0x2d   :  { %1724 = vmatpush.bf16.msrb.mxu1 %v2539_v12  ;;  %v2562_v3 = vld [vmem:[%s5247_s1 + $0x300] sm:$0xf]  ;;  %v3313_v4 = vld [vmem:[%s5247_s1 + $0x304] sm:$0xf0]  ;;  %v2746_v9 = vld [vmem:[%s5247_s1 + $0x470] sm:$0xf]  ;;  %v2635_v11 = vor.u32 %v3331_v60, %v2634_v59  ;;  %v2499_v23 = vor.u32 %v3297_v2, %v2498_v0 }
  0x2e   :  { %1738 = vmatpush.bf16.msrb.mxu2 %v2603_v13  ;;  %v2626_v7 = vld [vmem:[%s5247_s1 + $0x380] sm:$0xf]  ;;  %v3329_v8 = vld [vmem:[%s5247_s1 + $0x384] sm:$0xf0]  ;;  %v3359_v12 = vld [vmem:[%s5247_s1 + $0x474] sm:$0xf0] }
  0x2f   :  { %1752 = vmatpush.bf16.msrb.mxu3 %v2667_v18  ;;  %v2810_v13 = vld [vmem:[%s5247_s1 + $0x4f0] sm:$0xf]  ;;  %v3375_v14 = vld [vmem:[%s5247_s1 + $0x4f4] sm:$0xf0]  ;;  %v3202_v27 = vld [vmem:[%s5248_s0 + $0x14] sm:$0xf]  ;;  %v2627_v28 = vor.u32 %v3329_v8, %v2626_v7  ;;  %v2747_v29 = vor.u32 %v3359_v12, %v2746_v9 }
  0x30   :  { %1711 = vmatpush.bf16.msrb.mxu0 %v2467_v24  ;;  %v2874_v15 = vld [vmem:[%s5247_s1 + $0x570] sm:$0xf]  ;;  %v3391_v16 = vld [vmem:[%s5247_s1 + $0x574] sm:$0xf0]  ;;  %v2563_v24 = vor.u32 %v3313_v4, %v2562_v3  ;;  %v3203_v31 = vld [vmem:[%s5248_s0 + $0x1c] sm:$0xf]  ;;  %v2811_v33 = vor.u32 %v3375_v14, %v2810_v13 }
  0x31   :  { %1725 = vmatpush.bf16.msrb.mxu1 %v2531_v25  ;;  %v2938_v18 = vld [vmem:[%s5247_s1 + $0x5f0] sm:$0xf]  ;;  %v3407_v20 = vld [vmem:[%s5247_s1 + $0x5f4] sm:$0xf0]  ;;  %v2140_v32 = vld [vmem:[%s5248_s0 + $0x58] sm:$0xf0]  ;;  %v2875_v34 = vor.u32 %v3391_v16, %v2874_v15 }
  0x32   :  { %1739 = vmatpush.bf16.msrb.mxu2 %v2595_v26  ;;  %v2130_v21 = vld [vmem:[%s5248_s0 + $0x10] sm:$0xf]  ;;  %v2138_v25 = vld [vmem:[%s5248_s0 + $0x18] sm:$0xf]  ;;  %v2738_v35 = vld [vmem:[%s5247_s1 + $0x460] sm:$0xf]  ;;  %v3990_v47 = vor.u32 %v3203_v31, %v2140_v32 }
  0x33   :  { %1753 = vmatpush.bf16.msrb.mxu3 %v2659_v30  ;;  %v3210_v22 = vld [vmem:[%s5248_s0 + $0x4c] sm:$0xf0]  ;;  %v3211_v26 = vld [vmem:[%s5248_s0 + $0x54] sm:$0xf0]  ;;  %v2132_v30 = vld [vmem:[%s5248_s0 + $0x50] sm:$0xf0] }
  0x34   :  { %1712 = vmatpush.bf16.msrb.mxu0 %v2459_v36  ;;  %v3357_v36 = vld [vmem:[%s5247_s1 + $0x464] sm:$0xf0]  ;;  %v3969_v39 = vor.u32 %v3210_v22, %v2130_v21  ;;  %v2866_v41 = vld [vmem:[%s5247_s1 + $0x560] sm:$0xf]  ;;  %v3980_v43 = vor.u32 %v3211_v26, %v2138_v25  ;;  %v3982_v44 = vor.u32 %v3202_v27, %v2132_v30  ;;  %v3355_v52 = vld [vmem:[%s5247_s1 + $0x454] sm:$0xf0] }
  0x35   :  { %1726 = vmatpush.bf16.msrb.mxu1 %v2523_v37  ;;  %v2802_v37 = vld [vmem:[%s5247_s1 + $0x4e0] sm:$0xf]  ;;  %v3373_v40 = vld [vmem:[%s5247_s1 + $0x4e4] sm:$0xf0]  ;;  %v2794_v53 = vld [vmem:[%s5247_s1 + $0x4d0] sm:$0xf] }
  0x36   :  { %1740 = vmatpush.bf16.msrb.mxu2 %v2587_v38  ;;  %v2939_v38 = vor.u32 %v3407_v20, %v2938_v18  ;;  %v2930_v45 = vld [vmem:[%s5247_s1 + $0x5e0] sm:$0xf]  ;;  %v3405_v46 = vld [vmem:[%s5247_s1 + $0x5e4] sm:$0xf0]  ;;  %v2803_v49 = vor.u32 %v3373_v40, %v2802_v37  ;;  %v2858_v56 = vld [vmem:[%s5247_s1 + $0x550] sm:$0xf] }
  0x37   :  { %1754 = vmatpush.bf16.msrb.mxu3 %v2651_v42  ;;  %v3389_v42 = vld [vmem:[%s5247_s1 + $0x564] sm:$0xf0]  ;;  %v2931_v54 = vor.u32 %v3405_v46, %v2930_v45  ;;  %v3387_v57 = vld [vmem:[%s5247_s1 + $0x554] sm:$0xf0]  ;;  %v2922_v59 = vld [vmem:[%s5247_s1 + $0x5d0] sm:$0xf] }
  0x38   :  { %1713 = vmatpush.bf16.msrb.mxu0 %v2451_v48  ;;  %v2739_v48 = vor.u32 %v3357_v36, %v2738_v35  ;;  %v3403_v60 = vld [vmem:[%s5247_s1 + $0x5d4] sm:$0xf0]  ;;  %v2722_v0 = vld [vmem:[%s5247_s1 + $0x440] sm:$0xf]  ;;  %v3353_v2 = vld [vmem:[%s5247_s1 + $0x444] sm:$0xf0] }
  0x39   :  { %1727 = vmatpush.bf16.msrb.mxu1 %v2515_v50  ;;  %v2867_v50 = vor.u32 %v3389_v42, %v2866_v41  ;;  %v2786_v3 = vld [vmem:[%s5247_s1 + $0x4c0] sm:$0xf]  ;;  %v2923_v4 = vor.u32 %v3403_v60, %v2922_v59  ;;  %v3385_v7 = vld [vmem:[%s5247_s1 + $0x544] sm:$0xf0]  ;;  %v2714_v14 = vld [vmem:[%s5247_s1 + $0x430] sm:$0xf] }
  0x3a   :  { %1741 = vmatpush.bf16.msrb.mxu2 %v2579_v51  ;;  %v2730_v51 = vld [vmem:[%s5247_s1 + $0x450] sm:$0xf]  ;;  %v2914_v8 = vld [vmem:[%s5247_s1 + $0x5c0] sm:$0xf]  ;;  %v3401_v9 = vld [vmem:[%s5247_s1 + $0x5c4] sm:$0xf0] }
  0x3b   :  { %1755 = vmatpush.bf16.msrb.mxu3 %v2643_v55  ;;  %v3371_v55 = vld [vmem:[%s5247_s1 + $0x4d4] sm:$0xf0]  ;;  %v2731_v61 = vor.u32 %v3355_v52, %v2730_v51  ;;  %v2778_v16 = vld [vmem:[%s5247_s1 + $0x4b0] sm:$0xf]  ;;  %v2915_v18 = vor.u32 %v3401_v9, %v2914_v8  ;;  %v2706_v27 = vld [vmem:[%s5247_s1 + $0x420] sm:$0xf] }
  0x3c   :  { %1714 = vmatpush.bf16.msrb.mxu0 %v2443_v63  ;;  %v2795_v62 = vor.u32 %v3371_v55, %v2794_v53  ;;  %v2859_v63 = vor.u32 %v3387_v57, %v2858_v56  ;;  %v3351_v15 = vld [vmem:[%s5247_s1 + $0x434] sm:$0xf0]  ;;  %v2842_v20 = vld [vmem:[%s5247_s1 + $0x530] sm:$0xf]  ;;  %v3365_v31 = vld [vmem:[%s5247_s1 + $0x4a4] sm:$0xf0] }
  0x3d   :  { %1728 = vmatpush.bf16.msrb.mxu1 %v2507_v5  ;;  %v3369_v5 = vld [vmem:[%s5247_s1 + $0x4c4] sm:$0xf0]  ;;  %v3383_v21 = vld [vmem:[%s5247_s1 + $0x534] sm:$0xf0]  ;;  %v2906_v22 = vld [vmem:[%s5247_s1 + $0x5b0] sm:$0xf] }
  0x3e   :  { %1742 = vmatpush.bf16.msrb.mxu2 %v2571_v6  ;;  %v2850_v6 = vld [vmem:[%s5247_s1 + $0x540] sm:$0xf]  ;;  %v2787_v12 = vor.u32 %v3369_v5, %v2786_v3  ;;  %v2843_v26 = vor.u32 %v3383_v21, %v2842_v20  ;;  %v3397_v35 = vld [vmem:[%s5247_s1 + $0x5a4] sm:$0xf0]  ;;  %v2698_v37 = vld [vmem:[%s5247_s1 + $0x410] sm:$0xf] }
  0x3f   :  { %1756 = vmatpush.bf16.msrb.mxu3 %v2635_v11  ;;  %v2723_v11 = vor.u32 %v3353_v2, %v2722_v0  ;;  %v2851_v13 = vor.u32 %v3385_v7, %v2850_v6  ;;  %v2834_v32 = vld [vmem:[%s5247_s1 + $0x520] sm:$0xf]  ;;  %v3347_v41 = vld [vmem:[%s5247_s1 + $0x414] sm:$0xf0]  ;;  %v2762_v42 = vld [vmem:[%s5247_s1 + $0x490] sm:$0xf] }
  0x40   :  { %1715 = vmatpush.bf16.msrb.mxu0 %v2435_v19  ;;  %v3367_v19 = vld [vmem:[%s5247_s1 + $0x4b4] sm:$0xf0]  ;;  %v2690_v52 = vld [vmem:[%s5247_s1 + $0x400] sm:$0xf]  ;;  %v3345_v53 = vld [vmem:[%s5247_s1 + $0x404] sm:$0xf0] }
  0x41   :  { %1729 = vmatpush.bf16.msrb.mxu1 %v2499_v23  ;;  %v3399_v23 = vld [vmem:[%s5247_s1 + $0x5b4] sm:$0xf0]  ;;  %v2779_v25 = vor.u32 %v3367_v19, %v2778_v16  ;;  %v2754_v55 = vld [vmem:[%s5247_s1 + $0x480] sm:$0xf]  ;;  %v3361_v56 = vld [vmem:[%s5247_s1 + $0x484] sm:$0xf0]  ;;  %v2691_v9 = vor.u32 %v3345_v53, %v2690_v52 }
  0x42   :  { %1743 = vmatpush.bf16.msrb.mxu2 %v2563_v24  ;;  %v2715_v24 = vor.u32 %v3351_v15, %v2714_v14  ;;  %v2907_v30 = vor.u32 %v3399_v23, %v2906_v22  ;;  %v3363_v45 = vld [vmem:[%s5247_s1 + $0x494] sm:$0xf0]  ;;  %v2818_v57 = vld [vmem:[%s5247_s1 + $0x500] sm:$0xf]  ;;  %v3377_v59 = vld [vmem:[%s5247_s1 + $0x504] sm:$0xf0]  ;;  %v2755_v14 = vor.u32 %v3361_v56, %v2754_v55 }
  0x43   :  { %1757 = vmatpush.bf16.msrb.mxu3 %v2627_v28  ;;  %1716 = vmatmul.bf16.vlgmr.msrb.gmra.mxu0 %v3969_v39  ;;  %v3349_v28 = vld [vmem:[%s5247_s1 + $0x424] sm:$0xf0]  ;;  %v3395_v51 = vld [vmem:[%s5247_s1 + $0x594] sm:$0xf0]  ;;  %v2763_v60 = vor.u32 %v3363_v45, %v2762_v42  ;;  %v3002_v0 = vld [vmem:[%s5247_s1 + $0x670] sm:$0xf]  ;;  %v2819_v15 = vor.u32 %v3377_v59, %v2818_v57 }
  0x44   :  { %1764 = vmatpush.bf16.msra.mxu0 %v2747_v29  ;;  %1730 = vmatmul.bf16.vlgmr.msrb.gmra.mxu1 %v3982_v44  ;;  %v2770_v29 = vld [vmem:[%s5247_s1 + $0x4a0] sm:$0xf]  ;;  %v2707_v36 = vor.u32 %v3349_v28, %v2706_v27  ;;  %v3423_v3 = vld [vmem:[%s5247_s1 + $0x674] sm:$0xf0]  ;;  %v3130_v6 = vld [vmem:[%s5247_s1 + $0x770] sm:$0xf] }
  0x45   :  { %1778 = vmatpush.bf16.msra.mxu1 %v2811_v33  ;;  %1744 = vmatmul.bf16.vlgmr.msrb.gmra.mxu2 %v3980_v43  ;;  %v3381_v33 = vld [vmem:[%s5247_s1 + $0x524] sm:$0xf0]  ;;  %v3439_v5 = vld [vmem:[%s5247_s1 + $0x6f4] sm:$0xf0]  ;;  %v3194_v8 = vld [vmem:[%s5247_s1 + $0x7f0] sm:$0xf]  ;;  %v3003_v21 = vor.u32 %v3423_v3, %v3002_v0 }
  0x46   :  { %1792 = vmatpush.bf16.msra.mxu2 %v2875_v34  ;;  %1758 = vmatmul.bf16.vlgmr.msrb.gmra.mxu3 %v3990_v47  ;;  %v2898_v34 = vld [vmem:[%s5247_s1 + $0x5a0] sm:$0xf]  ;;  %v2835_v40 = vor.u32 %v3381_v33, %v2834_v32  ;;  %v3455_v7 = vld [vmem:[%s5247_s1 + $0x774] sm:$0xf0]  ;;  %v2154_v16 = vld [vmem:[%s5248_s0 + $0x28] sm:$0xf] }
  0x47   :  { %1806 = vmatpush.bf16.msra.mxu3 %v2939_v38  ;;  %v2771_v38 = vor.u32 %v3365_v31, %v2770_v29  ;;  %v2899_v46 = vor.u32 %v3397_v35, %v2898_v34  ;;  %v3204_v19 = vld [vmem:[%s5248_s0 + $0x24] sm:$0xf]  ;;  %v3205_v23 = vld [vmem:[%s5248_s0 + $0x2c] sm:$0xf]  ;;  %v2994_v27 = vld [vmem:[%s5247_s1 + $0x660] sm:$0xf] }
  0x48   :  { %1765 = vmatpush.bf16.msra.mxu0 %v2739_v48  ;;  %v2826_v48 = vld [vmem:[%s5247_s1 + $0x510] sm:$0xf]  ;;  %v2148_v22 = vld [vmem:[%s5248_s0 + $0x60] sm:$0xf0]  ;;  %v3421_v28 = vld [vmem:[%s5247_s1 + $0x664] sm:$0xf0] }
  0x49   :  { %1779 = vmatpush.bf16.msra.mxu1 %v2803_v49  ;;  %v3379_v49 = vld [vmem:[%s5247_s1 + $0x514] sm:$0xf0]  ;;  %v3058_v29 = vld [vmem:[%s5247_s1 + $0x6e0] sm:$0xf]  ;;  %v3437_v32 = vld [vmem:[%s5247_s1 + $0x6e4] sm:$0xf0] }
  0x4a   :  { %1793 = vmatpush.bf16.msra.mxu2 %v2867_v50  ;;  %v2890_v50 = vld [vmem:[%s5247_s1 + $0x590] sm:$0xf]  ;;  %v3122_v33 = vld [vmem:[%s5247_s1 + $0x760] sm:$0xf]  ;;  %v3453_v34 = vld [vmem:[%s5247_s1 + $0x764] sm:$0xf0]  ;;  %v3059_v42 = vor.u32 %v3437_v32, %v3058_v29 }
  0x4b   :  { %1807 = vmatpush.bf16.msra.mxu3 %v2931_v54  ;;  %v2699_v54 = vor.u32 %v3347_v41, %v2698_v37  ;;  %v2891_v2 = vor.u32 %v3395_v51, %v2890_v50  ;;  %v3186_v37 = vld [vmem:[%s5247_s1 + $0x7e0] sm:$0xf]  ;;  %v2995_v41 = vor.u32 %v3421_v28, %v2994_v27  ;;  %v3123_v45 = vor.u32 %v3453_v34, %v3122_v33  ;;  %v3435_v51 = vld [vmem:[%s5247_s1 + $0x6d4] sm:$0xf0]  ;;  %v3114_v52 = vld [vmem:[%s5247_s1 + $0x750] sm:$0xf] }
  0x4c   :  { %1766 = vmatpush.bf16.msra.mxu0 %v2731_v61  ;;  %v2827_v61 = vor.u32 %v3379_v49, %v2826_v48  ;;  %v3419_v48 = vld [vmem:[%s5247_s1 + $0x654] sm:$0xf0]  ;;  %v3050_v49 = vld [vmem:[%s5247_s1 + $0x6d0] sm:$0xf]  ;;  %v3433_v0 = vld [vmem:[%s5247_s1 + $0x6c4] sm:$0xf0] }
  0x4d   :  { %1780 = vmatpush.bf16.msra.mxu1 %v2795_v62  ;;  %v2882_v62 = vld [vmem:[%s5247_s1 + $0x580] sm:$0xf]  ;;  %v3451_v53 = vld [vmem:[%s5247_s1 + $0x754] sm:$0xf0]  ;;  %v3051_v57 = vor.u32 %v3435_v51, %v3050_v49  ;;  %v3449_v3 = vld [vmem:[%s5247_s1 + $0x744] sm:$0xf0] }
  0x4e   :  { %1794 = vmatpush.bf16.msra.mxu2 %v2859_v63  ;;  %v3393_v63 = vld [vmem:[%s5247_s1 + $0x584] sm:$0xf0]  ;;  %v3467_v55 = vld [vmem:[%s5247_s1 + $0x7d4] sm:$0xf0]  ;;  %v3115_v59 = vor.u32 %v3451_v53, %v3114_v52  ;;  %v3090_v28 = vld [vmem:[%s5247_s1 + $0x720] sm:$0xf] }
  0x4f   :  { %1808 = vmatpush.bf16.msra.mxu3 %v2923_v4  ;;  %v3066_v4 = vld [vmem:[%s5247_s1 + $0x6f0] sm:$0xf]  ;;  %v2883_v20 = vor.u32 %v3393_v63, %v2882_v62  ;;  %v3042_v62 = vld [vmem:[%s5247_s1 + $0x6c0] sm:$0xf]  ;;  %v3429_v27 = vld [vmem:[%s5247_s1 + $0x6a4] sm:$0xf0] }
  0x50   :  { %1767 = vmatpush.bf16.msra.mxu0 %v2723_v11  ;;  %v3471_v11 = vld [vmem:[%s5247_s1 + $0x7f4] sm:$0xf0]  ;;  %v3445_v29 = vld [vmem:[%s5247_s1 + $0x724] sm:$0xf0]  ;;  %v2954_v34 = vld [vmem:[%s5247_s1 + $0x610] sm:$0xf] }
  0x51   :  { %1781 = vmatpush.bf16.msra.mxu1 %v2787_v12  ;;  %v2146_v12 = vld [vmem:[%s5248_s0 + $0x20] sm:$0xf]  ;;  %v3461_v32 = vld [vmem:[%s5247_s1 + $0x7a4] sm:$0xf0]  ;;  %v3443_v49 = vld [vmem:[%s5247_s1 + $0x714] sm:$0xf0] }
  0x52   :  { %1795 = vmatpush.bf16.msra.mxu2 %v2851_v13  ;;  %v3212_v13 = vld [vmem:[%s5248_s0 + $0x5c] sm:$0xf0]  ;;  %v3459_v51 = vld [vmem:[%s5247_s1 + $0x794] sm:$0xf0]  ;;  %v3409_v53 = vld [vmem:[%s5247_s1 + $0x604] sm:$0xf0] }
  0x53   :  { %1809 = vmatpush.bf16.msra.mxu3 %v2915_v18  ;;  %v3213_v18 = vld [vmem:[%s5248_s0 + $0x64] sm:$0xf0]  ;;  %v4197_v31 = vor.u32 %v3212_v13, %v2146_v12  ;;  %v3034_v12 = vld [vmem:[%s5247_s1 + $0x6b0] sm:$0xf]  ;;  %v2946_v52 = vld [vmem:[%s5247_s1 + $0x600] sm:$0xf] }
  0x54   :  { %1768 = vmatpush.bf16.msra.mxu0 %v2715_v24  ;;  %v2156_v24 = vld [vmem:[%s5248_s0 + $0x68] sm:$0xf0]  ;;  %v4208_v35 = vor.u32 %v3213_v18, %v2154_v16  ;;  %v3447_v16 = vld [vmem:[%s5247_s1 + $0x734] sm:$0xf0]  ;;  %v3162_v18 = vld [vmem:[%s5247_s1 + $0x7b0] sm:$0xf] }
  0x55   :  { %1782 = vmatpush.bf16.msra.mxu1 %v2779_v25  ;;  %v3067_v25 = vor.u32 %v3439_v5, %v3066_v4  ;;  %v3170_v4 = vld [vmem:[%s5247_s1 + $0x7c0] sm:$0xf]  ;;  %v3465_v5 = vld [vmem:[%s5247_s1 + $0x7c4] sm:$0xf0] }
  0x56   :  { %1796 = vmatpush.bf16.msra.mxu2 %v2843_v26  ;;  %v3131_v26 = vor.u32 %v3455_v7, %v3130_v6  ;;  %v3043_v7 = vor.u32 %v3433_v0, %v3042_v62  ;;  %v3171_v13 = vor.u32 %v3465_v5, %v3170_v4  ;;  %v3138_v62 = vld [vmem:[%s5247_s1 + $0x780] sm:$0xf]  ;;  %v3230_v0 = vld [vmem:[%s5247_s1 + $0x74] sm:$0xf]  ;;  %v2300_v5 = vld [vmem:[%s5247_s1 + $0xf8] sm:$0xf0] }
  0x57   :  { %1810 = vmatpush.bf16.msra.mxu3 %v2907_v30  ;;  %v3195_v30 = vor.u32 %v3471_v11, %v3194_v8  ;;  %v3415_v11 = vld [vmem:[%s5247_s1 + $0x634] sm:$0xf0]  ;;  %v3246_v4 = vld [vmem:[%s5247_s1 + $0xf4] sm:$0xf] }
  0x58   :  { %1769 = vmatpush.bf16.msra.mxu0 %v2707_v36  ;;  %v4210_v36 = vor.u32 %v3204_v19, %v2148_v22  ;;  %v3463_v19 = vld [vmem:[%s5247_s1 + $0x7b4] sm:$0xf0] }
  0x59   :  { %1783 = vmatpush.bf16.msra.mxu1 %v2771_v38  ;;  %v3469_v38 = vld [vmem:[%s5247_s1 + $0x7e4] sm:$0xf0] }
  0x5a   :  { %1797 = vmatpush.bf16.msra.mxu2 %v2835_v40  ;;  %v4218_v40 = vor.u32 %v3205_v23, %v2156_v24  ;;  %v3187_v50 = vor.u32 %v3469_v38, %v3186_v37  ;;  %v2962_v23 = vld [vmem:[%s5247_s1 + $0x620] sm:$0xf]  ;;  %v3413_v24 = vld [vmem:[%s5247_s1 + $0x624] sm:$0xf0]  ;;  %v3091_v38 = vor.u32 %v3445_v29, %v3090_v28  ;;  %v2228_v28 = vld [vmem:[%s5247_s1 + $0x68] sm:$0xf0] }
  0x5b   :  { %1811 = vmatpush.bf16.msra.mxu3 %v2899_v46  ;;  %v2986_v46 = vld [vmem:[%s5247_s1 + $0x650] sm:$0xf]  ;;  %v2963_v33 = vor.u32 %v3413_v24, %v2962_v23  ;;  %v3207_v23 = vld [vmem:[%s5248_s0 + $0x3c] sm:$0xf]  ;;  %v3244_v29 = vld [vmem:[%s5247_s1 + $0xe4] sm:$0xf] }
  0x5c   :  { %1770 = vmatpush.bf16.msra.mxu0 %v2699_v54  ;;  %v3178_v54 = vld [vmem:[%s5247_s1 + $0x7d0] sm:$0xf]  ;;  %v2987_v56 = vor.u32 %v3419_v48, %v2986_v46  ;;  %v2172_v24 = vld [vmem:[%s5248_s0 + $0x78] sm:$0xf0] }
  0x5d   :  { %1784 = vmatpush.bf16.msra.mxu1 %v2763_v60  ;;  %v2978_v60 = vld [vmem:[%s5247_s1 + $0x640] sm:$0xf]  ;;  %v3179_v63 = vor.u32 %v3467_v55, %v3178_v54  ;;  %v3082_v48 = vld [vmem:[%s5247_s1 + $0x710] sm:$0xf] }
  0x5e   :  { %1798 = vmatpush.bf16.msra.mxu2 %v2827_v61  ;;  %v3417_v61 = vld [vmem:[%s5247_s1 + $0x644] sm:$0xf0]  ;;  %v3010_v55 = vld [vmem:[%s5247_s1 + $0x680] sm:$0xf] }
  0x5f   :  { %1812 = vmatpush.bf16.msra.mxu3 %v2891_v2  ;;  %v3106_v2 = vld [vmem:[%s5247_s1 + $0x740] sm:$0xf]  ;;  %v2979_v6 = vor.u32 %v3417_v61, %v2978_v60  ;;  %v3083_v61 = vor.u32 %v3443_v49, %v3082_v48 }
  0x60   :  { %1771 = vmatpush.bf16.msra.mxu0 %v2691_v9  ;;  %v3107_v8 = vor.u32 %v3449_v3, %v3106_v2  ;;  %v2970_v9 = vld [vmem:[%s5247_s1 + $0x630] sm:$0xf]  ;;  %v2236_v3 = vld [vmem:[%s5247_s1 + $0x78] sm:$0xf0] }
  0x61   :  { %1785 = vmatpush.bf16.msra.mxu1 %v2755_v14  ;;  %v3431_v14 = vld [vmem:[%s5247_s1 + $0x6b4] sm:$0xf0] }
  0x62   :  { %1799 = vmatpush.bf16.msra.mxu2 %v2819_v15  ;;  %v3098_v15 = vld [vmem:[%s5247_s1 + $0x730] sm:$0xf] }
  0x63   :  { %1813 = vmatpush.bf16.msra.mxu3 %v2883_v20  ;;  %1772 = vmatmul.bf16.vlgmr.msra.gmra.mxu0 %v4197_v31  ;;  %v2971_v20 = vor.u32 %v3415_v11, %v2970_v9  ;;  %v3099_v22 = vor.u32 %v3447_v16, %v3098_v15  ;;  %v2947_v9 = vor.u32 %v3409_v53, %v2946_v52  ;;  %v2428_v11 = vld [vmem:[%s5247_s1 + $0x1f8] sm:$0xf0]  ;;  %v2170_v16 = vld [vmem:[%s5248_s0 + $0x38] sm:$0xf]  ;;  %v3242_v53 = vld [vmem:[%s5247_s1 + $0xd4] sm:$0xf] }
  0x64   :  { %1820 = vmatpush.bf16.msrb.mxu0 %v3003_v21  ;;  %1786 = vmatmul.bf16.vlgmr.msra.gmra.mxu1 %v4210_v36  ;;  %v3035_v21 = vor.u32 %v3431_v14, %v3034_v12  ;;  %v2162_v12 = vld [vmem:[%s5248_s0 + $0x30] sm:$0xf]  ;;  %v2220_v52 = vld [vmem:[%s5247_s1 + $0x58] sm:$0xf0] }
  0x65   :  { %1834 = vmatpush.bf16.msrb.mxu1 %v3067_v25  ;;  %1800 = vmatmul.bf16.vlgmr.msra.gmra.mxu2 %v4208_v35  ;;  %v3026_v25 = vld [vmem:[%s5247_s1 + $0x6a0] sm:$0xf] }
  0x66   :  { %1848 = vmatpush.bf16.msrb.mxu2 %v3131_v26  ;;  %1814 = vmatmul.bf16.vlgmr.msra.gmra.mxu3 %v4218_v40  ;;  %v3163_v26 = vor.u32 %v3463_v19, %v3162_v18  ;;  %v3027_v37 = vor.u32 %v3429_v27, %v3026_v25  ;;  %v3215_v18 = vld [vmem:[%s5248_s0 + $0x74] sm:$0xf0]  ;;  %v3206_v19 = vld [vmem:[%s5248_s0 + $0x34] sm:$0xf]  ;;  %v2303_v25 = vor.u32 %v3246_v4, %v2300_v5  ;;  %v3228_v27 = vld [vmem:[%s5247_s1 + $0x64] sm:$0xf] }
  0x67   :  { %1862 = vmatpush.bf16.msrb.mxu3 %v3195_v30  ;;  %v3154_v30 = vld [vmem:[%s5247_s1 + $0x7a0] sm:$0xf]  ;;  %v2231_v48 = vor.u32 %v3228_v27, %v2228_v28  ;;  %v2276_v5 = vld [vmem:[%s5247_s1 + $0xc8] sm:$0xf0]  ;;  %v3220_v27 = vld [vmem:[%s5247_s1 + $0x24] sm:$0xf] }
  0x68   :  { %1821 = vmatpush.bf16.msrb.mxu0 %v2995_v41  ;;  %v3411_v41 = vld [vmem:[%s5247_s1 + $0x614] sm:$0xf0]  ;;  %v3155_v46 = vor.u32 %v3461_v32, %v3154_v30  ;;  %v2196_v28 = vld [vmem:[%s5247_s1 + $0x28] sm:$0xf0] }
  0x69   :  { %1835 = vmatpush.bf16.msrb.mxu1 %v3059_v42  ;;  %v3018_v42 = vld [vmem:[%s5247_s1 + $0x690] sm:$0xf]  ;;  %v2955_v54 = vor.u32 %v3411_v41, %v2954_v34  ;;  %v3260_v34 = vld [vmem:[%s5247_s1 + $0x164] sm:$0xf] }
  0x6a   :  { %1849 = vmatpush.bf16.msrb.mxu2 %v3123_v45  ;;  %v3427_v45 = vld [vmem:[%s5247_s1 + $0x694] sm:$0xf0] }
  0x6b   :  { %1863 = vmatpush.bf16.msrb.mxu3 %v3187_v50  ;;  %v3146_v50 = vld [vmem:[%s5247_s1 + $0x790] sm:$0xf]  ;;  %v3019_v60 = vor.u32 %v3427_v45, %v3018_v42  ;;  %v3276_v42 = vld [vmem:[%s5247_s1 + $0x1e4] sm:$0xf]  ;;  %v2420_v45 = vld [vmem:[%s5247_s1 + $0x1e8] sm:$0xf0] }
  0x6c   :  { %1822 = vmatpush.bf16.msrb.mxu0 %v2987_v56  ;;  %v3425_v56 = vld [vmem:[%s5247_s1 + $0x684] sm:$0xf0]  ;;  %v3147_v2 = vor.u32 %v3459_v51, %v3146_v50  ;;  %v3226_v51 = vld [vmem:[%s5247_s1 + $0x54] sm:$0xf] }
  0x6d   :  { %1836 = vmatpush.bf16.msrb.mxu1 %v3051_v57  ;;  %v3074_v57 = vld [vmem:[%s5247_s1 + $0x700] sm:$0xf]  ;;  %v3011_v14 = vor.u32 %v3425_v56, %v3010_v55  ;;  %v2284_v55 = vld [vmem:[%s5247_s1 + $0xd8] sm:$0xf0]  ;;  %v3258_v56 = vld [vmem:[%s5247_s1 + $0x154] sm:$0xf] }
  0x6e   :  { %1850 = vmatpush.bf16.msrb.mxu2 %v3115_v59  ;;  %v3441_v59 = vld [vmem:[%s5247_s1 + $0x704] sm:$0xf0] }
  0x6f   :  { %1864 = vmatpush.bf16.msrb.mxu3 %v3179_v63  ;;  %v3457_v63 = vld [vmem:[%s5247_s1 + $0x784] sm:$0xf0]  ;;  %v3075_v15 = vor.u32 %v3441_v59, %v3074_v57  ;;  %v2348_v57 = vld [vmem:[%s5247_s1 + $0x158] sm:$0xf0]  ;;  %v3274_v59 = vld [vmem:[%s5247_s1 + $0x1d4] sm:$0xf] }
  0x70   :  { %1823 = vmatpush.bf16.msrb.mxu0 %v2979_v6  ;;  %v3262_v6 = vld [vmem:[%s5247_s1 + $0x174] sm:$0xf] }
  0x71   :  { %1837 = vmatpush.bf16.msrb.mxu1 %v3043_v7  ;;  %v2364_v7 = vld [vmem:[%s5247_s1 + $0x178] sm:$0xf0] }
  0x72   :  { %1851 = vmatpush.bf16.msrb.mxu2 %v3107_v8  ;;  %v3278_v8 = vld [vmem:[%s5247_s1 + $0x1f4] sm:$0xf] }
  0x73   :  { %1865 = vmatpush.bf16.msrb.mxu3 %v3171_v13  ;;  %v3214_v13 = vld [vmem:[%s5248_s0 + $0x6c] sm:$0xf0]  ;;  %v2431_v30 = vor.u32 %v3278_v8, %v2428_v11  ;;  %v3272_v8 = vld [vmem:[%s5247_s1 + $0x1c4] sm:$0xf] }
  0x74   :  { %1824 = vmatpush.bf16.msrb.mxu0 %v2971_v20  ;;  %v3139_v20 = vor.u32 %v3457_v63, %v3138_v62  ;;  %v4425_v32 = vor.u32 %v3214_v13, %v2162_v12  ;;  %v2287_v62 = vor.u32 %v3242_v53, %v2284_v55  ;;  %v2351_v63 = vor.u32 %v3258_v56, %v2348_v57  ;;  %v3234_v53 = vld [vmem:[%s5247_s1 + $0x94] sm:$0xf]  ;;  %v2252_v55 = vld [vmem:[%s5247_s1 + $0x98] sm:$0xf0] }
  0x75   :  { %1838 = vmatpush.bf16.msrb.mxu1 %v3035_v21  ;;  %v2239_v21 = vor.u32 %v3230_v0, %v2236_v3  ;;  %v3224_v0 = vld [vmem:[%s5247_s1 + $0x44] sm:$0xf]  ;;  %v3250_v56 = vld [vmem:[%s5247_s1 + $0x114] sm:$0xf]  ;;  %v2316_v57 = vld [vmem:[%s5247_s1 + $0x118] sm:$0xf0] }
  0x76   :  { %1852 = vmatpush.bf16.msrb.mxu2 %v3099_v22  ;;  %v2164_v22 = vld [vmem:[%s5248_s0 + $0x70] sm:$0xf0]  ;;  %v3240_v3 = vld [vmem:[%s5247_s1 + $0xc4] sm:$0xf] }
  0x77   :  { %1866 = vmatpush.bf16.msrb.mxu3 %v3163_v26  ;;  %v2367_v26 = vor.u32 %v3262_v6, %v2364_v7  ;;  %v4438_v41 = vor.u32 %v3206_v19, %v2164_v22  ;;  %v3256_v6 = vld [vmem:[%s5247_s1 + $0x144] sm:$0xf]  ;;  %v2340_v7 = vld [vmem:[%s5247_s1 + $0x148] sm:$0xf0]  ;;  %v2279_v12 = vor.u32 %v3240_v3, %v2276_v5  ;;  %v2268_v19 = vld [vmem:[%s5247_s1 + $0xb8] sm:$0xf0] }
  0x78   :  { %1825 = vmatpush.bf16.msrb.mxu0 %v2963_v33  ;;  %v2292_v33 = vld [vmem:[%s5247_s1 + $0xe8] sm:$0xf0]  ;;  %v2343_v13 = vor.u32 %v3256_v6, %v2340_v7  ;;  %v3270_v22 = vld [vmem:[%s5247_s1 + $0x1b4] sm:$0xf]  ;;  %v3232_v3 = vld [vmem:[%s5247_s1 + $0x84] sm:$0xf] }
  0x79   :  { %1839 = vmatpush.bf16.msrb.mxu1 %v3027_v37  ;;  %v2356_v37 = vld [vmem:[%s5247_s1 + $0x168] sm:$0xf0]  ;;  %v2295_v49 = vor.u32 %v3244_v29, %v2292_v33  ;;  %v3236_v29 = vld [vmem:[%s5247_s1 + $0xa4] sm:$0xf] }
  0x7a   :  { %1853 = vmatpush.bf16.msrb.mxu2 %v3091_v38  ;;  %v4436_v38 = vor.u32 %v3215_v18, %v2170_v16  ;;  %v2359_v50 = vor.u32 %v3260_v34, %v2356_v37  ;;  %v3238_v16 = vld [vmem:[%s5247_s1 + $0xb4] sm:$0xf]  ;;  %v2260_v33 = vld [vmem:[%s5247_s1 + $0xa8] sm:$0xf0]  ;;  %v3252_v34 = vld [vmem:[%s5247_s1 + $0x124] sm:$0xf] }
  0x7b   :  { %1867 = vmatpush.bf16.msrb.mxu3 %v3155_v46  ;;  %v4446_v46 = vor.u32 %v3207_v23, %v2172_v24  ;;  %v2396_v23 = vld [vmem:[%s5247_s1 + $0x1b8] sm:$0xf0]  ;;  %v2324_v37 = vld [vmem:[%s5247_s1 + $0x128] sm:$0xf0]  ;;  %v3248_v5 = vld [vmem:[%s5247_s1 + $0x104] sm:$0xf] }
  0x7c   :  { %1826 = vmatpush.bf16.msrb.mxu0 %v2955_v54  ;;  %v2423_v54 = vor.u32 %v3276_v42, %v2420_v45  ;;  %v3268_v42 = vld [vmem:[%s5247_s1 + $0x1a4] sm:$0xf]  ;;  %v2388_v45 = vld [vmem:[%s5247_s1 + $0x1a8] sm:$0xf0] }
  0x7d   :  { %1840 = vmatpush.bf16.msrb.mxu1 %v3019_v60  ;;  %v2412_v60 = vld [vmem:[%s5247_s1 + $0x1d8] sm:$0xf0]  ;;  %v2308_v7 = vld [vmem:[%s5247_s1 + $0x108] sm:$0xf0] }
  0x7e   :  { %1854 = vmatpush.bf16.msrb.mxu2 %v3083_v61  ;;  %v2223_v61 = vor.u32 %v3226_v51, %v2220_v52  ;;  %v2415_v4 = vor.u32 %v3274_v59, %v2412_v60  ;;  %v3218_v51 = vld [vmem:[%s5247_s1 + $0x14] sm:$0xf]  ;;  %v2188_v52 = vld [vmem:[%s5247_s1 + $0x18] sm:$0xf0] }
  0x7f   :  { %1868 = vmatpush.bf16.msrb.mxu3 %v3147_v2  ;;  %v2212_v2 = vld [vmem:[%s5247_s1 + $0x48] sm:$0xf0]  ;;  %v3266_v59 = vld [vmem:[%s5247_s1 + $0x194] sm:$0xf]  ;;  %v2380_v60 = vld [vmem:[%s5247_s1 + $0x198] sm:$0xf0] }
  0x80   :  { %1827 = vmatpush.bf16.msrb.mxu0 %v2947_v9  ;;  %v2404_v9 = vld [vmem:[%s5247_s1 + $0x1c8] sm:$0xf0]  ;;  %v2215_v11 = vor.u32 %v3224_v0, %v2212_v2  ;;  %v2255_v0 = vor.u32 %v3234_v53, %v2252_v55  ;;  %v2319_v2 = vor.u32 %v3250_v56, %v2316_v57  ;;  %v2383_v6 = vor.u32 %v3266_v59, %v2380_v60  ;;  %v3306_v53 = vld [vmem:[%s5247_s1 + $0x2d4] sm:$0xf]  ;;  %v2540_v55 = vld [vmem:[%s5247_s1 + $0x2d8] sm:$0xf0] }
  0x81   :  { %1841 = vmatpush.bf16.msrb.mxu1 %v3011_v14  ;;  %v3222_v14 = vld [vmem:[%s5247_s1 + $0x34] sm:$0xf]  ;;  %v2407_v18 = vor.u32 %v3272_v8, %v2404_v9  ;;  %v3264_v8 = vld [vmem:[%s5247_s1 + $0x184] sm:$0xf]  ;;  %v2372_v9 = vld [vmem:[%s5247_s1 + $0x188] sm:$0xf0] }
  0x82   :  { %1855 = vmatpush.bf16.msrb.mxu2 %v3075_v15  ;;  %v2204_v15 = vld [vmem:[%s5247_s1 + $0x38] sm:$0xf0]  ;;  %v3322_v56 = vld [vmem:[%s5247_s1 + $0x354] sm:$0xf] }
  0x83   :  { %1869 = vmatpush.bf16.msrb.mxu3 %v3139_v20  ;;  %1828 = vmatmul.bf16.vlgmr.msrb.gmra.mxu0 %v4425_v32  ;;  %v3254_v20 = vld [vmem:[%s5247_s1 + $0x134] sm:$0xf]  ;;  %v2207_v24 = vor.u32 %v3222_v14, %v2204_v15  ;;  %v2556_v15 = vld [vmem:[%s5247_s1 + $0x2f8] sm:$0xf0] }
  0x84   :  { %1876 = vmatpush.bf16.msra.mxu0 %v2239_v21  ;;  %1842 = vmatmul.bf16.vlgmr.msrb.gmra.mxu1 %v4438_v41  ;;  %v2332_v21 = vld [vmem:[%s5247_s1 + $0x138] sm:$0xf0]  ;;  %v3338_v59 = vld [vmem:[%s5247_s1 + $0x3d4] sm:$0xf] }
  0x85   :  { %1890 = vmatpush.bf16.msra.mxu1 %v2303_v25  ;;  %1856 = vmatmul.bf16.vlgmr.msrb.gmra.mxu2 %v4436_v38  ;;  %v2271_v25 = vor.u32 %v3238_v16, %v2268_v19  ;;  %v3326_v16 = vld [vmem:[%s5247_s1 + $0x374] sm:$0xf]  ;;  %v2604_v57 = vld [vmem:[%s5247_s1 + $0x358] sm:$0xf0] }
  0x86   :  { %1904 = vmatpush.bf16.msra.mxu2 %v2367_v26  ;;  %1870 = vmatmul.bf16.vlgmr.msrb.gmra.mxu3 %v4446_v46  ;;  %v2335_v26 = vor.u32 %v3254_v20, %v2332_v21  ;;  %v2311_v20 = vor.u32 %v3248_v5, %v2308_v7  ;;  %v3342_v21 = vld [vmem:[%s5247_s1 + $0x3f4] sm:$0xf]  ;;  %v2668_v60 = vld [vmem:[%s5247_s1 + $0x3d8] sm:$0xf0]  ;;  %v2660_v5 = vld [vmem:[%s5247_s1 + $0x3c8] sm:$0xf0] }
  0x87   :  { %1918 = vmatpush.bf16.msra.mxu3 %v2431_v30  ;;  %v2399_v30 = vor.u32 %v3270_v22, %v2396_v23  ;;  %v2684_v22 = vld [vmem:[%s5247_s1 + $0x3f8] sm:$0xf0]  ;;  %v2375_v23 = vor.u32 %v3264_v8, %v2372_v9  ;;  %v3286_v9 = vld [vmem:[%s5247_s1 + $0x234] sm:$0xf] }
  0x88   :  { %1877 = vmatpush.bf16.msra.mxu0 %v2231_v48  ;;  %v2199_v48 = vor.u32 %v3220_v27, %v2196_v28  ;;  %v3292_v27 = vld [vmem:[%s5247_s1 + $0x264] sm:$0xf]  ;;  %v2484_v28 = vld [vmem:[%s5247_s1 + $0x268] sm:$0xf0] }
  0x89   :  { %1891 = vmatpush.bf16.msra.mxu1 %v2295_v49  ;;  %v2263_v49 = vor.u32 %v3236_v29, %v2260_v33  ;;  %v3308_v29 = vld [vmem:[%s5247_s1 + $0x2e4] sm:$0xf]  ;;  %v2548_v33 = vld [vmem:[%s5247_s1 + $0x2e8] sm:$0xf0] }
  0x8a   :  { %1905 = vmatpush.bf16.msra.mxu2 %v2359_v50  ;;  %v2327_v50 = vor.u32 %v3252_v34, %v2324_v37  ;;  %v3324_v34 = vld [vmem:[%s5247_s1 + $0x364] sm:$0xf]  ;;  %v2612_v37 = vld [vmem:[%s5247_s1 + $0x368] sm:$0xf0] }
  0x8b   :  { %1919 = vmatpush.bf16.msra.mxu3 %v2423_v54  ;;  %v2391_v54 = vor.u32 %v3268_v42, %v2388_v45  ;;  %v3340_v42 = vld [vmem:[%s5247_s1 + $0x3e4] sm:$0xf]  ;;  %v2676_v45 = vld [vmem:[%s5247_s1 + $0x3e8] sm:$0xf0] }
  0x8c   :  { %1878 = vmatpush.bf16.msra.mxu0 %v2223_v61  ;;  %v2191_v61 = vor.u32 %v3218_v51, %v2188_v52  ;;  %v3290_v51 = vld [vmem:[%s5247_s1 + $0x254] sm:$0xf]  ;;  %v2476_v52 = vld [vmem:[%s5247_s1 + $0x258] sm:$0xf0] }
  0x8d   :  { %1892 = vmatpush.bf16.msra.mxu1 %v2287_v62  ;;  %v3216_v62 = vld [vmem:[%s5247_s1 + $0x4] sm:$0xf] }
  0x8e   :  { %1906 = vmatpush.bf16.msra.mxu2 %v2351_v63  ;;  %v2180_v63 = vld [vmem:[%s5247_s1 + $0x8] sm:$0xf0] }
  0x8f   :  { %1920 = vmatpush.bf16.msra.mxu3 %v2415_v4  ;;  %v2244_v4 = vld [vmem:[%s5247_s1 + $0x88] sm:$0xf0]  ;;  %v2183_v14 = vor.u32 %v3216_v62, %v2180_v63  ;;  %v2543_v62 = vor.u32 %v3306_v53, %v2540_v55  ;;  %v3288_v63 = vld [vmem:[%s5247_s1 + $0x244] sm:$0xf]  ;;  %v2572_v53 = vld [vmem:[%s5247_s1 + $0x318] sm:$0xf0] }
  0x90   :  { %1879 = vmatpush.bf16.msra.mxu0 %v2215_v11  ;;  %v3294_v11 = vld [vmem:[%s5247_s1 + $0x274] sm:$0xf]  ;;  %v2247_v19 = vor.u32 %v3232_v3, %v2244_v4  ;;  %v2596_v3 = vld [vmem:[%s5247_s1 + $0x348] sm:$0xf0]  ;;  %v3336_v4 = vld [vmem:[%s5247_s1 + $0x3c4] sm:$0xf] }
  0x91   :  { %1893 = vmatpush.bf16.msra.mxu1 %v2279_v12  ;;  %v2492_v12 = vld [vmem:[%s5247_s1 + $0x278] sm:$0xf0] }
  0x92   :  { %1907 = vmatpush.bf16.msra.mxu2 %v2343_v13  ;;  %v3310_v13 = vld [vmem:[%s5247_s1 + $0x2f4] sm:$0xf]  ;;  %v2636_v55 = vld [vmem:[%s5247_s1 + $0x398] sm:$0xf0] }
  0x93   :  { %1921 = vmatpush.bf16.msra.mxu3 %v2407_v18  ;;  %v2620_v18 = vld [vmem:[%s5247_s1 + $0x378] sm:$0xf0] }
  0x94   :  { %1880 = vmatpush.bf16.msra.mxu0 %v2207_v24  ;;  %v2495_v24 = vor.u32 %v3294_v11, %v2492_v12  ;;  %v2460_v11 = vld [vmem:[%s5247_s1 + $0x238] sm:$0xf0]  ;;  %v3302_v12 = vld [vmem:[%s5247_s1 + $0x2b4] sm:$0xf] }
  0x95   :  { %1894 = vmatpush.bf16.msra.mxu1 %v2271_v25  ;;  %v2559_v25 = vor.u32 %v3310_v13, %v2556_v15  ;;  %v2663_v13 = vor.u32 %v3336_v4, %v2660_v5  ;;  %v3318_v15 = vld [vmem:[%s5247_s1 + $0x334] sm:$0xf] }
  0x96   :  { %1908 = vmatpush.bf16.msra.mxu2 %v2335_v26  ;;  %v2623_v26 = vor.u32 %v3326_v16, %v2620_v18  ;;  %v2588_v16 = vld [vmem:[%s5247_s1 + $0x338] sm:$0xf0]  ;;  %v3334_v18 = vld [vmem:[%s5247_s1 + $0x3b4] sm:$0xf] }
  0x97   :  { %1922 = vmatpush.bf16.msra.mxu3 %v2399_v30  ;;  %v2687_v30 = vor.u32 %v3342_v21, %v2684_v22  ;;  %v2591_v22 = vor.u32 %v3318_v15, %v2588_v16  ;;  %v3374_v4 = vld [vmem:[%s5247_s1 + $0x4f4] sm:$0xf] }
  0x98   :  { %1881 = vmatpush.bf16.msra.mxu0 %v2199_v48  ;;  %v2487_v48 = vor.u32 %v3292_v27, %v2484_v28  ;;  %v2516_v27 = vld [vmem:[%s5247_s1 + $0x2a8] sm:$0xf0]  ;;  %v3316_v28 = vld [vmem:[%s5247_s1 + $0x324] sm:$0xf] }
  0x99   :  { %1895 = vmatpush.bf16.msra.mxu1 %v2263_v49  ;;  %v2551_v49 = vor.u32 %v3308_v29, %v2548_v33  ;;  %v2580_v29 = vld [vmem:[%s5247_s1 + $0x328] sm:$0xf0] }
  0x9a   :  { %1909 = vmatpush.bf16.msra.mxu2 %v2327_v50  ;;  %v2615_v50 = vor.u32 %v3324_v34, %v2612_v37  ;;  %v2644_v33 = vld [vmem:[%s5247_s1 + $0x3a8] sm:$0xf0] }
  0x9b   :  { %1923 = vmatpush.bf16.msra.mxu3 %v2391_v54  ;;  %v2679_v54 = vor.u32 %v3340_v42, %v2676_v45  ;;  %v2583_v42 = vor.u32 %v3316_v28, %v2580_v29  ;;  %v3282_v45 = vld [vmem:[%s5247_s1 + $0x214] sm:$0xf] }
  0x9c   :  { %1882 = vmatpush.bf16.msra.mxu0 %v2191_v61  ;;  %v2479_v61 = vor.u32 %v3290_v51, %v2476_v52  ;;  %v2508_v51 = vld [vmem:[%s5247_s1 + $0x298] sm:$0xf0]  ;;  %v3314_v52 = vld [vmem:[%s5247_s1 + $0x314] sm:$0xf] }
  0x9d   :  { %1896 = vmatpush.bf16.msra.mxu1 %v2255_v0  ;;  %v2468_v0 = vld [vmem:[%s5247_s1 + $0x248] sm:$0xf0] }
  0x9e   :  { %1910 = vmatpush.bf16.msra.mxu2 %v2319_v2  ;;  %v3320_v2 = vld [vmem:[%s5247_s1 + $0x344] sm:$0xf] }
  0x9f   :  { %1924 = vmatpush.bf16.msra.mxu3 %v2383_v6  ;;  %v2471_v6 = vor.u32 %v3288_v63, %v2468_v0  ;;  %v2599_v8 = vor.u32 %v3320_v2, %v2596_v3  ;;  %v3312_v63 = vld [vmem:[%s5247_s1 + $0x304] sm:$0xf]  ;;  %v3358_v2 = vld [vmem:[%s5247_s1 + $0x474] sm:$0xf]  ;;  %v2748_v3 = vld [vmem:[%s5247_s1 + $0x478] sm:$0xf0] }
  0xa0   :  { %1883 = vmatpush.bf16.msra.mxu0 %v2183_v14  ;;  %v2524_v14 = vld [vmem:[%s5247_s1 + $0x2b8] sm:$0xf0]  ;;  %v2751_v15 = vor.u32 %v3358_v2, %v2748_v3  ;;  %v3382_v2 = vld [vmem:[%s5247_s1 + $0x534] sm:$0xf] }
  0xa1   :  { %1897 = vmatpush.bf16.msra.mxu1 %v2247_v19  ;;  %v2652_v19 = vld [vmem:[%s5247_s1 + $0x3b8] sm:$0xf0]  ;;  %v2527_v21 = vor.u32 %v3302_v12, %v2524_v14  ;;  %v3406_v12 = vld [vmem:[%s5247_s1 + $0x5f4] sm:$0xf] }
  0xa2   :  { %1911 = vmatpush.bf16.msra.mxu2 %v2311_v20  ;;  %v2463_v20 = vor.u32 %v3286_v9, %v2460_v11  ;;  %v2844_v3 = vld [vmem:[%s5247_s1 + $0x538] sm:$0xf0] }
  0xa3   :  { %1925 = vmatpush.bf16.msra.mxu3 %v2375_v23  ;;  %1884 = vmatmul.bf16.vlgmr.msra.gmra.mxu0 %v3747_v58  ;;  %v2607_v58 = vor.u32 %v3322_v56, %v2604_v57  ;;  %v3284_v23 = vld [vmem:[%s5247_s1 + $0x224] sm:$0xf] }
  0xa4   :  { %1932 = vmatpush.bf16.msrb.mxu0 %v2495_v24  ;;  %1898 = vmatmul.bf16.vlgmr.msra.gmra.mxu1 %v3783_v10  ;;  %v2671_v10 = vor.u32 %v3338_v59, %v2668_v60  ;;  %v2452_v24 = vld [vmem:[%s5247_s1 + $0x228] sm:$0xf0]  ;;  %v3280_v57 = vld [vmem:[%s5247_s1 + $0x204] sm:$0xf] }
  0xa5   :  { %1946 = vmatpush.bf16.msrb.mxu1 %v2559_v25  ;;  %1912 = vmatmul.bf16.vlgmr.msra.gmra.mxu2 %v3761_v1  ;;  %v3304_v1 = vld [vmem:[%s5247_s1 + $0x2c4] sm:$0xf]  ;;  %v2455_v34 = vor.u32 %v3284_v23, %v2452_v24  ;;  %v2436_v59 = vld [vmem:[%s5247_s1 + $0x208] sm:$0xf0] }
  0xa6   :  { %1960 = vmatpush.bf16.msrb.mxu2 %v2623_v26  ;;  %1926 = vmatmul.bf16.vlgmr.msra.gmra.mxu3 %v3797_v17  ;;  %v2532_v17 = vld [vmem:[%s5247_s1 + $0x2c8] sm:$0xf0]  ;;  %v3300_v25 = vld [vmem:[%s5247_s1 + $0x2a4] sm:$0xf]  ;;  %v2655_v26 = vor.u32 %v3334_v18, %v2652_v19  ;;  %v2439_v5 = vor.u32 %v3280_v57, %v2436_v59 }
  0xa7   :  { %1974 = vmatpush.bf16.msrb.mxu3 %v2687_v30  ;;  %v2535_v7 = vor.u32 %v3304_v1, %v2532_v17  ;;  %v3332_v30 = vld [vmem:[%s5247_s1 + $0x3a4] sm:$0xf]  ;;  %v2519_v37 = vor.u32 %v3300_v25, %v2516_v27  ;;  %v2564_v1 = vld [vmem:[%s5247_s1 + $0x308] sm:$0xf0] }
  0xa8   :  { %1933 = vmatpush.bf16.msrb.mxu0 %v2487_v48  ;;  %v2444_v48 = vld [vmem:[%s5247_s1 + $0x218] sm:$0xf0]  ;;  %v2628_v17 = vld [vmem:[%s5247_s1 + $0x388] sm:$0xf0]  ;;  %v2567_v11 = vor.u32 %v3312_v63, %v2564_v1  ;;  %v3356_v19 = vld [vmem:[%s5247_s1 + $0x464] sm:$0xf] }
  0xa9   :  { %1947 = vmatpush.bf16.msrb.mxu1 %v2551_v49  ;;  %v3298_v49 = vld [vmem:[%s5247_s1 + $0x294] sm:$0xf]  ;;  %v2447_v56 = vor.u32 %v3282_v45, %v2444_v48  ;;  %v2804_v23 = vld [vmem:[%s5247_s1 + $0x4e8] sm:$0xf0]  ;;  %v3388_v24 = vld [vmem:[%s5247_s1 + $0x564] sm:$0xf] }
  0xaa   :  { %1961 = vmatpush.bf16.msrb.mxu2 %v2615_v50  ;;  %v2647_v50 = vor.u32 %v3332_v30, %v2644_v33  ;;  %v2511_v60 = vor.u32 %v3298_v49, %v2508_v51  ;;  %v2868_v25 = vld [vmem:[%s5247_s1 + $0x568] sm:$0xf0]  ;;  %v3354_v33 = vld [vmem:[%s5247_s1 + $0x454] sm:$0xf]  ;;  %v2796_v45 = vld [vmem:[%s5247_s1 + $0x4d8] sm:$0xf0] }
  0xab   :  { %1975 = vmatpush.bf16.msrb.mxu3 %v2679_v54  ;;  %v3330_v54 = vld [vmem:[%s5247_s1 + $0x394] sm:$0xf]  ;;  %v2932_v27 = vld [vmem:[%s5247_s1 + $0x5e8] sm:$0xf0]  ;;  %v2871_v30 = vor.u32 %v3388_v24, %v2868_v25  ;;  %v2860_v49 = vld [vmem:[%s5247_s1 + $0x558] sm:$0xf0] }
  0xac   :  { %1934 = vmatpush.bf16.msrb.mxu0 %v2479_v61  ;;  %v2575_v61 = vor.u32 %v3314_v52, %v2572_v53  ;;  %v2639_v0 = vor.u32 %v3330_v54, %v2636_v55  ;;  %v3386_v48 = vld [vmem:[%s5247_s1 + $0x554] sm:$0xf]  ;;  %v3368_v54 = vld [vmem:[%s5247_s1 + $0x4c4] sm:$0xf]  ;;  %v2788_v55 = vld [vmem:[%s5247_s1 + $0x4c8] sm:$0xf0] }
  0xad   :  { %1948 = vmatpush.bf16.msrb.mxu1 %v2543_v62  ;;  %v3296_v62 = vld [vmem:[%s5247_s1 + $0x284] sm:$0xf]  ;;  %v2863_v53 = vor.u32 %v3386_v48, %v2860_v49  ;;  %v2852_v57 = vld [vmem:[%s5247_s1 + $0x548] sm:$0xf0]  ;;  %v3350_v63 = vld [vmem:[%s5247_s1 + $0x434] sm:$0xf] }
  0xae   :  { %1962 = vmatpush.bf16.msrb.mxu2 %v2607_v58  ;;  %v2500_v58 = vld [vmem:[%s5247_s1 + $0x288] sm:$0xf0]  ;;  %v3400_v59 = vld [vmem:[%s5247_s1 + $0x5c4] sm:$0xf]  ;;  %v3366_v1 = vld [vmem:[%s5247_s1 + $0x4b4] sm:$0xf] }
  0xaf   :  { %1976 = vmatpush.bf16.msrb.mxu3 %v2671_v10  ;;  %v3328_v10 = vld [vmem:[%s5247_s1 + $0x384] sm:$0xf]  ;;  %v2503_v9 = vor.u32 %v3296_v62, %v2500_v58  ;;  %v2791_v62 = vor.u32 %v3368_v54, %v2788_v55  ;;  %v2892_v48 = vld [vmem:[%s5247_s1 + $0x598] sm:$0xf0]  ;;  %v2756_v54 = vld [vmem:[%s5247_s1 + $0x488] sm:$0xf0] }
  0xb0   :  { %1935 = vmatpush.bf16.msrb.mxu0 %v2471_v6  ;;  %v2812_v6 = vld [vmem:[%s5247_s1 + $0x4f8] sm:$0xf0]  ;;  %v2631_v14 = vor.u32 %v3328_v10, %v2628_v17 }
  0xb1   :  { %1949 = vmatpush.bf16.msrb.mxu1 %v2535_v7  ;;  %v3390_v7 = vld [vmem:[%s5247_s1 + $0x574] sm:$0xf]  ;;  %v2815_v16 = vor.u32 %v3374_v4, %v2812_v6  ;;  %v2780_v17 = vld [vmem:[%s5247_s1 + $0x4b8] sm:$0xf0]  ;;  %v4910_v4 = vpop.f32.mrf.mxu0 }
  0xb2   :  { %1963 = vmatpush.bf16.msrb.mxu2 %v2599_v8  ;;  %v2876_v8 = vld [vmem:[%s5247_s1 + $0x578] sm:$0xf0] }
  0xb3   :  { %1977 = vmatpush.bf16.msrb.mxu3 %v2663_v13  ;;  %v2940_v13 = vld [vmem:[%s5247_s1 + $0x5f8] sm:$0xf0]  ;;  %v2879_v18 = vor.u32 %v3390_v7, %v2876_v8  ;;  %v4918_v7 = vpop.f32.mrf.mxu1 }
  0xb4   :  { %1936 = vmatpush.bf16.msrb.mxu0 %v2463_v20  ;;  %v2740_v20 = vld [vmem:[%s5247_s1 + $0x468] sm:$0xf0]  ;;  %v2908_v6 = vld [vmem:[%s5247_s1 + $0x5b8] sm:$0xf0] }
  0xb5   :  { %1950 = vmatpush.bf16.msrb.mxu1 %v2527_v21  ;;  %v3372_v21 = vld [vmem:[%s5247_s1 + $0x4e4] sm:$0xf]  ;;  %v2743_v28 = vor.u32 %v3356_v19, %v2740_v20  ;;  %v2836_v19 = vld [vmem:[%s5247_s1 + $0x528] sm:$0xf0] }
  0xb6   :  { %1964 = vmatpush.bf16.msrb.mxu2 %v2591_v22  ;;  %v2943_v22 = vor.u32 %v3406_v12, %v2940_v13  ;;  %v2807_v29 = vor.u32 %v3372_v21, %v2804_v23  ;;  %v3348_v12 = vld [vmem:[%s5247_s1 + $0x424] sm:$0xf]  ;;  %v2708_v13 = vld [vmem:[%s5247_s1 + $0x428] sm:$0xf0] }
  0xb7   :  { %1978 = vmatpush.bf16.msrb.mxu3 %v2655_v26  ;;  %v3404_v26 = vld [vmem:[%s5247_s1 + $0x5e4] sm:$0xf]  ;;  %v2900_v21 = vld [vmem:[%s5247_s1 + $0x5a8] sm:$0xf0]  ;;  %v2711_v23 = vor.u32 %v3348_v12, %v2708_v13 }
  0xb8   :  { %1937 = vmatpush.bf16.msrb.mxu0 %v2455_v34  ;;  %v2732_v34 = vld [vmem:[%s5247_s1 + $0x458] sm:$0xf0]  ;;  %v3396_v20 = vld [vmem:[%s5247_s1 + $0x5a4] sm:$0xf] }
  0xb9   :  { %1951 = vmatpush.bf16.msrb.mxu1 %v2519_v37  ;;  %v3370_v37 = vld [vmem:[%s5247_s1 + $0x4d4] sm:$0xf]  ;;  %v2735_v51 = vor.u32 %v3354_v33, %v2732_v34  ;;  %v2764_v33 = vld [vmem:[%s5247_s1 + $0x498] sm:$0xf0]  ;;  %v3420_v13 = vld [vmem:[%s5247_s1 + $0x664] sm:$0xf] }
  0xba   :  { %1965 = vmatpush.bf16.msrb.mxu2 %v2583_v42  ;;  %v2935_v42 = vor.u32 %v3404_v26, %v2932_v27  ;;  %v2799_v52 = vor.u32 %v3370_v37, %v2796_v45  ;;  %v3346_v26 = vld [vmem:[%s5247_s1 + $0x414] sm:$0xf]  ;;  %v2700_v27 = vld [vmem:[%s5247_s1 + $0x418] sm:$0xf0] }
  0xbb   :  { %1979 = vmatpush.bf16.msrb.mxu3 %v2647_v50  ;;  %v2924_v50 = vld [vmem:[%s5247_s1 + $0x5d8] sm:$0xf0]  ;;  %v3378_v34 = vld [vmem:[%s5247_s1 + $0x514] sm:$0xf]  ;;  %v4995_v55 = vpop.f32.mrf.mxu1 }
  0xbc   :  { %1938 = vmatpush.bf16.msrb.mxu0 %v2447_v56  ;;  %v3384_v56 = vld [vmem:[%s5247_s1 + $0x544] sm:$0xf]  ;;  %v2828_v37 = vld [vmem:[%s5247_s1 + $0x518] sm:$0xf0]  ;;  %v3394_v45 = vld [vmem:[%s5247_s1 + $0x594] sm:$0xf] }
  0xbd   :  { %1952 = vmatpush.bf16.msrb.mxu1 %v2511_v60  ;;  %v2916_v60 = vld [vmem:[%s5247_s1 + $0x5c8] sm:$0xf0]  ;;  %v2855_v58 = vor.u32 %v3384_v56, %v2852_v57  ;;  %v2895_v56 = vor.u32 %v3394_v45, %v2892_v48  ;;  %v3052_v48 = vld [vmem:[%s5247_s1 + $0x6d8] sm:$0xf0] }
  0xbe   :  { %1966 = vmatpush.bf16.msrb.mxu2 %v2575_v61  ;;  %v2919_v10 = vor.u32 %v3400_v59, %v2916_v60  ;;  %v2820_v57 = vld [vmem:[%s5247_s1 + $0x508] sm:$0xf0]  ;;  %v3392_v59 = vld [vmem:[%s5247_s1 + $0x584] sm:$0xf] }
  0xbf   :  { %1980 = vmatpush.bf16.msrb.mxu3 %v2639_v0  ;;  %v2716_v0 = vld [vmem:[%s5247_s1 + $0x438] sm:$0xf0]  ;;  %v2884_v60 = vld [vmem:[%s5247_s1 + $0x588] sm:$0xf0] }
  0xc0   :  { %1939 = vmatpush.bf16.msrb.mxu0 %v2439_v5  ;;  %v3398_v5 = vld [vmem:[%s5247_s1 + $0x5b4] sm:$0xf]  ;;  %v2719_v8 = vor.u32 %v3350_v63, %v2716_v0  ;;  %v3068_v0 = vld [vmem:[%s5247_s1 + $0x6f8] sm:$0xf0] }
  0xc1   :  { %1953 = vmatpush.bf16.msrb.mxu1 %v2503_v9  ;;  %v2783_v9 = vor.u32 %v3366_v1, %v2780_v17  ;;  %v3454_v1 = vld [vmem:[%s5247_s1 + $0x774] sm:$0xf] }
  0xc2   :  { %1967 = vmatpush.bf16.msrb.mxu2 %v2567_v11  ;;  %v2847_v11 = vor.u32 %v3382_v2, %v2844_v3  ;;  %v3470_v3 = vld [vmem:[%s5247_s1 + $0x7f4] sm:$0xf] }
  0xc3   :  { %1981 = vmatpush.bf16.msrb.mxu3 %v2631_v14  ;;  %1940 = vmatmul.bf16.vlgmr.msrb.gmra.mxu0 %v3969_v39  ;;  %v3402_v39 = vld [vmem:[%s5247_s1 + $0x5d4] sm:$0xf]  ;;  %v3364_v14 = vld [vmem:[%s5247_s1 + $0x4a4] sm:$0xf]  ;;  %v5071_v45 = vpop.f32.mrf.mxu1 }
  0xc4   :  { %1988 = vmatpush.bf16.msra.mxu0 %v2751_v15  ;;  %1954 = vmatmul.bf16.vlgmr.msrb.gmra.mxu1 %v3982_v44  ;;  %v2724_v44 = vld [vmem:[%s5247_s1 + $0x448] sm:$0xf0]  ;;  %v2911_v15 = vor.u32 %v3398_v5, %v2908_v6  ;;  %v3196_v5 = vld [vmem:[%s5247_s1 + $0x7f8] sm:$0xf0]  ;;  %v2887_v6 = vor.u32 %v3392_v59, %v2884_v60  ;;  %v3464_v60 = vld [vmem:[%s5247_s1 + $0x7c4] sm:$0xf] }
  0xc5   :  { %2002 = vmatpush.bf16.msra.mxu1 %v2815_v16  ;;  %1968 = vmatmul.bf16.vlgmr.msrb.gmra.mxu2 %v3980_v43  ;;  %v3352_v43 = vld [vmem:[%s5247_s1 + $0x444] sm:$0xf]  ;;  %v2772_v16 = vld [vmem:[%s5247_s1 + $0x4a8] sm:$0xf0] }
  0xc6   :  { %2016 = vmatpush.bf16.msra.mxu2 %v2879_v18  ;;  %1982 = vmatmul.bf16.vlgmr.msrb.gmra.mxu3 %v3990_v47  ;;  %v2927_v47 = vor.u32 %v3402_v39, %v2924_v50  ;;  %v2727_v61 = vor.u32 %v3352_v43, %v2724_v44  ;;  %v3380_v18 = vld [vmem:[%s5247_s1 + $0x524] sm:$0xf]  ;;  %v2775_v24 = vor.u32 %v3364_v14, %v2772_v16  ;;  %v2996_v14 = vld [vmem:[%s5247_s1 + $0x668] sm:$0xf0] }
  0xc7   :  { %2030 = vmatpush.bf16.msra.mxu3 %v2943_v22  ;;  %v4947_v22 = vld [vmem:[%s5249_s2] sm:$0x3]  ;;  %v2839_v25 = vor.u32 %v3380_v18, %v2836_v19  ;;  %v2703_v39 = vor.u32 %v3346_v26, %v2700_v27  ;;  %v3344_v50 = vld [vmem:[%s5247_s1 + $0x404] sm:$0xf]  ;;  %v2831_v43 = vor.u32 %v3378_v34, %v2828_v37  ;;  %v3199_v18 = vor.u32 %v3470_v3, %v3196_v5  ;;  %v2988_v34 = vld [vmem:[%s5247_s1 + $0x658] sm:$0xf0] }
  0xc8   :  { %1989 = vmatpush.bf16.msra.mxu0 %v2743_v28  ;;  %v3362_v28 = vld [vmem:[%s5247_s1 + $0x494] sm:$0xf]  ;;  %v288_v49 = vperm.slane %v4947_v22, 0  ;;  %v3360_v44 = vld [vmem:[%s5247_s1 + $0x484] sm:$0xf] }
  0xc9   :  { %2003 = vmatpush.bf16.msra.mxu1 %v2807_v29  ;;  %v4958_v29 = vpop.f32.mrf.mxu2  ;;  %v2759_v17 = vor.u32 %v3360_v44, %v2756_v54  ;;  %v3452_v19 = vld [vmem:[%s5247_s1 + $0x764] sm:$0xf]  ;;  %v3434_v37 = vld [vmem:[%s5247_s1 + $0x6d4] sm:$0xf]  ;;  %v2980_v54 = vld [vmem:[%s5247_s1 + $0x648] sm:$0xf0] }
  0xca   :  { %2017 = vmatpush.bf16.msra.mxu2 %v2871_v30  ;;  %v2903_v30 = vor.u32 %v3396_v20, %v2900_v21  ;;  %v3124_v20 = vld [vmem:[%s5247_s1 + $0x768] sm:$0xf0]  ;;  %v3055_v44 = vor.u32 %v3434_v37, %v3052_v48  ;;  %v3446_v3 = vld [vmem:[%s5247_s1 + $0x734] sm:$0xf]  ;;  %v3100_v5 = vld [vmem:[%s5247_s1 + $0x738] sm:$0xf0] }
  0xcb   :  { %2031 = vmatpush.bf16.msra.mxu3 %v2935_v42  ;;  %v4969_v42 = vpop.f32.mrf.mxu3  ;;  %v3426_v48 = vld [vmem:[%s5247_s1 + $0x694] sm:$0xf] }
  0xcc   :  { %1990 = vmatpush.bf16.msra.mxu0 %v2735_v51  ;;  %v2692_v51 = vld [vmem:[%s5247_s1 + $0x408] sm:$0xf0] }
  0xcd   :  { %2004 = vmatpush.bf16.msra.mxu1 %v2799_v52  ;;  %v4984_v52 = vpop.f32.mrf.mxu0  ;;  %v2695_v63 = vor.u32 %v3344_v50, %v2692_v51  ;;  %v3116_v50 = vld [vmem:[%s5247_s1 + $0x758] sm:$0xf0] }
  0xce   :  { %2018 = vmatpush.bf16.msra.mxu2 %v2863_v53  ;;  %v2767_v53 = vor.u32 %v3362_v28, %v2764_v33  ;;  %v3418_v33 = vld [vmem:[%s5247_s1 + $0x654] sm:$0xf]  ;;  %v3180_v51 = vld [vmem:[%s5247_s1 + $0x7d8] sm:$0xf0]  ;;  %v1664_v59 = vadd.f32 %v4984_v52, %v288_v49 }
  0xcf   :  { %2032 = vmatpush.bf16.msra.mxu3 %v2927_v47  ;;  %v3376_v47 = vld [vmem:[%s5247_s1 + $0x504] sm:$0xf]  ;;  %v3414_v52 = vld [vmem:[%s5247_s1 + $0x634] sm:$0xf] }
  0xd0   :  { %1991 = vmatpush.bf16.msra.mxu0 %v2727_v61  ;;  %v3422_v61 = vld [vmem:[%s5247_s1 + $0x674] sm:$0xf]  ;;  %v2823_v2 = vor.u32 %v3376_v47, %v2820_v57  ;;  %v3108_v57 = vld [vmem:[%s5247_s1 + $0x748] sm:$0xf0] }
  0xd1   :  { %2005 = vmatpush.bf16.msra.mxu1 %v2791_v62  ;;  %v3004_v62 = vld [vmem:[%s5247_s1 + $0x678] sm:$0xf0]  ;;  %v5042_v16 = vpop.f32.mrf.mxu2 }
  0xd2   :  { %2019 = vmatpush.bf16.msra.mxu2 %v2855_v58  ;;  %v3438_v58 = vld [vmem:[%s5247_s1 + $0x6f4] sm:$0xf] }
  0xd3   :  { %2033 = vmatpush.bf16.msra.mxu3 %v2919_v10  ;;  %v3132_v10 = vld [vmem:[%s5247_s1 + $0x778] sm:$0xf0]  ;;  %v5053_v21 = vpop.f32.mrf.mxu3 }
  0xd4   :  { %1992 = vmatpush.bf16.msra.mxu0 %v2719_v8  ;;  %v3007_v8 = vor.u32 %v3422_v61, %v3004_v62  ;;  %v3135_v12 = vor.u32 %v3454_v1, %v3132_v10  ;;  %v3172_v61 = vld [vmem:[%s5247_s1 + $0x7c8] sm:$0xf0]  ;;  %v2972_v10 = vld [vmem:[%s5247_s1 + $0x638] sm:$0xf0] }
  0xd5   :  { %2006 = vmatpush.bf16.msra.mxu1 %v2783_v9  ;;  %v1662_v9 = vadd.f32 %v4910_v4, %v288_v49  ;;  %v3060_v4 = vld [vmem:[%s5247_s1 + $0x6e8] sm:$0xf0]  ;;  %v1717_v27 = vpop.f32.mrf.mxu0 }
  0xd6   :  { %2020 = vmatpush.bf16.msra.mxu2 %v2847_v11  ;;  %v3071_v11 = vor.u32 %v3438_v58, %v3068_v0 }
  0xd7   :  { %2034 = vmatpush.bf16.msra.mxu3 %v2911_v15  ;;  %v3436_v15 = vld [vmem:[%s5247_s1 + $0x6e4] sm:$0xf]  ;;  %v1676_v26 = vadd.f32 %v4918_v7, %v1662_v9  ;;  %v3462_v9 = vld [vmem:[%s5247_s1 + $0x7b4] sm:$0xf] }
  0xd8   :  { %1993 = vmatpush.bf16.msra.mxu0 %v2711_v23  ;;  %v3468_v23 = vld [vmem:[%s5247_s1 + $0x7e4] sm:$0xf]  ;;  %v3063_v28 = vor.u32 %v3436_v15, %v3060_v4  ;;  %v2964_v4 = vld [vmem:[%s5247_s1 + $0x628] sm:$0xf0] }
  0xd9   :  { %2007 = vmatpush.bf16.msra.mxu1 %v2775_v24  ;;  %v3188_v24 = vld [vmem:[%s5247_s1 + $0x7e8] sm:$0xf0]  ;;  %v5120_v62 = vpop.f32.mrf.mxu2 }
  0xda   :  { %2021 = vmatpush.bf16.msra.mxu2 %v2839_v25  ;;  %v2999_v25 = vor.u32 %v3420_v13, %v2996_v14  ;;  %v3191_v7 = vor.u32 %v3468_v23, %v3188_v24  ;;  %v2975_v13 = vor.u32 %v3414_v52, %v2972_v10  ;;  %v3028_v23 = vld [vmem:[%s5247_s1 + $0x6a8] sm:$0xf0]  ;;  %v3444_v24 = vld [vmem:[%s5247_s1 + $0x724] sm:$0xf] }
  0xdb   :  { %2035 = vmatpush.bf16.msra.mxu3 %v2903_v30  ;;  %v3127_v30 = vor.u32 %v3452_v19, %v3124_v20  ;;  %v5123_v0 = vpop.f32.mrf.mxu3  ;;  %v3428_v19 = vld [vmem:[%s5247_s1 + $0x6a4] sm:$0xf] }
  0xdc   :  { %1994 = vmatpush.bf16.msra.mxu0 %v2703_v39  ;;  %v3450_v39 = vld [vmem:[%s5247_s1 + $0x754] sm:$0xf] }
  0xdd   :  { %2008 = vmatpush.bf16.msra.mxu1 %v2767_v53  ;;  %v2991_v53 = vor.u32 %v3418_v33, %v2988_v34  ;;  %v3031_v34 = vor.u32 %v3428_v19, %v3028_v23 }
  0xde   :  { %2022 = vmatpush.bf16.msra.mxu2 %v2831_v43  ;;  %v1690_v43 = vadd.f32 %v4958_v29, %v1676_v26  ;;  %v3044_v29 = vld [vmem:[%s5247_s1 + $0x6c8] sm:$0xf0] }
  0xdf   :  { %2036 = vmatpush.bf16.msra.mxu3 %v2895_v56  ;;  %v3448_v56 = vld [vmem:[%s5247_s1 + $0x744] sm:$0xf] }
  0xe0   :  { %1995 = vmatpush.bf16.msra.mxu0 %v2695_v63  ;;  %v1704_v63 = vadd.f32 %v4969_v42, %v1690_v43  ;;  %v3111_v49 = vor.u32 %v3448_v56, %v3108_v57  ;;  %v3175_v42 = vor.u32 %v3464_v60, %v3172_v61  ;;  %v2948_v57 = vld [vmem:[%s5247_s1 + $0x608] sm:$0xf0] }
  0xe1   :  { %2009 = vmatpush.bf16.msra.mxu1 %v2759_v17  ;;  %v3430_v17 = vld [vmem:[%s5247_s1 + $0x6b4] sm:$0xf]  ;;  %v3012_v61 = vld [vmem:[%s5247_s1 + $0x688] sm:$0xf0] }
  0xe2   :  { %2023 = vmatpush.bf16.msra.mxu2 %v2823_v2  ;;  %v3036_v2 = vld [vmem:[%s5247_s1 + $0x6b8] sm:$0xf0]  ;;  %v1718_v14 = vadd.f32 %v1717_v27, %v1704_v63  ;;  %v3460_v27 = vld [vmem:[%s5247_s1 + $0x7a4] sm:$0xf] }
  0xe3   :  { %2037 = vmatpush.bf16.msra.mxu3 %v2887_v6  ;;  %1996 = vmatmul.bf16.vlgmr.msra.gmra.mxu0 %v4197_v31  ;;  %v3466_v31 = vld [vmem:[%s5247_s1 + $0x7d4] sm:$0xf]  ;;  %v1678_v6 = vadd.f32 %v4995_v55, %v1664_v59  ;;  %v3039_v15 = vor.u32 %v3430_v17, %v3036_v2  ;;  %v3412_v55 = vld [vmem:[%s5247_s1 + $0x624] sm:$0xf]  ;;  %v1761_v43 = vpop.f32.mrf.mxu3 }
  0xe4   :  { %2044 = vmatpush.bf16.msrb.mxu0 %v3007_v8  ;;  %2010 = vmatmul.bf16.vlgmr.msra.gmra.mxu1 %v4210_v36  ;;  %v3416_v36 = vld [vmem:[%s5247_s1 + $0x644] sm:$0xf]  ;;  %v3183_v47 = vor.u32 %v3466_v31, %v3180_v51  ;;  %v1719_v8 = vpop.f32.mrf.mxu0  ;;  %v1732_v33 = vadd.f32 %v5071_v45, %v1718_v14  ;;  %v3020_v45 = vld [vmem:[%s5247_s1 + $0x698] sm:$0xf0]  ;;  %v3442_v31 = vld [vmem:[%s5247_s1 + $0x714] sm:$0xf] }
  0xe5   :  { %2058 = vmatpush.bf16.msrb.mxu1 %v3071_v11  ;;  %2024 = vmatmul.bf16.vlgmr.msra.gmra.mxu2 %v4208_v35  ;;  %v3119_v35 = vor.u32 %v3450_v39, %v3116_v50  ;;  %v2983_v58 = vor.u32 %v3416_v36, %v2980_v54  ;;  %v3164_v11 = vld [vmem:[%s5247_s1 + $0x7b8] sm:$0xf0]  ;;  %v1692_v26 = vadd.f32 %v5042_v16, %v1678_v6  ;;  %v3410_v16 = vld [vmem:[%s5247_s1 + $0x614] sm:$0xf]  ;;  %v1747_v39 = vpop.f32.mrf.mxu2  ;;  %v3424_v59 = vld [vmem:[%s5247_s1 + $0x684] sm:$0xf] }
  0xe6   :  { %2072 = vmatpush.bf16.msrb.mxu2 %v3135_v12  ;;  %2038 = vmatmul.bf16.vlgmr.msra.gmra.mxu3 %v4218_v40  ;;  %v3432_v40 = vld [vmem:[%s5247_s1 + $0x6c4] sm:$0xf]  ;;  %v5150_v12 = vpop.f32.mrf.mxu1  ;;  %v3167_v20 = vor.u32 %v3462_v9, %v3164_v11  ;;  %v3084_v51 = vld [vmem:[%s5247_s1 + $0x718] sm:$0xf0]  ;;  %v3015_v17 = vor.u32 %v3424_v59, %v3012_v61 }
  0xe7   :  { %2086 = vmatpush.bf16.msrb.mxu3 %v3199_v18  ;;  %v3047_v1 = vor.u32 %v3432_v40, %v3044_v29  ;;  %v3103_v18 = vor.u32 %v3446_v3, %v3100_v5  ;;  %v3148_v36 = vld [vmem:[%s5247_s1 + $0x798] sm:$0xf0]  ;;  %v3023_v29 = vor.u32 %v3426_v48, %v3020_v45  ;;  %v3087_v56 = vor.u32 %v3442_v31, %v3084_v51 }
  0xe8   :  { %2045 = vmatpush.bf16.msrb.mxu0 %v2999_v25  ;;  %v3092_v25 = vld [vmem:[%s5247_s1 + $0x728] sm:$0xf0] }
  0xe9   :  { %2059 = vmatpush.bf16.msrb.mxu1 %v3063_v28  ;;  %v3156_v28 = vld [vmem:[%s5247_s1 + $0x7a8] sm:$0xf0]  ;;  %v3095_v37 = vor.u32 %v3444_v24, %v3092_v25 }
  0xea   :  { %2073 = vmatpush.bf16.msrb.mxu2 %v3127_v30  ;;  %v2967_v30 = vor.u32 %v3412_v55, %v2964_v4  ;;  %v3159_v50 = vor.u32 %v3460_v27, %v3156_v28 }
  0xeb   :  { %2087 = vmatpush.bf16.msrb.mxu3 %v3191_v7  ;;  %v2956_v7 = vld [vmem:[%s5247_s1 + $0x618] sm:$0xf0] }
  0xec   :  { %2046 = vmatpush.bf16.msrb.mxu0 %v2991_v53  ;;  %v1706_v53 = vadd.f32 %v5053_v21, %v1692_v26  ;;  %v2959_v40 = vor.u32 %v3410_v16, %v2956_v7  ;;  %v3408_v21 = vld [vmem:[%s5247_s1 + $0x604] sm:$0xf] }
  0xed   :  { %2060 = vmatpush.bf16.msrb.mxu1 %v3055_v44  ;;  %v1773_v44 = vpop.f32.mrf.mxu0  ;;  %v2951_v52 = vor.u32 %v3408_v21, %v2948_v57  ;;  %v1801_v2 = vpop.f32.mrf.mxu2 }
  0xee   :  { %2074 = vmatpush.bf16.msrb.mxu2 %v3119_v35  ;;  %v3458_v35 = vld [vmem:[%s5247_s1 + $0x794] sm:$0xf]  ;;  %v1787_v54 = vpop.f32.mrf.mxu1  ;;  %v1720_v63 = vadd.f32 %v1719_v8, %v1706_v53  ;;  %v1815_v8 = vpop.f32.mrf.mxu3 }
  0xef   :  { %2088 = vmatpush.bf16.msrb.mxu3 %v3183_v47  ;;  %v1746_v47 = vadd.f32 %v5120_v62, %v1732_v33  ;;  %v3151_v60 = vor.u32 %v3458_v35, %v3148_v36  ;;  %v3440_v62 = vld [vmem:[%s5247_s1 + $0x704] sm:$0xf] }
  0xf0   :  { %2047 = vmatpush.bf16.msrb.mxu0 %v2983_v58  ;;  %v3076_v58 = vld [vmem:[%s5247_s1 + $0x708] sm:$0xf0]  ;;  %v1734_v5 = vadd.f32 %v5150_v12, %v1720_v63 }
  0xf1   :  { %2061 = vmatpush.bf16.msrb.mxu1 %v3047_v1  ;;  %v3456_v1 = vld [vmem:[%s5247_s1 + $0x784] sm:$0xf]  ;;  %v1760_v10 = vadd.f32 %v5123_v0, %v1746_v47 }
  0xf2   :  { %2075 = vmatpush.bf16.msrb.mxu2 %v3111_v49  ;;  %v3140_v49 = vld [vmem:[%s5247_s1 + $0x788] sm:$0xf0]  ;;  %v1748_v9 = vadd.f32 %v1747_v39, %v1734_v5 }
  0xf3   :  { %2089 = vmatpush.bf16.msrb.mxu3 %v3175_v42  ;;  %v3079_v42 = vor.u32 %v3440_v62, %v3076_v58  ;;  %v3143_v3 = vor.u32 %v3456_v1, %v3140_v49  ;;  %v1774_v6 = vadd.f32 %v1773_v44, %v1760_v10  ;;  %v289_v44 = vperm.slane %v4947_v22, 1 }
  0xf4   :  { %2048 = vmatpush.bf16.msrb.mxu0 %v2975_v13  ;;  %v1762_v0 = vadd.f32 %v1761_v43, %v1748_v9 }
  0xf5   :  { %2062 = vmatpush.bf16.msrb.mxu1 %v3039_v15  ;;  %v1775_v11 = vpop.f32.mrf.mxu0  ;;  %v1788_v14 = vadd.f32 %v1787_v54, %v1774_v6 }
  0xf6   :  { %2076 = vmatpush.bf16.msrb.mxu2 %v3103_v18  ;;  %v1789_v13 = vpop.f32.mrf.mxu1  ;;  %v1776_v12 = vadd.f32 %v1775_v11, %v1762_v0  ;;  %v1803_v18 = vpop.f32.mrf.mxu2 }
  0xf7   :  { %2090 = vmatpush.bf16.msrb.mxu3 %v3167_v20  ;;  %v1802_v15 = vadd.f32 %v1801_v2, %v1788_v14  ;;  %v1817_v4 = vpop.f32.mrf.mxu3 }
  0xf8   :  { %2049 = vmatpush.bf16.msrb.mxu0 %v2967_v30  ;;  %v1790_v23 = vadd.f32 %v1789_v13, %v1776_v12 }
  0xf9   :  { %2063 = vmatpush.bf16.msrb.mxu1 %v3031_v34  ;;  %v1816_v55 = vadd.f32 %v1815_v8, %v1802_v15 }
  0xfa   :  { %2077 = vmatpush.bf16.msrb.mxu2 %v3095_v37  ;;  %v1804_v25 = vadd.f32 %v1803_v18, %v1790_v23 }
  0xfb   :  { %2091 = vmatpush.bf16.msrb.mxu3 %v3159_v50 }
  0xfc   :  { %2050 = vmatpush.bf16.msrb.mxu0 %v2959_v40 }
  0xfd   :  { %2064 = vmatpush.bf16.msrb.mxu1 %v3023_v29 }
  0xfe   :  { %2078 = vmatpush.bf16.msrb.mxu2 %v3087_v56 }
  0xff   :  { %2092 = vmatpush.bf16.msrb.mxu3 %v3151_v60 }
 0x100   :  { %2051 = vmatpush.bf16.msrb.mxu0 %v2951_v52  ;;  %v1829_v19 = vpop.f32.mrf.mxu0 }
 0x101   :  { %2065 = vmatpush.bf16.msrb.mxu1 %v3015_v17  ;;  %v1843_v20 = vpop.f32.mrf.mxu1  ;;  %v1830_v24 = vadd.f32 %v1829_v19, %v1816_v55 }
 0x102   :  { %2079 = vmatpush.bf16.msrb.mxu2 %v3079_v42 }
 0x103   :  { %2093 = vmatpush.bf16.msrb.mxu3 %v3143_v3  ;;  %2052 = vmatmul.bf16.vlgmr.msrb.gmra.mxu0 %v4425_v32  ;;  %v1844_v26 = vadd.f32 %v1843_v20, %v1830_v24  ;;  %v1818_v32 = vadd.f32 %v1817_v4, %v1804_v25 }
 0x104   :  { %2066 = vmatmul.bf16.vlgmr.msrb.gmra.mxu1 %v4438_v41 }
 0x105   :  { %2080 = vmatmul.bf16.vlgmr.msrb.gmra.mxu2 %v4436_v38 }
 0x106   :  { %2094 = vmatmul.bf16.vlgmr.msrb.gmra.mxu3 %v4446_v46 }
 0x108   :  { %v1857_v27 = vpop.f32.mrf.mxu2  ;;  %v1831_v41 = vpop.f32.mrf.mxu0 }
 0x109   :  { %v1858_v28 = vadd.f32 %v1857_v27, %v1844_v26  ;;  %v1871_v30 = vpop.f32.mrf.mxu3  ;;  %v1832_v38 = vadd.f32 %v1831_v41, %v1818_v32  ;;  %v1845_v34 = vpop.f32.mrf.mxu1 }
 0x10b   :  { %v1872_v33 = vadd.f32 %v1871_v30, %v1858_v28  ;;  %v1846_v46 = vadd.f32 %v1845_v34, %v1832_v38 }
 0x10d   :  { %v2100_v37 = vmax.f32 %v1872_v33, 0.0 }
 0x10f   :  { %2104 = vst [vmem:[%s5250_s3] sm:$0xff] %v2100_v37 }
 0x110   :  { %v1859_v16 = vpop.f32.mrf.mxu2 }
 0x111   :  { %v1860_v7 = vadd.f32 %v1859_v16, %v1846_v46  ;;  %v1873_v48 = vpop.f32.mrf.mxu3 }
 0x113   :  { %v1874_v39 = vadd.f32 %v1873_v48, %v1860_v7 }
 0x115   :  { %v2102_v50 = vmax.f32 %v1874_v39, 0.0 }
 0x117   :  { %2106 = vst [vmem:[%s5250_s3 + $0x10] sm:$0xff] %v2102_v50 }
 0x120   :  { %v1885_v45 = vpop.f32.mrf.mxu0 }
 0x121   :  { %v1899_v31 = vpop.f32.mrf.mxu1  ;;  %v1886_v36 = vadd.f32 %v1885_v45, %v289_v44 }
 0x123   :  { %v1900_v47 = vadd.f32 %v1899_v31, %v1886_v36 }
 0x128   :  { %v1913_v51 = vpop.f32.mrf.mxu2  ;;  %v1887_v43 = vpop.f32.mrf.mxu0 }
 0x129   :  { %v1927_v53 = vpop.f32.mrf.mxu3  ;;  %v1901_v35 = vpop.f32.mrf.mxu1  ;;  %v1914_v21 = vadd.f32 %v1913_v51, %v1900_v47  ;;  %v1888_v57 = vadd.f32 %v1887_v43, %v289_v44 }
 0x12b   :  { %v1928_v60 = vadd.f32 %v1927_v53, %v1914_v21  ;;  %v1902_v62 = vadd.f32 %v1901_v35, %v1888_v57 }
 0x130   :  { %v1915_v54 = vpop.f32.mrf.mxu2 }
 0x131   :  { %v1929_v40 = vpop.f32.mrf.mxu3  ;;  %v1916_v49 = vadd.f32 %v1915_v54, %v1902_v62 }
 0x133   :  { %v1930_v22 = vadd.f32 %v1929_v40, %v1916_v49 }
 0x140   :  { %v1941_v29 = vpop.f32.mrf.mxu0 }
 0x141   :  { %v1955_v56 = vpop.f32.mrf.mxu1  ;;  %v1942_v63 = vadd.f32 %v1941_v29, %v1928_v60 }
 0x143   :  { %v1956_v52 = vadd.f32 %v1955_v56, %v1942_v63 }
 0x148   :  { %v1969_v59 = vpop.f32.mrf.mxu2  ;;  %v1943_v58 = vpop.f32.mrf.mxu0 }
 0x149   :  { %v1983_v61 = vpop.f32.mrf.mxu3  ;;  %v1957_v1 = vpop.f32.mrf.mxu1  ;;  %v1970_v2 = vadd.f32 %v1969_v59, %v1956_v52  ;;  %v1944_v5 = vadd.f32 %v1943_v58, %v1930_v22 }
 0x14b   :  { %v1984_v6 = vadd.f32 %v1983_v61, %v1970_v2  ;;  %v1958_v9 = vadd.f32 %v1957_v1, %v1944_v5 }
 0x150   :  { %v1971_v10 = vpop.f32.mrf.mxu2 }
 0x151   :  { %v1985_v17 = vpop.f32.mrf.mxu3  ;;  %v1972_v14 = vadd.f32 %v1971_v10, %v1958_v9 }
 0x153   :  { %v1986_v18 = vadd.f32 %v1985_v17, %v1972_v14 }
 0x160   :  { %v1997_v42 = vpop.f32.mrf.mxu0 }
 0x161   :  { %v2011_v3 = vpop.f32.mrf.mxu1  ;;  %v1998_v11 = vadd.f32 %v1997_v42, %v1984_v6 }
 0x163   :  { %v2012_v15 = vadd.f32 %v2011_v3, %v1998_v11 }
 0x168   :  { %v2025_v8 = vpop.f32.mrf.mxu2  ;;  %v1999_v0 = vpop.f32.mrf.mxu0 }
 0x169   :  { %v2039_v13 = vpop.f32.mrf.mxu3  ;;  %v2013_v12 = vpop.f32.mrf.mxu1  ;;  %v2026_v55 = vadd.f32 %v2025_v8, %v2012_v15  ;;  %v2000_v4 = vadd.f32 %v1999_v0, %v1986_v18 }
 0x16b   :  { %v2040_v20 = vadd.f32 %v2039_v13, %v2026_v55  ;;  %v2014_v25 = vadd.f32 %v2013_v12, %v2000_v4 }
 0x170   :  { %v2027_v19 = vpop.f32.mrf.mxu2 }
 0x171   :  { %v2041_v23 = vpop.f32.mrf.mxu3  ;;  %v2028_v32 = vadd.f32 %v2027_v19, %v2014_v25 }
 0x173   :  { %v2042_v30 = vadd.f32 %v2041_v23, %v2028_v32 }
 0x180   :  { %v2053_v24 = vpop.f32.mrf.mxu0 }
 0x181   :  { %v2054_v26 = vadd.f32 %v2053_v24, %v2040_v20  ;;  %v2067_v27 = vpop.f32.mrf.mxu1 }
 0x183   :  { %v2068_v28 = vadd.f32 %v2067_v27, %v2054_v26 }
 0x188   :  { %v2081_v41 = vpop.f32.mrf.mxu2  ;;  %v2055_v34 = vpop.f32.mrf.mxu0 }
 0x189   :  { %v2082_v38 = vadd.f32 %v2081_v41, %v2068_v28  ;;  %v2095_v33 = vpop.f32.mrf.mxu3  ;;  %v2056_v46 = vadd.f32 %v2055_v34, %v2042_v30  ;;  %v2069_v7 = vpop.f32.mrf.mxu1 }
 0x18b   :  { %v2096_v37 = vadd.f32 %v2095_v33, %v2082_v38  ;;  %v2070_v48 = vadd.f32 %v2069_v7, %v2056_v46 }
 0x18d   :  { %v2101_v16 = vmax.f32 %v2096_v37, 0.0 }
 0x18f   :  { %2105 = vst [vmem:[%s5250_s3 + $0x8] sm:$0xff] %v2101_v16 }
 0x190   :  { %v2083_v39 = vpop.f32.mrf.mxu2 }
 0x191   :  { %v2084_v50 = vadd.f32 %v2083_v39, %v2070_v48  ;;  %v2097_v45 = vpop.f32.mrf.mxu3 }
 0x193   :  { %v2098_v31 = vadd.f32 %v2097_v45, %v2084_v50 }
 0x195   :  { %v2103_v51 = vmax.f32 %v2098_v31, 0.0 }
 0x197   :  { %2107 = vst [vmem:[%s5250_s3 + $0x18] sm:$0xff] %v2103_v51 }

// kernel: _lambda_.14
= control target key start
LH: loop header
LB: loop body
LE: loop exit
PB: predicated region body
PF: predicated region fallthrough
CT: control target
= control target key end

     0   :  { %s1530_s1 = inlined_call_operand.vmem [shape: f32[1024,128], index: 1, kind: input, shape index: {}]   ;;  %s1531_s0 = inlined_call_operand.vmem [shape: f32[8,1024], index: 0, kind: input, shape index: {}]   ;;  %s1532_s3 = inlined_call_operand.vmem [shape: f32[1024,128], index: 3, kind: input, shape index: {}]   ;;  %s1533_s2 = inlined_call_operand.vmem [shape: f32[1,128], index: 2, kind: input, shape index: {}, may-alias: {2,4}]   ;;  %s1534_s4 = inlined_call_operand.vmem [shape: f32[1,128], index: 4, kind: input, shape index: {}, may-alias: {2,4}]   ;;  %s1535_s6 = inlined_call_operand.vmem [shape: f32[8,128], index: 6, kind: output, shape index: {0}]   ;;  %s1536_s7 = inlined_call_operand.vmem [shape: f32[8,128], index: 7, kind: output, shape index: {1}]   ;;  %s1537_s5 = inlined_call_operand.vmem [shape: f32[8,128], index: 5, kind: input, shape index: {}]   ;;  %s1538_s8 = inlined_call_operand.vmem [shape: f32[8,128], index: 8, kind: output, shape index: {2}]  }
   0x1   :  { %v81_v0 = vld [vmem:[%s1530_s1 + $0x178] sm:$0xff]  ;;  %v80_v2 = vld [vmem:[%s1530_s1 + $0x170] sm:$0xff]  ;;  %v79_v6 = vld [vmem:[%s1530_s1 + $0x168] sm:$0xff] }
   0x2   :  { %v49_v1 = vld [vmem:[%s1530_s1 + $0x78] sm:$0xff]  ;;  %206 = vmatpush.msra.mxu2 %v81_v0  ;;  %v48_v4 = vld [vmem:[%s1530_s1 + $0x70] sm:$0xff]  ;;  %v47_v8 = vld [vmem:[%s1530_s1 + $0x68] sm:$0xff] }
   0x3   :  { %166 = vmatpush.msra.mxu0 %v49_v1  ;;  %v97_v3 = vld [vmem:[%s1530_s1 + $0x1f8] sm:$0xff]  ;;  %v96_v7 = vld [vmem:[%s1530_s1 + $0x1f0] sm:$0xff]  ;;  %v95_v10 = vld [vmem:[%s1530_s1 + $0x1e8] sm:$0xff] }
   0x4   :  { %v65_v5 = vld [vmem:[%s1530_s1 + $0xf8] sm:$0xff]  ;;  %226 = vmatpush.msra.mxu3 %v97_v3  ;;  %207 = vmatpush.msra.mxu2 %v80_v2  ;;  %v64_v9 = vld [vmem:[%s1530_s1 + $0xf0] sm:$0xff]  ;;  %v78_v11 = vld [vmem:[%s1530_s1 + $0x160] sm:$0xff] }
   0x5   :  { %186 = vmatpush.msra.mxu1 %v65_v5  ;;  %167 = vmatpush.msra.mxu0 %v48_v4  ;;  %v46_v12 = vld [vmem:[%s1530_s1 + $0x60] sm:$0xff]  ;;  %v63_v13 = vld [vmem:[%s1530_s1 + $0xe8] sm:$0xff]  ;;  %v77_v16 = vld [vmem:[%s1530_s1 + $0x158] sm:$0xff] }
   0x6   :  { %227 = vmatpush.msra.mxu3 %v96_v7  ;;  %208 = vmatpush.msra.mxu2 %v79_v6  ;;  %v94_v14 = vld [vmem:[%s1530_s1 + $0x1e0] sm:$0xff]  ;;  %v45_v17 = vld [vmem:[%s1530_s1 + $0x58] sm:$0xff]  ;;  %v76_v20 = vld [vmem:[%s1530_s1 + $0x150] sm:$0xff] }
   0x7   :  { %187 = vmatpush.msra.mxu1 %v64_v9  ;;  %168 = vmatpush.msra.mxu0 %v47_v8  ;;  %v62_v15 = vld [vmem:[%s1530_s1 + $0xe0] sm:$0xff]  ;;  %v93_v18 = vld [vmem:[%s1530_s1 + $0x1d8] sm:$0xff]  ;;  %v44_v21 = vld [vmem:[%s1530_s1 + $0x50] sm:$0xff] }
   0x8   :  { %228 = vmatpush.msra.mxu3 %v95_v10  ;;  %209 = vmatpush.msra.mxu2 %v78_v11  ;;  %v61_v19 = vld [vmem:[%s1530_s1 + $0xd8] sm:$0xff]  ;;  %v92_v22 = vld [vmem:[%s1530_s1 + $0x1d0] sm:$0xff]  ;;  %v75_v24 = vld [vmem:[%s1530_s1 + $0x148] sm:$0xff] }
   0x9   :  { %188 = vmatpush.msra.mxu1 %v63_v13  ;;  %169 = vmatpush.msra.mxu0 %v46_v12  ;;  %v60_v23 = vld [vmem:[%s1530_s1 + $0xd0] sm:$0xff]  ;;  %v43_v25 = vld [vmem:[%s1530_s1 + $0x48] sm:$0xff]  ;;  %v74_v28 = vld [vmem:[%s1530_s1 + $0x140] sm:$0xff] }
   0xa   :  { %229 = vmatpush.msra.mxu3 %v94_v14  ;;  %210 = vmatpush.msra.mxu2 %v77_v16  ;;  %v91_v26 = vld [vmem:[%s1530_s1 + $0x1c8] sm:$0xff]  ;;  %v42_v29 = vld [vmem:[%s1530_s1 + $0x40] sm:$0xff]  ;;  %v73_v32 = vld [vmem:[%s1530_s1 + $0x138] sm:$0xff] }
   0xb   :  { %189 = vmatpush.msra.mxu1 %v62_v15  ;;  %170 = vmatpush.msra.mxu0 %v45_v17  ;;  %v59_v27 = vld [vmem:[%s1530_s1 + $0xc8] sm:$0xff]  ;;  %v90_v30 = vld [vmem:[%s1530_s1 + $0x1c0] sm:$0xff]  ;;  %v41_v33 = vld [vmem:[%s1530_s1 + $0x38] sm:$0xff] }
   0xc   :  { %230 = vmatpush.msra.mxu3 %v93_v18  ;;  %211 = vmatpush.msra.mxu2 %v76_v20  ;;  %v58_v31 = vld [vmem:[%s1530_s1 + $0xc0] sm:$0xff]  ;;  %v89_v34 = vld [vmem:[%s1530_s1 + $0x1b8] sm:$0xff]  ;;  %v72_v36 = vld [vmem:[%s1530_s1 + $0x130] sm:$0xff] }
   0xd   :  { %190 = vmatpush.msra.mxu1 %v61_v19  ;;  %171 = vmatpush.msra.mxu0 %v44_v21  ;;  %v57_v35 = vld [vmem:[%s1530_s1 + $0xb8] sm:$0xff]  ;;  %v40_v37 = vld [vmem:[%s1530_s1 + $0x30] sm:$0xff]  ;;  %v71_v40 = vld [vmem:[%s1530_s1 + $0x128] sm:$0xff] }
   0xe   :  { %231 = vmatpush.msra.mxu3 %v92_v22  ;;  %212 = vmatpush.msra.mxu2 %v75_v24  ;;  %v88_v38 = vld [vmem:[%s1530_s1 + $0x1b0] sm:$0xff]  ;;  %v39_v41 = vld [vmem:[%s1530_s1 + $0x28] sm:$0xff]  ;;  %v70_v44 = vld [vmem:[%s1530_s1 + $0x120] sm:$0xff] }
   0xf   :  { %191 = vmatpush.msra.mxu1 %v60_v23  ;;  %172 = vmatpush.msra.mxu0 %v43_v25  ;;  %v56_v39 = vld [vmem:[%s1530_s1 + $0xb0] sm:$0xff]  ;;  %v87_v42 = vld [vmem:[%s1530_s1 + $0x1a8] sm:$0xff]  ;;  %v38_v45 = vld [vmem:[%s1530_s1 + $0x20] sm:$0xff] }
  0x10   :  { %232 = vmatpush.msra.mxu3 %v91_v26  ;;  %213 = vmatpush.msra.mxu2 %v74_v28  ;;  %v55_v43 = vld [vmem:[%s1530_s1 + $0xa8] sm:$0xff]  ;;  %v86_v46 = vld [vmem:[%s1530_s1 + $0x1a0] sm:$0xff]  ;;  %v69_v48 = vld [vmem:[%s1530_s1 + $0x118] sm:$0xff] }
  0x11   :  { %192 = vmatpush.msra.mxu1 %v59_v27  ;;  %173 = vmatpush.msra.mxu0 %v42_v29  ;;  %v54_v47 = vld [vmem:[%s1530_s1 + $0xa0] sm:$0xff]  ;;  %v37_v49 = vld [vmem:[%s1530_s1 + $0x18] sm:$0xff]  ;;  %v68_v52 = vld [vmem:[%s1530_s1 + $0x110] sm:$0xff] }
  0x12   :  { %233 = vmatpush.msra.mxu3 %v90_v30  ;;  %214 = vmatpush.msra.mxu2 %v73_v32  ;;  %v85_v50 = vld [vmem:[%s1530_s1 + $0x198] sm:$0xff]  ;;  %v36_v53 = vld [vmem:[%s1530_s1 + $0x10] sm:$0xff]  ;;  %v67_v56 = vld [vmem:[%s1530_s1 + $0x108] sm:$0xff] }
  0x13   :  { %193 = vmatpush.msra.mxu1 %v58_v31  ;;  %174 = vmatpush.msra.mxu0 %v41_v33  ;;  %v53_v51 = vld [vmem:[%s1530_s1 + $0x98] sm:$0xff]  ;;  %v84_v54 = vld [vmem:[%s1530_s1 + $0x190] sm:$0xff]  ;;  %v35_v57 = vld [vmem:[%s1530_s1 + $0x8] sm:$0xff] }
  0x14   :  { %234 = vmatpush.msra.mxu3 %v89_v34  ;;  %215 = vmatpush.msra.mxu2 %v72_v36  ;;  %v52_v55 = vld [vmem:[%s1530_s1 + $0x90] sm:$0xff]  ;;  %v83_v58 = vld [vmem:[%s1530_s1 + $0x188] sm:$0xff]  ;;  %v66_v60 = vld [vmem:[%s1530_s1 + $0x100] sm:$0xff] }
  0x15   :  { %194 = vmatpush.msra.mxu1 %v57_v35  ;;  %175 = vmatpush.msra.mxu0 %v40_v37  ;;  %v51_v59 = vld [vmem:[%s1530_s1 + $0x88] sm:$0xff]  ;;  %v34_v61 = vld [vmem:[%s1530_s1] sm:$0xff]  ;;  %v145_v62 = vld [vmem:[%s1530_s1 + $0x378] sm:$0xff] }
  0x16   :  { %235 = vmatpush.msra.mxu3 %v88_v38  ;;  %216 = vmatpush.msra.mxu2 %v71_v40  ;;  %v82_v63 = vld [vmem:[%s1530_s1 + $0x180] sm:$0xff]  ;;  %v113_v0 = vld [vmem:[%s1530_s1 + $0x278] sm:$0xff]  ;;  %v144_v2 = vld [vmem:[%s1530_s1 + $0x370] sm:$0xff] }
  0x17   :  { %195 = vmatpush.msra.mxu1 %v56_v39  ;;  %176 = vmatpush.msra.mxu0 %v39_v41  ;;  %v161_v1 = vld [vmem:[%s1530_s1 + $0x3f8] sm:$0xff]  ;;  %v50_v3 = vld [vmem:[%s1530_s1 + $0x80] sm:$0xff]  ;;  %v112_v4 = vld [vmem:[%s1530_s1 + $0x270] sm:$0xff] }
  0x18   :  { %236 = vmatpush.msra.mxu3 %v87_v42  ;;  %217 = vmatpush.msra.mxu2 %v70_v44  ;;  %v129_v5 = vld [vmem:[%s1530_s1 + $0x2f8] sm:$0xff]  ;;  %v143_v6 = vld [vmem:[%s1530_s1 + $0x368] sm:$0xff]  ;;  %v160_v7 = vld [vmem:[%s1530_s1 + $0x3f0] sm:$0xff] }
  0x19   :  { %196 = vmatpush.msra.mxu1 %v55_v43  ;;  %177 = vmatpush.msra.mxu0 %v38_v45  ;;  %v111_v8 = vld [vmem:[%s1530_s1 + $0x268] sm:$0xff]  ;;  %v128_v9 = vld [vmem:[%s1530_s1 + $0x2f0] sm:$0xff]  ;;  %v142_v10 = vld [vmem:[%s1530_s1 + $0x360] sm:$0xff] }
  0x1a   :  { %237 = vmatpush.msra.mxu3 %v86_v46  ;;  %218 = vmatpush.msra.mxu2 %v69_v48  ;;  %v159_v11 = vld [vmem:[%s1530_s1 + $0x3e8] sm:$0xff]  ;;  %v110_v12 = vld [vmem:[%s1530_s1 + $0x260] sm:$0xff]  ;;  %v141_v14 = vld [vmem:[%s1530_s1 + $0x358] sm:$0xff] }
  0x1b   :  { %197 = vmatpush.msra.mxu1 %v54_v47  ;;  %178 = vmatpush.msra.mxu0 %v37_v49  ;;  %v127_v13 = vld [vmem:[%s1530_s1 + $0x2e8] sm:$0xff]  ;;  %v158_v15 = vld [vmem:[%s1530_s1 + $0x3e0] sm:$0xff]  ;;  %v109_v16 = vld [vmem:[%s1530_s1 + $0x258] sm:$0xff] }
  0x1c   :  { %238 = vmatpush.msra.mxu3 %v85_v50  ;;  %219 = vmatpush.msra.mxu2 %v68_v52  ;;  %v126_v17 = vld [vmem:[%s1530_s1 + $0x2e0] sm:$0xff]  ;;  %v140_v18 = vld [vmem:[%s1530_s1 + $0x350] sm:$0xff]  ;;  %v157_v19 = vld [vmem:[%s1530_s1 + $0x3d8] sm:$0xff] }
  0x1d   :  { %198 = vmatpush.msra.mxu1 %v53_v51  ;;  %179 = vmatpush.msra.mxu0 %v36_v53  ;;  %v108_v20 = vld [vmem:[%s1530_s1 + $0x250] sm:$0xff]  ;;  %v125_v21 = vld [vmem:[%s1530_s1 + $0x2d8] sm:$0xff]  ;;  %v139_v22 = vld [vmem:[%s1530_s1 + $0x348] sm:$0xff] }
  0x1e   :  { %239 = vmatpush.msra.mxu3 %v84_v54  ;;  %220 = vmatpush.msra.mxu2 %v67_v56  ;;  %v156_v23 = vld [vmem:[%s1530_s1 + $0x3d0] sm:$0xff]  ;;  %v107_v24 = vld [vmem:[%s1530_s1 + $0x248] sm:$0xff]  ;;  %v138_v26 = vld [vmem:[%s1530_s1 + $0x340] sm:$0xff] }
  0x1f   :  { %199 = vmatpush.msra.mxu1 %v52_v55  ;;  %180 = vmatpush.msra.mxu0 %v35_v57  ;;  %v124_v25 = vld [vmem:[%s1530_s1 + $0x2d0] sm:$0xff]  ;;  %v155_v27 = vld [vmem:[%s1530_s1 + $0x3c8] sm:$0xff]  ;;  %v106_v28 = vld [vmem:[%s1530_s1 + $0x240] sm:$0xff] }
  0x20   :  { %240 = vmatpush.msra.mxu3 %v83_v58  ;;  %221 = vmatpush.msra.mxu2 %v66_v60  ;;  %v123_v29 = vld [vmem:[%s1530_s1 + $0x2c8] sm:$0xff]  ;;  %v137_v30 = vld [vmem:[%s1530_s1 + $0x338] sm:$0xff]  ;;  %v154_v31 = vld [vmem:[%s1530_s1 + $0x3c0] sm:$0xff] }
  0x21   :  { %200 = vmatpush.msra.mxu1 %v51_v59  ;;  %181 = vmatpush.msra.mxu0 %v34_v61  ;;  %v105_v32 = vld [vmem:[%s1530_s1 + $0x238] sm:$0xff]  ;;  %v122_v33 = vld [vmem:[%s1530_s1 + $0x2c0] sm:$0xff]  ;;  %v136_v34 = vld [vmem:[%s1530_s1 + $0x330] sm:$0xff] }
  0x22   :  { %286 = vmatpush.msrb.mxu2 %v145_v62  ;;  %241 = vmatpush.msra.mxu3 %v82_v63  ;;  %v153_v35 = vld [vmem:[%s1530_s1 + $0x3b8] sm:$0xff]  ;;  %v104_v36 = vld [vmem:[%s1530_s1 + $0x230] sm:$0xff]  ;;  %v135_v38 = vld [vmem:[%s1530_s1 + $0x328] sm:$0xff] }
  0x23   :  { %246 = vmatpush.msrb.mxu0 %v113_v0  ;;  %201 = vmatpush.msra.mxu1 %v50_v3  ;;  %v121_v37 = vld [vmem:[%s1530_s1 + $0x2b8] sm:$0xff]  ;;  %v152_v39 = vld [vmem:[%s1530_s1 + $0x3b0] sm:$0xff]  ;;  %v103_v40 = vld [vmem:[%s1530_s1 + $0x228] sm:$0xff] }
  0x24   :  { %306 = vmatpush.msrb.mxu3 %v161_v1  ;;  %287 = vmatpush.msrb.mxu2 %v144_v2  ;;  %v120_v41 = vld [vmem:[%s1530_s1 + $0x2b0] sm:$0xff]  ;;  %v134_v42 = vld [vmem:[%s1530_s1 + $0x320] sm:$0xff]  ;;  %v151_v43 = vld [vmem:[%s1530_s1 + $0x3a8] sm:$0xff] }
  0x25   :  { %247 = vmatpush.msrb.mxu0 %v112_v4  ;;  %266 = vmatpush.msrb.mxu1 %v129_v5  ;;  %v102_v44 = vld [vmem:[%s1530_s1 + $0x220] sm:$0xff]  ;;  %v119_v45 = vld [vmem:[%s1530_s1 + $0x2a8] sm:$0xff]  ;;  %v133_v46 = vld [vmem:[%s1530_s1 + $0x318] sm:$0xff] }
  0x26   :  { %288 = vmatpush.msrb.mxu2 %v143_v6  ;;  %307 = vmatpush.msrb.mxu3 %v160_v7  ;;  %v150_v47 = vld [vmem:[%s1530_s1 + $0x3a0] sm:$0xff]  ;;  %v101_v48 = vld [vmem:[%s1530_s1 + $0x218] sm:$0xff]  ;;  %v132_v50 = vld [vmem:[%s1530_s1 + $0x310] sm:$0xff] }
  0x27   :  { %248 = vmatpush.msrb.mxu0 %v111_v8  ;;  %267 = vmatpush.msrb.mxu1 %v128_v9  ;;  %v118_v49 = vld [vmem:[%s1530_s1 + $0x2a0] sm:$0xff]  ;;  %v149_v51 = vld [vmem:[%s1530_s1 + $0x398] sm:$0xff]  ;;  %v100_v52 = vld [vmem:[%s1530_s1 + $0x210] sm:$0xff] }
  0x28   :  { %289 = vmatpush.msrb.mxu2 %v142_v10  ;;  %308 = vmatpush.msrb.mxu3 %v159_v11  ;;  %v117_v53 = vld [vmem:[%s1530_s1 + $0x298] sm:$0xff]  ;;  %v131_v54 = vld [vmem:[%s1530_s1 + $0x308] sm:$0xff]  ;;  %v148_v55 = vld [vmem:[%s1530_s1 + $0x390] sm:$0xff] }
  0x29   :  { %249 = vmatpush.msrb.mxu0 %v110_v12  ;;  %268 = vmatpush.msrb.mxu1 %v127_v13  ;;  %v99_v56 = vld [vmem:[%s1530_s1 + $0x208] sm:$0xff]  ;;  %v116_v57 = vld [vmem:[%s1530_s1 + $0x290] sm:$0xff]  ;;  %v130_v58 = vld [vmem:[%s1530_s1 + $0x300] sm:$0xff] }
  0x2a   :  { %290 = vmatpush.msrb.mxu2 %v141_v14  ;;  %309 = vmatpush.msrb.mxu3 %v158_v15  ;;  %v147_v59 = vld [vmem:[%s1530_s1 + $0x388] sm:$0xff]  ;;  %v1063_v60 = vld [vmem:[%s1531_s0 + $0x10] sm:$0xff]  ;;  %v98_v61 = vld [vmem:[%s1530_s1 + $0x200] sm:$0xff] }
  0x2b   :  { %250 = vmatpush.msrb.mxu0 %v109_v16  ;;  %269 = vmatpush.msrb.mxu1 %v126_v17  ;;  %v373_v62 = vld [vmem:[%s1532_s3 + $0x178] sm:$0xff]  ;;  %v115_v63 = vld [vmem:[%s1530_s1 + $0x288] sm:$0xff]  ;;  %v146_v0 = vld [vmem:[%s1530_s1 + $0x380] sm:$0xff] }
  0x2c   :  { %291 = vmatpush.msrb.mxu2 %v140_v18  ;;  %310 = vmatpush.msrb.mxu3 %v157_v19  ;;  %v1080_v1 = vld [vmem:[%s1531_s0] sm:$0xff]  ;;  %v1086_v2 = vld [vmem:[%s1531_s0 + $0x18] sm:$0xff]  ;;  %v372_v4 = vld [vmem:[%s1532_s3 + $0x170] sm:$0xff] }
  0x2d   :  { %251 = vmatpush.msrb.mxu0 %v108_v20  ;;  %270 = vmatpush.msrb.mxu1 %v125_v21  ;;  %v341_v3 = vld [vmem:[%s1532_s3 + $0x78] sm:$0xff]  ;;  %v114_v6 = vld [vmem:[%s1530_s1 + $0x280] sm:$0xff]  ;;  %v340_v7 = vld [vmem:[%s1532_s3 + $0x70] sm:$0xff] }
  0x2e   :  { %292 = vmatpush.msrb.mxu2 %v139_v22  ;;  %311 = vmatpush.msrb.mxu3 %v156_v23  ;;  %v389_v5 = vld [vmem:[%s1532_s3 + $0x1f8] sm:$0xff]  ;;  %v1108_v8 = vld [vmem:[%s1531_s0 + $0x8] sm:$0xff]  ;;  %v388_v11 = vld [vmem:[%s1532_s3 + $0x1f0] sm:$0xff] }
  0x2f   :  { %252 = vmatpush.msrb.mxu0 %v107_v24  ;;  %271 = vmatpush.msrb.mxu1 %v124_v25  ;;  %v371_v9 = vld [vmem:[%s1532_s3 + $0x168] sm:$0xff]  ;;  %v357_v10 = vld [vmem:[%s1532_s3 + $0xf8] sm:$0xff]  ;;  %v370_v13 = vld [vmem:[%s1532_s3 + $0x160] sm:$0xff] }
  0x30   :  { %293 = vmatpush.msrb.mxu2 %v138_v26  ;;  %312 = vmatpush.msrb.mxu3 %v155_v27  ;;  %v339_v12 = vld [vmem:[%s1532_s3 + $0x68] sm:$0xff]  ;;  %v356_v14 = vld [vmem:[%s1532_s3 + $0xf0] sm:$0xff]  ;;  %v338_v17 = vld [vmem:[%s1532_s3 + $0x60] sm:$0xff] }
  0x31   :  { %253 = vmatpush.msrb.mxu0 %v106_v28  ;;  %272 = vmatpush.msrb.mxu1 %v123_v29  ;;  %v387_v15 = vld [vmem:[%s1532_s3 + $0x1e8] sm:$0xff]  ;;  %v1135_v16 = vld [vmem:[%s1531_s0 + $0x30] sm:$0xff]  ;;  %v369_v19 = vld [vmem:[%s1532_s3 + $0x158] sm:$0xff] }
  0x32   :  { %294 = vmatpush.msrb.mxu2 %v137_v30  ;;  %313 = vmatpush.msrb.mxu3 %v154_v31  ;;  %v355_v18 = vld [vmem:[%s1532_s3 + $0xe8] sm:$0xff]  ;;  %v386_v20 = vld [vmem:[%s1532_s3 + $0x1e0] sm:$0xff]  ;;  %v1158_v22 = vld [vmem:[%s1531_s0 + $0x38] sm:$0xff] }
  0x33   :  { %254 = vmatpush.msrb.mxu0 %v105_v32  ;;  %273 = vmatpush.msrb.mxu1 %v122_v33  ;;  %v1152_v21 = vld [vmem:[%s1531_s0 + $0x20] sm:$0xff]  ;;  %v337_v23 = vld [vmem:[%s1532_s3 + $0x58] sm:$0xff]  ;;  %v368_v25 = vld [vmem:[%s1532_s3 + $0x150] sm:$0xff] }
  0x34   :  { %295 = vmatpush.msrb.mxu2 %v136_v34  ;;  %314 = vmatpush.msrb.mxu3 %v153_v35  ;;  %v354_v24 = vld [vmem:[%s1532_s3 + $0xe0] sm:$0xff]  ;;  %v385_v26 = vld [vmem:[%s1532_s3 + $0x1d8] sm:$0xff]  ;;  %v1176_v27 = vld [vmem:[%s1531_s0 + $0x28] sm:$0xff] }
  0x35   :  { %255 = vmatpush.msrb.mxu0 %v104_v36  ;;  %274 = vmatpush.msrb.mxu1 %v121_v37  ;;  %v336_v28 = vld [vmem:[%s1532_s3 + $0x50] sm:$0xff]  ;;  %v353_v29 = vld [vmem:[%s1532_s3 + $0xd8] sm:$0xff]  ;;  %v367_v30 = vld [vmem:[%s1532_s3 + $0x148] sm:$0xff] }
  0x36   :  { %296 = vmatpush.msrb.mxu2 %v135_v38  ;;  %315 = vmatpush.msrb.mxu3 %v152_v39  ;;  %v384_v31 = vld [vmem:[%s1532_s3 + $0x1d0] sm:$0xff]  ;;  %v335_v32 = vld [vmem:[%s1532_s3 + $0x48] sm:$0xff]  ;;  %v366_v34 = vld [vmem:[%s1532_s3 + $0x140] sm:$0xff] }
  0x37   :  { %256 = vmatpush.msrb.mxu0 %v103_v40  ;;  %275 = vmatpush.msrb.mxu1 %v120_v41  ;;  %v352_v33 = vld [vmem:[%s1532_s3 + $0xd0] sm:$0xff]  ;;  %v383_v35 = vld [vmem:[%s1532_s3 + $0x1c8] sm:$0xff]  ;;  %v334_v36 = vld [vmem:[%s1532_s3 + $0x40] sm:$0xff] }
  0x38   :  { %297 = vmatpush.msrb.mxu2 %v134_v42  ;;  %316 = vmatpush.msrb.mxu3 %v151_v43  ;;  %v351_v37 = vld [vmem:[%s1532_s3 + $0xc8] sm:$0xff]  ;;  %v365_v38 = vld [vmem:[%s1532_s3 + $0x138] sm:$0xff]  ;;  %v382_v39 = vld [vmem:[%s1532_s3 + $0x1c0] sm:$0xff] }
  0x39   :  { %257 = vmatpush.msrb.mxu0 %v102_v44  ;;  %276 = vmatpush.msrb.mxu1 %v119_v45  ;;  %v333_v40 = vld [vmem:[%s1532_s3 + $0x38] sm:$0xff]  ;;  %v350_v41 = vld [vmem:[%s1532_s3 + $0xc0] sm:$0xff]  ;;  %v364_v42 = vld [vmem:[%s1532_s3 + $0x130] sm:$0xff] }
  0x3a   :  { %298 = vmatpush.msrb.mxu2 %v133_v46  ;;  %317 = vmatpush.msrb.mxu3 %v150_v47  ;;  %v381_v43 = vld [vmem:[%s1532_s3 + $0x1b8] sm:$0xff]  ;;  %v332_v44 = vld [vmem:[%s1532_s3 + $0x30] sm:$0xff]  ;;  %v363_v46 = vld [vmem:[%s1532_s3 + $0x128] sm:$0xff] }
  0x3b   :  { %258 = vmatpush.msrb.mxu0 %v101_v48  ;;  %277 = vmatpush.msrb.mxu1 %v118_v49  ;;  %v349_v45 = vld [vmem:[%s1532_s3 + $0xb8] sm:$0xff]  ;;  %v380_v47 = vld [vmem:[%s1532_s3 + $0x1b0] sm:$0xff]  ;;  %v331_v48 = vld [vmem:[%s1532_s3 + $0x28] sm:$0xff] }
  0x3c   :  { %299 = vmatpush.msrb.mxu2 %v132_v50  ;;  %318 = vmatpush.msrb.mxu3 %v149_v51  ;;  %v348_v49 = vld [vmem:[%s1532_s3 + $0xb0] sm:$0xff]  ;;  %v362_v50 = vld [vmem:[%s1532_s3 + $0x120] sm:$0xff]  ;;  %v379_v51 = vld [vmem:[%s1532_s3 + $0x1a8] sm:$0xff] }
  0x3d   :  { %259 = vmatpush.msrb.mxu0 %v100_v52  ;;  %278 = vmatpush.msrb.mxu1 %v117_v53  ;;  %v330_v52 = vld [vmem:[%s1532_s3 + $0x20] sm:$0xff]  ;;  %v347_v53 = vld [vmem:[%s1532_s3 + $0xa8] sm:$0xff] }
  0x3e   :  { %300 = vmatpush.msrb.mxu2 %v131_v54  ;;  %319 = vmatpush.msrb.mxu3 %v148_v55  ;;  %v361_v54 = vld [vmem:[%s1532_s3 + $0x118] sm:$0xff]  ;;  %v378_v55 = vld [vmem:[%s1532_s3 + $0x1a0] sm:$0xff] }
  0x3f   :  { %260 = vmatpush.msrb.mxu0 %v99_v56  ;;  %279 = vmatpush.msrb.mxu1 %v116_v57  ;;  %v329_v56 = vld [vmem:[%s1532_s3 + $0x18] sm:$0xff]  ;;  %v346_v57 = vld [vmem:[%s1532_s3 + $0xa0] sm:$0xff] }
  0x40   :  { %301 = vmatpush.msrb.mxu2 %v130_v58  ;;  %320 = vmatpush.msrb.mxu3 %v147_v59  ;;  %v360_v58 = vld [vmem:[%s1532_s3 + $0x110] sm:$0xff]  ;;  %v377_v59 = vld [vmem:[%s1532_s3 + $0x198] sm:$0xff] }
  0x41   :  { %222 = vmatmul.f32.vlgmr.msra.gmra.mxu2 %v1063_v60  ;;  %261 = vmatpush.msrb.mxu0 %v98_v61  ;;  %v328_v61 = vld [vmem:[%s1532_s3 + $0x10] sm:$0xff] }
  0x42   :  { %498 = vmatpush.msra.mxu2 %v373_v62  ;;  %280 = vmatpush.msrb.mxu1 %v115_v63  ;;  %v345_v62 = vld [vmem:[%s1532_s3 + $0x98] sm:$0xff]  ;;  %v359_v63 = vld [vmem:[%s1532_s3 + $0x108] sm:$0xff] }
  0x43   :  { %321 = vmatpush.msrb.mxu3 %v146_v0  ;;  %182 = vmatmul.f32.vlgmr.msra.gmra.mxu0 %v1080_v1  ;;  %v376_v0 = vld [vmem:[%s1532_s3 + $0x190] sm:$0xff] }
  0x44   :  { %242 = vmatmul.f32.vlgmr.msra.gmra.mxu3 %v1086_v2  ;;  %458 = vmatpush.msra.mxu0 %v341_v3  ;;  %v327_v3 = vld [vmem:[%s1532_s3 + $0x8] sm:$0xff] }
  0x45   :  { %499 = vmatpush.msra.mxu2 %v372_v4  ;;  %518 = vmatpush.msra.mxu3 %v389_v5  ;;  %v344_v4 = vld [vmem:[%s1532_s3 + $0x90] sm:$0xff]  ;;  %v358_v5 = vld [vmem:[%s1532_s3 + $0x100] sm:$0xff] }
  0x46   :  { %281 = vmatpush.msrb.mxu1 %v114_v6  ;;  %459 = vmatpush.msra.mxu0 %v340_v7  ;;  %v375_v6 = vld [vmem:[%s1532_s3 + $0x188] sm:$0xff]  ;;  %v437_v7 = vld [vmem:[%s1532_s3 + $0x378] sm:$0xff] }
  0x47   :  { %202 = vmatmul.f32.vlgmr.msra.gmra.mxu1 %v1108_v8  ;;  %500 = vmatpush.msra.mxu2 %v371_v9  ;;  %v326_v9 = vld [vmem:[%s1532_s3] sm:$0xff] }
  0x48   :  { %478 = vmatpush.msra.mxu1 %v357_v10  ;;  %519 = vmatpush.msra.mxu3 %v388_v11  ;;  %v343_v10 = vld [vmem:[%s1532_s3 + $0x88] sm:$0xff]  ;;  %v374_v11 = vld [vmem:[%s1532_s3 + $0x180] sm:$0xff] }
  0x49   :  { %460 = vmatpush.msra.mxu0 %v339_v12  ;;  %501 = vmatpush.msra.mxu2 %v370_v13  ;;  %v405_v12 = vld [vmem:[%s1532_s3 + $0x278] sm:$0xff]  ;;  %v436_v13 = vld [vmem:[%s1532_s3 + $0x370] sm:$0xff] }
  0x4a   :  { %479 = vmatpush.msra.mxu1 %v356_v14  ;;  %520 = vmatpush.msra.mxu3 %v387_v15  ;;  %v453_v14 = vld [vmem:[%s1532_s3 + $0x3f8] sm:$0xff]  ;;  %v342_v15 = vld [vmem:[%s1532_s3 + $0x80] sm:$0xff] }
  0x4b   :  { %302 = vmatmul.f32.vlgmr.msrb.gmra.mxu2 %v1135_v16  ;;  %461 = vmatpush.msra.mxu0 %v338_v17  ;;  %v404_v17 = vld [vmem:[%s1532_s3 + $0x270] sm:$0xff] }
  0x4c   :  { %480 = vmatpush.msra.mxu1 %v355_v18  ;;  %502 = vmatpush.msra.mxu2 %v369_v19  ;;  %v421_v18 = vld [vmem:[%s1532_s3 + $0x2f8] sm:$0xff]  ;;  %v435_v19 = vld [vmem:[%s1532_s3 + $0x368] sm:$0xff] }
  0x4d   :  { %521 = vmatpush.msra.mxu3 %v386_v20  ;;  %262 = vmatmul.f32.vlgmr.msrb.gmra.mxu0 %v1152_v21  ;;  %v452_v20 = vld [vmem:[%s1532_s3 + $0x3f0] sm:$0xff] }
  0x4e   :  { %322 = vmatmul.f32.vlgmr.msrb.gmra.mxu3 %v1158_v22  ;;  %462 = vmatpush.msra.mxu0 %v337_v23  ;;  %v403_v23 = vld [vmem:[%s1532_s3 + $0x268] sm:$0xff] }
  0x4f   :  { %481 = vmatpush.msra.mxu1 %v354_v24  ;;  %503 = vmatpush.msra.mxu2 %v368_v25  ;;  %v420_v24 = vld [vmem:[%s1532_s3 + $0x2f0] sm:$0xff]  ;;  %v434_v25 = vld [vmem:[%s1532_s3 + $0x360] sm:$0xff] }
  0x50   :  { %522 = vmatpush.msra.mxu3 %v385_v26  ;;  %282 = vmatmul.f32.vlgmr.msrb.gmra.mxu1 %v1176_v27  ;;  %v451_v26 = vld [vmem:[%s1532_s3 + $0x3e8] sm:$0xff] }
  0x51   :  { %463 = vmatpush.msra.mxu0 %v336_v28  ;;  %482 = vmatpush.msra.mxu1 %v353_v29  ;;  %v402_v28 = vld [vmem:[%s1532_s3 + $0x260] sm:$0xff]  ;;  %v419_v29 = vld [vmem:[%s1532_s3 + $0x2e8] sm:$0xff] }
  0x52   :  { %504 = vmatpush.msra.mxu2 %v367_v30  ;;  %523 = vmatpush.msra.mxu3 %v384_v31  ;;  %v433_v30 = vld [vmem:[%s1532_s3 + $0x358] sm:$0xff]  ;;  %v450_v31 = vld [vmem:[%s1532_s3 + $0x3e0] sm:$0xff] }
  0x53   :  { %464 = vmatpush.msra.mxu0 %v335_v32  ;;  %483 = vmatpush.msra.mxu1 %v352_v33  ;;  %v401_v32 = vld [vmem:[%s1532_s3 + $0x258] sm:$0xff]  ;;  %v418_v33 = vld [vmem:[%s1532_s3 + $0x2e0] sm:$0xff] }
  0x54   :  { %505 = vmatpush.msra.mxu2 %v366_v34  ;;  %524 = vmatpush.msra.mxu3 %v383_v35  ;;  %v432_v34 = vld [vmem:[%s1532_s3 + $0x350] sm:$0xff]  ;;  %v449_v35 = vld [vmem:[%s1532_s3 + $0x3d8] sm:$0xff] }
  0x55   :  { %465 = vmatpush.msra.mxu0 %v334_v36  ;;  %484 = vmatpush.msra.mxu1 %v351_v37  ;;  %v400_v36 = vld [vmem:[%s1532_s3 + $0x250] sm:$0xff]  ;;  %v417_v37 = vld [vmem:[%s1532_s3 + $0x2d8] sm:$0xff] }
  0x56   :  { %506 = vmatpush.msra.mxu2 %v365_v38  ;;  %525 = vmatpush.msra.mxu3 %v382_v39  ;;  %v431_v38 = vld [vmem:[%s1532_s3 + $0x348] sm:$0xff]  ;;  %v448_v39 = vld [vmem:[%s1532_s3 + $0x3d0] sm:$0xff] }
  0x57   :  { %466 = vmatpush.msra.mxu0 %v333_v40  ;;  %485 = vmatpush.msra.mxu1 %v350_v41  ;;  %v399_v40 = vld [vmem:[%s1532_s3 + $0x248] sm:$0xff]  ;;  %v416_v41 = vld [vmem:[%s1532_s3 + $0x2d0] sm:$0xff] }
  0x58   :  { %507 = vmatpush.msra.mxu2 %v364_v42  ;;  %526 = vmatpush.msra.mxu3 %v381_v43  ;;  %v430_v42 = vld [vmem:[%s1532_s3 + $0x340] sm:$0xff]  ;;  %v447_v43 = vld [vmem:[%s1532_s3 + $0x3c8] sm:$0xff] }
  0x59   :  { %467 = vmatpush.msra.mxu0 %v332_v44  ;;  %486 = vmatpush.msra.mxu1 %v349_v45  ;;  %v398_v44 = vld [vmem:[%s1532_s3 + $0x240] sm:$0xff]  ;;  %v415_v45 = vld [vmem:[%s1532_s3 + $0x2c8] sm:$0xff] }
  0x5a   :  { %508 = vmatpush.msra.mxu2 %v363_v46  ;;  %527 = vmatpush.msra.mxu3 %v380_v47  ;;  %v429_v46 = vld [vmem:[%s1532_s3 + $0x338] sm:$0xff]  ;;  %v446_v47 = vld [vmem:[%s1532_s3 + $0x3c0] sm:$0xff] }
  0x5b   :  { %468 = vmatpush.msra.mxu0 %v331_v48  ;;  %487 = vmatpush.msra.mxu1 %v348_v49  ;;  %v397_v48 = vld [vmem:[%s1532_s3 + $0x238] sm:$0xff]  ;;  %v414_v49 = vld [vmem:[%s1532_s3 + $0x2c0] sm:$0xff] }
  0x5c   :  { %509 = vmatpush.msra.mxu2 %v362_v50  ;;  %528 = vmatpush.msra.mxu3 %v379_v51  ;;  %v428_v50 = vld [vmem:[%s1532_s3 + $0x330] sm:$0xff]  ;;  %v445_v51 = vld [vmem:[%s1532_s3 + $0x3b8] sm:$0xff] }
  0x5d   :  { %469 = vmatpush.msra.mxu0 %v330_v52  ;;  %488 = vmatpush.msra.mxu1 %v347_v53  ;;  %v396_v52 = vld [vmem:[%s1532_s3 + $0x230] sm:$0xff]  ;;  %v413_v53 = vld [vmem:[%s1532_s3 + $0x2b8] sm:$0xff] }
  0x5e   :  { %510 = vmatpush.msra.mxu2 %v361_v54  ;;  %529 = vmatpush.msra.mxu3 %v378_v55  ;;  %v427_v54 = vld [vmem:[%s1532_s3 + $0x328] sm:$0xff]  ;;  %v444_v55 = vld [vmem:[%s1532_s3 + $0x3b0] sm:$0xff] }
  0x5f   :  { %470 = vmatpush.msra.mxu0 %v329_v56  ;;  %489 = vmatpush.msra.mxu1 %v346_v57  ;;  %v395_v56 = vld [vmem:[%s1532_s3 + $0x228] sm:$0xff]  ;;  %v412_v57 = vld [vmem:[%s1532_s3 + $0x2b0] sm:$0xff] }
  0x60   :  { %511 = vmatpush.msra.mxu2 %v360_v58  ;;  %530 = vmatpush.msra.mxu3 %v377_v59  ;;  %v426_v58 = vld [vmem:[%s1532_s3 + $0x320] sm:$0xff]  ;;  %v443_v59 = vld [vmem:[%s1532_s3 + $0x3a8] sm:$0xff] }
  0x61   :  { %471 = vmatpush.msra.mxu0 %v328_v61  ;;  %490 = vmatpush.msra.mxu1 %v345_v62  ;;  %v394_v61 = vld [vmem:[%s1532_s3 + $0x220] sm:$0xff]  ;;  %v411_v62 = vld [vmem:[%s1532_s3 + $0x2a8] sm:$0xff] }
  0x62   :  { %512 = vmatpush.msra.mxu2 %v359_v63  ;;  %531 = vmatpush.msra.mxu3 %v376_v0  ;;  %v425_v63 = vld [vmem:[%s1532_s3 + $0x318] sm:$0xff]  ;;  %v442_v0 = vld [vmem:[%s1532_s3 + $0x3a0] sm:$0xff] }
  0x63   :  { %472 = vmatpush.msra.mxu0 %v327_v3  ;;  %491 = vmatpush.msra.mxu1 %v344_v4  ;;  %v393_v3 = vld [vmem:[%s1532_s3 + $0x218] sm:$0xff]  ;;  %v410_v4 = vld [vmem:[%s1532_s3 + $0x2a0] sm:$0xff] }
  0x64   :  { %513 = vmatpush.msra.mxu2 %v358_v5  ;;  %532 = vmatpush.msra.mxu3 %v375_v6  ;;  %v424_v5 = vld [vmem:[%s1532_s3 + $0x310] sm:$0xff] }
  0x65   :  { %473 = vmatpush.msra.mxu0 %v326_v9  ;;  %492 = vmatpush.msra.mxu1 %v343_v10  ;;  %v392_v6 = vld [vmem:[%s1532_s3 + $0x210] sm:$0xff] }
  0x66   :  { %578 = vmatpush.msrb.mxu2 %v437_v7  ;;  %533 = vmatpush.msra.mxu3 %v374_v11  ;;  %v409_v7 = vld [vmem:[%s1532_s3 + $0x298] sm:$0xff]  ;;  %v440_v9 = vld [vmem:[%s1532_s3 + $0x390] sm:$0xff]  ;;  %v422_v11 = vld [vmem:[%s1532_s3 + $0x300] sm:$0xff] }
  0x67   :  { %538 = vmatpush.msrb.mxu0 %v405_v12  ;;  %493 = vmatpush.msra.mxu1 %v342_v15  ;;  %v408_v10 = vld [vmem:[%s1532_s3 + $0x290] sm:$0xff]  ;;  %v439_v12 = vld [vmem:[%s1532_s3 + $0x388] sm:$0xff]  ;;  %v406_v15 = vld [vmem:[%s1532_s3 + $0x280] sm:$0xff] }
  0x68   :  { %579 = vmatpush.msrb.mxu2 %v436_v13  ;;  %598 = vmatpush.msrb.mxu3 %v453_v14  ;;  %v407_v13 = vld [vmem:[%s1532_s3 + $0x288] sm:$0xff]  ;;  %v438_v14 = vld [vmem:[%s1532_s3 + $0x380] sm:$0xff] }
  0x69   :  { %539 = vmatpush.msrb.mxu0 %v404_v17  ;;  %558 = vmatpush.msrb.mxu1 %v421_v18  ;;  %v639_v17 = vld [vmem:[%s1533_s2] ss:$0 sm:$0xff] }
  0x6a   :  { %580 = vmatpush.msrb.mxu2 %v435_v19  ;;  %599 = vmatpush.msrb.mxu3 %v452_v20 }
  0x6b   :  { %540 = vmatpush.msrb.mxu0 %v403_v23  ;;  %559 = vmatpush.msrb.mxu1 %v420_v24 }
  0x6c   :  { %581 = vmatpush.msrb.mxu2 %v434_v25  ;;  %600 = vmatpush.msrb.mxu3 %v451_v26 }
  0x6d   :  { %541 = vmatpush.msrb.mxu0 %v402_v28  ;;  %560 = vmatpush.msrb.mxu1 %v419_v29 }
  0x6e   :  { %582 = vmatpush.msrb.mxu2 %v433_v30  ;;  %601 = vmatpush.msrb.mxu3 %v450_v31 }
  0x6f   :  { %542 = vmatpush.msrb.mxu0 %v401_v32  ;;  %561 = vmatpush.msrb.mxu1 %v418_v33  ;;  %v640_v33 = vld [vmem:[%s1534_s4] ss:$0 sm:$0xff] }
  0x70   :  { %583 = vmatpush.msrb.mxu2 %v432_v34  ;;  %602 = vmatpush.msrb.mxu3 %v449_v35 }
  0x71   :  { %543 = vmatpush.msrb.mxu0 %v400_v36  ;;  %562 = vmatpush.msrb.mxu1 %v417_v37 }
  0x72   :  { %584 = vmatpush.msrb.mxu2 %v431_v38  ;;  %603 = vmatpush.msrb.mxu3 %v448_v39 }
  0x73   :  { %544 = vmatpush.msrb.mxu0 %v399_v40  ;;  %563 = vmatpush.msrb.mxu1 %v416_v41 }
  0x74   :  { %585 = vmatpush.msrb.mxu2 %v430_v42  ;;  %604 = vmatpush.msrb.mxu3 %v447_v43 }
  0x75   :  { %545 = vmatpush.msrb.mxu0 %v398_v44  ;;  %564 = vmatpush.msrb.mxu1 %v415_v45 }
  0x76   :  { %586 = vmatpush.msrb.mxu2 %v429_v46  ;;  %605 = vmatpush.msrb.mxu3 %v446_v47 }
  0x77   :  { %546 = vmatpush.msrb.mxu0 %v397_v48  ;;  %565 = vmatpush.msrb.mxu1 %v414_v49 }
  0x78   :  { %587 = vmatpush.msrb.mxu2 %v428_v50  ;;  %606 = vmatpush.msrb.mxu3 %v445_v51 }
  0x79   :  { %547 = vmatpush.msrb.mxu0 %v396_v52  ;;  %566 = vmatpush.msrb.mxu1 %v413_v53  ;;  %v620_v52 = vld [vmem:[%s1537_s5] sm:$0xff] }
  0x7a   :  { %588 = vmatpush.msrb.mxu2 %v427_v54  ;;  %607 = vmatpush.msrb.mxu3 %v444_v55 }
  0x7b   :  { %548 = vmatpush.msrb.mxu0 %v395_v56  ;;  %567 = vmatpush.msrb.mxu1 %v412_v57 }
  0x7c   :  { %589 = vmatpush.msrb.mxu2 %v426_v58  ;;  %608 = vmatpush.msrb.mxu3 %v443_v59 }
  0x7d   :  { %514 = vmatmul.f32.vlgmr.msra.gmra.mxu2 %v1063_v60  ;;  %549 = vmatpush.msrb.mxu0 %v394_v61  ;;  %v441_v60 = vld [vmem:[%s1532_s3 + $0x398] sm:$0xff] }
  0x7e   :  { %568 = vmatpush.msrb.mxu1 %v411_v62  ;;  %590 = vmatpush.msrb.mxu2 %v425_v63 }
  0x7f   :  { %609 = vmatpush.msrb.mxu3 %v442_v0  ;;  %474 = vmatmul.f32.vlgmr.msra.gmra.mxu0 %v1080_v1  ;;  %v423_v1 = vld [vmem:[%s1532_s3 + $0x308] sm:$0xff] }
  0x80   :  { %534 = vmatmul.f32.vlgmr.msra.gmra.mxu3 %v1086_v2  ;;  %550 = vmatpush.msrb.mxu0 %v393_v3  ;;  %v391_v2 = vld [vmem:[%s1532_s3 + $0x208] sm:$0xff] }
  0x81   :  { %569 = vmatpush.msrb.mxu1 %v410_v4  ;;  %591 = vmatpush.msrb.mxu2 %v424_v5 }
  0x82   :  { %610 = vmatpush.msrb.mxu3 %v441_v60  ;;  %494 = vmatmul.f32.vlgmr.msra.gmra.mxu1 %v1108_v8  ;;  %v390_v8 = vld [vmem:[%s1532_s3 + $0x200] sm:$0xff] }
  0x83   :  { %551 = vmatpush.msrb.mxu0 %v392_v6  ;;  %570 = vmatpush.msrb.mxu1 %v409_v7 }
  0x84   :  { %592 = vmatpush.msrb.mxu2 %v423_v1  ;;  %611 = vmatpush.msrb.mxu3 %v440_v9 }
  0x85   :  { %552 = vmatpush.msrb.mxu0 %v391_v2  ;;  %571 = vmatpush.msrb.mxu1 %v408_v10 }
  0x86   :  { %593 = vmatpush.msrb.mxu2 %v422_v11  ;;  %612 = vmatpush.msrb.mxu3 %v439_v12 }
  0x87   :  { %594 = vmatmul.f32.vlgmr.msrb.gmra.mxu2 %v1135_v16  ;;  %553 = vmatpush.msrb.mxu0 %v390_v8 }
  0x88   :  { %572 = vmatpush.msrb.mxu1 %v407_v13  ;;  %613 = vmatpush.msrb.mxu3 %v438_v14 }
  0x89   :  { %554 = vmatmul.f32.vlgmr.msrb.gmra.mxu0 %v1152_v21  ;;  %614 = vmatmul.f32.vlgmr.msrb.gmra.mxu3 %v1158_v22 }
  0x8a   :  { %573 = vmatpush.msrb.mxu1 %v406_v15 }
  0x8b   :  { %574 = vmatmul.f32.vlgmr.msrb.gmra.mxu1 %v1176_v27 }
  0xc0   :  { %v183_v18 = vpop.f32.mrf.mxu0 }
  0xc1   :  { %v184_v16 = vadd.f32 %v639_v17, %v183_v18 }
  0xc4   :  { %v203_v19 = vpop.f32.mrf.mxu1  ;;  %v223_v20 = vpop.f32.mrf.mxu2 }
  0xc5   :  { %v204_v23 = vadd.f32 %v203_v19, %v184_v16 }
  0xc7   :  { %v224_v24 = vadd.f32 %v223_v20, %v204_v23  ;;  %v243_v25 = vpop.f32.mrf.mxu3 }
  0xc9   :  { %v244_v26 = vadd.f32 %v243_v25, %v224_v24 }
  0xca   :  { %v263_v28 = vpop.f32.mrf.mxu0 }
  0xcb   :  { %v264_v29 = vadd.f32 %v263_v28, %v244_v26 }
  0xcd   :  { %v283_v21 = vpop.f32.mrf.mxu1 }
  0xce   :  { %v284_v30 = vadd.f32 %v283_v21, %v264_v29  ;;  %v303_v22 = vpop.f32.mrf.mxu2 }
  0xd0   :  { %v304_v31 = vadd.f32 %v303_v22, %v284_v30 }
  0xd1   :  { %v323_v32 = vpop.f32.mrf.mxu3 }
  0xd2   :  { %v324_v27 = vadd.f32 %v323_v32, %v304_v31 }
  0xd4   :  { %618 = vst [vmem:[%s1535_s6] sm:$0xff] %v324_v27 }
  0xfc   :  { %v475_v34 = vpop.f32.mrf.mxu0 }
  0xfd   :  { %v476_v35 = vadd.f32 %v640_v33, %v475_v34 }
  0xff   :  { %v495_v36 = vpop.f32.mrf.mxu1 }
 0x100   :  { %v496_v37 = vadd.f32 %v495_v36, %v476_v35  ;;  %v515_v38 = vpop.f32.mrf.mxu2 }
 0x102   :  { %v516_v39 = vadd.f32 %v515_v38, %v496_v37 }
 0x103   :  { %v535_v40 = vpop.f32.mrf.mxu3 }
 0x104   :  { %v536_v41 = vadd.f32 %v535_v40, %v516_v39 }
 0x106   :  { %v555_v42 = vpop.f32.mrf.mxu0 }
 0x107   :  { %v556_v43 = vadd.f32 %v555_v42, %v536_v41 }
 0x108   :  { %v575_v44 = vpop.f32.mrf.mxu1 }
 0x109   :  { %v576_v45 = vadd.f32 %v575_v44, %v556_v43 }
 0x10a   :  { %v595_v46 = vpop.f32.mrf.mxu2 }
 0x10b   :  { %v596_v47 = vadd.f32 %v595_v46, %v576_v45 }
 0x10c   :  { %v615_v48 = vpop.f32.mrf.mxu3 }
 0x10d   :  { %v616_v49 = vadd.f32 %v615_v48, %v596_v47 }
 0x10f   :  { %619 = vst [vmem:[%s1536_s7] sm:$0xff] %v616_v49  ;;  %v621_v50 = vmul.f32 0.5, %v616_v49 }
 0x111   :  { %v622_v51 = vmul.f32 1.442695, %v621_v50 }
 0x113   :  { %641 = vpow2.f32 %v622_v51 }
 0x119   :  { %v642_v53 = vpop.eup %641 }
 0x11a   :  { %v624_v54 = vmul.f32 %v642_v53, %v620_v52 }
 0x11c   :  { %v625_v55 = vadd.f32 %v624_v54, %v324_v27 }
 0x11e   :  { %626 = vst [vmem:[%s1538_s8] sm:$0xff] %v625_v55 }

// kernel: _lambda_.15
= control target key start
LH: loop header
LB: loop body
LE: loop exit
PB: predicated region body
PF: predicated region fallthrough
CT: control target
= control target key end

     0   :  { %s793_s12 = smov 0   ;;  %s795_s13 = smov 0   ;;  %s928_s0 = inlined_call_operand.vmem [shape: bf16[16,128], index: 0, kind: input, shape index: {}]   ;;  %s929_s1 = inlined_call_operand.vmem [shape: bf16[128,1024], index: 1, kind: input, shape index: {}]   ;;  %s930_s2 = inlined_call_operand.vmem [shape: f32[1,1024], index: 2, kind: input, shape index: {}]   ;;  %s931_s3 = inlined_call_operand.vmem [shape: f32[16,1024], index: 3, kind: output, shape index: {}]  }
   0x1   :  { %s797_s14 = smov 0   ;;  %s799_s15 = smov 0  }
   0x2   :  { %s801_s16 = smov 0  }
   0x3 LB: > { %s22_s17 = sadd.s32 1, %s767_s15  ;;  %s589_s18 = sadd.s32 4294967295, %s771_s16   ;;  %s771_s16 = sphi %s801_s16, %s13_s16   ;;  %s767_s15 = sphi %s799_s15, %s936_s15   ;;  %s763_s14 = sphi %s797_s14, %s935_s14   ;;  %s759_s13 = sphi %s795_s13, %s934_s13   ;;  %s755_s12 = sphi %s793_s12, %s933_s12  }
   0x4   : > { %p23_p0 = scmp.ge.s32.totalorder %s22_s17, 4  ;;  %p65_p1 = scmp.ne.s32.totalorder %s759_s13, %s755_s12 }
   0x5   : > { %p66_p2 = scmp.eq.s32.totalorder %s771_s16, 0  ;;  %p123_p4 = scmp.eq.s32.totalorder %s589_s18, 3 }
   0x6   : > { %s938_s17 = smov (%p23_p0, %s22_s17), 0  ;;  %s58_s20 = sadd.s32 1, %s759_s13 }
   0x7   : > { %p67_p3 = por %p66_p2, %p65_p1  ;;  %s55_s19 = ssub.s32 %s767_s15, %s938_s17 }
   0x8   : > { %p56_p5 = scmp.eq.s32.totalorder %s55_s19, 0  ;;  %p828_p6 = por %p123_p4, %p65_p1 }
   0x9   : > { %p593_p7 = scmp.ge.s32.totalorder %s771_s16, 4 }
   0xa   : > { %s833_s22 = scalar_select %p56_p5, %s759_s13, %s58_s20  }
   0xb   : > { %154 = sbr.rel (%p593_p7) target bundleno = 36 (0x24), region = 20 }
  0x10   : > { %157 = sbr.rel (!%p67_p3) target bundleno = 36 (0x24), region = 24  ;;  %s159_s23 = sand.u32 (%p67_p3), 1, %s759_s13  }
  0x11   : > { %s674_s24 = sshll.u32 (%p67_p3), %s767_s15, 3  ;;  %s594_s25 = sshll.u32 (%p67_p3), %s159_s23, 7 }
  0x12   : > { %s841_s28 = scalar_lea.vmem (%p67_p3), %s929_s1, %s674_s24  ;;  %s161_s29 = scalar_lea.vmem (%p67_p3), [#allocation2], %s594_s25 }
  0x13   : > { %v223_v0 = vld [vmem:[%s841_s28] sm:$0xff] (%p67_p3) }
  0x14   : > { %v225_v1 = vld [vmem:[%s841_s28 + $0x20] sm:$0xff] (%p67_p3)  ;;  %224 = vst [vmem:[%s161_s29] sm:$0xff] (%p67_p3), %v223_v0 }
  0x15   : > { %v227_v2 = vld [vmem:[%s841_s28 + $0x40] sm:$0xff]  ;;  %226 = vst [vmem:[%s161_s29 + $0x8] sm:$0xff] %v225_v1 }
  0x16   : > { %v229_v3 = vld [vmem:[%s841_s28 + $0x60] sm:$0xff]  ;;  %228 = vst [vmem:[%s161_s29 + $0x10] sm:$0xff] %v227_v2 }
  0x17   : > { %v231_v4 = vld [vmem:[%s841_s28 + $0x80] sm:$0xff]  ;;  %230 = vst [vmem:[%s161_s29 + $0x18] sm:$0xff] %v229_v3 }
  0x18   : > { %v233_v5 = vld [vmem:[%s841_s28 + $0xa0] sm:$0xff]  ;;  %232 = vst [vmem:[%s161_s29 + $0x20] sm:$0xff] %v231_v4 }
  0x19   : > { %v235_v6 = vld [vmem:[%s841_s28 + $0xc0] sm:$0xff]  ;;  %234 = vst [vmem:[%s161_s29 + $0x28] sm:$0xff] %v233_v5 }
  0x1a   : > { %v237_v7 = vld [vmem:[%s841_s28 + $0xe0] sm:$0xff]  ;;  %236 = vst [vmem:[%s161_s29 + $0x30] sm:$0xff] %v235_v6 }
  0x1b   : > { %v239_v8 = vld [vmem:[%s841_s28 + $0x100] sm:$0xff]  ;;  %238 = vst [vmem:[%s161_s29 + $0x38] sm:$0xff] %v237_v7 }
  0x1c   : > { %v241_v9 = vld [vmem:[%s841_s28 + $0x120] sm:$0xff]  ;;  %240 = vst [vmem:[%s161_s29 + $0x40] sm:$0xff] %v239_v8 }
  0x1d   : > { %v243_v10 = vld [vmem:[%s841_s28 + $0x140] sm:$0xff]  ;;  %242 = vst [vmem:[%s161_s29 + $0x48] sm:$0xff] %v241_v9 }
  0x1e   : > { %v245_v11 = vld [vmem:[%s841_s28 + $0x160] sm:$0xff]  ;;  %244 = vst [vmem:[%s161_s29 + $0x50] sm:$0xff] %v243_v10 }
  0x1f   : > { %v247_v12 = vld [vmem:[%s841_s28 + $0x180] sm:$0xff]  ;;  %246 = vst [vmem:[%s161_s29 + $0x58] sm:$0xff] %v245_v11 }
  0x20   : > { %v249_v13 = vld [vmem:[%s841_s28 + $0x1a0] sm:$0xff]  ;;  %248 = vst [vmem:[%s161_s29 + $0x60] sm:$0xff] %v247_v12 }
  0x21   : > { %v251_v14 = vld [vmem:[%s841_s28 + $0x1c0] sm:$0xff]  ;;  %250 = vst [vmem:[%s161_s29 + $0x68] sm:$0xff] %v249_v13 }
  0x22   : > { %v253_v15 = vld [vmem:[%s841_s28 + $0x1e0] sm:$0xff]  ;;  %252 = vst [vmem:[%s161_s29 + $0x70] sm:$0xff] %v251_v14 }
  0x23   : > { %254 = vst [vmem:[%s161_s29 + $0x78] sm:$0xff] %v253_v15 }
  0x24 PF: > { %p597_p8 = scmp.ge.s32.totalorder %s771_s16, 1  ;;  %p267_p9 = scmp.lt.s32.totalorder %s771_s16, 5 }
  0x26   : > { %p268_p10 = pnand %p597_p8, %p267_p9 }
  0x27   : > { %s274_s30 = sand.u32 (!%p268_p10), 1, %s755_s12   ;;  %s600_s8 = sshll.u32 (!%p268_p10), %s763_s14, 1 }
  0x28   : > { %271 = sbr.rel (%p268_p10) target bundleno = 225 (0xe1), region = 66  ;;  %s598_s4 = sshll.u32 (!%p268_p10), %s274_s30, 7 }
  0x29   : > { %s864_s5 = scalar_lea.vmem (!%p268_p10), [#allocation2], %s598_s4  ;;  %p313_p11 = scmp.lt.s32.totalorder (!%p268_p10), %s600_s8, 7 }
  0x2a   : > { %s599_s18 = sshll.u32 (!%p268_p10), %s274_s30, 5 }
  0x2b   : > { %s304_s19 = scalar_lea.vmem (!%p268_p10), [#allocation3], %s599_s18 }
  0x2d   : > { %v663_v16 = vld [vmem:[%s864_s5 + $0x70] sm:$0xf]  ;;  %v691_v17 = vld [vmem:[%s864_s5 + $0x74] sm:$0xf0]  ;;  %v690_v18 = vld [vmem:[%s864_s5 + $0x74] sm:$0xf] }
  0x2e   : > { %v664_v19 = vor.u32 %v691_v17, %v663_v16  ;;  %v665_v20 = vld [vmem:[%s864_s5 + $0x78] sm:$0xf0]  ;;  %v655_v21 = vld [vmem:[%s864_s5 + $0x60] sm:$0xf]  ;;  %v689_v22 = vld [vmem:[%s864_s5 + $0x64] sm:$0xf0] }
  0x2f   : > { %v668_v23 = vor.u32 %v690_v18, %v665_v20  ;;  %v688_v24 = vld [vmem:[%s864_s5 + $0x64] sm:$0xf]  ;;  %v657_v25 = vld [vmem:[%s864_s5 + $0x68] sm:$0xf0]  ;;  %v656_v26 = vor.u32 %v689_v22, %v655_v21  ;;  %v647_v28 = vld [vmem:[%s864_s5 + $0x50] sm:$0xf] }
  0x30   : > { %429 = vmatpush.bf16.msra.mxu0 %v664_v19  ;;  %v660_v27 = vor.u32 %v688_v24, %v657_v25  ;;  %v687_v29 = vld [vmem:[%s864_s5 + $0x54] sm:$0xf0]  ;;  %v686_v30 = vld [vmem:[%s864_s5 + $0x54] sm:$0xf]  ;;  %v649_v31 = vld [vmem:[%s864_s5 + $0x58] sm:$0xf0] }
  0x31   : > { %443 = vmatpush.bf16.msra.mxu1 %v668_v23  ;;  %v648_v32 = vor.u32 %v687_v29, %v647_v28  ;;  %v652_v33 = vor.u32 %v686_v30, %v649_v31  ;;  %v639_v34 = vld [vmem:[%s864_s5 + $0x40] sm:$0xf]  ;;  %v685_v35 = vld [vmem:[%s864_s5 + $0x44] sm:$0xf0]  ;;  %v684_v36 = vld [vmem:[%s864_s5 + $0x44] sm:$0xf] }
  0x32   : > { %v641_v37 = vld [vmem:[%s864_s5 + $0x48] sm:$0xf0]  ;;  %v640_v38 = vor.u32 %v685_v35, %v639_v34  ;;  %v631_v40 = vld [vmem:[%s864_s5 + $0x30] sm:$0xf]  ;;  %v683_v41 = vld [vmem:[%s864_s5 + $0x34] sm:$0xf0] }
  0x33   : > { %v644_v39 = vor.u32 %v684_v36, %v641_v37  ;;  %v682_v42 = vld [vmem:[%s864_s5 + $0x34] sm:$0xf]  ;;  %v633_v43 = vld [vmem:[%s864_s5 + $0x38] sm:$0xf0]  ;;  %v632_v44 = vor.u32 %v683_v41, %v631_v40  ;;  %v623_v46 = vld [vmem:[%s864_s5 + $0x20] sm:$0xf] }
  0x34   : > { %430 = vmatpush.bf16.msra.mxu0 %v656_v26  ;;  %v636_v45 = vor.u32 %v682_v42, %v633_v43  ;;  %v681_v47 = vld [vmem:[%s864_s5 + $0x24] sm:$0xf0]  ;;  %v680_v48 = vld [vmem:[%s864_s5 + $0x24] sm:$0xf]  ;;  %v625_v49 = vld [vmem:[%s864_s5 + $0x28] sm:$0xf0] }
  0x35   : > { %444 = vmatpush.bf16.msra.mxu1 %v660_v27  ;;  %v624_v50 = vor.u32 %v681_v47, %v623_v46  ;;  %v628_v51 = vor.u32 %v680_v48, %v625_v49  ;;  %v615_v52 = vld [vmem:[%s864_s5 + $0x10] sm:$0xf]  ;;  %v679_v53 = vld [vmem:[%s864_s5 + $0x14] sm:$0xf0]  ;;  %v678_v54 = vld [vmem:[%s864_s5 + $0x14] sm:$0xf] }
  0x36   : > { %v617_v55 = vld [vmem:[%s864_s5 + $0x18] sm:$0xf0]  ;;  %v616_v56 = vor.u32 %v679_v53, %v615_v52  ;;  %v607_v58 = vld [vmem:[%s864_s5] sm:$0xf]  ;;  %v677_v59 = vld [vmem:[%s864_s5 + $0x4] sm:$0xf0] }
  0x37   : > { %v620_v57 = vor.u32 %v678_v54, %v617_v55  ;;  %v676_v60 = vld [vmem:[%s864_s5 + $0x4] sm:$0xf]  ;;  %v609_v61 = vld [vmem:[%s864_s5 + $0x8] sm:$0xf0]  ;;  %v608_v62 = vor.u32 %v677_v59, %v607_v58  ;;  %s940_s8 = smov (!%p313_p11, %s600_s8), 7  ;;  %s692_s12 = sshll.u32 (%p828_p6), %s763_s14, 4 }
  0x38   : > { %431 = vmatpush.bf16.msra.mxu0 %v648_v32  ;;  %v612_v63 = vor.u32 %v676_v60, %v609_v61  ;;  %v675_v0 = vld [vmem:[%s928_s0] sm:$0xff]  ;;  %s315_s11 = scalar_lea.vmem %s930_s2, %s940_s8  ;;  %s473_s24 = scalar_lea.vmem (%p828_p6), %s931_s3, %s692_s12 }
  0x39   : > { %445 = vmatpush.bf16.msra.mxu1 %v652_v33  ;;  %v337_v1 = vld [vmem:[%s315_s11] sm:$0x3] }
  0x3a   : > { %v339_v2 = vperm.slane %v337_v1, 0  ;;  %v340_v3 = vperm.slane %v337_v1, 1 }
  0x3c   : > { %432 = vmatpush.bf16.msra.mxu0 %v640_v38 }
  0x3d   : > { %446 = vmatpush.bf16.msra.mxu1 %v644_v39 }
  0x40   : > { %433 = vmatpush.bf16.msra.mxu0 %v632_v44 }
  0x41   : > { %447 = vmatpush.bf16.msra.mxu1 %v636_v45 }
  0x44   : > { %434 = vmatpush.bf16.msra.mxu0 %v624_v50 }
  0x45   : > { %448 = vmatpush.bf16.msra.mxu1 %v628_v51 }
  0x48   : > { %435 = vmatpush.bf16.msra.mxu0 %v616_v56 }
  0x49   : > { %449 = vmatpush.bf16.msra.mxu1 %v620_v57 }
  0x4c   : > { %436 = vmatpush.bf16.msra.mxu0 %v608_v62 }
  0x4d   : > { %450 = vmatpush.bf16.msra.mxu1 %v612_v63 }
  0x4f   : > { %437 = vmatmul.bf16.vlgmr.msra.gmra.mxu0 %v675_v0 }
  0x50   : > { %451 = vmatmul.bf16.vlgmr.msra.gmra.mxu1 %v675_v0 }
  0xcc   : > { %v438_v4 = vpop.f32.mrf.mxu0 }
  0xcd   : > { %v439_v5 = vadd.f32 %v438_v4, %v339_v2  ;;  %v452_v6 = vpop.f32.mrf.mxu1 }
  0xce   : > { %v453_v7 = vadd.f32 %v452_v6, %v340_v3 }
  0xcf   : > { %457 = vst [vmem:[%s304_s19] sm:$0xff] %v439_v5 }
  0xd0   : > { %458 = vst [vmem:[%s304_s19 + $0x8] sm:$0xff] %v453_v7 }
  0xd4   : > { %v440_v8 = vpop.f32.mrf.mxu0  ;;  %467 = sbr.rel (!%p828_p6) target bundleno = 225 (0xe1), region = 74 }
  0xd5   : > { %v441_v9 = vadd.f32 %v440_v8, %v339_v2  ;;  %v454_v10 = vpop.f32.mrf.mxu1 }
  0xd6   : > { %v455_v11 = vadd.f32 %v454_v10, %v340_v3  ;;  %v486_v12 = vld [vmem:[%s304_s19] sm:$0xff] (%p828_p6) }
  0xd7   : > { %459 = vst [vmem:[%s304_s19 + $0x10] sm:$0xff] %v441_v9  ;;  %v488_v13 = vld [vmem:[%s304_s19 + $0x8] sm:$0xff] (%p828_p6) }
  0xd8   : > { %460 = vst [vmem:[%s304_s19 + $0x18] sm:$0xff] %v455_v11 }
  0xd9   : > { %487 = vst [vmem:[%s473_s24] sm:$0xff] %v486_v12 }
  0xda   : > { %489 = vst [vmem:[%s473_s24 + $0x8] sm:$0xff] %v488_v13 }
  0xde   : > { %v490_v14 = vld [vmem:[%s304_s19 + $0x10] sm:$0xff] }
  0xdf   : > { %v492_v15 = vld [vmem:[%s304_s19 + $0x18] sm:$0xff]  ;;  %491 = vst [vmem:[%s473_s24 + $0x40] sm:$0xff] %v490_v14 }
  0xe0   : > { %493 = vst [vmem:[%s473_s24 + $0x48] sm:$0xff] %v492_v15 }
  0xe1 PF: > { %s13_s16 = sadd.s32 1, %s771_s16   ;;  %s933_s12 = smov %s759_s13 }
  0xe2   : > { %p10_p12 = scmp.ge.s32.totalorder %s13_s16, 6   ;;  %s934_s13 = smov %s833_s22 }
  0xe3   : > { %s935_s14 = smov %s767_s15  ;;  %s936_s15 = smov %s938_s17 }
  0xe4   :  { %12 = sbr.rel (!%p10_p12) target bundleno = 3 (0x3), region = 134 }

// kernel: _lambda_.16
= control target key start
LH: loop header
LB: loop body
LE: loop exit
PB: predicated region body
PF: predicated region fallthrough
CT: control target
= control target key end

     0   :  { %s2751_s12 = smov 0   ;;  %s2753_s13 = smov 0   ;;  %s3439_s0 = inlined_call_operand.vmem [shape: bf16[16,1024], index: 0, kind: input, shape index: {}]   ;;  %s3440_s1 = inlined_call_operand.vmem [shape: bf16[1024,3328], index: 1, kind: input, shape index: {}]   ;;  %s3441_s2 = inlined_call_operand.vmem [shape: f32[1,3328], index: 2, kind: input, shape index: {}]   ;;  %s3442_s3 = inlined_call_operand.vmem [shape: f32[16,3328], index: 3, kind: output, shape index: {}]  }
   0x1   :  { %s2755_s14 = smov 0   ;;  %s2757_s15 = smov 0  }
   0x2   :  { %s2759_s16 = smov 0  }
   0x3 LB: > { %s22_s17 = sadd.s32 1, %s2725_s15  ;;  %s1952_s18 = sadd.s32 4294967295, %s2729_s16   ;;  %s2729_s16 = sphi %s2759_s16, %s13_s16   ;;  %s2725_s15 = sphi %s2757_s15, %s3447_s15   ;;  %s2721_s14 = sphi %s2755_s14, %s3446_s14   ;;  %s2717_s13 = sphi %s2753_s13, %s3445_s13   ;;  %s2713_s12 = sphi %s2751_s12, %s3444_s12  }
   0x4   : > { %p23_p0 = scmp.ge.s32.totalorder %s22_s17, 13  ;;  %p65_p1 = scmp.ne.s32.totalorder %s2717_s13, %s2713_s12 }
   0x5   : > { %p66_p2 = scmp.eq.s32.totalorder %s2729_s16, 0  ;;  %p123_p4 = scmp.eq.s32.totalorder %s1952_s18, 12 }
   0x6   : > { %s3449_s17 = smov (%p23_p0, %s22_s17), 0  ;;  %s58_s20 = sadd.s32 1, %s2717_s13 }
   0x7   : > { %p67_p3 = por %p66_p2, %p65_p1  ;;  %s55_s19 = ssub.s32 %s2725_s15, %s3449_s17 }
   0x8   : > { %p56_p5 = scmp.eq.s32.totalorder %s55_s19, 0  ;;  %p2786_p6 = por %p123_p4, %p65_p1 }
   0x9   : > { %p1956_p7 = scmp.ge.s32.totalorder %s2729_s16, 13 }
   0xa   : > { %s2791_s22 = scalar_select %p56_p5, %s2717_s13, %s58_s20  }
   0xb   : > { %155 = sbr.rel (%p1956_p7) target bundleno = 148 (0x94), region = 20 }
  0x10   : > { %158 = sbr.rel (!%p67_p3) target bundleno = 148 (0x94), region = 24  ;;  %s160_s23 = sand.u32 (%p67_p3), 1, %s2717_s13  }
  0x11   : > { %s2513_s24 = sshll.u32 (%p67_p3), %s2725_s15, 3  ;;  %s1957_s25 = sshll.u32 (%p67_p3), %s160_s23, 10 }
  0x12   : > { %s2799_s28 = scalar_lea.vmem (%p67_p3), %s3440_s1, %s2513_s24  ;;  %s2804_s29 = scalar_lea.vmem (%p67_p3), [#allocation2], %s1957_s25 }
  0x13   : > { %v448_v0 = vld [vmem:[%s2799_s28] sm:$0xff] (%p67_p3)  ;;  %v450_v1 = vld [vmem:[%s2799_s28 + $0x68] sm:$0xff] (%p67_p3)  ;;  %v452_v2 = vld [vmem:[%s2799_s28 + $0xd0] sm:$0xff] (%p67_p3) }
  0x14   : > { %449 = vst [vmem:[%s2804_s29] sm:$0xff] (%p67_p3), %v448_v0  ;;  %v454_v3 = vld [vmem:[%s2799_s28 + $0x138] sm:$0xff] (%p67_p3)  ;;  %v456_v4 = vld [vmem:[%s2799_s28 + $0x1a0] sm:$0xff] (%p67_p3)  ;;  %v458_v5 = vld [vmem:[%s2799_s28 + $0x208] sm:$0xff] (%p67_p3) }
  0x15   : > { %451 = vst [vmem:[%s2804_s29 + $0x8] sm:$0xff] %v450_v1  ;;  %v460_v6 = vld [vmem:[%s2799_s28 + $0x270] sm:$0xff]  ;;  %v462_v7 = vld [vmem:[%s2799_s28 + $0x2d8] sm:$0xff]  ;;  %v464_v8 = vld [vmem:[%s2799_s28 + $0x340] sm:$0xff] }
  0x16   : > { %453 = vst [vmem:[%s2804_s29 + $0x10] sm:$0xff] %v452_v2  ;;  %v466_v9 = vld [vmem:[%s2799_s28 + $0x3a8] sm:$0xff]  ;;  %v468_v10 = vld [vmem:[%s2799_s28 + $0x410] sm:$0xff]  ;;  %v470_v11 = vld [vmem:[%s2799_s28 + $0x478] sm:$0xff] }
  0x17   : > { %455 = vst [vmem:[%s2804_s29 + $0x18] sm:$0xff] %v454_v3  ;;  %v472_v12 = vld [vmem:[%s2799_s28 + $0x4e0] sm:$0xff]  ;;  %v474_v13 = vld [vmem:[%s2799_s28 + $0x548] sm:$0xff]  ;;  %v476_v14 = vld [vmem:[%s2799_s28 + $0x5b0] sm:$0xff] }
  0x18   : > { %457 = vst [vmem:[%s2804_s29 + $0x20] sm:$0xff] %v456_v4  ;;  %v478_v15 = vld [vmem:[%s2799_s28 + $0x618] sm:$0xff]  ;;  %v480_v16 = vld [vmem:[%s2799_s28 + $0x680] sm:$0xff]  ;;  %v482_v17 = vld [vmem:[%s2799_s28 + $0x6e8] sm:$0xff] }
  0x19   : > { %459 = vst [vmem:[%s2804_s29 + $0x28] sm:$0xff] %v458_v5  ;;  %v484_v18 = vld [vmem:[%s2799_s28 + $0x750] sm:$0xff]  ;;  %v486_v19 = vld [vmem:[%s2799_s28 + $0x7b8] sm:$0xff]  ;;  %v488_v20 = vld [vmem:[%s2799_s28 + $0x820] sm:$0xff] }
  0x1a   : > { %461 = vst [vmem:[%s2804_s29 + $0x30] sm:$0xff] %v460_v6  ;;  %v490_v21 = vld [vmem:[%s2799_s28 + $0x888] sm:$0xff]  ;;  %v492_v22 = vld [vmem:[%s2799_s28 + $0x8f0] sm:$0xff]  ;;  %v494_v23 = vld [vmem:[%s2799_s28 + $0x958] sm:$0xff] }
  0x1b   : > { %463 = vst [vmem:[%s2804_s29 + $0x38] sm:$0xff] %v462_v7  ;;  %v496_v24 = vld [vmem:[%s2799_s28 + $0x9c0] sm:$0xff]  ;;  %v498_v25 = vld [vmem:[%s2799_s28 + $0xa28] sm:$0xff]  ;;  %v500_v26 = vld [vmem:[%s2799_s28 + $0xa90] sm:$0xff] }
  0x1c   : > { %465 = vst [vmem:[%s2804_s29 + $0x40] sm:$0xff] %v464_v8  ;;  %v502_v27 = vld [vmem:[%s2799_s28 + $0xaf8] sm:$0xff]  ;;  %v504_v28 = vld [vmem:[%s2799_s28 + $0xb60] sm:$0xff]  ;;  %v506_v29 = vld [vmem:[%s2799_s28 + $0xbc8] sm:$0xff] }
  0x1d   : > { %467 = vst [vmem:[%s2804_s29 + $0x48] sm:$0xff] %v466_v9  ;;  %v508_v30 = vld [vmem:[%s2799_s28 + $0xc30] sm:$0xff]  ;;  %v510_v31 = vld [vmem:[%s2799_s28 + $0xc98] sm:$0xff]  ;;  %v512_v32 = vld [vmem:[%s2799_s28 + $0xd00] sm:$0xff] }
  0x1e   : > { %469 = vst [vmem:[%s2804_s29 + $0x50] sm:$0xff] %v468_v10  ;;  %v514_v33 = vld [vmem:[%s2799_s28 + $0xd68] sm:$0xff]  ;;  %v516_v34 = vld [vmem:[%s2799_s28 + $0xdd0] sm:$0xff]  ;;  %v518_v35 = vld [vmem:[%s2799_s28 + $0xe38] sm:$0xff] }
  0x1f   : > { %471 = vst [vmem:[%s2804_s29 + $0x58] sm:$0xff] %v470_v11  ;;  %v520_v36 = vld [vmem:[%s2799_s28 + $0xea0] sm:$0xff]  ;;  %v522_v37 = vld [vmem:[%s2799_s28 + $0xf08] sm:$0xff]  ;;  %v524_v38 = vld [vmem:[%s2799_s28 + $0xf70] sm:$0xff] }
  0x20   : > { %473 = vst [vmem:[%s2804_s29 + $0x60] sm:$0xff] %v472_v12  ;;  %v526_v39 = vld [vmem:[%s2799_s28 + $0xfd8] sm:$0xff]  ;;  %v528_v40 = vld [vmem:[%s2799_s28 + $0x1040] sm:$0xff]  ;;  %v530_v41 = vld [vmem:[%s2799_s28 + $0x10a8] sm:$0xff] }
  0x21   : > { %475 = vst [vmem:[%s2804_s29 + $0x68] sm:$0xff] %v474_v13  ;;  %v532_v42 = vld [vmem:[%s2799_s28 + $0x1110] sm:$0xff]  ;;  %v534_v43 = vld [vmem:[%s2799_s28 + $0x1178] sm:$0xff]  ;;  %v536_v44 = vld [vmem:[%s2799_s28 + $0x11e0] sm:$0xff] }
  0x22   : > { %477 = vst [vmem:[%s2804_s29 + $0x70] sm:$0xff] %v476_v14  ;;  %v538_v45 = vld [vmem:[%s2799_s28 + $0x1248] sm:$0xff]  ;;  %v540_v46 = vld [vmem:[%s2799_s28 + $0x12b0] sm:$0xff]  ;;  %v542_v47 = vld [vmem:[%s2799_s28 + $0x1318] sm:$0xff] }
  0x23   : > { %479 = vst [vmem:[%s2804_s29 + $0x78] sm:$0xff] %v478_v15  ;;  %v544_v48 = vld [vmem:[%s2799_s28 + $0x1380] sm:$0xff]  ;;  %v546_v49 = vld [vmem:[%s2799_s28 + $0x13e8] sm:$0xff]  ;;  %v548_v50 = vld [vmem:[%s2799_s28 + $0x1450] sm:$0xff] }
  0x24   : > { %481 = vst [vmem:[%s2804_s29 + $0x80] sm:$0xff] %v480_v16  ;;  %v550_v51 = vld [vmem:[%s2799_s28 + $0x14b8] sm:$0xff]  ;;  %v552_v52 = vld [vmem:[%s2799_s28 + $0x1520] sm:$0xff]  ;;  %v554_v53 = vld [vmem:[%s2799_s28 + $0x1588] sm:$0xff] }
  0x25   : > { %483 = vst [vmem:[%s2804_s29 + $0x88] sm:$0xff] %v482_v17  ;;  %v556_v54 = vld [vmem:[%s2799_s28 + $0x15f0] sm:$0xff]  ;;  %v558_v55 = vld [vmem:[%s2799_s28 + $0x1658] sm:$0xff]  ;;  %v560_v56 = vld [vmem:[%s2799_s28 + $0x16c0] sm:$0xff] }
  0x26   : > { %485 = vst [vmem:[%s2804_s29 + $0x90] sm:$0xff] %v484_v18  ;;  %v562_v57 = vld [vmem:[%s2799_s28 + $0x1728] sm:$0xff]  ;;  %v564_v58 = vld [vmem:[%s2799_s28 + $0x1790] sm:$0xff]  ;;  %v566_v59 = vld [vmem:[%s2799_s28 + $0x17f8] sm:$0xff] }
  0x27   : > { %487 = vst [vmem:[%s2804_s29 + $0x98] sm:$0xff] %v486_v19  ;;  %v568_v60 = vld [vmem:[%s2799_s28 + $0x1860] sm:$0xff]  ;;  %v570_v61 = vld [vmem:[%s2799_s28 + $0x18c8] sm:$0xff]  ;;  %v572_v62 = vld [vmem:[%s2799_s28 + $0x1930] sm:$0xff] }
  0x28   : > { %489 = vst [vmem:[%s2804_s29 + $0xa0] sm:$0xff] %v488_v20  ;;  %v574_v63 = vld [vmem:[%s2799_s28 + $0x1998] sm:$0xff]  ;;  %v576_v0 = vld [vmem:[%s2799_s28 + $0x1a00] sm:$0xff]  ;;  %v578_v1 = vld [vmem:[%s2799_s28 + $0x1a68] sm:$0xff] }
  0x29   : > { %491 = vst [vmem:[%s2804_s29 + $0xa8] sm:$0xff] %v490_v21  ;;  %v580_v2 = vld [vmem:[%s2799_s28 + $0x1ad0] sm:$0xff]  ;;  %v582_v3 = vld [vmem:[%s2799_s28 + $0x1b38] sm:$0xff]  ;;  %v584_v4 = vld [vmem:[%s2799_s28 + $0x1ba0] sm:$0xff] }
  0x2a   : > { %493 = vst [vmem:[%s2804_s29 + $0xb0] sm:$0xff] %v492_v22  ;;  %v586_v5 = vld [vmem:[%s2799_s28 + $0x1c08] sm:$0xff]  ;;  %v588_v6 = vld [vmem:[%s2799_s28 + $0x1c70] sm:$0xff]  ;;  %v590_v7 = vld [vmem:[%s2799_s28 + $0x1cd8] sm:$0xff] }
  0x2b   : > { %495 = vst [vmem:[%s2804_s29 + $0xb8] sm:$0xff] %v494_v23  ;;  %v592_v8 = vld [vmem:[%s2799_s28 + $0x1d40] sm:$0xff]  ;;  %v594_v9 = vld [vmem:[%s2799_s28 + $0x1da8] sm:$0xff]  ;;  %v596_v10 = vld [vmem:[%s2799_s28 + $0x1e10] sm:$0xff] }
  0x2c   : > { %497 = vst [vmem:[%s2804_s29 + $0xc0] sm:$0xff] %v496_v24  ;;  %v598_v11 = vld [vmem:[%s2799_s28 + $0x1e78] sm:$0xff]  ;;  %v600_v12 = vld [vmem:[%s2799_s28 + $0x1ee0] sm:$0xff]  ;;  %v602_v13 = vld [vmem:[%s2799_s28 + $0x1f48] sm:$0xff] }
  0x2d   : > { %499 = vst [vmem:[%s2804_s29 + $0xc8] sm:$0xff] %v498_v25  ;;  %v604_v14 = vld [vmem:[%s2799_s28 + $0x1fb0] sm:$0xff]  ;;  %v606_v15 = vld [vmem:[%s2799_s28 + $0x2018] sm:$0xff]  ;;  %v608_v16 = vld [vmem:[%s2799_s28 + $0x2080] sm:$0xff] }
  0x2e   : > { %501 = vst [vmem:[%s2804_s29 + $0xd0] sm:$0xff] %v500_v26  ;;  %v610_v17 = vld [vmem:[%s2799_s28 + $0x20e8] sm:$0xff]  ;;  %v612_v18 = vld [vmem:[%s2799_s28 + $0x2150] sm:$0xff]  ;;  %v614_v19 = vld [vmem:[%s2799_s28 + $0x21b8] sm:$0xff] }
  0x2f   : > { %503 = vst [vmem:[%s2804_s29 + $0xd8] sm:$0xff] %v502_v27  ;;  %v616_v20 = vld [vmem:[%s2799_s28 + $0x2220] sm:$0xff]  ;;  %v618_v21 = vld [vmem:[%s2799_s28 + $0x2288] sm:$0xff]  ;;  %v620_v22 = vld [vmem:[%s2799_s28 + $0x22f0] sm:$0xff] }
  0x30   : > { %505 = vst [vmem:[%s2804_s29 + $0xe0] sm:$0xff] %v504_v28  ;;  %v622_v23 = vld [vmem:[%s2799_s28 + $0x2358] sm:$0xff]  ;;  %v624_v24 = vld [vmem:[%s2799_s28 + $0x23c0] sm:$0xff]  ;;  %v626_v25 = vld [vmem:[%s2799_s28 + $0x2428] sm:$0xff] }
  0x31   : > { %507 = vst [vmem:[%s2804_s29 + $0xe8] sm:$0xff] %v506_v29  ;;  %v628_v26 = vld [vmem:[%s2799_s28 + $0x2490] sm:$0xff]  ;;  %v630_v27 = vld [vmem:[%s2799_s28 + $0x24f8] sm:$0xff]  ;;  %v632_v28 = vld [vmem:[%s2799_s28 + $0x2560] sm:$0xff] }
  0x32   : > { %509 = vst [vmem:[%s2804_s29 + $0xf0] sm:$0xff] %v508_v30  ;;  %v634_v29 = vld [vmem:[%s2799_s28 + $0x25c8] sm:$0xff]  ;;  %v636_v30 = vld [vmem:[%s2799_s28 + $0x2630] sm:$0xff] }
  0x33   : > { %511 = vst [vmem:[%s2804_s29 + $0xf8] sm:$0xff] %v510_v31  ;;  %v638_v31 = vld [vmem:[%s2799_s28 + $0x2698] sm:$0xff] }
  0x34   : > { %513 = vst [vmem:[%s2804_s29 + $0x100] sm:$0xff] %v512_v32  ;;  %v640_v32 = vld [vmem:[%s2799_s28 + $0x2700] sm:$0xff] }
  0x35   : > { %515 = vst [vmem:[%s2804_s29 + $0x108] sm:$0xff] %v514_v33  ;;  %v642_v33 = vld [vmem:[%s2799_s28 + $0x2768] sm:$0xff] }
  0x36   : > { %517 = vst [vmem:[%s2804_s29 + $0x110] sm:$0xff] %v516_v34  ;;  %v644_v34 = vld [vmem:[%s2799_s28 + $0x27d0] sm:$0xff] }
  0x37   : > { %519 = vst [vmem:[%s2804_s29 + $0x118] sm:$0xff] %v518_v35  ;;  %v646_v35 = vld [vmem:[%s2799_s28 + $0x2838] sm:$0xff] }
  0x38   : > { %521 = vst [vmem:[%s2804_s29 + $0x120] sm:$0xff] %v520_v36  ;;  %v648_v36 = vld [vmem:[%s2799_s28 + $0x28a0] sm:$0xff] }
  0x39   : > { %523 = vst [vmem:[%s2804_s29 + $0x128] sm:$0xff] %v522_v37  ;;  %v650_v37 = vld [vmem:[%s2799_s28 + $0x2908] sm:$0xff] }
  0x3a   : > { %525 = vst [vmem:[%s2804_s29 + $0x130] sm:$0xff] %v524_v38  ;;  %v652_v38 = vld [vmem:[%s2799_s28 + $0x2970] sm:$0xff] }
  0x3b   : > { %527 = vst [vmem:[%s2804_s29 + $0x138] sm:$0xff] %v526_v39  ;;  %v654_v39 = vld [vmem:[%s2799_s28 + $0x29d8] sm:$0xff] }
  0x3c   : > { %529 = vst [vmem:[%s2804_s29 + $0x140] sm:$0xff] %v528_v40  ;;  %v656_v40 = vld [vmem:[%s2799_s28 + $0x2a40] sm:$0xff] }
  0x3d   : > { %531 = vst [vmem:[%s2804_s29 + $0x148] sm:$0xff] %v530_v41  ;;  %v658_v41 = vld [vmem:[%s2799_s28 + $0x2aa8] sm:$0xff] }
  0x3e   : > { %533 = vst [vmem:[%s2804_s29 + $0x150] sm:$0xff] %v532_v42  ;;  %v660_v42 = vld [vmem:[%s2799_s28 + $0x2b10] sm:$0xff] }
  0x3f   : > { %535 = vst [vmem:[%s2804_s29 + $0x158] sm:$0xff] %v534_v43  ;;  %v662_v43 = vld [vmem:[%s2799_s28 + $0x2b78] sm:$0xff] }
  0x40   : > { %537 = vst [vmem:[%s2804_s29 + $0x160] sm:$0xff] %v536_v44  ;;  %v664_v44 = vld [vmem:[%s2799_s28 + $0x2be0] sm:$0xff] }
  0x41   : > { %539 = vst [vmem:[%s2804_s29 + $0x168] sm:$0xff] %v538_v45  ;;  %v666_v45 = vld [vmem:[%s2799_s28 + $0x2c48] sm:$0xff] }
  0x42   : > { %541 = vst [vmem:[%s2804_s29 + $0x170] sm:$0xff] %v540_v46  ;;  %v668_v46 = vld [vmem:[%s2799_s28 + $0x2cb0] sm:$0xff] }
  0x43   : > { %543 = vst [vmem:[%s2804_s29 + $0x178] sm:$0xff] %v542_v47  ;;  %v670_v47 = vld [vmem:[%s2799_s28 + $0x2d18] sm:$0xff] }
  0x44   : > { %545 = vst [vmem:[%s2804_s29 + $0x180] sm:$0xff] %v544_v48  ;;  %v672_v48 = vld [vmem:[%s2799_s28 + $0x2d80] sm:$0xff] }
  0x45   : > { %547 = vst [vmem:[%s2804_s29 + $0x188] sm:$0xff] %v546_v49  ;;  %v674_v49 = vld [vmem:[%s2799_s28 + $0x2de8] sm:$0xff] }
  0x46   : > { %549 = vst [vmem:[%s2804_s29 + $0x190] sm:$0xff] %v548_v50  ;;  %v676_v50 = vld [vmem:[%s2799_s28 + $0x2e50] sm:$0xff] }
  0x47   : > { %551 = vst [vmem:[%s2804_s29 + $0x198] sm:$0xff] %v550_v51  ;;  %v678_v51 = vld [vmem:[%s2799_s28 + $0x2eb8] sm:$0xff] }
  0x48   : > { %553 = vst [vmem:[%s2804_s29 + $0x1a0] sm:$0xff] %v552_v52  ;;  %v680_v52 = vld [vmem:[%s2799_s28 + $0x2f20] sm:$0xff] }
  0x49   : > { %555 = vst [vmem:[%s2804_s29 + $0x1a8] sm:$0xff] %v554_v53  ;;  %v682_v53 = vld [vmem:[%s2799_s28 + $0x2f88] sm:$0xff] }
  0x4a   : > { %557 = vst [vmem:[%s2804_s29 + $0x1b0] sm:$0xff] %v556_v54  ;;  %v684_v54 = vld [vmem:[%s2799_s28 + $0x2ff0] sm:$0xff] }
  0x4b   : > { %559 = vst [vmem:[%s2804_s29 + $0x1b8] sm:$0xff] %v558_v55  ;;  %v686_v55 = vld [vmem:[%s2799_s28 + $0x3058] sm:$0xff] }
  0x4c   : > { %561 = vst [vmem:[%s2804_s29 + $0x1c0] sm:$0xff] %v560_v56  ;;  %v688_v56 = vld [vmem:[%s2799_s28 + $0x30c0] sm:$0xff] }
  0x4d   : > { %563 = vst [vmem:[%s2804_s29 + $0x1c8] sm:$0xff] %v562_v57  ;;  %v690_v57 = vld [vmem:[%s2799_s28 + $0x3128] sm:$0xff] }
  0x4e   : > { %565 = vst [vmem:[%s2804_s29 + $0x1d0] sm:$0xff] %v564_v58  ;;  %v692_v58 = vld [vmem:[%s2799_s28 + $0x3190] sm:$0xff] }
  0x4f   : > { %567 = vst [vmem:[%s2804_s29 + $0x1d8] sm:$0xff] %v566_v59  ;;  %v694_v59 = vld [vmem:[%s2799_s28 + $0x31f8] sm:$0xff] }
  0x50   : > { %569 = vst [vmem:[%s2804_s29 + $0x1e0] sm:$0xff] %v568_v60  ;;  %v696_v60 = vld [vmem:[%s2799_s28 + $0x3260] sm:$0xff] }
  0x51   : > { %571 = vst [vmem:[%s2804_s29 + $0x1e8] sm:$0xff] %v570_v61  ;;  %v698_v61 = vld [vmem:[%s2799_s28 + $0x32c8] sm:$0xff] }
  0x52   : > { %573 = vst [vmem:[%s2804_s29 + $0x1f0] sm:$0xff] %v572_v62  ;;  %v700_v62 = vld [vmem:[%s2799_s28 + $0x3330] sm:$0xff] }
  0x53   : > { %575 = vst [vmem:[%s2804_s29 + $0x1f8] sm:$0xff] %v574_v63  ;;  %v702_v63 = vld [vmem:[%s2799_s28 + $0x3398] sm:$0xff] }
  0x54   : > { %577 = vst [vmem:[%s2804_s29 + $0x200] sm:$0xff] %v576_v0 }
  0x55   : > { %579 = vst [vmem:[%s2804_s29 + $0x208] sm:$0xff] %v578_v1 }
  0x56   : > { %581 = vst [vmem:[%s2804_s29 + $0x210] sm:$0xff] %v580_v2 }
  0x57   : > { %583 = vst [vmem:[%s2804_s29 + $0x218] sm:$0xff] %v582_v3 }
  0x58   : > { %585 = vst [vmem:[%s2804_s29 + $0x220] sm:$0xff] %v584_v4 }
  0x59   : > { %587 = vst [vmem:[%s2804_s29 + $0x228] sm:$0xff] %v586_v5 }
  0x5a   : > { %589 = vst [vmem:[%s2804_s29 + $0x230] sm:$0xff] %v588_v6 }
  0x5b   : > { %591 = vst [vmem:[%s2804_s29 + $0x238] sm:$0xff] %v590_v7 }
  0x5c   : > { %593 = vst [vmem:[%s2804_s29 + $0x240] sm:$0xff] %v592_v8 }
  0x5d   : > { %595 = vst [vmem:[%s2804_s29 + $0x248] sm:$0xff] %v594_v9 }
  0x5e   : > { %597 = vst [vmem:[%s2804_s29 + $0x250] sm:$0xff] %v596_v10 }
  0x5f   : > { %599 = vst [vmem:[%s2804_s29 + $0x258] sm:$0xff] %v598_v11 }
  0x60   : > { %601 = vst [vmem:[%s2804_s29 + $0x260] sm:$0xff] %v600_v12 }
  0x61   : > { %603 = vst [vmem:[%s2804_s29 + $0x268] sm:$0xff] %v602_v13 }
  0x62   : > { %605 = vst [vmem:[%s2804_s29 + $0x270] sm:$0xff] %v604_v14 }
  0x63   : > { %607 = vst [vmem:[%s2804_s29 + $0x278] sm:$0xff] %v606_v15 }
  0x64   : > { %609 = vst [vmem:[%s2804_s29 + $0x280] sm:$0xff] %v608_v16 }
  0x65   : > { %611 = vst [vmem:[%s2804_s29 + $0x288] sm:$0xff] %v610_v17 }
  0x66   : > { %613 = vst [vmem:[%s2804_s29 + $0x290] sm:$0xff] %v612_v18 }
  0x67   : > { %615 = vst [vmem:[%s2804_s29 + $0x298] sm:$0xff] %v614_v19 }
  0x68   : > { %617 = vst [vmem:[%s2804_s29 + $0x2a0] sm:$0xff] %v616_v20 }
  0x69   : > { %619 = vst [vmem:[%s2804_s29 + $0x2a8] sm:$0xff] %v618_v21 }
  0x6a   : > { %621 = vst [vmem:[%s2804_s29 + $0x2b0] sm:$0xff] %v620_v22 }
  0x6b   : > { %623 = vst [vmem:[%s2804_s29 + $0x2b8] sm:$0xff] %v622_v23 }
  0x6c   : > { %625 = vst [vmem:[%s2804_s29 + $0x2c0] sm:$0xff] %v624_v24 }
  0x6d   : > { %627 = vst [vmem:[%s2804_s29 + $0x2c8] sm:$0xff] %v626_v25 }
  0x6e   : > { %629 = vst [vmem:[%s2804_s29 + $0x2d0] sm:$0xff] %v628_v26 }
  0x6f   : > { %631 = vst [vmem:[%s2804_s29 + $0x2d8] sm:$0xff] %v630_v27 }
  0x70   : > { %633 = vst [vmem:[%s2804_s29 + $0x2e0] sm:$0xff] %v632_v28 }
  0x71   : > { %635 = vst [vmem:[%s2804_s29 + $0x2e8] sm:$0xff] %v634_v29 }
  0x72   : > { %637 = vst [vmem:[%s2804_s29 + $0x2f0] sm:$0xff] %v636_v30 }
  0x73   : > { %639 = vst [vmem:[%s2804_s29 + $0x2f8] sm:$0xff] %v638_v31 }
  0x74   : > { %641 = vst [vmem:[%s2804_s29 + $0x300] sm:$0xff] %v640_v32 }
  0x75   : > { %643 = vst [vmem:[%s2804_s29 + $0x308] sm:$0xff] %v642_v33 }
  0x76   : > { %645 = vst [vmem:[%s2804_s29 + $0x310] sm:$0xff] %v644_v34 }
  0x77   : > { %647 = vst [vmem:[%s2804_s29 + $0x318] sm:$0xff] %v646_v35 }
  0x78   : > { %649 = vst [vmem:[%s2804_s29 + $0x320] sm:$0xff] %v648_v36 }
  0x79   : > { %651 = vst [vmem:[%s2804_s29 + $0x328] sm:$0xff] %v650_v37 }
  0x7a   : > { %653 = vst [vmem:[%s2804_s29 + $0x330] sm:$0xff] %v652_v38 }
  0x7b   : > { %655 = vst [vmem:[%s2804_s29 + $0x338] sm:$0xff] %v654_v39 }
  0x7c   : > { %657 = vst [vmem:[%s2804_s29 + $0x340] sm:$0xff] %v656_v40 }
  0x7d   : > { %659 = vst [vmem:[%s2804_s29 + $0x348] sm:$0xff] %v658_v41 }
  0x7e   : > { %661 = vst [vmem:[%s2804_s29 + $0x350] sm:$0xff] %v660_v42 }
  0x7f   : > { %663 = vst [vmem:[%s2804_s29 + $0x358] sm:$0xff] %v662_v43 }
  0x80   : > { %665 = vst [vmem:[%s2804_s29 + $0x360] sm:$0xff] %v664_v44 }
  0x81   : > { %667 = vst [vmem:[%s2804_s29 + $0x368] sm:$0xff] %v666_v45 }
  0x82   : > { %669 = vst [vmem:[%s2804_s29 + $0x370] sm:$0xff] %v668_v46 }
  0x83   : > { %671 = vst [vmem:[%s2804_s29 + $0x378] sm:$0xff] %v670_v47 }
  0x84   : > { %673 = vst [vmem:[%s2804_s29 + $0x380] sm:$0xff] %v672_v48 }
  0x85   : > { %675 = vst [vmem:[%s2804_s29 + $0x388] sm:$0xff] %v674_v49 }
  0x86   : > { %677 = vst [vmem:[%s2804_s29 + $0x390] sm:$0xff] %v676_v50 }
  0x87   : > { %679 = vst [vmem:[%s2804_s29 + $0x398] sm:$0xff] %v678_v51 }
  0x88   : > { %681 = vst [vmem:[%s2804_s29 + $0x3a0] sm:$0xff] %v680_v52 }
  0x89   : > { %683 = vst [vmem:[%s2804_s29 + $0x3a8] sm:$0xff] %v682_v53 }
  0x8a   : > { %685 = vst [vmem:[%s2804_s29 + $0x3b0] sm:$0xff] %v684_v54 }
  0x8b   : > { %687 = vst [vmem:[%s2804_s29 + $0x3b8] sm:$0xff] %v686_v55 }
  0x8c   : > { %689 = vst [vmem:[%s2804_s29 + $0x3c0] sm:$0xff] %v688_v56 }
  0x8d   : > { %691 = vst [vmem:[%s2804_s29 + $0x3c8] sm:$0xff] %v690_v57 }
  0x8e   : > { %693 = vst [vmem:[%s2804_s29 + $0x3d0] sm:$0xff] %v692_v58 }
  0x8f   : > { %695 = vst [vmem:[%s2804_s29 + $0x3d8] sm:$0xff] %v694_v59 }
  0x90   : > { %697 = vst [vmem:[%s2804_s29 + $0x3e0] sm:$0xff] %v696_v60 }
  0x91   : > { %699 = vst [vmem:[%s2804_s29 + $0x3e8] sm:$0xff] %v698_v61 }
  0x92   : > { %701 = vst [vmem:[%s2804_s29 + $0x3f0] sm:$0xff] %v700_v62 }
  0x93   : > { %703 = vst [vmem:[%s2804_s29 + $0x3f8] sm:$0xff] %v702_v63 }
  0x94 PF: > { %p1960_p8 = scmp.ge.s32.totalorder %s2729_s16, 1  ;;  %p716_p9 = scmp.lt.s32.totalorder %s2729_s16, 14 }
  0x96   : > { %p717_p10 = pnand %p1960_p8, %p716_p9 }
  0x97   : > { %s723_s30 = sand.u32 (!%p717_p10), 1, %s2713_s12  }
  0x98   : > { %720 = sbr.rel (%p717_p10) target bundleno = 444 (0x1bc), region = 66  ;;  %s1961_s4 = sshll.u32 (!%p717_p10), %s723_s30, 10 }
  0x99   : > { %s3064_s5 = scalar_lea.vmem (!%p717_p10), [#allocation2], %s1961_s4  ;;  %s1962_s7 = sshll.u32 (!%p717_p10), %s723_s30, 5 }
  0x9a   : > { %s3408_s8 = scalar_lea.vmem (!%p717_p10), [#allocation3], %s1962_s7 }
  0x9d   : > { %v2054_v0 = vld [vmem:[%s3064_s5 + $0x70] sm:$0xf]  ;;  %v2537_v1 = vld [vmem:[%s3064_s5 + $0x74] sm:$0xf0]  ;;  %v2046_v11 = vld [vmem:[%s3064_s5 + $0x60] sm:$0xf] }
  0x9e   : > { %v2118_v2 = vld [vmem:[%s3064_s5 + $0xf0] sm:$0xf]  ;;  %v2055_v3 = vor.u32 %v2537_v1, %v2054_v0  ;;  %v2553_v4 = vld [vmem:[%s3064_s5 + $0xf4] sm:$0xf0]  ;;  %v2535_v13 = vld [vmem:[%s3064_s5 + $0x64] sm:$0xf0] }
  0x9f   : > { %v2182_v5 = vld [vmem:[%s3064_s5 + $0x170] sm:$0xf]  ;;  %v2569_v6 = vld [vmem:[%s3064_s5 + $0x174] sm:$0xf0]  ;;  %v2119_v7 = vor.u32 %v2553_v4, %v2118_v2  ;;  %v2110_v14 = vld [vmem:[%s3064_s5 + $0xe0] sm:$0xf]  ;;  %v2047_v16 = vor.u32 %v2535_v13, %v2046_v11 }
  0xa0   : > { %v2183_v8 = vor.u32 %v2569_v6, %v2182_v5  ;;  %v2246_v9 = vld [vmem:[%s3064_s5 + $0x1f0] sm:$0xf]  ;;  %v2585_v10 = vld [vmem:[%s3064_s5 + $0x1f4] sm:$0xf0]  ;;  %1592 = vmatpush.bf16.msra.mxu0 %v2055_v3  ;;  %v2551_v15 = vld [vmem:[%s3064_s5 + $0xe4] sm:$0xf0] }
  0xa1   : > { %v2247_v12 = vor.u32 %v2585_v10, %v2246_v9  ;;  %1606 = vmatpush.bf16.msra.mxu1 %v2119_v7  ;;  %v2111_v17 = vor.u32 %v2551_v15, %v2110_v14  ;;  %v2174_v18 = vld [vmem:[%s3064_s5 + $0x160] sm:$0xf]  ;;  %v2567_v19 = vld [vmem:[%s3064_s5 + $0x164] sm:$0xf0]  ;;  %v2038_v23 = vld [vmem:[%s3064_s5 + $0x50] sm:$0xf] }
  0xa2   : > { %1620 = vmatpush.bf16.msra.mxu2 %v2183_v8  ;;  %v2238_v20 = vld [vmem:[%s3064_s5 + $0x1e0] sm:$0xf]  ;;  %v2175_v21 = vor.u32 %v2567_v19, %v2174_v18  ;;  %v2583_v22 = vld [vmem:[%s3064_s5 + $0x1e4] sm:$0xf0]  ;;  %v2533_v24 = vld [vmem:[%s3064_s5 + $0x54] sm:$0xf0] }
  0xa3   : > { %1634 = vmatpush.bf16.msra.mxu3 %v2247_v12  ;;  %v2239_v25 = vor.u32 %v2583_v22, %v2238_v20  ;;  %v2102_v26 = vld [vmem:[%s3064_s5 + $0xd0] sm:$0xf]  ;;  %v2549_v27 = vld [vmem:[%s3064_s5 + $0xd4] sm:$0xf0]  ;;  %v2039_v29 = vor.u32 %v2533_v24, %v2038_v23  ;;  %v2030_v35 = vld [vmem:[%s3064_s5 + $0x40] sm:$0xf] }
  0xa4   : > { %v2166_v28 = vld [vmem:[%s3064_s5 + $0x150] sm:$0xf]  ;;  %1593 = vmatpush.bf16.msra.mxu0 %v2047_v16  ;;  %v2565_v30 = vld [vmem:[%s3064_s5 + $0x154] sm:$0xf0]  ;;  %v2103_v33 = vor.u32 %v2549_v27, %v2102_v26  ;;  %v2531_v36 = vld [vmem:[%s3064_s5 + $0x44] sm:$0xf0] }
  0xa5   : > { %v2230_v31 = vld [vmem:[%s3064_s5 + $0x1d0] sm:$0xf]  ;;  %v2581_v32 = vld [vmem:[%s3064_s5 + $0x1d4] sm:$0xf0]  ;;  %1607 = vmatpush.bf16.msra.mxu1 %v2111_v17  ;;  %v2167_v34 = vor.u32 %v2565_v30, %v2166_v28  ;;  %v2094_v37 = vld [vmem:[%s3064_s5 + $0xc0] sm:$0xf]  ;;  %v2031_v44 = vor.u32 %v2531_v36, %v2030_v35 }
  0xa6   : > { %1621 = vmatpush.bf16.msra.mxu2 %v2175_v21  ;;  %v2231_v38 = vor.u32 %v2581_v32, %v2230_v31  ;;  %v2547_v39 = vld [vmem:[%s3064_s5 + $0xc4] sm:$0xf0]  ;;  %v2158_v40 = vld [vmem:[%s3064_s5 + $0x140] sm:$0xf]  ;;  %v2022_v47 = vld [vmem:[%s3064_s5 + $0x30] sm:$0xf] }
  0xa7   : > { %1635 = vmatpush.bf16.msra.mxu3 %v2239_v25  ;;  %v2563_v41 = vld [vmem:[%s3064_s5 + $0x144] sm:$0xf0]  ;;  %v2222_v42 = vld [vmem:[%s3064_s5 + $0x1c0] sm:$0xf]  ;;  %v2095_v45 = vor.u32 %v2547_v39, %v2094_v37  ;;  %v2529_v48 = vld [vmem:[%s3064_s5 + $0x34] sm:$0xf0] }
  0xa8   : > { %v2579_v43 = vld [vmem:[%s3064_s5 + $0x1c4] sm:$0xf0]  ;;  %1594 = vmatpush.bf16.msra.mxu0 %v2039_v29  ;;  %v2159_v46 = vor.u32 %v2563_v41, %v2158_v40  ;;  %v2086_v49 = vld [vmem:[%s3064_s5 + $0xb0] sm:$0xf]  ;;  %v2545_v51 = vld [vmem:[%s3064_s5 + $0xb4] sm:$0xf0]  ;;  %v2023_v56 = vor.u32 %v2529_v48, %v2022_v47 }
  0xa9   : > { %1608 = vmatpush.bf16.msra.mxu1 %v2103_v33  ;;  %v2223_v50 = vor.u32 %v2579_v43, %v2222_v42  ;;  %v2150_v52 = vld [vmem:[%s3064_s5 + $0x130] sm:$0xf]  ;;  %v2561_v53 = vld [vmem:[%s3064_s5 + $0x134] sm:$0xf0]  ;;  %v2087_v57 = vor.u32 %v2545_v51, %v2086_v49  ;;  %v2014_v59 = vld [vmem:[%s3064_s5 + $0x20] sm:$0xf] }
  0xaa   : > { %1622 = vmatpush.bf16.msra.mxu2 %v2167_v34  ;;  %v2214_v54 = vld [vmem:[%s3064_s5 + $0x1b0] sm:$0xf]  ;;  %v2577_v55 = vld [vmem:[%s3064_s5 + $0x1b4] sm:$0xf0]  ;;  %v2151_v58 = vor.u32 %v2561_v53, %v2150_v52  ;;  %v2527_v60 = vld [vmem:[%s3064_s5 + $0x24] sm:$0xf0] }
  0xab   : > { %1636 = vmatpush.bf16.msra.mxu3 %v2231_v38  ;;  %v2078_v61 = vld [vmem:[%s3064_s5 + $0xa0] sm:$0xf]  ;;  %v2215_v62 = vor.u32 %v2577_v55, %v2214_v54  ;;  %v2543_v63 = vld [vmem:[%s3064_s5 + $0xa4] sm:$0xf0]  ;;  %v2015_v4 = vor.u32 %v2527_v60, %v2014_v59  ;;  %v2006_v7 = vld [vmem:[%s3064_s5 + $0x10] sm:$0xf] }
  0xac   : > { %1595 = vmatpush.bf16.msra.mxu0 %v2031_v44  ;;  %v2142_v0 = vld [vmem:[%s3064_s5 + $0x120] sm:$0xf]  ;;  %v2559_v1 = vld [vmem:[%s3064_s5 + $0x124] sm:$0xf0]  ;;  %v2079_v5 = vor.u32 %v2543_v63, %v2078_v61  ;;  %v2525_v8 = vld [vmem:[%s3064_s5 + $0x14] sm:$0xf0] }
  0xad   : > { %1609 = vmatpush.bf16.msra.mxu1 %v2095_v45  ;;  %v2206_v2 = vld [vmem:[%s3064_s5 + $0x1a0] sm:$0xf]  ;;  %v2575_v3 = vld [vmem:[%s3064_s5 + $0x1a4] sm:$0xf0]  ;;  %v2143_v6 = vor.u32 %v2559_v1, %v2142_v0  ;;  %v2070_v9 = vld [vmem:[%s3064_s5 + $0x90] sm:$0xf]  ;;  %v2007_v16 = vor.u32 %v2525_v8, %v2006_v7 }
  0xae   : > { %1623 = vmatpush.bf16.msra.mxu2 %v2159_v46  ;;  %v2207_v10 = vor.u32 %v2575_v3, %v2206_v2  ;;  %v2541_v11 = vld [vmem:[%s3064_s5 + $0x94] sm:$0xf0]  ;;  %v2134_v12 = vld [vmem:[%s3064_s5 + $0x110] sm:$0xf]  ;;  %v1998_v17 = vld [vmem:[%s3064_s5] sm:$0xf] }
  0xaf   : > { %1637 = vmatpush.bf16.msra.mxu3 %v2223_v50  ;;  %v2557_v13 = vld [vmem:[%s3064_s5 + $0x114] sm:$0xf0]  ;;  %v2198_v14 = vld [vmem:[%s3064_s5 + $0x190] sm:$0xf]  ;;  %v2523_v18 = vld [vmem:[%s3064_s5 + $0x4] sm:$0xf0]  ;;  %v2071_v19 = vor.u32 %v2541_v11, %v2070_v9 }
  0xb0   : > { %1596 = vmatpush.bf16.msra.mxu0 %v2023_v56  ;;  %v2573_v15 = vld [vmem:[%s3064_s5 + $0x194] sm:$0xf0]  ;;  %v2135_v20 = vor.u32 %v2557_v13, %v2134_v12  ;;  %v2062_v21 = vld [vmem:[%s3064_s5 + $0x80] sm:$0xf]  ;;  %v2539_v22 = vld [vmem:[%s3064_s5 + $0x84] sm:$0xf0]  ;;  %v1999_v31 = vor.u32 %v2523_v18, %v1998_v17 }
  0xb1   : > { %1610 = vmatpush.bf16.msra.mxu1 %v2087_v57  ;;  %v2126_v23 = vld [vmem:[%s3064_s5 + $0x100] sm:$0xf]  ;;  %v2199_v24 = vor.u32 %v2573_v15, %v2198_v14  ;;  %v2555_v25 = vld [vmem:[%s3064_s5 + $0x104] sm:$0xf0]  ;;  %v2310_v28 = vld [vmem:[%s3064_s5 + $0x270] sm:$0xf]  ;;  %v2063_v35 = vor.u32 %v2539_v22, %v2062_v21 }
  0xb2   : > { %1624 = vmatpush.bf16.msra.mxu2 %v2151_v58  ;;  %v2190_v26 = vld [vmem:[%s3064_s5 + $0x180] sm:$0xf]  ;;  %v2571_v27 = vld [vmem:[%s3064_s5 + $0x184] sm:$0xf0]  ;;  %v2601_v29 = vld [vmem:[%s3064_s5 + $0x274] sm:$0xf0]  ;;  %v2127_v36 = vor.u32 %v2555_v25, %v2126_v23 }
  0xb3   : > { %1638 = vmatpush.bf16.msra.mxu3 %v2215_v62  ;;  %v2374_v30 = vld [vmem:[%s3064_s5 + $0x2f0] sm:$0xf]  ;;  %v2617_v32 = vld [vmem:[%s3064_s5 + $0x2f4] sm:$0xf0]  ;;  %v2191_v39 = vor.u32 %v2571_v27, %v2190_v26  ;;  %v2311_v40 = vor.u32 %v2601_v29, %v2310_v28  ;;  %v2302_v41 = vld [vmem:[%s3064_s5 + $0x260] sm:$0xf] }
  0xb4   : > { %1597 = vmatpush.bf16.msra.mxu0 %v2015_v4  ;;  %v2438_v33 = vld [vmem:[%s3064_s5 + $0x370] sm:$0xf]  ;;  %v2633_v34 = vld [vmem:[%s3064_s5 + $0x374] sm:$0xf0]  ;;  %v2599_v42 = vld [vmem:[%s3064_s5 + $0x264] sm:$0xf0]  ;;  %v2375_v43 = vor.u32 %v2617_v32, %v2374_v30 }
  0xb5   : > { %1611 = vmatpush.bf16.msra.mxu1 %v2079_v5  ;;  %v2502_v37 = vld [vmem:[%s3064_s5 + $0x3f0] sm:$0xf]  ;;  %v2649_v38 = vld [vmem:[%s3064_s5 + $0x3f4] sm:$0xf0]  ;;  %v2439_v44 = vor.u32 %v2633_v34, %v2438_v33  ;;  %v2366_v45 = vld [vmem:[%s3064_s5 + $0x2e0] sm:$0xf]  ;;  %v2303_v55 = vor.u32 %v2599_v42, %v2302_v41 }
  0xb6   : > { %1625 = vmatpush.bf16.msra.mxu2 %v2143_v6  ;;  %v2615_v46 = vld [vmem:[%s3064_s5 + $0x2e4] sm:$0xf0]  ;;  %v2430_v47 = vld [vmem:[%s3064_s5 + $0x360] sm:$0xf]  ;;  %v2503_v48 = vor.u32 %v2649_v38, %v2502_v37  ;;  %v2294_v56 = vld [vmem:[%s3064_s5 + $0x250] sm:$0xf] }
  0xb7   : > { %1639 = vmatpush.bf16.msra.mxu3 %v2207_v10  ;;  %v2631_v49 = vld [vmem:[%s3064_s5 + $0x364] sm:$0xf0]  ;;  %v2494_v50 = vld [vmem:[%s3064_s5 + $0x3e0] sm:$0xf]  ;;  %v2597_v57 = vld [vmem:[%s3064_s5 + $0x254] sm:$0xf0]  ;;  %v2367_v60 = vor.u32 %v2615_v46, %v2366_v45 }
  0xb8   : > { %1598 = vmatpush.bf16.msra.mxu0 %v2007_v16  ;;  %v2647_v51 = vld [vmem:[%s3064_s5 + $0x3e4] sm:$0xf0]  ;;  %v1966_v52 = vld [vmem:[%s3439_s0] sm:$0xf]  ;;  %v2431_v61 = vor.u32 %v2631_v49, %v2430_v47  ;;  %v2358_v62 = vld [vmem:[%s3064_s5 + $0x2d0] sm:$0xf]  ;;  %v2295_v9 = vor.u32 %v2597_v57, %v2294_v56 }
  0xb9   : > { %1612 = vmatpush.bf16.msra.mxu1 %v2071_v19  ;;  %v2518_v53 = vld [vmem:[%s3439_s0 + $0x1c] sm:$0xf0]  ;;  %v1974_v54 = vld [vmem:[%s3439_s0 + $0x8] sm:$0xf]  ;;  %v2613_v63 = vld [vmem:[%s3064_s5 + $0x2d4] sm:$0xf0]  ;;  %v2495_v2 = vor.u32 %v2647_v51, %v2494_v50 }
  0xba   : > { %1626 = vmatpush.bf16.msra.mxu2 %v2135_v20  ;;  %v3157_v58 = vor.u32 %v2518_v53, %v1966_v52  ;;  %v2519_v59 = vld [vmem:[%s3439_s0 + $0x24] sm:$0xf0]  ;;  %v2422_v0 = vld [vmem:[%s3064_s5 + $0x350] sm:$0xf]  ;;  %v2629_v3 = vld [vmem:[%s3064_s5 + $0x354] sm:$0xf0]  ;;  %v2359_v12 = vor.u32 %v2613_v63, %v2358_v62 }
  0xbb   : > { %1640 = vmatpush.bf16.msra.mxu3 %v2199_v24  ;;  %v3165_v1 = vor.u32 %v2519_v59, %v1974_v54  ;;  %v2486_v4 = vld [vmem:[%s3064_s5 + $0x3d0] sm:$0xf]  ;;  %v2645_v5 = vld [vmem:[%s3064_s5 + $0x3d4] sm:$0xf0]  ;;  %v2514_v6 = vld [vmem:[%s3439_s0 + $0x4] sm:$0xf]  ;;  %v2423_v13 = vor.u32 %v2629_v3, %v2422_v0 }
  0xbc   : > { %1599 = vmatpush.bf16.msra.mxu0 %v1999_v31  ;;  %v1968_v7 = vld [vmem:[%s3439_s0 + $0x20] sm:$0xf0]  ;;  %v2515_v8 = vld [vmem:[%s3439_s0 + $0xc] sm:$0xf]  ;;  %v2286_v14 = vld [vmem:[%s3064_s5 + $0x240] sm:$0xf]  ;;  %v2487_v18 = vor.u32 %v2645_v5, %v2486_v4 }
  0xbd   : > { %1613 = vmatpush.bf16.msra.mxu1 %v2063_v35  ;;  %v3181_v10 = vor.u32 %v2514_v6, %v1968_v7  ;;  %v1976_v11 = vld [vmem:[%s3439_s0 + $0x28] sm:$0xf0]  ;;  %v2595_v15 = vld [vmem:[%s3064_s5 + $0x244] sm:$0xf0]  ;;  %v2350_v16 = vld [vmem:[%s3064_s5 + $0x2c0] sm:$0xf] }
  0xbe   : > { %1627 = vmatpush.bf16.msra.mxu2 %v2127_v36  ;;  %v3189_v17 = vor.u32 %v2515_v8, %v1976_v11  ;;  %v2611_v19 = vld [vmem:[%s3064_s5 + $0x2c4] sm:$0xf0]  ;;  %v2414_v20 = vld [vmem:[%s3064_s5 + $0x340] sm:$0xf]  ;;  %v2287_v24 = vor.u32 %v2595_v15, %v2286_v14  ;;  %v2278_v27 = vld [vmem:[%s3064_s5 + $0x230] sm:$0xf] }
  0xbf   : > { %1641 = vmatpush.bf16.msra.mxu3 %v2191_v39  ;;  %1600 = vmatmul.bf16.vlgmr.msra.gmra.mxu0 %v3157_v58  ;;  %v2627_v21 = vld [vmem:[%s3064_s5 + $0x344] sm:$0xf0]  ;;  %v2478_v22 = vld [vmem:[%s3064_s5 + $0x3c0] sm:$0xf]  ;;  %v2351_v25 = vor.u32 %v2611_v19, %v2350_v16  ;;  %v2593_v28 = vld [vmem:[%s3064_s5 + $0x234] sm:$0xf0] }
  0xc0   : > { %1648 = vmatpush.bf16.msrb.mxu0 %v2311_v40  ;;  %1614 = vmatmul.bf16.vlgmr.msra.gmra.mxu1 %v3181_v10  ;;  %v2643_v23 = vld [vmem:[%s3064_s5 + $0x3c4] sm:$0xf0]  ;;  %v2415_v26 = vor.u32 %v2627_v21, %v2414_v20  ;;  %v2342_v29 = vld [vmem:[%s3064_s5 + $0x2b0] sm:$0xf]  ;;  %v2609_v31 = vld [vmem:[%s3064_s5 + $0x2b4] sm:$0xf0]  ;;  %v2279_v36 = vor.u32 %v2593_v28, %v2278_v27 }
  0xc1   : > { %1662 = vmatpush.bf16.msrb.mxu1 %v2375_v43  ;;  %1628 = vmatmul.bf16.vlgmr.msra.gmra.mxu2 %v3165_v1  ;;  %v2479_v30 = vor.u32 %v2643_v23, %v2478_v22  ;;  %v2406_v32 = vld [vmem:[%s3064_s5 + $0x330] sm:$0xf]  ;;  %v2625_v33 = vld [vmem:[%s3064_s5 + $0x334] sm:$0xf0]  ;;  %v2343_v37 = vor.u32 %v2609_v31, %v2342_v29  ;;  %v2270_v39 = vld [vmem:[%s3064_s5 + $0x220] sm:$0xf] }
  0xc2   : > { %1676 = vmatpush.bf16.msrb.mxu2 %v2439_v44  ;;  %1642 = vmatmul.bf16.vlgmr.msra.gmra.mxu3 %v3189_v17  ;;  %v2470_v34 = vld [vmem:[%s3064_s5 + $0x3b0] sm:$0xf]  ;;  %v2641_v35 = vld [vmem:[%s3064_s5 + $0x3b4] sm:$0xf0]  ;;  %v2407_v38 = vor.u32 %v2625_v33, %v2406_v32  ;;  %v2591_v40 = vld [vmem:[%s3064_s5 + $0x224] sm:$0xf0] }
  0xc3   : > { %1690 = vmatpush.bf16.msrb.mxu3 %v2503_v48  ;;  %v2334_v41 = vld [vmem:[%s3064_s5 + $0x2a0] sm:$0xf]  ;;  %v2471_v42 = vor.u32 %v2641_v35, %v2470_v34  ;;  %v2607_v43 = vld [vmem:[%s3064_s5 + $0x2a4] sm:$0xf0]  ;;  %v2271_v48 = vor.u32 %v2591_v40, %v2270_v39  ;;  %v2262_v49 = vld [vmem:[%s3064_s5 + $0x210] sm:$0xf] }
  0xc4   : > { %1649 = vmatpush.bf16.msrb.mxu0 %v2303_v55  ;;  %v2398_v44 = vld [vmem:[%s3064_s5 + $0x320] sm:$0xf]  ;;  %v2623_v45 = vld [vmem:[%s3064_s5 + $0x324] sm:$0xf0]  ;;  %v2335_v50 = vor.u32 %v2607_v43, %v2334_v41  ;;  %v2589_v52 = vld [vmem:[%s3064_s5 + $0x214] sm:$0xf0] }
  0xc5   : > { %1663 = vmatpush.bf16.msrb.mxu1 %v2367_v60  ;;  %v2462_v46 = vld [vmem:[%s3064_s5 + $0x3a0] sm:$0xf]  ;;  %v2639_v47 = vld [vmem:[%s3064_s5 + $0x3a4] sm:$0xf0]  ;;  %v2399_v51 = vor.u32 %v2623_v45, %v2398_v44  ;;  %v2326_v53 = vld [vmem:[%s3064_s5 + $0x290] sm:$0xf]  ;;  %v2263_v63 = vor.u32 %v2589_v52, %v2262_v49 }
  0xc6   : > { %1677 = vmatpush.bf16.msrb.mxu2 %v2431_v61  ;;  %v2605_v54 = vld [vmem:[%s3064_s5 + $0x294] sm:$0xf0]  ;;  %v2463_v55 = vor.u32 %v2639_v47, %v2462_v46  ;;  %v2390_v56 = vld [vmem:[%s3064_s5 + $0x310] sm:$0xf]  ;;  %v2254_v61 = vld [vmem:[%s3064_s5 + $0x200] sm:$0xf] }
  0xc7   : > { %1691 = vmatpush.bf16.msrb.mxu3 %v2495_v2  ;;  %v2621_v57 = vld [vmem:[%s3064_s5 + $0x314] sm:$0xf0]  ;;  %v2454_v59 = vld [vmem:[%s3064_s5 + $0x390] sm:$0xf]  ;;  %v2587_v62 = vld [vmem:[%s3064_s5 + $0x204] sm:$0xf0]  ;;  %v2327_v5 = vor.u32 %v2605_v54, %v2326_v53 }
  0xc8   : > { %1650 = vmatpush.bf16.msrb.mxu0 %v2295_v9  ;;  %v2637_v60 = vld [vmem:[%s3064_s5 + $0x394] sm:$0xf0]  ;;  %v2318_v0 = vld [vmem:[%s3064_s5 + $0x280] sm:$0xf]  ;;  %v2603_v2 = vld [vmem:[%s3064_s5 + $0x284] sm:$0xf0]  ;;  %v2391_v6 = vor.u32 %v2621_v57, %v2390_v56  ;;  %v2255_v19 = vor.u32 %v2587_v62, %v2254_v61 }
  0xc9   : > { %1664 = vmatpush.bf16.msrb.mxu1 %v2359_v12  ;;  %v2382_v3 = vld [vmem:[%s3064_s5 + $0x300] sm:$0xf]  ;;  %v2619_v4 = vld [vmem:[%s3064_s5 + $0x304] sm:$0xf0]  ;;  %v2536_v9 = vld [vmem:[%s3064_s5 + $0x74] sm:$0xf]  ;;  %v2455_v11 = vor.u32 %v2637_v60, %v2454_v59  ;;  %v2319_v23 = vor.u32 %v2603_v2, %v2318_v0 }
  0xca   : > { %1678 = vmatpush.bf16.msrb.mxu2 %v2423_v13  ;;  %v2446_v7 = vld [vmem:[%s3064_s5 + $0x380] sm:$0xf]  ;;  %v2635_v8 = vld [vmem:[%s3064_s5 + $0x384] sm:$0xf0]  ;;  %v2056_v12 = vld [vmem:[%s3064_s5 + $0x78] sm:$0xf0] }
  0xcb   : > { %1692 = vmatpush.bf16.msrb.mxu3 %v2487_v18  ;;  %v2552_v13 = vld [vmem:[%s3064_s5 + $0xf4] sm:$0xf]  ;;  %v2120_v14 = vld [vmem:[%s3064_s5 + $0xf8] sm:$0xf0]  ;;  %v1982_v21 = vld [vmem:[%s3439_s0 + $0x10] sm:$0xf]  ;;  %v2447_v28 = vor.u32 %v2635_v8, %v2446_v7  ;;  %v2059_v29 = vor.u32 %v2536_v9, %v2056_v12 }
  0xcc   : > { %1651 = vmatpush.bf16.msrb.mxu0 %v2287_v24  ;;  %v2568_v15 = vld [vmem:[%s3064_s5 + $0x174] sm:$0xf]  ;;  %v2184_v16 = vld [vmem:[%s3064_s5 + $0x178] sm:$0xf0]  ;;  %v2520_v22 = vld [vmem:[%s3439_s0 + $0x2c] sm:$0xf0]  ;;  %v2383_v24 = vor.u32 %v2619_v4, %v2382_v3  ;;  %v2123_v33 = vor.u32 %v2552_v13, %v2120_v14 }
  0xcd   : > { %1665 = vmatpush.bf16.msrb.mxu1 %v2351_v25  ;;  %v2584_v18 = vld [vmem:[%s3064_s5 + $0x1f4] sm:$0xf]  ;;  %v2248_v20 = vld [vmem:[%s3064_s5 + $0x1f8] sm:$0xf0]  ;;  %v1990_v25 = vld [vmem:[%s3439_s0 + $0x18] sm:$0xf]  ;;  %v2187_v34 = vor.u32 %v2568_v15, %v2184_v16  ;;  %v3265_v39 = vor.u32 %v2520_v22, %v1982_v21 }
  0xce   : > { %1679 = vmatpush.bf16.msrb.mxu2 %v2415_v26  ;;  %v2521_v26 = vld [vmem:[%s3439_s0 + $0x34] sm:$0xf0]  ;;  %v2516_v27 = vld [vmem:[%s3439_s0 + $0x14] sm:$0xf]  ;;  %v2517_v31 = vld [vmem:[%s3439_s0 + $0x1c] sm:$0xf] }
  0xcf   : > { %1693 = vmatpush.bf16.msrb.mxu3 %v2479_v30  ;;  %v1984_v30 = vld [vmem:[%s3439_s0 + $0x30] sm:$0xf0]  ;;  %v1992_v32 = vld [vmem:[%s3439_s0 + $0x38] sm:$0xf0]  ;;  %v2534_v35 = vld [vmem:[%s3064_s5 + $0x64] sm:$0xf]  ;;  %v3270_v43 = vor.u32 %v2521_v26, %v1990_v25 }
  0xd0   : > { %1652 = vmatpush.bf16.msrb.mxu0 %v2279_v36  ;;  %v2048_v36 = vld [vmem:[%s3064_s5 + $0x68] sm:$0xf0]  ;;  %v2566_v41 = vld [vmem:[%s3064_s5 + $0x164] sm:$0xf]  ;;  %v3272_v44 = vor.u32 %v2516_v27, %v1984_v30  ;;  %v3276_v47 = vor.u32 %v2517_v31, %v1992_v32  ;;  %v2040_v52 = vld [vmem:[%s3064_s5 + $0x58] sm:$0xf0] }
  0xd1   : > { %1666 = vmatpush.bf16.msrb.mxu1 %v2343_v37  ;;  %v2550_v37 = vld [vmem:[%s3064_s5 + $0xe4] sm:$0xf]  ;;  %v2112_v40 = vld [vmem:[%s3064_s5 + $0xe8] sm:$0xf0]  ;;  %v2548_v53 = vld [vmem:[%s3064_s5 + $0xd4] sm:$0xf] }
  0xd2   : > { %1680 = vmatpush.bf16.msrb.mxu2 %v2407_v38  ;;  %v2251_v38 = vor.u32 %v2584_v18, %v2248_v20  ;;  %v2582_v45 = vld [vmem:[%s3064_s5 + $0x1e4] sm:$0xf]  ;;  %v2240_v46 = vld [vmem:[%s3064_s5 + $0x1e8] sm:$0xf0]  ;;  %v2115_v49 = vor.u32 %v2550_v37, %v2112_v40  ;;  %v2564_v56 = vld [vmem:[%s3064_s5 + $0x154] sm:$0xf] }
  0xd3   : > { %1694 = vmatpush.bf16.msrb.mxu3 %v2471_v42  ;;  %v2176_v42 = vld [vmem:[%s3064_s5 + $0x168] sm:$0xf0]  ;;  %v2243_v54 = vor.u32 %v2582_v45, %v2240_v46  ;;  %v2168_v57 = vld [vmem:[%s3064_s5 + $0x158] sm:$0xf0]  ;;  %v2580_v59 = vld [vmem:[%s3064_s5 + $0x1d4] sm:$0xf] }
  0xd4   : > { %1653 = vmatpush.bf16.msrb.mxu0 %v2271_v48  ;;  %v2051_v48 = vor.u32 %v2534_v35, %v2048_v36  ;;  %v2232_v60 = vld [vmem:[%s3064_s5 + $0x1d8] sm:$0xf0]  ;;  %v2530_v0 = vld [vmem:[%s3064_s5 + $0x44] sm:$0xf]  ;;  %v2032_v2 = vld [vmem:[%s3064_s5 + $0x48] sm:$0xf0] }
  0xd5   : > { %1667 = vmatpush.bf16.msrb.mxu1 %v2335_v50  ;;  %v2179_v50 = vor.u32 %v2566_v41, %v2176_v42  ;;  %v2546_v3 = vld [vmem:[%s3064_s5 + $0xc4] sm:$0xf]  ;;  %v2235_v4 = vor.u32 %v2580_v59, %v2232_v60  ;;  %v2160_v7 = vld [vmem:[%s3064_s5 + $0x148] sm:$0xf0]  ;;  %v2528_v14 = vld [vmem:[%s3064_s5 + $0x34] sm:$0xf] }
  0xd6   : > { %1681 = vmatpush.bf16.msrb.mxu2 %v2399_v51  ;;  %v2532_v51 = vld [vmem:[%s3064_s5 + $0x54] sm:$0xf]  ;;  %v2578_v8 = vld [vmem:[%s3064_s5 + $0x1c4] sm:$0xf]  ;;  %v2224_v9 = vld [vmem:[%s3064_s5 + $0x1c8] sm:$0xf0] }
  0xd7   : > { %1695 = vmatpush.bf16.msrb.mxu3 %v2463_v55  ;;  %v2104_v55 = vld [vmem:[%s3064_s5 + $0xd8] sm:$0xf0]  ;;  %v2043_v61 = vor.u32 %v2532_v51, %v2040_v52  ;;  %v2544_v16 = vld [vmem:[%s3064_s5 + $0xb4] sm:$0xf]  ;;  %v2227_v18 = vor.u32 %v2578_v8, %v2224_v9  ;;  %v2526_v27 = vld [vmem:[%s3064_s5 + $0x24] sm:$0xf] }
  0xd8   : > { %1654 = vmatpush.bf16.msrb.mxu0 %v2263_v63  ;;  %v2107_v62 = vor.u32 %v2548_v53, %v2104_v55  ;;  %v2171_v63 = vor.u32 %v2564_v56, %v2168_v57  ;;  %v2024_v15 = vld [vmem:[%s3064_s5 + $0x38] sm:$0xf0]  ;;  %v2560_v20 = vld [vmem:[%s3064_s5 + $0x134] sm:$0xf]  ;;  %v2080_v31 = vld [vmem:[%s3064_s5 + $0xa8] sm:$0xf0] }
  0xd9   : > { %1668 = vmatpush.bf16.msrb.mxu1 %v2327_v5  ;;  %v2096_v5 = vld [vmem:[%s3064_s5 + $0xc8] sm:$0xf0]  ;;  %v2152_v21 = vld [vmem:[%s3064_s5 + $0x138] sm:$0xf0]  ;;  %v2576_v22 = vld [vmem:[%s3064_s5 + $0x1b4] sm:$0xf] }
  0xda   : > { %1682 = vmatpush.bf16.msrb.mxu2 %v2391_v6  ;;  %v2562_v6 = vld [vmem:[%s3064_s5 + $0x144] sm:$0xf]  ;;  %v2099_v12 = vor.u32 %v2546_v3, %v2096_v5  ;;  %v2155_v26 = vor.u32 %v2560_v20, %v2152_v21  ;;  %v2208_v35 = vld [vmem:[%s3064_s5 + $0x1a8] sm:$0xf0]  ;;  %v2524_v40 = vld [vmem:[%s3064_s5 + $0x14] sm:$0xf] }
  0xdb   : > { %1696 = vmatpush.bf16.msrb.mxu3 %v2455_v11  ;;  %v2035_v11 = vor.u32 %v2530_v0, %v2032_v2  ;;  %v2163_v13 = vor.u32 %v2562_v6, %v2160_v7  ;;  %v2558_v32 = vld [vmem:[%s3064_s5 + $0x124] sm:$0xf]  ;;  %v2008_v41 = vld [vmem:[%s3064_s5 + $0x18] sm:$0xf0]  ;;  %v2540_v42 = vld [vmem:[%s3064_s5 + $0x94] sm:$0xf] }
  0xdc   : > { %1655 = vmatpush.bf16.msrb.mxu0 %v2255_v19  ;;  %v2088_v19 = vld [vmem:[%s3064_s5 + $0xb8] sm:$0xf0]  ;;  %v2011_v52 = vor.u32 %v2524_v40, %v2008_v41  ;;  %v2522_v53 = vld [vmem:[%s3064_s5 + $0x4] sm:$0xf]  ;;  %v2064_v59 = vld [vmem:[%s3064_s5 + $0x88] sm:$0xf0] }
  0xdd   : > { %1669 = vmatpush.bf16.msrb.mxu1 %v2319_v23  ;;  %v2216_v23 = vld [vmem:[%s3064_s5 + $0x1b8] sm:$0xf0]  ;;  %v2091_v25 = vor.u32 %v2544_v16, %v2088_v19  ;;  %v2538_v57 = vld [vmem:[%s3064_s5 + $0x84] sm:$0xf]  ;;  %v2192_v0 = vld [vmem:[%s3064_s5 + $0x188] sm:$0xf0] }
  0xde   : > { %1683 = vmatpush.bf16.msrb.mxu2 %v2383_v24  ;;  %v2027_v24 = vor.u32 %v2528_v14, %v2024_v15  ;;  %v2219_v30 = vor.u32 %v2576_v22, %v2216_v23  ;;  %v2072_v46 = vld [vmem:[%s3064_s5 + $0x98] sm:$0xf0]  ;;  %v2554_v60 = vld [vmem:[%s3064_s5 + $0x104] sm:$0xf]  ;;  %v2600_v2 = vld [vmem:[%s3064_s5 + $0x274] sm:$0xf]  ;;  %v2067_v9 = vor.u32 %v2538_v57, %v2064_v59 }
  0xdf   : > { %1697 = vmatpush.bf16.msrb.mxu3 %v2447_v28  ;;  %1656 = vmatmul.bf16.vlgmr.msrb.gmra.mxu0 %v3265_v39  ;;  %v2016_v28 = vld [vmem:[%s3064_s5 + $0x28] sm:$0xf0]  ;;  %v2200_v51 = vld [vmem:[%s3064_s5 + $0x198] sm:$0xf0]  ;;  %v2075_v55 = vor.u32 %v2540_v42, %v2072_v46  ;;  %v2632_v7 = vld [vmem:[%s3064_s5 + $0x374] sm:$0xf] }
  0xe0   : > { %1704 = vmatpush.bf16.msra.mxu0 %v2059_v29  ;;  %1670 = vmatmul.bf16.vlgmr.msrb.gmra.mxu1 %v3272_v44  ;;  %v2542_v29 = vld [vmem:[%s3064_s5 + $0xa4] sm:$0xf]  ;;  %v2019_v36 = vor.u32 %v2526_v27, %v2016_v28  ;;  %v2312_v3 = vld [vmem:[%s3064_s5 + $0x278] sm:$0xf0]  ;;  %v2304_v20 = vld [vmem:[%s3064_s5 + $0x268] sm:$0xf0] }
  0xe1   : > { %1718 = vmatpush.bf16.msra.mxu1 %v2123_v33  ;;  %1684 = vmatmul.bf16.vlgmr.msrb.gmra.mxu2 %v3270_v43  ;;  %v2144_v33 = vld [vmem:[%s3064_s5 + $0x128] sm:$0xf0]  ;;  %v2083_v37 = vor.u32 %v2542_v29, %v2080_v31  ;;  %v2376_v6 = vld [vmem:[%s3064_s5 + $0x2f8] sm:$0xf0]  ;;  %v2315_v15 = vor.u32 %v2600_v2, %v2312_v3  ;;  %v2598_v19 = vld [vmem:[%s3064_s5 + $0x264] sm:$0xf] }
  0xe2   : > { %1732 = vmatpush.bf16.msra.mxu2 %v2187_v34  ;;  %1698 = vmatmul.bf16.vlgmr.msrb.gmra.mxu3 %v3276_v47  ;;  %v2574_v34 = vld [vmem:[%s3064_s5 + $0x1a4] sm:$0xf]  ;;  %v2440_v8 = vld [vmem:[%s3064_s5 + $0x378] sm:$0xf0]  ;;  %v2368_v23 = vld [vmem:[%s3064_s5 + $0x2e8] sm:$0xf0]  ;;  %v2307_v28 = vor.u32 %v2598_v19, %v2304_v20 }
  0xe3   : > { %1746 = vmatpush.bf16.msra.mxu3 %v2251_v38  ;;  %v2147_v38 = vor.u32 %v2558_v32, %v2144_v33  ;;  %v2211_v45 = vor.u32 %v2574_v34, %v2208_v35  ;;  %v2614_v21 = vld [vmem:[%s3064_s5 + $0x2e4] sm:$0xf]  ;;  %v2496_v27 = vld [vmem:[%s3064_s5 + $0x3e8] sm:$0xf0]  ;;  %v2596_v31 = vld [vmem:[%s3064_s5 + $0x254] sm:$0xf] }
  0xe4   : > { %1705 = vmatpush.bf16.msra.mxu0 %v2051_v48  ;;  %v2556_v48 = vld [vmem:[%s3064_s5 + $0x114] sm:$0xf]  ;;  %v2371_v29 = vor.u32 %v2614_v21, %v2368_v23  ;;  %v2296_v32 = vld [vmem:[%s3064_s5 + $0x258] sm:$0xf0]  ;;  %v2288_v46 = vld [vmem:[%s3064_s5 + $0x248] sm:$0xf0] }
  0xe5   : > { %1719 = vmatpush.bf16.msra.mxu1 %v2115_v49  ;;  %v2136_v49 = vld [vmem:[%s3064_s5 + $0x118] sm:$0xf0]  ;;  %v2612_v33 = vld [vmem:[%s3064_s5 + $0x2d4] sm:$0xf]  ;;  %v2299_v41 = vor.u32 %v2596_v31, %v2296_v32  ;;  %v2586_v31 = vld [vmem:[%s3064_s5 + $0x204] sm:$0xf] }
  0xe6   : > { %1733 = vmatpush.bf16.msra.mxu2 %v2179_v50  ;;  %v2572_v50 = vld [vmem:[%s3064_s5 + $0x194] sm:$0xf]  ;;  %v2139_v56 = vor.u32 %v2556_v48, %v2136_v49  ;;  %v2360_v35 = vld [vmem:[%s3064_s5 + $0x2d8] sm:$0xf0]  ;;  %v2610_v48 = vld [vmem:[%s3064_s5 + $0x2c4] sm:$0xf] }
  0xe7   : > { %1747 = vmatpush.bf16.msra.mxu3 %v2243_v54  ;;  %v2000_v54 = vld [vmem:[%s3064_s5 + $0x8] sm:$0xf0]  ;;  %v2488_v40 = vld [vmem:[%s3064_s5 + $0x3d8] sm:$0xf0]  ;;  %v2608_v57 = vld [vmem:[%s3064_s5 + $0x2b4] sm:$0xf] }
  0xe8   : > { %1706 = vmatpush.bf16.msra.mxu0 %v2043_v61  ;;  %v2203_v61 = vor.u32 %v2572_v50, %v2200_v51  ;;  %v2003_v5 = vor.u32 %v2522_v53, %v2000_v54  ;;  %v2352_v49 = vld [vmem:[%s3064_s5 + $0x2c8] sm:$0xf0]  ;;  %v2642_v51 = vld [vmem:[%s3064_s5 + $0x3c4] sm:$0xf]  ;;  %v2588_v19 = vld [vmem:[%s3064_s5 + $0x214] sm:$0xf] }
  0xe9   : > { %1720 = vmatpush.bf16.msra.mxu1 %v2107_v62  ;;  %v2128_v62 = vld [vmem:[%s3064_s5 + $0x108] sm:$0xf0]  ;;  %v2355_v53 = vor.u32 %v2610_v48, %v2352_v49  ;;  %v2264_v20 = vld [vmem:[%s3064_s5 + $0x218] sm:$0xf0]  ;;  %v2604_v21 = vld [vmem:[%s3064_s5 + $0x294] sm:$0xf] }
  0xea   : > { %1734 = vmatpush.bf16.msra.mxu2 %v2171_v63  ;;  %v2570_v63 = vld [vmem:[%s3064_s5 + $0x184] sm:$0xf]  ;;  %v2416_v50 = vld [vmem:[%s3064_s5 + $0x348] sm:$0xf0]  ;;  %v2328_v23 = vld [vmem:[%s3064_s5 + $0x298] sm:$0xf0] }
  0xeb   : > { %1748 = vmatpush.bf16.msra.mxu3 %v2235_v4  ;;  %v2616_v4 = vld [vmem:[%s3064_s5 + $0x2f4] sm:$0xf]  ;;  %v2195_v14 = vor.u32 %v2570_v63, %v2192_v0  ;;  %v2472_v0 = vld [vmem:[%s3064_s5 + $0x3b8] sm:$0xf0]  ;;  %v2256_v32 = vld [vmem:[%s3064_s5 + $0x208] sm:$0xf0] }
  0xec   : > { %1707 = vmatpush.bf16.msra.mxu0 %v2035_v11  ;;  %v2131_v11 = vor.u32 %v2554_v60, %v2128_v62  ;;  %v2379_v16 = vor.u32 %v2616_v4, %v2376_v6  ;;  %v2344_v60 = vld [vmem:[%s3064_s5 + $0x2b8] sm:$0xf0]  ;;  %v2640_v63 = vld [vmem:[%s3064_s5 + $0x3b4] sm:$0xf]  ;;  %v2272_v6 = vld [vmem:[%s3064_s5 + $0x228] sm:$0xf0] }
  0xed   : > { %1721 = vmatpush.bf16.msra.mxu1 %v2099_v12  ;;  %v2648_v12 = vld [vmem:[%s3064_s5 + $0x3f4] sm:$0xf]  ;;  %v2408_v62 = vld [vmem:[%s3064_s5 + $0x338] sm:$0xf0]  ;;  %v2347_v3 = vor.u32 %v2608_v57, %v2344_v60  ;;  %s2650_s12 = sshll.u32 (%p2786_p6), %s2721_s14, 4 }
  0xee   : > { %1735 = vmatpush.bf16.msra.mxu2 %v2163_v13  ;;  %v2504_v13 = vld [vmem:[%s3064_s5 + $0x3f8] sm:$0xf0]  ;;  %s1836_s10 = scalar_lea.vmem (%p2786_p6), %s3442_s3, %s2650_s12 }
  0xef   : > { %1749 = vmatpush.bf16.msra.mxu3 %v2227_v18  ;;  %v2443_v18 = vor.u32 %v2632_v7, %v2440_v8  ;;  %v2507_v22 = vor.u32 %v2648_v12, %v2504_v13  ;;  %v2606_v7 = vld [vmem:[%s3064_s5 + $0x2a4] sm:$0xf]  ;;  %v2475_v8 = vor.u32 %v2640_v63, %v2472_v0  ;;  %v2400_v12 = vld [vmem:[%s3064_s5 + $0x328] sm:$0xf0] }
  0xf0   : > { %1708 = vmatpush.bf16.msra.mxu0 %v2027_v24  ;;  %v2630_v24 = vld [vmem:[%s3064_s5 + $0x364] sm:$0xf] }
  0xf1   : > { %1722 = vmatpush.bf16.msra.mxu1 %v2091_v25  ;;  %v2432_v25 = vld [vmem:[%s3064_s5 + $0x368] sm:$0xf0]  ;;  %v2638_v13 = vld [vmem:[%s3064_s5 + $0x3a4] sm:$0xf] }
  0xf2   : > { %1736 = vmatpush.bf16.msra.mxu2 %v2155_v26  ;;  %v2646_v26 = vld [vmem:[%s3064_s5 + $0x3e4] sm:$0xf] }
  0xf3   : > { %1750 = vmatpush.bf16.msra.mxu3 %v2219_v30  ;;  %v2435_v30 = vor.u32 %v2630_v24, %v2432_v25  ;;  %v2499_v34 = vor.u32 %v2646_v26, %v2496_v27  ;;  %v2620_v24 = vld [vmem:[%s3064_s5 + $0x314] sm:$0xf]  ;;  %v2392_v25 = vld [vmem:[%s3064_s5 + $0x318] sm:$0xf0] }
  0xf4   : > { %1709 = vmatpush.bf16.msra.mxu0 %v2019_v36  ;;  %v2628_v36 = vld [vmem:[%s3064_s5 + $0x354] sm:$0xf]  ;;  %v2456_v27 = vld [vmem:[%s3064_s5 + $0x398] sm:$0xf0] }
  0xf5   : > { %1723 = vmatpush.bf16.msra.mxu1 %v2083_v37  ;;  %v2424_v37 = vld [vmem:[%s3064_s5 + $0x358] sm:$0xf0]  ;;  %v2636_v26 = vld [vmem:[%s3064_s5 + $0x394] sm:$0xf] }
  0xf6   : > { %1737 = vmatpush.bf16.msra.mxu2 %v2147_v38  ;;  %v2644_v38 = vld [vmem:[%s3064_s5 + $0x3d4] sm:$0xf]  ;;  %v2427_v42 = vor.u32 %v2628_v36, %v2424_v37  ;;  %v2618_v36 = vld [vmem:[%s3064_s5 + $0x304] sm:$0xf]  ;;  %v2384_v37 = vld [vmem:[%s3064_s5 + $0x308] sm:$0xf0] }
  0xf7   : > { %1751 = vmatpush.bf16.msra.mxu3 %v2211_v45  ;;  %v2594_v45 = vld [vmem:[%s3064_s5 + $0x244] sm:$0xf] }
  0xf8   : > { %1710 = vmatpush.bf16.msra.mxu0 %v2011_v52  ;;  %v2291_v52 = vor.u32 %v2594_v45, %v2288_v46 }
  0xf9   : > { %1724 = vmatpush.bf16.msra.mxu1 %v2075_v55  ;;  %v2592_v55 = vld [vmem:[%s3064_s5 + $0x234] sm:$0xf] }
  0xfa   : > { %1738 = vmatpush.bf16.msra.mxu2 %v2139_v56  ;;  %v2280_v56 = vld [vmem:[%s3064_s5 + $0x238] sm:$0xf0] }
  0xfb   : > { %1752 = vmatpush.bf16.msra.mxu3 %v2203_v61  ;;  %v2624_v61 = vld [vmem:[%s3064_s5 + $0x334] sm:$0xf]  ;;  %v2283_v2 = vor.u32 %v2592_v55, %v2280_v56 }
  0xfc   : > { %1711 = vmatpush.bf16.msra.mxu0 %v2003_v5  ;;  %v2411_v4 = vor.u32 %v2624_v61, %v2408_v62  ;;  %v2590_v5 = vld [vmem:[%s3064_s5 + $0x224] sm:$0xf] }
  0xfd   : > { %1725 = vmatpush.bf16.msra.mxu1 %v2067_v9  ;;  %v2336_v9 = vld [vmem:[%s3064_s5 + $0x2a8] sm:$0xf0] }
  0xfe   : > { %1739 = vmatpush.bf16.msra.mxu2 %v2131_v11  ;;  %v2622_v11 = vld [vmem:[%s3064_s5 + $0x324] sm:$0xf] }
  0xff   : > { %1753 = vmatpush.bf16.msra.mxu3 %v2195_v14  ;;  %1712 = vmatmul.bf16.vlgmr.msra.gmra.mxu0 %v3157_v58  ;;  %v2491_v58 = vor.u32 %v2644_v38, %v2488_v40  ;;  %v2464_v14 = vld [vmem:[%s3064_s5 + $0x3a8] sm:$0xf0]  ;;  %v2634_v38 = vld [vmem:[%s3064_s5 + $0x384] sm:$0xf] }
 0x100   : > { %1760 = vmatpush.bf16.msrb.mxu0 %v2315_v15  ;;  %1726 = vmatmul.bf16.vlgmr.msra.gmra.mxu1 %v3181_v10  ;;  %v2480_v10 = vld [vmem:[%s3064_s5 + $0x3c8] sm:$0xf0]  ;;  %v2275_v15 = vor.u32 %v2590_v5, %v2272_v6 }
 0x101   : > { %1774 = vmatpush.bf16.msrb.mxu1 %v2379_v16  ;;  %1740 = vmatmul.bf16.vlgmr.msra.gmra.mxu2 %v3165_v1  ;;  %v2363_v1 = vor.u32 %v2612_v33, %v2360_v35  ;;  %v2483_v59 = vor.u32 %v2642_v51, %v2480_v10  ;;  %v2339_v16 = vor.u32 %v2606_v7, %v2336_v9  ;;  %v2602_v33 = vld [vmem:[%s3064_s5 + $0x284] sm:$0xf]  ;;  %v2320_v35 = vld [vmem:[%s3064_s5 + $0x288] sm:$0xf0] }
 0x102   : > { %1788 = vmatpush.bf16.msrb.mxu2 %v2443_v18  ;;  %1754 = vmatmul.bf16.vlgmr.msra.gmra.mxu3 %v3189_v17  ;;  %v2626_v17 = vld [vmem:[%s3064_s5 + $0x344] sm:$0xf]  ;;  %v2403_v18 = vor.u32 %v2622_v11, %v2400_v12  ;;  %v2448_v40 = vld [vmem:[%s3064_s5 + $0x388] sm:$0xf0]  ;;  %s1963_s5 = sshll.u32 %s2721_s14, 1 }
 0x103   : > { %1802 = vmatpush.bf16.msrb.mxu3 %v2507_v22  ;;  %v2419_v54 = vor.u32 %v2626_v17, %v2416_v50  ;;  %v2467_v22 = vor.u32 %v2638_v13, %v2464_v14  ;;  %v2451_v45 = vor.u32 %v2634_v38, %v2448_v40  ;;  %p764_p11 = scmp.lt.s32.totalorder %s1963_s5, 25 }
 0x104   : > { %1761 = vmatpush.bf16.msrb.mxu0 %v2307_v28  ;;  %v2267_v28 = vor.u32 %v2588_v19, %v2264_v20 }
 0x105   : > { %1775 = vmatpush.bf16.msrb.mxu1 %v2371_v29  ;;  %v2331_v29 = vor.u32 %v2604_v21, %v2328_v23  ;;  %s3451_s5 = smov (!%p764_p11, %s1963_s5), 25 }
 0x106   : > { %1789 = vmatpush.bf16.msrb.mxu2 %v2435_v30  ;;  %v2395_v30 = vor.u32 %v2620_v24, %v2392_v25  ;;  %s766_s6 = scalar_lea.vmem %s3441_s2, %s3451_s5 }
 0x107   : > { %1803 = vmatpush.bf16.msrb.mxu3 %v2499_v34  ;;  %v2459_v34 = vor.u32 %v2636_v26, %v2456_v27  ;;  %v906_v46 = vld [vmem:[%s766_s6] sm:$0x3] }
 0x108   : > { %1762 = vmatpush.bf16.msrb.mxu0 %v2299_v41  ;;  %v2259_v41 = vor.u32 %v2586_v31, %v2256_v32 }
 0x109   : > { %1776 = vmatpush.bf16.msrb.mxu1 %v2363_v1  ;;  %v2323_v1 = vor.u32 %v2602_v33, %v2320_v35 }
 0x10a   : > { %1790 = vmatpush.bf16.msrb.mxu2 %v2427_v42  ;;  %v2387_v42 = vor.u32 %v2618_v36, %v2384_v37 }
 0x10b   : > { %1804 = vmatpush.bf16.msrb.mxu3 %v2491_v58  ;;  %v908_v58 = vperm.slane %v906_v46, 0 }
 0x10c   : > { %1763 = vmatpush.bf16.msrb.mxu0 %v2291_v52 }
 0x10d   : > { %1777 = vmatpush.bf16.msrb.mxu1 %v2355_v53 }
 0x10e   : > { %1791 = vmatpush.bf16.msrb.mxu2 %v2419_v54 }
 0x10f   : > { %1805 = vmatpush.bf16.msrb.mxu3 %v2483_v59 }
 0x110   : > { %1764 = vmatpush.bf16.msrb.mxu0 %v2283_v2 }
 0x111   : > { %1778 = vmatpush.bf16.msrb.mxu1 %v2347_v3 }
 0x112   : > { %1792 = vmatpush.bf16.msrb.mxu2 %v2411_v4 }
 0x113   : > { %1806 = vmatpush.bf16.msrb.mxu3 %v2475_v8 }
 0x114   : > { %1765 = vmatpush.bf16.msrb.mxu0 %v2275_v15 }
 0x115   : > { %1779 = vmatpush.bf16.msrb.mxu1 %v2339_v16  ;;  %v909_v16 = vperm.slane %v906_v46, 1 }
 0x116   : > { %1793 = vmatpush.bf16.msrb.mxu2 %v2403_v18 }
 0x117   : > { %1807 = vmatpush.bf16.msrb.mxu3 %v2467_v22 }
 0x118   : > { %1766 = vmatpush.bf16.msrb.mxu0 %v2267_v28 }
 0x119   : > { %1780 = vmatpush.bf16.msrb.mxu1 %v2331_v29 }
 0x11a   : > { %1794 = vmatpush.bf16.msrb.mxu2 %v2395_v30 }
 0x11b   : > { %1808 = vmatpush.bf16.msrb.mxu3 %v2459_v34 }
 0x11c   : > { %1767 = vmatpush.bf16.msrb.mxu0 %v2259_v41 }
 0x11d   : > { %1781 = vmatpush.bf16.msrb.mxu1 %v2323_v1 }
 0x11e   : > { %1795 = vmatpush.bf16.msrb.mxu2 %v2387_v42 }
 0x11f   : > { %1809 = vmatpush.bf16.msrb.mxu3 %v2451_v45  ;;  %1768 = vmatmul.bf16.vlgmr.msrb.gmra.mxu0 %v3265_v39 }
 0x120   : > { %1782 = vmatmul.bf16.vlgmr.msrb.gmra.mxu1 %v3272_v44 }
 0x121   : > { %1796 = vmatmul.bf16.vlgmr.msrb.gmra.mxu2 %v3270_v43 }
 0x122   : > { %1810 = vmatmul.bf16.vlgmr.msrb.gmra.mxu3 %v3276_v47 }
 0x13c   : > { %v1601_v48 = vpop.f32.mrf.mxu0 }
 0x13d   : > { %v1615_v49 = vpop.f32.mrf.mxu1  ;;  %v1602_v17 = vadd.f32 %v1601_v48, %v908_v58 }
 0x13f   : > { %v1616_v51 = vadd.f32 %v1615_v49, %v1602_v17 }
 0x144   : > { %v1629_v50 = vpop.f32.mrf.mxu2  ;;  %v1603_v44 = vpop.f32.mrf.mxu0 }
 0x145   : > { %v1643_v39 = vpop.f32.mrf.mxu3  ;;  %v1617_v10 = vpop.f32.mrf.mxu1  ;;  %v1630_v43 = vadd.f32 %v1629_v50, %v1616_v51  ;;  %v1604_v47 = vadd.f32 %v1603_v44, %v908_v58 }
 0x147   : > { %v1644_v52 = vadd.f32 %v1643_v39, %v1630_v43  ;;  %v1618_v54 = vadd.f32 %v1617_v10, %v1604_v47 }
 0x14c   : > { %v1631_v53 = vpop.f32.mrf.mxu2 }
 0x14d   : > { %v1645_v55 = vpop.f32.mrf.mxu3  ;;  %v1632_v60 = vadd.f32 %v1631_v53, %v1618_v54 }
 0x14f   : > { %v1646_v62 = vadd.f32 %v1645_v55, %v1632_v60 }
 0x15c   : > { %v1657_v56 = vpop.f32.mrf.mxu0 }
 0x15d   : > { %v1658_v57 = vadd.f32 %v1657_v56, %v1644_v52  ;;  %v1671_v59 = vpop.f32.mrf.mxu1 }
 0x15f   : > { %v1672_v61 = vadd.f32 %v1671_v59, %v1658_v57 }
 0x164   : > { %v1685_v63 = vpop.f32.mrf.mxu2  ;;  %v1659_v2 = vpop.f32.mrf.mxu0 }
 0x165   : > { %v1686_v0 = vadd.f32 %v1685_v63, %v1672_v61  ;;  %v1699_v3 = vpop.f32.mrf.mxu3  ;;  %v1660_v4 = vadd.f32 %v1659_v2, %v1646_v62  ;;  %v1673_v6 = vpop.f32.mrf.mxu1 }
 0x167   : > { %v1700_v5 = vadd.f32 %v1699_v3, %v1686_v0  ;;  %v1674_v8 = vadd.f32 %v1673_v6, %v1660_v4 }
 0x169   : > { %v1816_v7 = vmax.f32 %v1700_v5, 0.0 }
 0x16b   : > { %1820 = vst [vmem:[%s3408_s8] sm:$0xff] %v1816_v7 }
 0x16c   : > { %v1687_v9 = vpop.f32.mrf.mxu2 }
 0x16d   : > { %v1688_v11 = vadd.f32 %v1687_v9, %v1674_v8  ;;  %v1701_v12 = vpop.f32.mrf.mxu3 }
 0x16f   : > { %v1702_v13 = vadd.f32 %v1701_v12, %v1688_v11 }
 0x171   : > { %v1818_v14 = vmax.f32 %v1702_v13, 0.0 }
 0x172   : > { %v1849_v51 = vld [vmem:[%s3408_s8] sm:$0xff] (%p2786_p6) }
 0x173   : > { %1822 = vst [vmem:[%s3408_s8 + $0x10] sm:$0xff] %v1818_v14 }
 0x174   : > { %1850 = vst [vmem:[%s1836_s10] sm:$0xff] (%p2786_p6), %v1849_v51 }
 0x17a   : > { %v1853_v10 = vld [vmem:[%s3408_s8 + $0x10] sm:$0xff] (%p2786_p6) }
 0x17b   : > { %1854 = vst [vmem:[%s1836_s10 + $0xd0] sm:$0xff] (%p2786_p6), %v1853_v10 }
 0x17c   : > { %v1713_v15 = vpop.f32.mrf.mxu0 }
 0x17d   : > { %v1727_v18 = vpop.f32.mrf.mxu1  ;;  %v1714_v19 = vadd.f32 %v1713_v15, %v909_v16 }
 0x17f   : > { %v1728_v22 = vadd.f32 %v1727_v18, %v1714_v19 }
 0x184   : > { %v1741_v20 = vpop.f32.mrf.mxu2  ;;  %v1715_v23 = vpop.f32.mrf.mxu0 }
 0x185   : > { %v1755_v21 = vpop.f32.mrf.mxu3  ;;  %v1729_v24 = vpop.f32.mrf.mxu1  ;;  %v1742_v25 = vadd.f32 %v1741_v20, %v1728_v22  ;;  %v1716_v26 = vadd.f32 %v1715_v23, %v909_v16 }
 0x187   : > { %v1756_v28 = vadd.f32 %v1755_v21, %v1742_v25  ;;  %v1730_v29 = vadd.f32 %v1729_v24, %v1716_v26 }
 0x18c   : > { %v1743_v27 = vpop.f32.mrf.mxu2 }
 0x18d   : > { %v1757_v30 = vpop.f32.mrf.mxu3  ;;  %v1744_v34 = vadd.f32 %v1743_v27, %v1730_v29 }
 0x18f   : > { %v1758_v37 = vadd.f32 %v1757_v30, %v1744_v34 }
 0x19c   : > { %v1769_v31 = vpop.f32.mrf.mxu0 }
 0x19d   : > { %v1770_v32 = vadd.f32 %v1769_v31, %v1756_v28  ;;  %v1783_v33 = vpop.f32.mrf.mxu1 }
 0x19f   : > { %v1784_v35 = vadd.f32 %v1783_v33, %v1770_v32 }
 0x1a4   : > { %v1797_v36 = vpop.f32.mrf.mxu2  ;;  %v1771_v41 = vpop.f32.mrf.mxu0 }
 0x1a5   : > { %v1798_v38 = vadd.f32 %v1797_v36, %v1784_v35  ;;  %v1811_v40 = vpop.f32.mrf.mxu3  ;;  %v1772_v42 = vadd.f32 %v1771_v41, %v1758_v37  ;;  %v1785_v46 = vpop.f32.mrf.mxu1 }
 0x1a7   : > { %v1812_v1 = vadd.f32 %v1811_v40, %v1798_v38  ;;  %v1786_v48 = vadd.f32 %v1785_v46, %v1772_v42 }
 0x1a9   : > { %v1817_v45 = vmax.f32 %v1812_v1, 0.0 }
 0x1ab   : > { %1821 = vst [vmem:[%s3408_s8 + $0x8] sm:$0xff] %v1817_v45 }
 0x1ac   : > { %v1799_v58 = vpop.f32.mrf.mxu2 }
 0x1ad   : > { %v1800_v49 = vadd.f32 %v1799_v58, %v1786_v48  ;;  %v1813_v17 = vpop.f32.mrf.mxu3 }
 0x1af   : > { %v1814_v50 = vadd.f32 %v1813_v17, %v1800_v49  ;;  %1830 = sbr.rel (!%p2786_p6) target bundleno = 444 (0x1bc), region = 74 }
 0x1b1   : > { %v1819_v39 = vmax.f32 %v1814_v50, 0.0 }
 0x1b2   : > { %v1851_v44 = vld [vmem:[%s3408_s8 + $0x8] sm:$0xff] (%p2786_p6) }
 0x1b3   : > { %1823 = vst [vmem:[%s3408_s8 + $0x18] sm:$0xff] %v1819_v39 }
 0x1b4   : > { %1852 = vst [vmem:[%s1836_s10 + $0x8] sm:$0xff] %v1851_v44 }
 0x1ba   : > { %v1855_v43 = vld [vmem:[%s3408_s8 + $0x18] sm:$0xff] }
 0x1bb   : > { %1856 = vst [vmem:[%s1836_s10 + $0xd8] sm:$0xff] %v1855_v43 }
 0x1bc PF: > { %s13_s16 = sadd.s32 1, %s2729_s16   ;;  %s3444_s12 = smov %s2717_s13 }
 0x1bd   : > { %p10_p12 = scmp.ge.s32.totalorder %s13_s16, 15   ;;  %s3445_s13 = smov %s2791_s22 }
 0x1be   : > { %s3446_s14 = smov %s2725_s15  ;;  %s3447_s15 = smov %s3449_s17 }
 0x1bf   :  { %12 = sbr.rel (!%p10_p12) target bundleno = 3 (0x3), region = 134 }

// kernel: _lambda_.17
= control target key start
LH: loop header
LB: loop body
LE: loop exit
PB: predicated region body
PF: predicated region fallthrough
CT: control target
= control target key end

     0   :  { %s914_s12 = smov 0   ;;  %s916_s13 = smov 0   ;;  %s1092_s0 = inlined_call_operand.vmem [shape: bf16[64,128], index: 0, kind: input, shape index: {}]   ;;  %s1093_s1 = inlined_call_operand.vmem [shape: bf16[128,1792], index: 1, kind: input, shape index: {}]   ;;  %s1094_s2 = inlined_call_operand.vmem [shape: f32[1,1792], index: 2, kind: input, shape index: {}]   ;;  %s1095_s3 = inlined_call_operand.vmem [shape: f32[64,1792], index: 3, kind: output, shape index: {}]  }
   0x1   :  { %s918_s14 = smov 0   ;;  %s920_s15 = smov 0  }
   0x2   :  { %s922_s16 = smov 0  }
   0x3 LB: > { %s22_s17 = sadd.s32 1, %s888_s15  ;;  %s679_s18 = sadd.s32 4294967295, %s892_s16   ;;  %s892_s16 = sphi %s922_s16, %s13_s16   ;;  %s888_s15 = sphi %s920_s15, %s1100_s15   ;;  %s884_s14 = sphi %s918_s14, %s1099_s14   ;;  %s880_s13 = sphi %s916_s13, %s1098_s13   ;;  %s876_s12 = sphi %s914_s12, %s1097_s12  }
   0x4   : > { %p23_p0 = scmp.ge.s32.totalorder %s22_s17, 7  ;;  %p65_p1 = scmp.ne.s32.totalorder %s880_s13, %s876_s12 }
   0x5   : > { %p66_p2 = scmp.eq.s32.totalorder %s892_s16, 0  ;;  %p123_p4 = scmp.eq.s32.totalorder %s679_s18, 6 }
   0x6   : > { %s1102_s17 = smov (%p23_p0, %s22_s17), 0  ;;  %s58_s20 = sadd.s32 1, %s880_s13 }
   0x7   : > { %p67_p3 = por %p66_p2, %p65_p1  ;;  %s55_s19 = ssub.s32 %s888_s15, %s1102_s17 }
   0x8   : > { %p56_p5 = scmp.eq.s32.totalorder %s55_s19, 0  ;;  %p949_p6 = por %p123_p4, %p65_p1 }
   0x9   : > { %p683_p7 = scmp.ge.s32.totalorder %s892_s16, 7 }
   0xa   : > { %s954_s22 = scalar_select %p56_p5, %s880_s13, %s58_s20  }
   0xb   : > { %154 = sbr.rel (%p683_p7) target bundleno = 36 (0x24), region = 20 }
  0x10   : > { %157 = sbr.rel (!%p67_p3) target bundleno = 36 (0x24), region = 24  ;;  %s159_s23 = sand.u32 (%p67_p3), 1, %s880_s13  }
  0x11   : > { %s776_s24 = sshll.u32 (%p67_p3), %s888_s15, 3  ;;  %s684_s25 = sshll.u32 (%p67_p3), %s159_s23, 7 }
  0x12   : > { %s962_s28 = scalar_lea.vmem (%p67_p3), %s1093_s1, %s776_s24  ;;  %s161_s29 = scalar_lea.vmem (%p67_p3), [#allocation2], %s684_s25 }
  0x13   : > { %v223_v0 = vld [vmem:[%s962_s28] sm:$0xff] (%p67_p3)  ;;  %v225_v1 = vld [vmem:[%s962_s28 + $0x38] sm:$0xff] (%p67_p3)  ;;  %v227_v2 = vld [vmem:[%s962_s28 + $0x70] sm:$0xff] (%p67_p3) }
  0x14   : > { %224 = vst [vmem:[%s161_s29] sm:$0xff] (%p67_p3), %v223_v0  ;;  %v229_v3 = vld [vmem:[%s962_s28 + $0xa8] sm:$0xff] (%p67_p3)  ;;  %v231_v4 = vld [vmem:[%s962_s28 + $0xe0] sm:$0xff] (%p67_p3)  ;;  %v233_v5 = vld [vmem:[%s962_s28 + $0x118] sm:$0xff] (%p67_p3) }
  0x15   : > { %226 = vst [vmem:[%s161_s29 + $0x8] sm:$0xff] %v225_v1  ;;  %v235_v6 = vld [vmem:[%s962_s28 + $0x150] sm:$0xff]  ;;  %v237_v7 = vld [vmem:[%s962_s28 + $0x188] sm:$0xff]  ;;  %v239_v8 = vld [vmem:[%s962_s28 + $0x1c0] sm:$0xff] }
  0x16   : > { %228 = vst [vmem:[%s161_s29 + $0x10] sm:$0xff] %v227_v2  ;;  %v241_v9 = vld [vmem:[%s962_s28 + $0x1f8] sm:$0xff]  ;;  %v243_v10 = vld [vmem:[%s962_s28 + $0x230] sm:$0xff]  ;;  %v245_v11 = vld [vmem:[%s962_s28 + $0x268] sm:$0xff] }
  0x17   : > { %230 = vst [vmem:[%s161_s29 + $0x18] sm:$0xff] %v229_v3  ;;  %v247_v12 = vld [vmem:[%s962_s28 + $0x2a0] sm:$0xff]  ;;  %v249_v13 = vld [vmem:[%s962_s28 + $0x2d8] sm:$0xff]  ;;  %v251_v14 = vld [vmem:[%s962_s28 + $0x310] sm:$0xff] }
  0x18   : > { %232 = vst [vmem:[%s161_s29 + $0x20] sm:$0xff] %v231_v4  ;;  %v253_v15 = vld [vmem:[%s962_s28 + $0x348] sm:$0xff] }
  0x19   : > { %234 = vst [vmem:[%s161_s29 + $0x28] sm:$0xff] %v233_v5 }
  0x1a   : > { %236 = vst [vmem:[%s161_s29 + $0x30] sm:$0xff] %v235_v6 }
  0x1b   : > { %238 = vst [vmem:[%s161_s29 + $0x38] sm:$0xff] %v237_v7 }
  0x1c   : > { %240 = vst [vmem:[%s161_s29 + $0x40] sm:$0xff] %v239_v8 }
  0x1d   : > { %242 = vst [vmem:[%s161_s29 + $0x48] sm:$0xff] %v241_v9 }
  0x1e   : > { %244 = vst [vmem:[%s161_s29 + $0x50] sm:$0xff] %v243_v10 }
  0x1f   : > { %246 = vst [vmem:[%s161_s29 + $0x58] sm:$0xff] %v245_v11 }
  0x20   : > { %248 = vst [vmem:[%s161_s29 + $0x60] sm:$0xff] %v247_v12 }
  0x21   : > { %250 = vst [vmem:[%s161_s29 + $0x68] sm:$0xff] %v249_v13 }
  0x22   : > { %252 = vst [vmem:[%s161_s29 + $0x70] sm:$0xff] %v251_v14 }
  0x23   : > { %254 = vst [vmem:[%s161_s29 + $0x78] sm:$0xff] %v253_v15 }
  0x24 PF: > { %p687_p8 = scmp.ge.s32.totalorder %s892_s16, 1  ;;  %p267_p9 = scmp.lt.s32.totalorder %s892_s16, 8 }
  0x26   : > { %p268_p10 = pnand %p687_p8, %p267_p9 }
  0x27   : > { %s274_s30 = sand.u32 (!%p268_p10), 1, %s876_s12   ;;  %s690_s19 = sshll.u32 (!%p268_p10), %s884_s14, 1 }
  0x28   : > { %271 = sbr.rel (%p268_p10) target bundleno = 247 (0xf7), region = 66  ;;  %s983_s4 = sshll.u32 (!%p268_p10), %s274_s30, 7 }
  0x29   : > { %s986_s5 = scalar_lea.vmem (!%p268_p10), [#allocation2], %s983_s4  ;;  %p313_p11 = scmp.lt.s32.totalorder (!%p268_p10), %s690_s19, 13 }
  0x2a   : > { %s1037_s25 = scalar_lea.vmem (!%p268_p10), [#allocation3], %s983_s4 }
  0x2d   : > { %v765_v16 = vld [vmem:[%s986_s5 + $0x70] sm:$0xf]  ;;  %v796_v17 = vld [vmem:[%s986_s5 + $0x74] sm:$0xf0]  ;;  %v795_v18 = vld [vmem:[%s986_s5 + $0x74] sm:$0xf] }
  0x2e   : > { %v766_v19 = vor.u32 %v796_v17, %v765_v16  ;;  %v767_v20 = vld [vmem:[%s986_s5 + $0x78] sm:$0xf0]  ;;  %v757_v21 = vld [vmem:[%s986_s5 + $0x60] sm:$0xf]  ;;  %v794_v22 = vld [vmem:[%s986_s5 + $0x64] sm:$0xf0] }
  0x2f   : > { %v770_v23 = vor.u32 %v795_v18, %v767_v20  ;;  %v793_v24 = vld [vmem:[%s986_s5 + $0x64] sm:$0xf]  ;;  %v759_v25 = vld [vmem:[%s986_s5 + $0x68] sm:$0xf0]  ;;  %v758_v26 = vor.u32 %v794_v22, %v757_v21  ;;  %v749_v28 = vld [vmem:[%s986_s5 + $0x50] sm:$0xf] }
  0x30   : > { %453 = vmatpush.bf16.msra.mxu0 %v766_v19  ;;  %798 = vmatpush.bf16.msra.mxu2 %v766_v19  ;;  %v762_v27 = vor.u32 %v793_v24, %v759_v25  ;;  %v792_v29 = vld [vmem:[%s986_s5 + $0x54] sm:$0xf0]  ;;  %v791_v30 = vld [vmem:[%s986_s5 + $0x54] sm:$0xf]  ;;  %v751_v31 = vld [vmem:[%s986_s5 + $0x58] sm:$0xf0] }
  0x31   : > { %482 = vmatpush.bf16.msra.mxu1 %v770_v23  ;;  %806 = vmatpush.bf16.msra.mxu3 %v770_v23  ;;  %v750_v32 = vor.u32 %v792_v29, %v749_v28  ;;  %v754_v33 = vor.u32 %v791_v30, %v751_v31  ;;  %v741_v34 = vld [vmem:[%s986_s5 + $0x40] sm:$0xf]  ;;  %v790_v35 = vld [vmem:[%s986_s5 + $0x44] sm:$0xf0]  ;;  %v789_v36 = vld [vmem:[%s986_s5 + $0x44] sm:$0xf] }
  0x32   : > { %v743_v37 = vld [vmem:[%s986_s5 + $0x48] sm:$0xf0]  ;;  %v742_v38 = vor.u32 %v790_v35, %v741_v34  ;;  %v733_v40 = vld [vmem:[%s986_s5 + $0x30] sm:$0xf]  ;;  %v788_v41 = vld [vmem:[%s986_s5 + $0x34] sm:$0xf0] }
  0x33   : > { %v746_v39 = vor.u32 %v789_v36, %v743_v37  ;;  %v787_v42 = vld [vmem:[%s986_s5 + $0x34] sm:$0xf]  ;;  %v735_v43 = vld [vmem:[%s986_s5 + $0x38] sm:$0xf0]  ;;  %v734_v44 = vor.u32 %v788_v41, %v733_v40  ;;  %v725_v46 = vld [vmem:[%s986_s5 + $0x20] sm:$0xf] }
  0x34   : > { %454 = vmatpush.bf16.msra.mxu0 %v758_v26  ;;  %799 = vmatpush.bf16.msra.mxu2 %v758_v26  ;;  %v738_v45 = vor.u32 %v787_v42, %v735_v43  ;;  %v786_v47 = vld [vmem:[%s986_s5 + $0x24] sm:$0xf0]  ;;  %v785_v48 = vld [vmem:[%s986_s5 + $0x24] sm:$0xf]  ;;  %v727_v49 = vld [vmem:[%s986_s5 + $0x28] sm:$0xf0] }
  0x35   : > { %483 = vmatpush.bf16.msra.mxu1 %v762_v27  ;;  %807 = vmatpush.bf16.msra.mxu3 %v762_v27  ;;  %v726_v50 = vor.u32 %v786_v47, %v725_v46  ;;  %v730_v51 = vor.u32 %v785_v48, %v727_v49  ;;  %v717_v52 = vld [vmem:[%s986_s5 + $0x10] sm:$0xf]  ;;  %v784_v53 = vld [vmem:[%s986_s5 + $0x14] sm:$0xf0]  ;;  %v783_v54 = vld [vmem:[%s986_s5 + $0x14] sm:$0xf] }
  0x36   : > { %v719_v55 = vld [vmem:[%s986_s5 + $0x18] sm:$0xf0]  ;;  %v718_v56 = vor.u32 %v784_v53, %v717_v52  ;;  %v709_v58 = vld [vmem:[%s986_s5] sm:$0xf]  ;;  %v782_v59 = vld [vmem:[%s986_s5 + $0x4] sm:$0xf0] }
  0x37   : > { %v722_v57 = vor.u32 %v783_v54, %v719_v55  ;;  %v781_v60 = vld [vmem:[%s986_s5 + $0x4] sm:$0xf]  ;;  %v711_v61 = vld [vmem:[%s986_s5 + $0x8] sm:$0xf0]  ;;  %v710_v62 = vor.u32 %v782_v59, %v709_v58  ;;  %v779_v1 = vld [vmem:[%s1092_s0 + $0x10] sm:$0xff]  ;;  %s1104_s19 = smov (!%p313_p11, %s690_s19), 13 }
  0x38   : > { %455 = vmatpush.bf16.msra.mxu0 %v750_v32  ;;  %800 = vmatpush.bf16.msra.mxu2 %v750_v32  ;;  %v714_v63 = vor.u32 %v781_v60, %v711_v61  ;;  %v777_v0 = vld [vmem:[%s1092_s0] sm:$0xff]  ;;  %v778_v2 = vld [vmem:[%s1092_s0 + $0x8] sm:$0xff]  ;;  %v780_v3 = vld [vmem:[%s1092_s0 + $0x18] sm:$0xff]  ;;  %s315_s24 = scalar_lea.vmem %s1094_s2, %s1104_s19  ;;  %s797_s26 = sshll.u32 (%p949_p6), %s884_s14, 4 }
  0x39   : > { %484 = vmatpush.bf16.msra.mxu1 %v754_v33  ;;  %808 = vmatpush.bf16.msra.mxu3 %v754_v33  ;;  %v343_v4 = vld [vmem:[%s315_s24] sm:$0x3]  ;;  %s539_s29 = scalar_lea.vmem (%p949_p6), %s1095_s3, %s797_s26 }
  0x3a   : > { %v345_v5 = vperm.slane %v343_v4, 0  ;;  %v346_v6 = vperm.slane %v343_v4, 1 }
  0x3c   : > { %456 = vmatpush.bf16.msra.mxu0 %v742_v38  ;;  %801 = vmatpush.bf16.msra.mxu2 %v742_v38 }
  0x3d   : > { %485 = vmatpush.bf16.msra.mxu1 %v746_v39  ;;  %809 = vmatpush.bf16.msra.mxu3 %v746_v39 }
  0x40   : > { %457 = vmatpush.bf16.msra.mxu0 %v734_v44  ;;  %802 = vmatpush.bf16.msra.mxu2 %v734_v44 }
  0x41   : > { %486 = vmatpush.bf16.msra.mxu1 %v738_v45  ;;  %810 = vmatpush.bf16.msra.mxu3 %v738_v45 }
  0x44   : > { %458 = vmatpush.bf16.msra.mxu0 %v726_v50  ;;  %803 = vmatpush.bf16.msra.mxu2 %v726_v50 }
  0x45   : > { %487 = vmatpush.bf16.msra.mxu1 %v730_v51  ;;  %811 = vmatpush.bf16.msra.mxu3 %v730_v51 }
  0x48   : > { %459 = vmatpush.bf16.msra.mxu0 %v718_v56  ;;  %804 = vmatpush.bf16.msra.mxu2 %v718_v56 }
  0x49   : > { %488 = vmatpush.bf16.msra.mxu1 %v722_v57  ;;  %812 = vmatpush.bf16.msra.mxu3 %v722_v57 }
  0x4c   : > { %460 = vmatpush.bf16.msra.mxu0 %v710_v62  ;;  %805 = vmatpush.bf16.msra.mxu2 %v710_v62 }
  0x4d   : > { %489 = vmatpush.bf16.msra.mxu1 %v714_v63  ;;  %813 = vmatpush.bf16.msra.mxu3 %v714_v63 }
  0x4f   : > { %461 = vmatmul.bf16.vlgmr.msra.gmra.mxu0 %v777_v0  ;;  %471 = vmatmul.bf16.vlgmr.msra.gmra.mxu2 %v779_v1 }
  0x50   : > { %490 = vmatmul.bf16.vlgmr.msra.gmra.mxu1 %v777_v0  ;;  %500 = vmatmul.bf16.vlgmr.msra.gmra.mxu3 %v779_v1 }
  0x5f   : > { %466 = vmatmul.bf16.gmra.mxu0 %v778_v2  ;;  %476 = vmatmul.bf16.gmra.mxu2 %v780_v3 }
  0x60   : > { %495 = vmatmul.bf16.gmra.mxu1 %v778_v2  ;;  %505 = vmatmul.bf16.gmra.mxu3 %v780_v3 }
  0xcc   : > { %v462_v7 = vpop.f32.mrf.mxu0 }
  0xcd   : > { %v463_v8 = vadd.f32 %v462_v7, %v345_v5  ;;  %v491_v9 = vpop.f32.mrf.mxu1 }
  0xce   : > { %v492_v10 = vadd.f32 %v491_v9, %v346_v6 }
  0xcf   : > { %511 = vst [vmem:[%s1037_s25] sm:$0xff] %v463_v8 }
  0xd0   : > { %512 = vst [vmem:[%s1037_s25 + $0x8] sm:$0xff] %v492_v10 }
  0xd2   : > { %v472_v11 = vpop.f32.mrf.mxu2 }
  0xd3   : > { %v473_v12 = vadd.f32 %v472_v11, %v345_v5  ;;  %v501_v13 = vpop.f32.mrf.mxu3 }
  0xd4   : > { %v502_v14 = vadd.f32 %v501_v13, %v346_v6  ;;  %v464_v15 = vpop.f32.mrf.mxu0 }
  0xd5   : > { %519 = vst [vmem:[%s1037_s25 + $0x40] sm:$0xff] %v473_v12  ;;  %v465_v16 = vadd.f32 %v464_v15, %v345_v5  ;;  %v493_v17 = vpop.f32.mrf.mxu1 }
  0xd6   : > { %520 = vst [vmem:[%s1037_s25 + $0x48] sm:$0xff] %v502_v14  ;;  %v494_v18 = vadd.f32 %v493_v17, %v346_v6  ;;  %v552_v39 = vld [vmem:[%s1037_s25] sm:$0xff] (%p949_p6) }
  0xd7   : > { %513 = vst [vmem:[%s1037_s25 + $0x10] sm:$0xff] %v465_v16  ;;  %v554_v40 = vld [vmem:[%s1037_s25 + $0x8] sm:$0xff] (%p949_p6) }
  0xd8   : > { %514 = vst [vmem:[%s1037_s25 + $0x18] sm:$0xff] %v494_v18 }
  0xd9   : > { %553 = vst [vmem:[%s539_s29] sm:$0xff] (%p949_p6), %v552_v39 }
  0xda   : > { %v474_v19 = vpop.f32.mrf.mxu2  ;;  %555 = vst [vmem:[%s539_s29 + $0x8] sm:$0xff] (%p949_p6), %v554_v40 }
  0xdb   : > { %v475_v20 = vadd.f32 %v474_v19, %v345_v5  ;;  %v503_v21 = vpop.f32.mrf.mxu3 }
  0xdc   : > { %v504_v22 = vadd.f32 %v503_v21, %v346_v6  ;;  %v467_v23 = vpop.f32.mrf.mxu0  ;;  %v568_v47 = vld [vmem:[%s1037_s25 + $0x40] sm:$0xff] (%p949_p6) }
  0xdd   : > { %521 = vst [vmem:[%s1037_s25 + $0x50] sm:$0xff] %v475_v20  ;;  %v468_v24 = vadd.f32 %v467_v23, %v345_v5  ;;  %v496_v25 = vpop.f32.mrf.mxu1  ;;  %v570_v48 = vld [vmem:[%s1037_s25 + $0x48] sm:$0xff] (%p949_p6) }
  0xde   : > { %522 = vst [vmem:[%s1037_s25 + $0x58] sm:$0xff] %v504_v22  ;;  %v497_v26 = vadd.f32 %v496_v25, %v346_v6  ;;  %v556_v41 = vld [vmem:[%s1037_s25 + $0x10] sm:$0xff] (%p949_p6) }
  0xdf   : > { %515 = vst [vmem:[%s1037_s25 + $0x20] sm:$0xff] %v468_v24  ;;  %v558_v42 = vld [vmem:[%s1037_s25 + $0x18] sm:$0xff] (%p949_p6) }
  0xe0   : > { %516 = vst [vmem:[%s1037_s25 + $0x28] sm:$0xff] %v497_v26 }
  0xe1   : > { %557 = vst [vmem:[%s539_s29 + $0x70] sm:$0xff] (%p949_p6), %v556_v41 }
  0xe2   : > { %v477_v27 = vpop.f32.mrf.mxu2  ;;  %559 = vst [vmem:[%s539_s29 + $0x78] sm:$0xff] (%p949_p6), %v558_v42 }
  0xe3   : > { %v478_v28 = vadd.f32 %v477_v27, %v345_v5  ;;  %v506_v29 = vpop.f32.mrf.mxu3  ;;  %569 = vst [vmem:[%s539_s29 + $0x1c0] sm:$0xff] (%p949_p6), %v568_v47 }
  0xe4   : > { %v507_v30 = vadd.f32 %v506_v29, %v346_v6  ;;  %v469_v31 = vpop.f32.mrf.mxu0  ;;  %v572_v49 = vld [vmem:[%s1037_s25 + $0x50] sm:$0xff] (%p949_p6)  ;;  %571 = vst [vmem:[%s539_s29 + $0x1c8] sm:$0xff] (%p949_p6), %v570_v48 }
  0xe5   : > { %523 = vst [vmem:[%s1037_s25 + $0x60] sm:$0xff] %v478_v28  ;;  %v470_v32 = vadd.f32 %v469_v31, %v345_v5  ;;  %v498_v33 = vpop.f32.mrf.mxu1  ;;  %v574_v50 = vld [vmem:[%s1037_s25 + $0x58] sm:$0xff] (%p949_p6) }
  0xe6   : > { %524 = vst [vmem:[%s1037_s25 + $0x68] sm:$0xff] %v507_v30  ;;  %v499_v34 = vadd.f32 %v498_v33, %v346_v6  ;;  %v560_v43 = vld [vmem:[%s1037_s25 + $0x20] sm:$0xff] (%p949_p6) }
  0xe7   : > { %517 = vst [vmem:[%s1037_s25 + $0x30] sm:$0xff] %v470_v32  ;;  %v562_v44 = vld [vmem:[%s1037_s25 + $0x28] sm:$0xff] (%p949_p6) }
  0xe8   : > { %518 = vst [vmem:[%s1037_s25 + $0x38] sm:$0xff] %v499_v34 }
  0xe9   : > { %561 = vst [vmem:[%s539_s29 + $0xe0] sm:$0xff] (%p949_p6), %v560_v43 }
  0xea   : > { %v479_v35 = vpop.f32.mrf.mxu2  ;;  %533 = sbr.rel (!%p949_p6) target bundleno = 247 (0xf7), region = 74  ;;  %563 = vst [vmem:[%s539_s29 + $0xe8] sm:$0xff] (%p949_p6), %v562_v44 }
  0xeb   : > { %v480_v36 = vadd.f32 %v479_v35, %v345_v5  ;;  %v508_v37 = vpop.f32.mrf.mxu3  ;;  %573 = vst [vmem:[%s539_s29 + $0x230] sm:$0xff] (%p949_p6), %v572_v49 }
  0xec   : > { %v509_v38 = vadd.f32 %v508_v37, %v346_v6  ;;  %v576_v51 = vld [vmem:[%s1037_s25 + $0x60] sm:$0xff] (%p949_p6)  ;;  %575 = vst [vmem:[%s539_s29 + $0x238] sm:$0xff] (%p949_p6), %v574_v50 }
  0xed   : > { %525 = vst [vmem:[%s1037_s25 + $0x70] sm:$0xff] %v480_v36  ;;  %v578_v52 = vld [vmem:[%s1037_s25 + $0x68] sm:$0xff] (%p949_p6) }
  0xee   : > { %526 = vst [vmem:[%s1037_s25 + $0x78] sm:$0xff] %v509_v38  ;;  %v564_v45 = vld [vmem:[%s1037_s25 + $0x30] sm:$0xff] (%p949_p6) }
  0xef   : > { %v566_v46 = vld [vmem:[%s1037_s25 + $0x38] sm:$0xff]  ;;  %565 = vst [vmem:[%s539_s29 + $0x150] sm:$0xff] %v564_v45 }
  0xf0   : > { %567 = vst [vmem:[%s539_s29 + $0x158] sm:$0xff] %v566_v46 }
  0xf1   : > { %577 = vst [vmem:[%s539_s29 + $0x2a0] sm:$0xff] %v576_v51 }
  0xf2   : > { %579 = vst [vmem:[%s539_s29 + $0x2a8] sm:$0xff] %v578_v52 }
  0xf4   : > { %v580_v53 = vld [vmem:[%s1037_s25 + $0x70] sm:$0xff] }
  0xf5   : > { %v582_v54 = vld [vmem:[%s1037_s25 + $0x78] sm:$0xff]  ;;  %581 = vst [vmem:[%s539_s29 + $0x310] sm:$0xff] %v580_v53 }
  0xf6   : > { %583 = vst [vmem:[%s539_s29 + $0x318] sm:$0xff] %v582_v54 }
  0xf7 PF: > { %s13_s16 = sadd.s32 1, %s892_s16   ;;  %s1097_s12 = smov %s880_s13 }
  0xf8   : > { %p10_p12 = scmp.ge.s32.totalorder %s13_s16, 9   ;;  %s1098_s13 = smov %s954_s22 }
  0xf9   : > { %s1099_s14 = smov %s888_s15  ;;  %s1100_s15 = smov %s1102_s17 }
  0xfa   :  { %12 = sbr.rel (!%p10_p12) target bundleno = 3 (0x3), region = 134 }

// kernel: _lambda_.18
= control target key start
LH: loop header
LB: loop body
LE: loop exit
PB: predicated region body
PF: predicated region fallthrough
CT: control target
= control target key end

     0   :  { %s1543_s12 = smov 0   ;;  %s1545_s13 = smov 0   ;;  %s2101_s0 = inlined_call_operand.vmem [shape: bf16[352,128], index: 0, kind: input, shape index: {}]   ;;  %s2102_s1 = inlined_call_operand.vmem [shape: bf16[128,1280], index: 1, kind: input, shape index: {}]   ;;  %s2103_s2 = inlined_call_operand.vmem [shape: f32[1,1280], index: 2, kind: input, shape index: {}]   ;;  %s2104_s3 = inlined_call_operand.vmem [shape: f32[352,1280], index: 3, kind: output, shape index: {}]  }
   0x1   :  { %s1547_s14 = smov 0   ;;  %s1549_s15 = smov 0  }
   0x2   :  { %s1551_s16 = smov 0  }
   0x3 LB: > { %s22_s17 = sadd.s32 1, %s1517_s15  ;;  %s1219_s18 = sadd.s32 4294967295, %s1521_s16   ;;  %s1521_s16 = sphi %s1551_s16, %s13_s16   ;;  %s1517_s15 = sphi %s1549_s15, %s2109_s15   ;;  %s1513_s14 = sphi %s1547_s14, %s2108_s14   ;;  %s1509_s13 = sphi %s1545_s13, %s2107_s13   ;;  %s1505_s12 = sphi %s1543_s12, %s2106_s12  }
   0x4   : > { %p23_p0 = scmp.ge.s32.totalorder %s22_s17, 5  ;;  %p65_p1 = scmp.ne.s32.totalorder %s1509_s13, %s1505_s12 }
   0x5   : > { %p66_p2 = scmp.eq.s32.totalorder %s1521_s16, 0  ;;  %p123_p4 = scmp.eq.s32.totalorder %s1219_s18, 4 }
   0x6   : > { %s2111_s17 = smov (%p23_p0, %s22_s17), 0  ;;  %s58_s20 = sadd.s32 1, %s1509_s13 }
   0x7   : > { %p67_p3 = por %p66_p2, %p65_p1  ;;  %s55_s19 = ssub.s32 %s1517_s15, %s2111_s17 }
   0x8   : > { %p56_p5 = scmp.eq.s32.totalorder %s55_s19, 0  ;;  %p1578_p6 = por %p123_p4, %p65_p1 }
   0x9   : > { %p1223_p7 = scmp.ge.s32.totalorder %s1521_s16, 5 }
   0xa   : > { %s1583_s22 = scalar_select %p56_p5, %s1509_s13, %s58_s20  }
   0xb   : > { %154 = sbr.rel (%p1223_p7) target bundleno = 36 (0x24), region = 20 }
  0x10   : > { %157 = sbr.rel (!%p67_p3) target bundleno = 36 (0x24), region = 24  ;;  %s159_s23 = sand.u32 (%p67_p3), 1, %s1509_s13  }
  0x11   : > { %s1386_s24 = sshll.u32 (%p67_p3), %s1517_s15, 3  ;;  %s1224_s25 = sshll.u32 (%p67_p3), %s159_s23, 7 }
  0x12   : > { %s1591_s28 = scalar_lea.vmem (%p67_p3), %s2102_s1, %s1386_s24  ;;  %s161_s29 = scalar_lea.vmem (%p67_p3), [#allocation2], %s1224_s25 }
  0x13   : > { %v223_v0 = vld [vmem:[%s1591_s28] sm:$0xff] (%p67_p3)  ;;  %v225_v1 = vld [vmem:[%s1591_s28 + $0x28] sm:$0xff] (%p67_p3)  ;;  %v227_v2 = vld [vmem:[%s1591_s28 + $0x50] sm:$0xff] (%p67_p3) }
  0x14   : > { %224 = vst [vmem:[%s161_s29] sm:$0xff] (%p67_p3), %v223_v0  ;;  %v229_v3 = vld [vmem:[%s1591_s28 + $0x78] sm:$0xff] (%p67_p3)  ;;  %v231_v4 = vld [vmem:[%s1591_s28 + $0xa0] sm:$0xff] (%p67_p3)  ;;  %v233_v5 = vld [vmem:[%s1591_s28 + $0xc8] sm:$0xff] (%p67_p3) }
  0x15   : > { %226 = vst [vmem:[%s161_s29 + $0x8] sm:$0xff] %v225_v1  ;;  %v235_v6 = vld [vmem:[%s1591_s28 + $0xf0] sm:$0xff]  ;;  %v237_v7 = vld [vmem:[%s1591_s28 + $0x118] sm:$0xff]  ;;  %v239_v8 = vld [vmem:[%s1591_s28 + $0x140] sm:$0xff] }
  0x16   : > { %228 = vst [vmem:[%s161_s29 + $0x10] sm:$0xff] %v227_v2  ;;  %v241_v9 = vld [vmem:[%s1591_s28 + $0x168] sm:$0xff]  ;;  %v243_v10 = vld [vmem:[%s1591_s28 + $0x190] sm:$0xff]  ;;  %v245_v11 = vld [vmem:[%s1591_s28 + $0x1b8] sm:$0xff] }
  0x17   : > { %230 = vst [vmem:[%s161_s29 + $0x18] sm:$0xff] %v229_v3  ;;  %v247_v12 = vld [vmem:[%s1591_s28 + $0x1e0] sm:$0xff]  ;;  %v249_v13 = vld [vmem:[%s1591_s28 + $0x208] sm:$0xff]  ;;  %v251_v14 = vld [vmem:[%s1591_s28 + $0x230] sm:$0xff] }
  0x18   : > { %232 = vst [vmem:[%s161_s29 + $0x20] sm:$0xff] %v231_v4  ;;  %v253_v15 = vld [vmem:[%s1591_s28 + $0x258] sm:$0xff] }
  0x19   : > { %234 = vst [vmem:[%s161_s29 + $0x28] sm:$0xff] %v233_v5 }
  0x1a   : > { %236 = vst [vmem:[%s161_s29 + $0x30] sm:$0xff] %v235_v6 }
  0x1b   : > { %238 = vst [vmem:[%s161_s29 + $0x38] sm:$0xff] %v237_v7 }
  0x1c   : > { %240 = vst [vmem:[%s161_s29 + $0x40] sm:$0xff] %v239_v8 }
  0x1d   : > { %242 = vst [vmem:[%s161_s29 + $0x48] sm:$0xff] %v241_v9 }
  0x1e   : > { %244 = vst [vmem:[%s161_s29 + $0x50] sm:$0xff] %v243_v10 }
  0x1f   : > { %246 = vst [vmem:[%s161_s29 + $0x58] sm:$0xff] %v245_v11 }
  0x20   : > { %248 = vst [vmem:[%s161_s29 + $0x60] sm:$0xff] %v247_v12 }
  0x21   : > { %250 = vst [vmem:[%s161_s29 + $0x68] sm:$0xff] %v249_v13 }
  0x22   : > { %252 = vst [vmem:[%s161_s29 + $0x70] sm:$0xff] %v251_v14 }
  0x23   : > { %254 = vst [vmem:[%s161_s29 + $0x78] sm:$0xff] %v253_v15 }
  0x24 PF: > { %p1227_p8 = scmp.ge.s32.totalorder %s1521_s16, 1  ;;  %p267_p9 = scmp.lt.s32.totalorder %s1521_s16, 6 }
  0x26   : > { %p268_p10 = pnand %p1227_p8, %p267_p9 }
  0x27   : > { %s274_s30 = sand.u32 (!%p268_p10), 1, %s1505_s12   ;;  %s1229_s24 = sshll.u32 (!%p268_p10), %s1513_s14, 1 }
  0x28   : > { %271 = sbr.rel (%p268_p10) target bundleno = 439 (0x1b7), region = 66  ;;  %s1228_s4 = sshll.u32 (!%p268_p10), %s274_s30, 7 }
  0x29   : > { %s1614_s5 = scalar_lea.vmem (!%p268_p10), [#allocation2], %s1228_s4  ;;  %p313_p11 = scmp.lt.s32.totalorder (!%p268_p10), %s1229_s24, 9 }
  0x2a   : > { %s1442_s6 = smul.u32 (!%p268_p10), 704, %s274_s30 }
  0x2c   : > { %s1714_s12 = scalar_lea.vmem (!%p268_p10), [#allocation3], %s1442_s6 }
  0x2d   : > { %v1376_v16 = vld [vmem:[%s1614_s5 + $0x70] sm:$0xf]  ;;  %v1424_v17 = vld [vmem:[%s1614_s5 + $0x74] sm:$0xf0]  ;;  %v1423_v18 = vld [vmem:[%s1614_s5 + $0x74] sm:$0xf] }
  0x2e   : > { %v1377_v19 = vor.u32 %v1424_v17, %v1376_v16  ;;  %v1378_v20 = vld [vmem:[%s1614_s5 + $0x78] sm:$0xf0]  ;;  %v1368_v21 = vld [vmem:[%s1614_s5 + $0x60] sm:$0xf]  ;;  %v1422_v22 = vld [vmem:[%s1614_s5 + $0x64] sm:$0xf0] }
  0x2f   : > { %v1381_v23 = vor.u32 %v1423_v18, %v1378_v20  ;;  %v1421_v24 = vld [vmem:[%s1614_s5 + $0x64] sm:$0xf]  ;;  %v1370_v25 = vld [vmem:[%s1614_s5 + $0x68] sm:$0xf0]  ;;  %v1369_v26 = vor.u32 %v1422_v22, %v1368_v21  ;;  %v1360_v28 = vld [vmem:[%s1614_s5 + $0x50] sm:$0xf] }
  0x30   : > { %597 = vmatpush.bf16.msra.mxu0 %v1377_v19  ;;  %1426 = vmatpush.bf16.msra.mxu2 %v1377_v19  ;;  %v1373_v27 = vor.u32 %v1421_v24, %v1370_v25  ;;  %v1420_v29 = vld [vmem:[%s1614_s5 + $0x54] sm:$0xf0]  ;;  %v1419_v30 = vld [vmem:[%s1614_s5 + $0x54] sm:$0xf]  ;;  %v1362_v31 = vld [vmem:[%s1614_s5 + $0x58] sm:$0xf0] }
  0x31   : > { %716 = vmatpush.bf16.msra.mxu1 %v1381_v23  ;;  %1434 = vmatpush.bf16.msra.mxu3 %v1381_v23  ;;  %v1361_v32 = vor.u32 %v1420_v29, %v1360_v28  ;;  %v1365_v33 = vor.u32 %v1419_v30, %v1362_v31  ;;  %v1352_v34 = vld [vmem:[%s1614_s5 + $0x40] sm:$0xf]  ;;  %v1418_v35 = vld [vmem:[%s1614_s5 + $0x44] sm:$0xf0]  ;;  %v1417_v36 = vld [vmem:[%s1614_s5 + $0x44] sm:$0xf] }
  0x32   : > { %v1354_v37 = vld [vmem:[%s1614_s5 + $0x48] sm:$0xf0]  ;;  %v1353_v38 = vor.u32 %v1418_v35, %v1352_v34  ;;  %v1344_v40 = vld [vmem:[%s1614_s5 + $0x30] sm:$0xf]  ;;  %v1416_v41 = vld [vmem:[%s1614_s5 + $0x34] sm:$0xf0] }
  0x33   : > { %v1357_v39 = vor.u32 %v1417_v36, %v1354_v37  ;;  %v1415_v42 = vld [vmem:[%s1614_s5 + $0x34] sm:$0xf]  ;;  %v1346_v43 = vld [vmem:[%s1614_s5 + $0x38] sm:$0xf0]  ;;  %v1345_v44 = vor.u32 %v1416_v41, %v1344_v40  ;;  %v1336_v46 = vld [vmem:[%s1614_s5 + $0x20] sm:$0xf] }
  0x34   : > { %598 = vmatpush.bf16.msra.mxu0 %v1369_v26  ;;  %1427 = vmatpush.bf16.msra.mxu2 %v1369_v26  ;;  %v1349_v45 = vor.u32 %v1415_v42, %v1346_v43  ;;  %v1414_v47 = vld [vmem:[%s1614_s5 + $0x24] sm:$0xf0]  ;;  %v1413_v48 = vld [vmem:[%s1614_s5 + $0x24] sm:$0xf]  ;;  %v1338_v49 = vld [vmem:[%s1614_s5 + $0x28] sm:$0xf0] }
  0x35   : > { %717 = vmatpush.bf16.msra.mxu1 %v1373_v27  ;;  %1435 = vmatpush.bf16.msra.mxu3 %v1373_v27  ;;  %v1337_v50 = vor.u32 %v1414_v47, %v1336_v46  ;;  %v1341_v51 = vor.u32 %v1413_v48, %v1338_v49  ;;  %v1328_v52 = vld [vmem:[%s1614_s5 + $0x10] sm:$0xf]  ;;  %v1412_v53 = vld [vmem:[%s1614_s5 + $0x14] sm:$0xf0]  ;;  %v1411_v54 = vld [vmem:[%s1614_s5 + $0x14] sm:$0xf] }
  0x36   : > { %v1330_v55 = vld [vmem:[%s1614_s5 + $0x18] sm:$0xf0]  ;;  %v1329_v56 = vor.u32 %v1412_v53, %v1328_v52  ;;  %v1320_v58 = vld [vmem:[%s1614_s5] sm:$0xf]  ;;  %v1410_v59 = vld [vmem:[%s1614_s5 + $0x4] sm:$0xf0] }
  0x37   : > { %v1333_v57 = vor.u32 %v1411_v54, %v1330_v55  ;;  %v1409_v60 = vld [vmem:[%s1614_s5 + $0x4] sm:$0xf]  ;;  %v1322_v61 = vld [vmem:[%s1614_s5 + $0x8] sm:$0xf0]  ;;  %v1321_v62 = vor.u32 %v1410_v59, %v1320_v58  ;;  %v1398_v1 = vld [vmem:[%s2101_s0 + $0x58] sm:$0xff]  ;;  %s2113_s24 = smov (!%p313_p11, %s1229_s24), 9 }
  0x38   : > { %599 = vmatpush.bf16.msra.mxu0 %v1361_v32  ;;  %1428 = vmatpush.bf16.msra.mxu2 %v1361_v32  ;;  %v1325_v63 = vor.u32 %v1409_v60, %v1322_v61  ;;  %v1387_v0 = vld [vmem:[%s2101_s0] sm:$0xff]  ;;  %v1388_v2 = vld [vmem:[%s2101_s0 + $0x8] sm:$0xff]  ;;  %v1389_v4 = vld [vmem:[%s2101_s0 + $0x10] sm:$0xff]  ;;  %s315_s5 = scalar_lea.vmem %s2103_s2, %s2113_s24  ;;  %s1425_s26 = sshll.u32 (%p1578_p6), %s1513_s14, 4 }
  0x39   : > { %718 = vmatpush.bf16.msra.mxu1 %v1365_v33  ;;  %1436 = vmatpush.bf16.msra.mxu3 %v1365_v33  ;;  %v1399_v3 = vld [vmem:[%s2101_s0 + $0x60] sm:$0xff]  ;;  %v1400_v5 = vld [vmem:[%s2101_s0 + $0x68] sm:$0xff]  ;;  %v1390_v6 = vld [vmem:[%s2101_s0 + $0x18] sm:$0xff]  ;;  %s1910_s29 = scalar_lea.vmem (%p1578_p6), %s2104_s3, %s1425_s26 }
  0x3a   : > { %v1401_v7 = vld [vmem:[%s2101_s0 + $0x70] sm:$0xff]  ;;  %v1391_v8 = vld [vmem:[%s2101_s0 + $0x20] sm:$0xff]  ;;  %v1402_v9 = vld [vmem:[%s2101_s0 + $0x78] sm:$0xff] }
  0x3b   : > { %v1392_v10 = vld [vmem:[%s2101_s0 + $0x28] sm:$0xff]  ;;  %v1403_v11 = vld [vmem:[%s2101_s0 + $0x80] sm:$0xff]  ;;  %v1393_v12 = vld [vmem:[%s2101_s0 + $0x30] sm:$0xff] }
  0x3c   : > { %600 = vmatpush.bf16.msra.mxu0 %v1353_v38  ;;  %1429 = vmatpush.bf16.msra.mxu2 %v1353_v38  ;;  %v1404_v13 = vld [vmem:[%s2101_s0 + $0x88] sm:$0xff]  ;;  %v1394_v14 = vld [vmem:[%s2101_s0 + $0x38] sm:$0xff]  ;;  %v1405_v15 = vld [vmem:[%s2101_s0 + $0x90] sm:$0xff] }
  0x3d   : > { %719 = vmatpush.bf16.msra.mxu1 %v1357_v39  ;;  %1437 = vmatpush.bf16.msra.mxu3 %v1357_v39  ;;  %v379_v16 = vld [vmem:[%s315_s5] sm:$0x3]  ;;  %v1406_v20 = vld [vmem:[%s2101_s0 + $0x98] sm:$0xff]  ;;  %v1396_v36 = vld [vmem:[%s2101_s0 + $0x48] sm:$0xff] }
  0x3e   : > { %v1702_v17 = vperm.slane %v379_v16, 0  ;;  %v1704_v18 = vperm.slane %v379_v16, 1  ;;  %v1395_v19 = vld [vmem:[%s2101_s0 + $0x40] sm:$0xff]  ;;  %v1397_v54 = vld [vmem:[%s2101_s0 + $0x50] sm:$0xff]  ;;  %v1408_v55 = vld [vmem:[%s2101_s0 + $0xa8] sm:$0xff] }
  0x3f   : > { %v1407_v37 = vld [vmem:[%s2101_s0 + $0xa0] sm:$0xff] }
  0x40   : > { %601 = vmatpush.bf16.msra.mxu0 %v1345_v44  ;;  %1430 = vmatpush.bf16.msra.mxu2 %v1345_v44 }
  0x41   : > { %720 = vmatpush.bf16.msra.mxu1 %v1349_v45  ;;  %1438 = vmatpush.bf16.msra.mxu3 %v1349_v45 }
  0x44   : > { %602 = vmatpush.bf16.msra.mxu0 %v1337_v50  ;;  %1431 = vmatpush.bf16.msra.mxu2 %v1337_v50 }
  0x45   : > { %721 = vmatpush.bf16.msra.mxu1 %v1341_v51  ;;  %1439 = vmatpush.bf16.msra.mxu3 %v1341_v51 }
  0x48   : > { %603 = vmatpush.bf16.msra.mxu0 %v1329_v56  ;;  %1432 = vmatpush.bf16.msra.mxu2 %v1329_v56 }
  0x49   : > { %722 = vmatpush.bf16.msra.mxu1 %v1333_v57  ;;  %1440 = vmatpush.bf16.msra.mxu3 %v1333_v57 }
  0x4c   : > { %604 = vmatpush.bf16.msra.mxu0 %v1321_v62  ;;  %1433 = vmatpush.bf16.msra.mxu2 %v1321_v62 }
  0x4d   : > { %723 = vmatpush.bf16.msra.mxu1 %v1325_v63  ;;  %1441 = vmatpush.bf16.msra.mxu3 %v1325_v63 }
  0x4f   : > { %605 = vmatmul.bf16.vlgmr.msra.gmra.mxu0 %v1387_v0  ;;  %660 = vmatmul.bf16.vlgmr.msra.gmra.mxu2 %v1398_v1 }
  0x50   : > { %724 = vmatmul.bf16.vlgmr.msra.gmra.mxu1 %v1387_v0  ;;  %779 = vmatmul.bf16.vlgmr.msra.gmra.mxu3 %v1398_v1 }
  0x5f   : > { %610 = vmatmul.bf16.gmra.mxu0 %v1388_v2  ;;  %665 = vmatmul.bf16.gmra.mxu2 %v1399_v3 }
  0x60   : > { %729 = vmatmul.bf16.gmra.mxu1 %v1388_v2  ;;  %784 = vmatmul.bf16.gmra.mxu3 %v1399_v3 }
  0x6f   : > { %615 = vmatmul.bf16.gmra.mxu0 %v1389_v4  ;;  %670 = vmatmul.bf16.gmra.mxu2 %v1400_v5 }
  0x70   : > { %734 = vmatmul.bf16.gmra.mxu1 %v1389_v4  ;;  %789 = vmatmul.bf16.gmra.mxu3 %v1400_v5 }
  0x7f   : > { %620 = vmatmul.bf16.gmra.mxu0 %v1390_v6  ;;  %675 = vmatmul.bf16.gmra.mxu2 %v1401_v7 }
  0x80   : > { %739 = vmatmul.bf16.gmra.mxu1 %v1390_v6  ;;  %794 = vmatmul.bf16.gmra.mxu3 %v1401_v7 }
  0x8f   : > { %625 = vmatmul.bf16.gmra.mxu0 %v1391_v8  ;;  %680 = vmatmul.bf16.gmra.mxu2 %v1402_v9 }
  0x90   : > { %744 = vmatmul.bf16.gmra.mxu1 %v1391_v8  ;;  %799 = vmatmul.bf16.gmra.mxu3 %v1402_v9 }
  0x9f   : > { %630 = vmatmul.bf16.gmra.mxu0 %v1392_v10  ;;  %685 = vmatmul.bf16.gmra.mxu2 %v1403_v11 }
  0xa0   : > { %749 = vmatmul.bf16.gmra.mxu1 %v1392_v10  ;;  %804 = vmatmul.bf16.gmra.mxu3 %v1403_v11 }
  0xaf   : > { %635 = vmatmul.bf16.gmra.mxu0 %v1393_v12  ;;  %690 = vmatmul.bf16.gmra.mxu2 %v1404_v13 }
  0xb0   : > { %754 = vmatmul.bf16.gmra.mxu1 %v1393_v12  ;;  %809 = vmatmul.bf16.gmra.mxu3 %v1404_v13 }
  0xbf   : > { %640 = vmatmul.bf16.gmra.mxu0 %v1394_v14  ;;  %695 = vmatmul.bf16.gmra.mxu2 %v1405_v15 }
  0xc0   : > { %759 = vmatmul.bf16.gmra.mxu1 %v1394_v14  ;;  %814 = vmatmul.bf16.gmra.mxu3 %v1405_v15 }
  0xcc   : > { %v606_v21 = vpop.f32.mrf.mxu0 }
  0xcd   : > { %v607_v22 = vadd.f32 %v606_v21, %v1702_v17  ;;  %v725_v23 = vpop.f32.mrf.mxu1 }
  0xce   : > { %v726_v24 = vadd.f32 %v725_v23, %v1704_v18 }
  0xcf   : > { %835 = vst [vmem:[%s1714_s12] sm:$0xff] %v607_v22  ;;  %645 = vmatmul.bf16.gmra.mxu0 %v1395_v19  ;;  %700 = vmatmul.bf16.gmra.mxu2 %v1406_v20 }
  0xd0   : > { %836 = vst [vmem:[%s1714_s12 + $0x8] sm:$0xff] %v726_v24  ;;  %764 = vmatmul.bf16.gmra.mxu1 %v1395_v19  ;;  %819 = vmatmul.bf16.gmra.mxu3 %v1406_v20 }
  0xd2   : > { %v661_v25 = vpop.f32.mrf.mxu2 }
  0xd3   : > { %v662_v26 = vadd.f32 %v661_v25, %v1702_v17  ;;  %v780_v27 = vpop.f32.mrf.mxu3 }
  0xd4   : > { %v781_v28 = vadd.f32 %v780_v27, %v1704_v18  ;;  %v608_v29 = vpop.f32.mrf.mxu0 }
  0xd5   : > { %879 = vst [vmem:[%s1714_s12 + $0x160] sm:$0xff] %v662_v26  ;;  %v609_v30 = vadd.f32 %v608_v29, %v1702_v17  ;;  %v727_v31 = vpop.f32.mrf.mxu1 }
  0xd6   : > { %880 = vst [vmem:[%s1714_s12 + $0x168] sm:$0xff] %v781_v28  ;;  %v728_v32 = vadd.f32 %v727_v31, %v1704_v18 }
  0xd7   : > { %837 = vst [vmem:[%s1714_s12 + $0x10] sm:$0xff] %v609_v30 }
  0xd8   : > { %838 = vst [vmem:[%s1714_s12 + $0x18] sm:$0xff] %v728_v32 }
  0xda   : > { %v663_v33 = vpop.f32.mrf.mxu2 }
  0xdb   : > { %v664_v34 = vadd.f32 %v663_v33, %v1702_v17  ;;  %v782_v35 = vpop.f32.mrf.mxu3 }
  0xdc   : > { %v783_v38 = vadd.f32 %v782_v35, %v1704_v18  ;;  %v611_v39 = vpop.f32.mrf.mxu0 }
  0xdd   : > { %881 = vst [vmem:[%s1714_s12 + $0x170] sm:$0xff] %v664_v34  ;;  %v612_v40 = vadd.f32 %v611_v39, %v1702_v17  ;;  %v730_v41 = vpop.f32.mrf.mxu1 }
  0xde   : > { %882 = vst [vmem:[%s1714_s12 + $0x178] sm:$0xff] %v783_v38  ;;  %v731_v42 = vadd.f32 %v730_v41, %v1704_v18 }
  0xdf   : > { %839 = vst [vmem:[%s1714_s12 + $0x20] sm:$0xff] %v612_v40  ;;  %650 = vmatmul.bf16.gmra.mxu0 %v1396_v36  ;;  %705 = vmatmul.bf16.gmra.mxu2 %v1407_v37 }
  0xe0   : > { %840 = vst [vmem:[%s1714_s12 + $0x28] sm:$0xff] %v731_v42  ;;  %769 = vmatmul.bf16.gmra.mxu1 %v1396_v36  ;;  %824 = vmatmul.bf16.gmra.mxu3 %v1407_v37 }
  0xe2   : > { %v666_v43 = vpop.f32.mrf.mxu2 }
  0xe3   : > { %v667_v44 = vadd.f32 %v666_v43, %v1702_v17  ;;  %v785_v45 = vpop.f32.mrf.mxu3 }
  0xe4   : > { %v786_v46 = vadd.f32 %v785_v45, %v1704_v18  ;;  %v613_v47 = vpop.f32.mrf.mxu0 }
  0xe5   : > { %883 = vst [vmem:[%s1714_s12 + $0x180] sm:$0xff] %v667_v44  ;;  %v614_v48 = vadd.f32 %v613_v47, %v1702_v17  ;;  %v732_v49 = vpop.f32.mrf.mxu1 }
  0xe6   : > { %884 = vst [vmem:[%s1714_s12 + $0x188] sm:$0xff] %v786_v46  ;;  %v733_v50 = vadd.f32 %v732_v49, %v1704_v18 }
  0xe7   : > { %841 = vst [vmem:[%s1714_s12 + $0x30] sm:$0xff] %v614_v48 }
  0xe8   : > { %842 = vst [vmem:[%s1714_s12 + $0x38] sm:$0xff] %v733_v50 }
  0xea   : > { %v668_v51 = vpop.f32.mrf.mxu2 }
  0xeb   : > { %v669_v52 = vadd.f32 %v668_v51, %v1702_v17  ;;  %v787_v53 = vpop.f32.mrf.mxu3 }
  0xec   : > { %v788_v56 = vadd.f32 %v787_v53, %v1704_v18  ;;  %v616_v57 = vpop.f32.mrf.mxu0 }
  0xed   : > { %885 = vst [vmem:[%s1714_s12 + $0x190] sm:$0xff] %v669_v52  ;;  %v617_v58 = vadd.f32 %v616_v57, %v1702_v17  ;;  %v735_v59 = vpop.f32.mrf.mxu1 }
  0xee   : > { %886 = vst [vmem:[%s1714_s12 + $0x198] sm:$0xff] %v788_v56  ;;  %v736_v60 = vadd.f32 %v735_v59, %v1704_v18 }
  0xef   : > { %843 = vst [vmem:[%s1714_s12 + $0x40] sm:$0xff] %v617_v58  ;;  %655 = vmatmul.bf16.gmra.mxu0 %v1397_v54  ;;  %710 = vmatmul.bf16.gmra.mxu2 %v1408_v55 }
  0xf0   : > { %844 = vst [vmem:[%s1714_s12 + $0x48] sm:$0xff] %v736_v60  ;;  %774 = vmatmul.bf16.gmra.mxu1 %v1397_v54  ;;  %829 = vmatmul.bf16.gmra.mxu3 %v1408_v55 }
  0xf2   : > { %v671_v61 = vpop.f32.mrf.mxu2 }
  0xf3   : > { %v672_v62 = vadd.f32 %v671_v61, %v1702_v17  ;;  %v790_v63 = vpop.f32.mrf.mxu3 }
  0xf4   : > { %v791_v0 = vadd.f32 %v790_v63, %v1704_v18  ;;  %v618_v1 = vpop.f32.mrf.mxu0 }
  0xf5   : > { %887 = vst [vmem:[%s1714_s12 + $0x1a0] sm:$0xff] %v672_v62  ;;  %v619_v2 = vadd.f32 %v618_v1, %v1702_v17  ;;  %v737_v3 = vpop.f32.mrf.mxu1 }
  0xf6   : > { %888 = vst [vmem:[%s1714_s12 + $0x1a8] sm:$0xff] %v791_v0  ;;  %v738_v4 = vadd.f32 %v737_v3, %v1704_v18 }
  0xf7   : > { %845 = vst [vmem:[%s1714_s12 + $0x50] sm:$0xff] %v619_v2 }
  0xf8   : > { %846 = vst [vmem:[%s1714_s12 + $0x58] sm:$0xff] %v738_v4 }
  0xfa   : > { %v673_v5 = vpop.f32.mrf.mxu2 }
  0xfb   : > { %v674_v6 = vadd.f32 %v673_v5, %v1702_v17  ;;  %v792_v7 = vpop.f32.mrf.mxu3 }
  0xfc   : > { %v793_v8 = vadd.f32 %v792_v7, %v1704_v18  ;;  %v621_v9 = vpop.f32.mrf.mxu0 }
  0xfd   : > { %889 = vst [vmem:[%s1714_s12 + $0x1b0] sm:$0xff] %v674_v6  ;;  %v622_v10 = vadd.f32 %v621_v9, %v1702_v17  ;;  %v740_v11 = vpop.f32.mrf.mxu1 }
  0xfe   : > { %890 = vst [vmem:[%s1714_s12 + $0x1b8] sm:$0xff] %v793_v8  ;;  %v741_v12 = vadd.f32 %v740_v11, %v1704_v18 }
  0xff   : > { %847 = vst [vmem:[%s1714_s12 + $0x60] sm:$0xff] %v622_v10 }
 0x100   : > { %848 = vst [vmem:[%s1714_s12 + $0x68] sm:$0xff] %v741_v12 }
 0x102   : > { %v676_v13 = vpop.f32.mrf.mxu2 }
 0x103   : > { %v677_v14 = vadd.f32 %v676_v13, %v1702_v17  ;;  %v795_v15 = vpop.f32.mrf.mxu3 }
 0x104   : > { %v796_v16 = vadd.f32 %v795_v15, %v1704_v18  ;;  %v623_v19 = vpop.f32.mrf.mxu0 }
 0x105   : > { %891 = vst [vmem:[%s1714_s12 + $0x1c0] sm:$0xff] %v677_v14  ;;  %v624_v20 = vadd.f32 %v623_v19, %v1702_v17  ;;  %v742_v21 = vpop.f32.mrf.mxu1 }
 0x106   : > { %892 = vst [vmem:[%s1714_s12 + $0x1c8] sm:$0xff] %v796_v16  ;;  %v743_v22 = vadd.f32 %v742_v21, %v1704_v18 }
 0x107   : > { %849 = vst [vmem:[%s1714_s12 + $0x70] sm:$0xff] %v624_v20 }
 0x108   : > { %850 = vst [vmem:[%s1714_s12 + $0x78] sm:$0xff] %v743_v22 }
 0x10a   : > { %v678_v23 = vpop.f32.mrf.mxu2 }
 0x10b   : > { %v679_v24 = vadd.f32 %v678_v23, %v1702_v17  ;;  %v797_v25 = vpop.f32.mrf.mxu3 }
 0x10c   : > { %v798_v26 = vadd.f32 %v797_v25, %v1704_v18  ;;  %v626_v27 = vpop.f32.mrf.mxu0 }
 0x10d   : > { %893 = vst [vmem:[%s1714_s12 + $0x1d0] sm:$0xff] %v679_v24  ;;  %v627_v28 = vadd.f32 %v626_v27, %v1702_v17  ;;  %v745_v29 = vpop.f32.mrf.mxu1 }
 0x10e   : > { %894 = vst [vmem:[%s1714_s12 + $0x1d8] sm:$0xff] %v798_v26  ;;  %v746_v30 = vadd.f32 %v745_v29, %v1704_v18 }
 0x10f   : > { %851 = vst [vmem:[%s1714_s12 + $0x80] sm:$0xff] %v627_v28 }
 0x110   : > { %852 = vst [vmem:[%s1714_s12 + $0x88] sm:$0xff] %v746_v30 }
 0x112   : > { %v681_v31 = vpop.f32.mrf.mxu2 }
 0x113   : > { %v682_v32 = vadd.f32 %v681_v31, %v1702_v17  ;;  %v800_v33 = vpop.f32.mrf.mxu3 }
 0x114   : > { %v801_v34 = vadd.f32 %v800_v33, %v1704_v18  ;;  %v628_v35 = vpop.f32.mrf.mxu0 }
 0x115   : > { %895 = vst [vmem:[%s1714_s12 + $0x1e0] sm:$0xff] %v682_v32  ;;  %v629_v36 = vadd.f32 %v628_v35, %v1702_v17  ;;  %v747_v37 = vpop.f32.mrf.mxu1 }
 0x116   : > { %896 = vst [vmem:[%s1714_s12 + $0x1e8] sm:$0xff] %v801_v34  ;;  %v748_v38 = vadd.f32 %v747_v37, %v1704_v18 }
 0x117   : > { %853 = vst [vmem:[%s1714_s12 + $0x90] sm:$0xff] %v629_v36 }
 0x118   : > { %854 = vst [vmem:[%s1714_s12 + $0x98] sm:$0xff] %v748_v38 }
 0x11a   : > { %v683_v39 = vpop.f32.mrf.mxu2 }
 0x11b   : > { %v684_v40 = vadd.f32 %v683_v39, %v1702_v17  ;;  %v802_v41 = vpop.f32.mrf.mxu3 }
 0x11c   : > { %v803_v42 = vadd.f32 %v802_v41, %v1704_v18  ;;  %v631_v43 = vpop.f32.mrf.mxu0 }
 0x11d   : > { %897 = vst [vmem:[%s1714_s12 + $0x1f0] sm:$0xff] %v684_v40  ;;  %v632_v44 = vadd.f32 %v631_v43, %v1702_v17  ;;  %v750_v45 = vpop.f32.mrf.mxu1 }
 0x11e   : > { %898 = vst [vmem:[%s1714_s12 + $0x1f8] sm:$0xff] %v803_v42  ;;  %v751_v46 = vadd.f32 %v750_v45, %v1704_v18 }
 0x11f   : > { %855 = vst [vmem:[%s1714_s12 + $0xa0] sm:$0xff] %v632_v44 }
 0x120   : > { %856 = vst [vmem:[%s1714_s12 + $0xa8] sm:$0xff] %v751_v46 }
 0x122   : > { %v686_v47 = vpop.f32.mrf.mxu2 }
 0x123   : > { %v687_v48 = vadd.f32 %v686_v47, %v1702_v17  ;;  %v805_v49 = vpop.f32.mrf.mxu3 }
 0x124   : > { %v806_v50 = vadd.f32 %v805_v49, %v1704_v18  ;;  %v633_v51 = vpop.f32.mrf.mxu0 }
 0x125   : > { %899 = vst [vmem:[%s1714_s12 + $0x200] sm:$0xff] %v687_v48  ;;  %v634_v52 = vadd.f32 %v633_v51, %v1702_v17  ;;  %v752_v53 = vpop.f32.mrf.mxu1 }
 0x126   : > { %900 = vst [vmem:[%s1714_s12 + $0x208] sm:$0xff] %v806_v50  ;;  %v753_v54 = vadd.f32 %v752_v53, %v1704_v18 }
 0x127   : > { %857 = vst [vmem:[%s1714_s12 + $0xb0] sm:$0xff] %v634_v52 }
 0x128   : > { %858 = vst [vmem:[%s1714_s12 + $0xb8] sm:$0xff] %v753_v54 }
 0x12a   : > { %v688_v55 = vpop.f32.mrf.mxu2 }
 0x12b   : > { %v689_v56 = vadd.f32 %v688_v55, %v1702_v17  ;;  %v807_v57 = vpop.f32.mrf.mxu3 }
 0x12c   : > { %v808_v58 = vadd.f32 %v807_v57, %v1704_v18  ;;  %v636_v59 = vpop.f32.mrf.mxu0 }
 0x12d   : > { %901 = vst [vmem:[%s1714_s12 + $0x210] sm:$0xff] %v689_v56  ;;  %v637_v60 = vadd.f32 %v636_v59, %v1702_v17  ;;  %v755_v61 = vpop.f32.mrf.mxu1 }
 0x12e   : > { %902 = vst [vmem:[%s1714_s12 + $0x218] sm:$0xff] %v808_v58  ;;  %v756_v62 = vadd.f32 %v755_v61, %v1704_v18 }
 0x12f   : > { %859 = vst [vmem:[%s1714_s12 + $0xc0] sm:$0xff] %v637_v60 }
 0x130   : > { %860 = vst [vmem:[%s1714_s12 + $0xc8] sm:$0xff] %v756_v62 }
 0x132   : > { %v691_v63 = vpop.f32.mrf.mxu2 }
 0x133   : > { %v692_v0 = vadd.f32 %v691_v63, %v1702_v17  ;;  %v810_v1 = vpop.f32.mrf.mxu3 }
 0x134   : > { %v811_v2 = vadd.f32 %v810_v1, %v1704_v18  ;;  %v638_v3 = vpop.f32.mrf.mxu0 }
 0x135   : > { %903 = vst [vmem:[%s1714_s12 + $0x220] sm:$0xff] %v692_v0  ;;  %v639_v4 = vadd.f32 %v638_v3, %v1702_v17  ;;  %v757_v5 = vpop.f32.mrf.mxu1 }
 0x136   : > { %904 = vst [vmem:[%s1714_s12 + $0x228] sm:$0xff] %v811_v2  ;;  %v758_v6 = vadd.f32 %v757_v5, %v1704_v18 }
 0x137   : > { %861 = vst [vmem:[%s1714_s12 + $0xd0] sm:$0xff] %v639_v4 }
 0x138   : > { %862 = vst [vmem:[%s1714_s12 + $0xd8] sm:$0xff] %v758_v6 }
 0x13a   : > { %v693_v7 = vpop.f32.mrf.mxu2 }
 0x13b   : > { %v694_v8 = vadd.f32 %v693_v7, %v1702_v17  ;;  %v812_v9 = vpop.f32.mrf.mxu3 }
 0x13c   : > { %v813_v10 = vadd.f32 %v812_v9, %v1704_v18  ;;  %v641_v11 = vpop.f32.mrf.mxu0 }
 0x13d   : > { %905 = vst [vmem:[%s1714_s12 + $0x230] sm:$0xff] %v694_v8  ;;  %v642_v12 = vadd.f32 %v641_v11, %v1702_v17  ;;  %v760_v13 = vpop.f32.mrf.mxu1 }
 0x13e   : > { %906 = vst [vmem:[%s1714_s12 + $0x238] sm:$0xff] %v813_v10  ;;  %v761_v14 = vadd.f32 %v760_v13, %v1704_v18  ;;  %v950_v13 = vld [vmem:[%s1714_s12 + $0x8] sm:$0xff] (%p1578_p6) }
 0x13f   : > { %863 = vst [vmem:[%s1714_s12 + $0xe0] sm:$0xff] %v642_v12 }
 0x140   : > { %864 = vst [vmem:[%s1714_s12 + $0xe8] sm:$0xff] %v761_v14  ;;  %v954_v14 = vld [vmem:[%s1714_s12 + $0x18] sm:$0xff] (%p1578_p6) }
 0x141   : > { %951 = vst [vmem:[%s1910_s29 + $0x8] sm:$0xff] (%p1578_p6), %v950_v13  ;;  %v1078_v13 = vld [vmem:[%s1714_s12 + $0x208] sm:$0xff] (%p1578_p6) }
 0x142   : > { %v696_v15 = vpop.f32.mrf.mxu2  ;;  %955 = vst [vmem:[%s1910_s29 + $0x58] sm:$0xff] (%p1578_p6), %v954_v14  ;;  %v1082_v14 = vld [vmem:[%s1714_s12 + $0x218] sm:$0xff] (%p1578_p6) }
 0x143   : > { %v697_v16 = vadd.f32 %v696_v15, %v1702_v17  ;;  %v815_v19 = vpop.f32.mrf.mxu3  ;;  %v956_v15 = vld [vmem:[%s1714_s12 + $0x20] sm:$0xff] (%p1578_p6)  ;;  %1079 = vst [vmem:[%s1910_s29 + $0xa08] sm:$0xff] (%p1578_p6), %v1078_v13 }
 0x144   : > { %v816_v20 = vadd.f32 %v815_v19, %v1704_v18  ;;  %v643_v21 = vpop.f32.mrf.mxu0  ;;  %v960_v19 = vld [vmem:[%s1714_s12 + $0x30] sm:$0xff] (%p1578_p6)  ;;  %957 = vst [vmem:[%s1910_s29 + $0xa0] sm:$0xff] (%p1578_p6), %v956_v15  ;;  %v1084_v15 = vld [vmem:[%s1714_s12 + $0x220] sm:$0xff] (%p1578_p6) }
 0x145   : > { %907 = vst [vmem:[%s1714_s12 + $0x240] sm:$0xff] %v697_v16  ;;  %v644_v22 = vadd.f32 %v643_v21, %v1702_v17  ;;  %v762_v23 = vpop.f32.mrf.mxu1  ;;  %v958_v16 = vld [vmem:[%s1714_s12 + $0x28] sm:$0xff] (%p1578_p6)  ;;  %v964_v21 = vld [vmem:[%s1714_s12 + $0x40] sm:$0xff] (%p1578_p6) }
 0x146   : > { %908 = vst [vmem:[%s1714_s12 + $0x248] sm:$0xff] %v816_v20  ;;  %v763_v24 = vadd.f32 %v762_v23, %v1704_v18  ;;  %v962_v20 = vld [vmem:[%s1714_s12 + $0x38] sm:$0xff] (%p1578_p6)  ;;  %v968_v23 = vld [vmem:[%s1714_s12 + $0x50] sm:$0xff] (%p1578_p6) }
 0x147   : > { %865 = vst [vmem:[%s1714_s12 + $0xf0] sm:$0xff] %v644_v22  ;;  %v966_v22 = vld [vmem:[%s1714_s12 + $0x48] sm:$0xff] (%p1578_p6) }
 0x148   : > { %866 = vst [vmem:[%s1714_s12 + $0xf8] sm:$0xff] %v763_v24  ;;  %v970_v24 = vld [vmem:[%s1714_s12 + $0x58] sm:$0xff] (%p1578_p6) }
 0x149   : > { %959 = vst [vmem:[%s1910_s29 + $0xa8] sm:$0xff] (%p1578_p6), %v958_v16  ;;  %v1086_v16 = vld [vmem:[%s1714_s12 + $0x228] sm:$0xff] (%p1578_p6) }
 0x14a   : > { %v698_v25 = vpop.f32.mrf.mxu2  ;;  %961 = vst [vmem:[%s1910_s29 + $0xf0] sm:$0xff] (%p1578_p6), %v960_v19  ;;  %v1088_v19 = vld [vmem:[%s1714_s12 + $0x230] sm:$0xff] (%p1578_p6) }
 0x14b   : > { %v699_v26 = vadd.f32 %v698_v25, %v1702_v17  ;;  %v817_v27 = vpop.f32.mrf.mxu3  ;;  %963 = vst [vmem:[%s1910_s29 + $0xf8] sm:$0xff] (%p1578_p6), %v962_v20  ;;  %v972_v25 = vld [vmem:[%s1714_s12 + $0x60] sm:$0xff] (%p1578_p6)  ;;  %v1090_v20 = vld [vmem:[%s1714_s12 + $0x238] sm:$0xff] (%p1578_p6) }
 0x14c   : > { %v818_v28 = vadd.f32 %v817_v27, %v1704_v18  ;;  %v646_v29 = vpop.f32.mrf.mxu0  ;;  %965 = vst [vmem:[%s1910_s29 + $0x140] sm:$0xff] (%p1578_p6), %v964_v21  ;;  %v976_v27 = vld [vmem:[%s1714_s12 + $0x70] sm:$0xff] (%p1578_p6)  ;;  %v1092_v21 = vld [vmem:[%s1714_s12 + $0x240] sm:$0xff] (%p1578_p6) }
 0x14d   : > { %909 = vst [vmem:[%s1714_s12 + $0x250] sm:$0xff] %v699_v26  ;;  %v647_v30 = vadd.f32 %v646_v29, %v1702_v17  ;;  %v765_v31 = vpop.f32.mrf.mxu1  ;;  %v974_v26 = vld [vmem:[%s1714_s12 + $0x68] sm:$0xff] (%p1578_p6)  ;;  %v980_v29 = vld [vmem:[%s1714_s12 + $0x80] sm:$0xff] (%p1578_p6) }
 0x14e   : > { %910 = vst [vmem:[%s1714_s12 + $0x258] sm:$0xff] %v818_v28  ;;  %v766_v32 = vadd.f32 %v765_v31, %v1704_v18  ;;  %v978_v28 = vld [vmem:[%s1714_s12 + $0x78] sm:$0xff] (%p1578_p6)  ;;  %v984_v31 = vld [vmem:[%s1714_s12 + $0x90] sm:$0xff] (%p1578_p6) }
 0x14f   : > { %867 = vst [vmem:[%s1714_s12 + $0x100] sm:$0xff] %v647_v30  ;;  %v982_v30 = vld [vmem:[%s1714_s12 + $0x88] sm:$0xff] (%p1578_p6) }
 0x150   : > { %868 = vst [vmem:[%s1714_s12 + $0x108] sm:$0xff] %v766_v32  ;;  %v986_v32 = vld [vmem:[%s1714_s12 + $0x98] sm:$0xff] (%p1578_p6) }
 0x151   : > { %967 = vst [vmem:[%s1910_s29 + $0x148] sm:$0xff] (%p1578_p6), %v966_v22  ;;  %v1094_v22 = vld [vmem:[%s1714_s12 + $0x248] sm:$0xff] (%p1578_p6) }
 0x152   : > { %v701_v33 = vpop.f32.mrf.mxu2  ;;  %969 = vst [vmem:[%s1910_s29 + $0x190] sm:$0xff] (%p1578_p6), %v968_v23 }
 0x153   : > { %v702_v34 = vadd.f32 %v701_v33, %v1702_v17  ;;  %v820_v35 = vpop.f32.mrf.mxu3  ;;  %971 = vst [vmem:[%s1910_s29 + $0x198] sm:$0xff] (%p1578_p6), %v970_v24  ;;  %v988_v33 = vld [vmem:[%s1714_s12 + $0xa0] sm:$0xff] (%p1578_p6) }
 0x154   : > { %v821_v36 = vadd.f32 %v820_v35, %v1704_v18  ;;  %v648_v37 = vpop.f32.mrf.mxu0  ;;  %973 = vst [vmem:[%s1910_s29 + $0x1e0] sm:$0xff] (%p1578_p6), %v972_v25  ;;  %v992_v35 = vld [vmem:[%s1714_s12 + $0xb0] sm:$0xff] (%p1578_p6) }
 0x155   : > { %911 = vst [vmem:[%s1714_s12 + $0x260] sm:$0xff] %v702_v34  ;;  %v649_v38 = vadd.f32 %v648_v37, %v1702_v17  ;;  %v767_v39 = vpop.f32.mrf.mxu1  ;;  %v990_v34 = vld [vmem:[%s1714_s12 + $0xa8] sm:$0xff] (%p1578_p6)  ;;  %v996_v37 = vld [vmem:[%s1714_s12 + $0xc0] sm:$0xff] (%p1578_p6)  ;;  %v1096_v23 = vld [vmem:[%s1714_s12 + $0x250] sm:$0xff] (%p1578_p6) }
 0x156   : > { %912 = vst [vmem:[%s1714_s12 + $0x268] sm:$0xff] %v821_v36  ;;  %v768_v40 = vadd.f32 %v767_v39, %v1704_v18  ;;  %v994_v36 = vld [vmem:[%s1714_s12 + $0xb8] sm:$0xff] (%p1578_p6)  ;;  %v1000_v39 = vld [vmem:[%s1714_s12 + $0xd0] sm:$0xff] (%p1578_p6) }
 0x157   : > { %869 = vst [vmem:[%s1714_s12 + $0x110] sm:$0xff] %v649_v38  ;;  %v998_v38 = vld [vmem:[%s1714_s12 + $0xc8] sm:$0xff] (%p1578_p6)  ;;  %v1098_v24 = vld [vmem:[%s1714_s12 + $0x258] sm:$0xff] (%p1578_p6) }
 0x158   : > { %870 = vst [vmem:[%s1714_s12 + $0x118] sm:$0xff] %v768_v40  ;;  %v1002_v40 = vld [vmem:[%s1714_s12 + $0xd8] sm:$0xff] (%p1578_p6) }
 0x159   : > { %975 = vst [vmem:[%s1910_s29 + $0x1e8] sm:$0xff] (%p1578_p6), %v974_v26 }
 0x15a   : > { %v703_v41 = vpop.f32.mrf.mxu2  ;;  %977 = vst [vmem:[%s1910_s29 + $0x230] sm:$0xff] (%p1578_p6), %v976_v27 }
 0x15b   : > { %v704_v42 = vadd.f32 %v703_v41, %v1702_v17  ;;  %v822_v43 = vpop.f32.mrf.mxu3  ;;  %979 = vst [vmem:[%s1910_s29 + $0x238] sm:$0xff] (%p1578_p6), %v978_v28  ;;  %v1004_v41 = vld [vmem:[%s1714_s12 + $0xe0] sm:$0xff] (%p1578_p6) }
 0x15c   : > { %v823_v44 = vadd.f32 %v822_v43, %v1704_v18  ;;  %v651_v45 = vpop.f32.mrf.mxu0  ;;  %981 = vst [vmem:[%s1910_s29 + $0x280] sm:$0xff] (%p1578_p6), %v980_v29  ;;  %v1008_v43 = vld [vmem:[%s1714_s12 + $0xf0] sm:$0xff] (%p1578_p6)  ;;  %v1100_v25 = vld [vmem:[%s1714_s12 + $0x260] sm:$0xff] (%p1578_p6) }
 0x15d   : > { %913 = vst [vmem:[%s1714_s12 + $0x270] sm:$0xff] %v704_v42  ;;  %v652_v46 = vadd.f32 %v651_v45, %v1702_v17  ;;  %v770_v47 = vpop.f32.mrf.mxu1  ;;  %v1006_v42 = vld [vmem:[%s1714_s12 + $0xe8] sm:$0xff] (%p1578_p6)  ;;  %v1012_v45 = vld [vmem:[%s1714_s12 + $0x100] sm:$0xff] (%p1578_p6) }
 0x15e   : > { %914 = vst [vmem:[%s1714_s12 + $0x278] sm:$0xff] %v823_v44  ;;  %v771_v48 = vadd.f32 %v770_v47, %v1704_v18  ;;  %v1010_v44 = vld [vmem:[%s1714_s12 + $0xf8] sm:$0xff] (%p1578_p6)  ;;  %v1016_v47 = vld [vmem:[%s1714_s12 + $0x110] sm:$0xff] (%p1578_p6)  ;;  %v1102_v26 = vld [vmem:[%s1714_s12 + $0x268] sm:$0xff] (%p1578_p6) }
 0x15f   : > { %871 = vst [vmem:[%s1714_s12 + $0x120] sm:$0xff] %v652_v46  ;;  %v1014_v46 = vld [vmem:[%s1714_s12 + $0x108] sm:$0xff] (%p1578_p6) }
 0x160   : > { %872 = vst [vmem:[%s1714_s12 + $0x128] sm:$0xff] %v771_v48  ;;  %v1018_v48 = vld [vmem:[%s1714_s12 + $0x118] sm:$0xff] (%p1578_p6) }
 0x161   : > { %983 = vst [vmem:[%s1910_s29 + $0x288] sm:$0xff] (%p1578_p6), %v982_v30 }
 0x162   : > { %v706_v49 = vpop.f32.mrf.mxu2  ;;  %985 = vst [vmem:[%s1910_s29 + $0x2d0] sm:$0xff] (%p1578_p6), %v984_v31 }
 0x163   : > { %v707_v50 = vadd.f32 %v706_v49, %v1702_v17  ;;  %v825_v51 = vpop.f32.mrf.mxu3  ;;  %987 = vst [vmem:[%s1910_s29 + $0x2d8] sm:$0xff] (%p1578_p6), %v986_v32 }
 0x164   : > { %v826_v52 = vadd.f32 %v825_v51, %v1704_v18  ;;  %v653_v53 = vpop.f32.mrf.mxu0  ;;  %989 = vst [vmem:[%s1910_s29 + $0x320] sm:$0xff] (%p1578_p6), %v988_v33  ;;  %v1104_v27 = vld [vmem:[%s1714_s12 + $0x270] sm:$0xff] (%p1578_p6) }
 0x165   : > { %915 = vst [vmem:[%s1714_s12 + $0x280] sm:$0xff] %v707_v50  ;;  %v654_v54 = vadd.f32 %v653_v53, %v1702_v17  ;;  %v772_v55 = vpop.f32.mrf.mxu1  ;;  %v1106_v28 = vld [vmem:[%s1714_s12 + $0x278] sm:$0xff] (%p1578_p6) }
 0x166   : > { %916 = vst [vmem:[%s1714_s12 + $0x288] sm:$0xff] %v826_v52  ;;  %v773_v56 = vadd.f32 %v772_v55, %v1704_v18  ;;  %v1020_v49 = vld [vmem:[%s1714_s12 + $0x120] sm:$0xff] (%p1578_p6) }
 0x167   : > { %873 = vst [vmem:[%s1714_s12 + $0x130] sm:$0xff] %v654_v54  ;;  %v1022_v50 = vld [vmem:[%s1714_s12 + $0x128] sm:$0xff] (%p1578_p6) }
 0x168   : > { %874 = vst [vmem:[%s1714_s12 + $0x138] sm:$0xff] %v773_v56 }
 0x169   : > { %991 = vst [vmem:[%s1910_s29 + $0x328] sm:$0xff] (%p1578_p6), %v990_v34 }
 0x16a   : > { %v708_v57 = vpop.f32.mrf.mxu2  ;;  %993 = vst [vmem:[%s1910_s29 + $0x370] sm:$0xff] (%p1578_p6), %v992_v35 }
 0x16b   : > { %v709_v58 = vadd.f32 %v708_v57, %v1702_v17  ;;  %v827_v59 = vpop.f32.mrf.mxu3  ;;  %995 = vst [vmem:[%s1910_s29 + $0x378] sm:$0xff] (%p1578_p6), %v994_v36  ;;  %v1036_v57 = vld [vmem:[%s1714_s12 + $0x160] sm:$0xff] (%p1578_p6) }
 0x16c   : > { %v828_v60 = vadd.f32 %v827_v59, %v1704_v18  ;;  %v656_v61 = vpop.f32.mrf.mxu0  ;;  %997 = vst [vmem:[%s1910_s29 + $0x3c0] sm:$0xff] (%p1578_p6), %v996_v37  ;;  %v1040_v59 = vld [vmem:[%s1714_s12 + $0x170] sm:$0xff] (%p1578_p6)  ;;  %v1108_v29 = vld [vmem:[%s1714_s12 + $0x280] sm:$0xff] (%p1578_p6) }
 0x16d   : > { %917 = vst [vmem:[%s1714_s12 + $0x290] sm:$0xff] %v709_v58  ;;  %v657_v62 = vadd.f32 %v656_v61, %v1702_v17  ;;  %v775_v63 = vpop.f32.mrf.mxu1  ;;  %v1038_v58 = vld [vmem:[%s1714_s12 + $0x168] sm:$0xff] (%p1578_p6)  ;;  %v1044_v61 = vld [vmem:[%s1714_s12 + $0x180] sm:$0xff] (%p1578_p6) }
 0x16e   : > { %918 = vst [vmem:[%s1714_s12 + $0x298] sm:$0xff] %v828_v60  ;;  %v776_v0 = vadd.f32 %v775_v63, %v1704_v18  ;;  %v1024_v51 = vld [vmem:[%s1714_s12 + $0x130] sm:$0xff] (%p1578_p6)  ;;  %v1042_v60 = vld [vmem:[%s1714_s12 + $0x178] sm:$0xff] (%p1578_p6)  ;;  %v1110_v30 = vld [vmem:[%s1714_s12 + $0x288] sm:$0xff] (%p1578_p6) }
 0x16f   : > { %875 = vst [vmem:[%s1714_s12 + $0x140] sm:$0xff] %v657_v62  ;;  %v1026_v52 = vld [vmem:[%s1714_s12 + $0x138] sm:$0xff] (%p1578_p6)  ;;  %v1046_v62 = vld [vmem:[%s1714_s12 + $0x188] sm:$0xff] (%p1578_p6)  ;;  %v1048_v63 = vld [vmem:[%s1714_s12 + $0x190] sm:$0xff] (%p1578_p6) }
 0x170   : > { %876 = vst [vmem:[%s1714_s12 + $0x148] sm:$0xff] %v776_v0  ;;  %v1050_v0 = vld [vmem:[%s1714_s12 + $0x198] sm:$0xff] (%p1578_p6) }
 0x171   : > { %999 = vst [vmem:[%s1910_s29 + $0x3c8] sm:$0xff] (%p1578_p6), %v998_v38 }
 0x172   : > { %v711_v1 = vpop.f32.mrf.mxu2  ;;  %1001 = vst [vmem:[%s1910_s29 + $0x410] sm:$0xff] (%p1578_p6), %v1000_v39 }
 0x173   : > { %v712_v2 = vadd.f32 %v711_v1, %v1702_v17  ;;  %v830_v3 = vpop.f32.mrf.mxu3  ;;  %1003 = vst [vmem:[%s1910_s29 + $0x418] sm:$0xff] (%p1578_p6), %v1002_v40  ;;  %v1052_v1 = vld [vmem:[%s1714_s12 + $0x1a0] sm:$0xff] (%p1578_p6) }
 0x174   : > { %v831_v4 = vadd.f32 %v830_v3, %v1704_v18  ;;  %v658_v5 = vpop.f32.mrf.mxu0  ;;  %1005 = vst [vmem:[%s1910_s29 + $0x460] sm:$0xff] (%p1578_p6), %v1004_v41  ;;  %v1056_v3 = vld [vmem:[%s1714_s12 + $0x1b0] sm:$0xff] (%p1578_p6) }
 0x175   : > { %919 = vst [vmem:[%s1714_s12 + $0x2a0] sm:$0xff] %v712_v2  ;;  %v659_v6 = vadd.f32 %v658_v5, %v1702_v17  ;;  %v777_v7 = vpop.f32.mrf.mxu1  ;;  %v1054_v2 = vld [vmem:[%s1714_s12 + $0x1a8] sm:$0xff] (%p1578_p6)  ;;  %v1060_v5 = vld [vmem:[%s1714_s12 + $0x1c0] sm:$0xff] (%p1578_p6)  ;;  %v1112_v31 = vld [vmem:[%s1714_s12 + $0x290] sm:$0xff] (%p1578_p6) }
 0x176   : > { %920 = vst [vmem:[%s1714_s12 + $0x2a8] sm:$0xff] %v831_v4  ;;  %v778_v8 = vadd.f32 %v777_v7, %v1704_v18  ;;  %v1028_v53 = vld [vmem:[%s1714_s12 + $0x140] sm:$0xff] (%p1578_p6)  ;;  %v1058_v4 = vld [vmem:[%s1714_s12 + $0x1b8] sm:$0xff] (%p1578_p6)  ;;  %v1064_v7 = vld [vmem:[%s1714_s12 + $0x1d0] sm:$0xff] (%p1578_p6) }
 0x177   : > { %877 = vst [vmem:[%s1714_s12 + $0x150] sm:$0xff] %v659_v6  ;;  %v1030_v54 = vld [vmem:[%s1714_s12 + $0x148] sm:$0xff] (%p1578_p6)  ;;  %v1114_v32 = vld [vmem:[%s1714_s12 + $0x298] sm:$0xff] (%p1578_p6) }
 0x178   : > { %878 = vst [vmem:[%s1714_s12 + $0x158] sm:$0xff] %v778_v8  ;;  %v1062_v6 = vld [vmem:[%s1714_s12 + $0x1c8] sm:$0xff] (%p1578_p6)  ;;  %v1066_v8 = vld [vmem:[%s1714_s12 + $0x1d8] sm:$0xff] (%p1578_p6) }
 0x179   : > { %1007 = vst [vmem:[%s1910_s29 + $0x468] sm:$0xff] (%p1578_p6), %v1006_v42 }
 0x17a   : > { %v713_v9 = vpop.f32.mrf.mxu2  ;;  %929 = sbr.rel (!%p1578_p6) target bundleno = 439 (0x1b7), region = 74  ;;  %1009 = vst [vmem:[%s1910_s29 + $0x4b0] sm:$0xff] (%p1578_p6), %v1008_v43 }
 0x17b   : > { %v714_v10 = vadd.f32 %v713_v9, %v1702_v17  ;;  %v832_v11 = vpop.f32.mrf.mxu3  ;;  %v948_v17 = vld [vmem:[%s1714_s12] sm:$0xff] (%p1578_p6)  ;;  %1011 = vst [vmem:[%s1910_s29 + $0x4b8] sm:$0xff] (%p1578_p6), %v1010_v44 }
 0x17c   : > { %v833_v12 = vadd.f32 %v832_v11, %v1704_v18  ;;  %v952_v18 = vld [vmem:[%s1714_s12 + $0x10] sm:$0xff] (%p1578_p6)  ;;  %949 = vst [vmem:[%s1910_s29] sm:$0xff] (%p1578_p6), %v948_v17  ;;  %v1068_v9 = vld [vmem:[%s1714_s12 + $0x1e0] sm:$0xff] (%p1578_p6) }
 0x17d   : > { %921 = vst [vmem:[%s1714_s12 + $0x2b0] sm:$0xff] %v714_v10  ;;  %v1070_v10 = vld [vmem:[%s1714_s12 + $0x1e8] sm:$0xff] (%p1578_p6)  ;;  %v1072_v11 = vld [vmem:[%s1714_s12 + $0x1f0] sm:$0xff] (%p1578_p6)  ;;  %v1076_v17 = vld [vmem:[%s1714_s12 + $0x200] sm:$0xff] (%p1578_p6) }
 0x17e   : > { %922 = vst [vmem:[%s1714_s12 + $0x2b8] sm:$0xff] %v833_v12  ;;  %v1032_v55 = vld [vmem:[%s1714_s12 + $0x150] sm:$0xff] (%p1578_p6)  ;;  %v1074_v12 = vld [vmem:[%s1714_s12 + $0x1f8] sm:$0xff] (%p1578_p6)  ;;  %v1116_v33 = vld [vmem:[%s1714_s12 + $0x2a0] sm:$0xff] (%p1578_p6) }
 0x17f   : > { %953 = vst [vmem:[%s1910_s29 + $0x50] sm:$0xff] %v952_v18  ;;  %v1034_v56 = vld [vmem:[%s1714_s12 + $0x158] sm:$0xff]  ;;  %v1080_v18 = vld [vmem:[%s1714_s12 + $0x210] sm:$0xff]  ;;  %v1118_v34 = vld [vmem:[%s1714_s12 + $0x2a8] sm:$0xff] }
 0x180   : > { %1013 = vst [vmem:[%s1910_s29 + $0x500] sm:$0xff] %v1012_v45 }
 0x181   : > { %1015 = vst [vmem:[%s1910_s29 + $0x508] sm:$0xff] %v1014_v46 }
 0x182   : > { %1017 = vst [vmem:[%s1910_s29 + $0x550] sm:$0xff] %v1016_v47 }
 0x183   : > { %1019 = vst [vmem:[%s1910_s29 + $0x558] sm:$0xff] %v1018_v48 }
 0x184   : > { %1021 = vst [vmem:[%s1910_s29 + $0x5a0] sm:$0xff] %v1020_v49  ;;  %v1120_v35 = vld [vmem:[%s1714_s12 + $0x2b0] sm:$0xff] }
 0x185   : > { %1023 = vst [vmem:[%s1910_s29 + $0x5a8] sm:$0xff] %v1022_v50  ;;  %v1122_v36 = vld [vmem:[%s1714_s12 + $0x2b8] sm:$0xff] }
 0x186   : > { %1025 = vst [vmem:[%s1910_s29 + $0x5f0] sm:$0xff] %v1024_v51 }
 0x187   : > { %1027 = vst [vmem:[%s1910_s29 + $0x5f8] sm:$0xff] %v1026_v52 }
 0x188   : > { %1029 = vst [vmem:[%s1910_s29 + $0x640] sm:$0xff] %v1028_v53 }
 0x189   : > { %1031 = vst [vmem:[%s1910_s29 + $0x648] sm:$0xff] %v1030_v54 }
 0x18a   : > { %1033 = vst [vmem:[%s1910_s29 + $0x690] sm:$0xff] %v1032_v55 }
 0x18b   : > { %1035 = vst [vmem:[%s1910_s29 + $0x698] sm:$0xff] %v1034_v56 }
 0x18c   : > { %1037 = vst [vmem:[%s1910_s29 + $0x6e0] sm:$0xff] %v1036_v57 }
 0x18d   : > { %1039 = vst [vmem:[%s1910_s29 + $0x6e8] sm:$0xff] %v1038_v58 }
 0x18e   : > { %1041 = vst [vmem:[%s1910_s29 + $0x730] sm:$0xff] %v1040_v59 }
 0x18f   : > { %1043 = vst [vmem:[%s1910_s29 + $0x738] sm:$0xff] %v1042_v60 }
 0x190   : > { %1045 = vst [vmem:[%s1910_s29 + $0x780] sm:$0xff] %v1044_v61 }
 0x191   : > { %1047 = vst [vmem:[%s1910_s29 + $0x788] sm:$0xff] %v1046_v62 }
 0x192   : > { %1049 = vst [vmem:[%s1910_s29 + $0x7d0] sm:$0xff] %v1048_v63 }
 0x193   : > { %1051 = vst [vmem:[%s1910_s29 + $0x7d8] sm:$0xff] %v1050_v0 }
 0x194   : > { %1053 = vst [vmem:[%s1910_s29 + $0x820] sm:$0xff] %v1052_v1 }
 0x195   : > { %1055 = vst [vmem:[%s1910_s29 + $0x828] sm:$0xff] %v1054_v2 }
 0x196   : > { %1057 = vst [vmem:[%s1910_s29 + $0x870] sm:$0xff] %v1056_v3 }
 0x197   : > { %1059 = vst [vmem:[%s1910_s29 + $0x878] sm:$0xff] %v1058_v4 }
 0x198   : > { %1061 = vst [vmem:[%s1910_s29 + $0x8c0] sm:$0xff] %v1060_v5 }
 0x199   : > { %1063 = vst [vmem:[%s1910_s29 + $0x8c8] sm:$0xff] %v1062_v6 }
 0x19a   : > { %1065 = vst [vmem:[%s1910_s29 + $0x910] sm:$0xff] %v1064_v7 }
 0x19b   : > { %1067 = vst [vmem:[%s1910_s29 + $0x918] sm:$0xff] %v1066_v8 }
 0x19c   : > { %1069 = vst [vmem:[%s1910_s29 + $0x960] sm:$0xff] %v1068_v9 }
 0x19d   : > { %1071 = vst [vmem:[%s1910_s29 + $0x968] sm:$0xff] %v1070_v10 }
 0x19e   : > { %1073 = vst [vmem:[%s1910_s29 + $0x9b0] sm:$0xff] %v1072_v11 }
 0x19f   : > { %1075 = vst [vmem:[%s1910_s29 + $0x9b8] sm:$0xff] %v1074_v12 }
 0x1a0   : > { %1077 = vst [vmem:[%s1910_s29 + $0xa00] sm:$0xff] %v1076_v17 }
 0x1a1   : > { %1081 = vst [vmem:[%s1910_s29 + $0xa50] sm:$0xff] %v1080_v18 }
 0x1a2   : > { %1083 = vst [vmem:[%s1910_s29 + $0xa58] sm:$0xff] %v1082_v14 }
 0x1a3   : > { %1085 = vst [vmem:[%s1910_s29 + $0xaa0] sm:$0xff] %v1084_v15 }
 0x1a4   : > { %1087 = vst [vmem:[%s1910_s29 + $0xaa8] sm:$0xff] %v1086_v16 }
 0x1a5   : > { %1089 = vst [vmem:[%s1910_s29 + $0xaf0] sm:$0xff] %v1088_v19 }
 0x1a6   : > { %1091 = vst [vmem:[%s1910_s29 + $0xaf8] sm:$0xff] %v1090_v20 }
 0x1a7   : > { %1093 = vst [vmem:[%s1910_s29 + $0xb40] sm:$0xff] %v1092_v21 }
 0x1a8   : > { %1095 = vst [vmem:[%s1910_s29 + $0xb48] sm:$0xff] %v1094_v22 }
 0x1a9   : > { %1097 = vst [vmem:[%s1910_s29 + $0xb90] sm:$0xff] %v1096_v23 }
 0x1aa   : > { %1099 = vst [vmem:[%s1910_s29 + $0xb98] sm:$0xff] %v1098_v24 }
 0x1ab   : > { %1101 = vst [vmem:[%s1910_s29 + $0xbe0] sm:$0xff] %v1100_v25 }
 0x1ac   : > { %1103 = vst [vmem:[%s1910_s29 + $0xbe8] sm:$0xff] %v1102_v26 }
 0x1ad   : > { %1105 = vst [vmem:[%s1910_s29 + $0xc30] sm:$0xff] %v1104_v27 }
 0x1ae   : > { %1107 = vst [vmem:[%s1910_s29 + $0xc38] sm:$0xff] %v1106_v28 }
 0x1af   : > { %1109 = vst [vmem:[%s1910_s29 + $0xc80] sm:$0xff] %v1108_v29 }
 0x1b0   : > { %1111 = vst [vmem:[%s1910_s29 + $0xc88] sm:$0xff] %v1110_v30 }
 0x1b1   : > { %1113 = vst [vmem:[%s1910_s29 + $0xcd0] sm:$0xff] %v1112_v31 }
 0x1b2   : > { %1115 = vst [vmem:[%s1910_s29 + $0xcd8] sm:$0xff] %v1114_v32 }
 0x1b3   : > { %1117 = vst [vmem:[%s1910_s29 + $0xd20] sm:$0xff] %v1116_v33 }
 0x1b4   : > { %1119 = vst [vmem:[%s1910_s29 + $0xd28] sm:$0xff] %v1118_v34 }
 0x1b5   : > { %1121 = vst [vmem:[%s1910_s29 + $0xd70] sm:$0xff] %v1120_v35 }
 0x1b6   : > { %1123 = vst [vmem:[%s1910_s29 + $0xd78] sm:$0xff] %v1122_v36 }
 0x1b7 PF: > { %s13_s16 = sadd.s32 1, %s1521_s16   ;;  %s2106_s12 = smov %s1509_s13 }
 0x1b8   : > { %p10_p12 = scmp.ge.s32.totalorder %s13_s16, 7   ;;  %s2107_s13 = smov %s1583_s22 }
 0x1b9   : > { %s2108_s14 = smov %s1517_s15  ;;  %s2109_s15 = smov %s2111_s17 }
 0x1ba   :  { %12 = sbr.rel (!%p10_p12) target bundleno = 3 (0x3), region = 134 }

// kernel: _lambda_.19
= control target key start
LH: loop header
LB: loop body
LE: loop exit
PB: predicated region body
PF: predicated region fallthrough
CT: control target
= control target key end

     0   :  { %s1190_s12 = smov 0   ;;  %s1192_s13 = smov 0   ;;  %s1423_s0 = inlined_call_operand.vmem [shape: bf16[2048,128], index: 0, kind: input, shape index: {}]   ;;  %s1424_s1 = inlined_call_operand.vmem [shape: bf16[128,128], index: 1, kind: input, shape index: {}]   ;;  %s1425_s2 = inlined_call_operand.vmem [shape: f32[1,128], index: 2, kind: input, shape index: {}]   ;;  %s1426_s3 = inlined_call_operand.vmem [shape: f32[2048,128], index: 3, kind: output, shape index: {}]  }
   0x1   :  { %s1194_s14 = smov 0  }
   0x2 LB: > { %s25_s15 = sadd.s32 1, %s1164_s13  ;;  %p890_p0 = scmp.ge.s32.totalorder %s1168_s14, 1  ;;  %s1168_s14 = sphi %s1194_s14, %s13_s14   ;;  %s1164_s13 = sphi %s1192_s13, %s1428_s13   ;;  %s1160_s12 = sphi %s1190_s12, %s1427_s12  }
   0x3   : > { %p27_p1 = scmp.ge.s32.totalorder %s25_s15, 4  ;;  %p169_p2 = scmp.lt.s32.totalorder %s1168_s14, 5 }
   0x5   : > { %s1430_s15 = smov (%p27_p1, %s25_s15), 0  ;;  %p170_p3 = pnand %p890_p0, %p169_p2 }
   0x6   : > { %s891_s24 = sshll.u32 (!%p170_p3), %s1160_s12, 6 }
   0x7   : > { %173 = sbr.rel (%p170_p3) target bundleno = 301 (0x12d), region = 32  ;;  %p204_p4 = scmp.lt.s32.totalorder (!%p170_p3), %s891_s24, 255 }
   0xc   : > { %v1096_v0 = vld [vmem:[%s1424_s1 + $0x38] sm:$0xff]  ;;  %v1095_v1 = vld [vmem:[%s1424_s1 + $0x30] sm:$0xff]  ;;  %v1094_v2 = vld [vmem:[%s1424_s1 + $0x28] sm:$0xff]  ;;  %s1432_s24 = smov (!%p204_p4, %s891_s24), 255 }
   0xd   : > { %549 = vmatpush.bf16.msra.mxu0 %v1096_v0  ;;  %1097 = vmatpush.bf16.msra.mxu1 %v1096_v0  ;;  %v1093_v3 = vld [vmem:[%s1424_s1 + $0x20] sm:$0xff]  ;;  %v1092_v4 = vld [vmem:[%s1424_s1 + $0x18] sm:$0xff]  ;;  %v1091_v5 = vld [vmem:[%s1424_s1 + $0x10] sm:$0xff]  ;;  %s892_s4 = sshll.u32 %s1432_s24, 2  ;;  %s894_s10 = sshll.u32 %s1432_s24, 3 }
   0xe   : > { %1098 = vmatpush.bf16.msra.mxu2 %v1096_v0  ;;  %1099 = vmatpush.bf16.msra.mxu3 %v1096_v0  ;;  %v1090_v6 = vld [vmem:[%s1424_s1 + $0x8] sm:$0xff]  ;;  %v1089_v7 = vld [vmem:[%s1424_s1] sm:$0xff]  ;;  %s1241_s9 = scalar_lea.vmem %s1423_s0, %s892_s4  ;;  %s1284_s18 = scalar_lea.vmem %s1426_s3, %s894_s10 }
   0xf   : > { %v1057_v8 = vld [vmem:[%s1241_s9] sm:$0xff]  ;;  %v1058_v12 = vld [vmem:[%s1241_s9 + $0x8] sm:$0xff]  ;;  %v1059_v16 = vld [vmem:[%s1241_s9 + $0x10] sm:$0xff] }
  0x10   : > { %v1065_v9 = vld [vmem:[%s1241_s9 + $0x40] sm:$0xff]  ;;  %v1066_v13 = vld [vmem:[%s1241_s9 + $0x48] sm:$0xff]  ;;  %v1067_v17 = vld [vmem:[%s1241_s9 + $0x50] sm:$0xff] }
  0x11   : > { %550 = vmatpush.bf16.msra.mxu0 %v1095_v1  ;;  %1100 = vmatpush.bf16.msra.mxu1 %v1095_v1  ;;  %v1073_v10 = vld [vmem:[%s1241_s9 + $0x80] sm:$0xff]  ;;  %v1074_v14 = vld [vmem:[%s1241_s9 + $0x88] sm:$0xff]  ;;  %v1075_v18 = vld [vmem:[%s1241_s9 + $0x90] sm:$0xff] }
  0x12   : > { %1101 = vmatpush.bf16.msra.mxu2 %v1095_v1  ;;  %1102 = vmatpush.bf16.msra.mxu3 %v1095_v1  ;;  %v1081_v11 = vld [vmem:[%s1241_s9 + $0xc0] sm:$0xff]  ;;  %v1082_v15 = vld [vmem:[%s1241_s9 + $0xc8] sm:$0xff]  ;;  %v1083_v19 = vld [vmem:[%s1241_s9 + $0xd0] sm:$0xff] }
  0x13   : > { %v1060_v20 = vld [vmem:[%s1241_s9 + $0x18] sm:$0xff]  ;;  %v1061_v24 = vld [vmem:[%s1241_s9 + $0x20] sm:$0xff]  ;;  %v1062_v28 = vld [vmem:[%s1241_s9 + $0x28] sm:$0xff] }
  0x14   : > { %v1068_v21 = vld [vmem:[%s1241_s9 + $0x58] sm:$0xff]  ;;  %v1069_v25 = vld [vmem:[%s1241_s9 + $0x60] sm:$0xff]  ;;  %v1070_v29 = vld [vmem:[%s1241_s9 + $0x68] sm:$0xff] }
  0x15   : > { %551 = vmatpush.bf16.msra.mxu0 %v1094_v2  ;;  %1103 = vmatpush.bf16.msra.mxu1 %v1094_v2  ;;  %v1076_v22 = vld [vmem:[%s1241_s9 + $0x98] sm:$0xff]  ;;  %v1077_v26 = vld [vmem:[%s1241_s9 + $0xa0] sm:$0xff]  ;;  %v1078_v30 = vld [vmem:[%s1241_s9 + $0xa8] sm:$0xff] }
  0x16   : > { %1104 = vmatpush.bf16.msra.mxu2 %v1094_v2  ;;  %1105 = vmatpush.bf16.msra.mxu3 %v1094_v2  ;;  %v1084_v23 = vld [vmem:[%s1241_s9 + $0xd8] sm:$0xff]  ;;  %v1085_v27 = vld [vmem:[%s1241_s9 + $0xe0] sm:$0xff]  ;;  %v1086_v31 = vld [vmem:[%s1241_s9 + $0xe8] sm:$0xff] }
  0x17   : > { %v1063_v32 = vld [vmem:[%s1241_s9 + $0x30] sm:$0xff]  ;;  %v1064_v36 = vld [vmem:[%s1241_s9 + $0x38] sm:$0xff]  ;;  %v1279_v40 = vld [vmem:[%s1425_s2] ss:$0 sm:$0xff] }
  0x18   : > { %v1071_v33 = vld [vmem:[%s1241_s9 + $0x70] sm:$0xff]  ;;  %v1072_v37 = vld [vmem:[%s1241_s9 + $0x78] sm:$0xff] }
  0x19   : > { %552 = vmatpush.bf16.msra.mxu0 %v1093_v3  ;;  %1106 = vmatpush.bf16.msra.mxu1 %v1093_v3  ;;  %v1079_v34 = vld [vmem:[%s1241_s9 + $0xb0] sm:$0xff]  ;;  %v1080_v38 = vld [vmem:[%s1241_s9 + $0xb8] sm:$0xff] }
  0x1a   : > { %1107 = vmatpush.bf16.msra.mxu2 %v1093_v3  ;;  %1108 = vmatpush.bf16.msra.mxu3 %v1093_v3  ;;  %v1087_v35 = vld [vmem:[%s1241_s9 + $0xf0] sm:$0xff]  ;;  %v1088_v39 = vld [vmem:[%s1241_s9 + $0xf8] sm:$0xff] }
  0x1d   : > { %553 = vmatpush.bf16.msra.mxu0 %v1092_v4  ;;  %1109 = vmatpush.bf16.msra.mxu1 %v1092_v4 }
  0x1e   : > { %1110 = vmatpush.bf16.msra.mxu2 %v1092_v4  ;;  %1111 = vmatpush.bf16.msra.mxu3 %v1092_v4 }
  0x21   : > { %554 = vmatpush.bf16.msra.mxu0 %v1091_v5  ;;  %1112 = vmatpush.bf16.msra.mxu1 %v1091_v5 }
  0x22   : > { %1113 = vmatpush.bf16.msra.mxu2 %v1091_v5  ;;  %1114 = vmatpush.bf16.msra.mxu3 %v1091_v5 }
  0x25   : > { %555 = vmatpush.bf16.msra.mxu0 %v1090_v6  ;;  %1115 = vmatpush.bf16.msra.mxu1 %v1090_v6 }
  0x26   : > { %1116 = vmatpush.bf16.msra.mxu2 %v1090_v6  ;;  %1117 = vmatpush.bf16.msra.mxu3 %v1090_v6 }
  0x29   : > { %556 = vmatpush.bf16.msra.mxu0 %v1089_v7  ;;  %1118 = vmatpush.bf16.msra.mxu1 %v1089_v7 }
  0x2a   : > { %1119 = vmatpush.bf16.msra.mxu2 %v1089_v7  ;;  %1120 = vmatpush.bf16.msra.mxu3 %v1089_v7 }
  0x2c   : > { %557 = vmatmul.bf16.vlgmr.msra.gmra.mxu0 %v1057_v8  ;;  %597 = vmatmul.bf16.vlgmr.msra.gmra.mxu1 %v1065_v9 }
  0x2d   : > { %637 = vmatmul.bf16.vlgmr.msra.gmra.mxu2 %v1073_v10  ;;  %677 = vmatmul.bf16.vlgmr.msra.gmra.mxu3 %v1081_v11 }
  0x3c   : > { %562 = vmatmul.bf16.gmra.mxu0 %v1058_v12  ;;  %602 = vmatmul.bf16.gmra.mxu1 %v1066_v13 }
  0x3d   : > { %642 = vmatmul.bf16.gmra.mxu2 %v1074_v14  ;;  %682 = vmatmul.bf16.gmra.mxu3 %v1082_v15 }
  0x4c   : > { %567 = vmatmul.bf16.gmra.mxu0 %v1059_v16  ;;  %607 = vmatmul.bf16.gmra.mxu1 %v1067_v17 }
  0x4d   : > { %647 = vmatmul.bf16.gmra.mxu2 %v1075_v18  ;;  %687 = vmatmul.bf16.gmra.mxu3 %v1083_v19 }
  0x5c   : > { %572 = vmatmul.bf16.gmra.mxu0 %v1060_v20  ;;  %612 = vmatmul.bf16.gmra.mxu1 %v1068_v21 }
  0x5d   : > { %652 = vmatmul.bf16.gmra.mxu2 %v1076_v22  ;;  %692 = vmatmul.bf16.gmra.mxu3 %v1084_v23 }
  0x6c   : > { %577 = vmatmul.bf16.gmra.mxu0 %v1061_v24  ;;  %617 = vmatmul.bf16.gmra.mxu1 %v1069_v25 }
  0x6d   : > { %657 = vmatmul.bf16.gmra.mxu2 %v1077_v26  ;;  %697 = vmatmul.bf16.gmra.mxu3 %v1085_v27 }
  0x7c   : > { %582 = vmatmul.bf16.gmra.mxu0 %v1062_v28  ;;  %622 = vmatmul.bf16.gmra.mxu1 %v1070_v29 }
  0x7d   : > { %662 = vmatmul.bf16.gmra.mxu2 %v1078_v30  ;;  %702 = vmatmul.bf16.gmra.mxu3 %v1086_v31 }
  0x8c   : > { %587 = vmatmul.bf16.gmra.mxu0 %v1063_v32  ;;  %627 = vmatmul.bf16.gmra.mxu1 %v1071_v33 }
  0x8d   : > { %667 = vmatmul.bf16.gmra.mxu2 %v1079_v34  ;;  %707 = vmatmul.bf16.gmra.mxu3 %v1087_v35 }
  0x9c   : > { %592 = vmatmul.bf16.gmra.mxu0 %v1064_v36  ;;  %632 = vmatmul.bf16.gmra.mxu1 %v1072_v37 }
  0x9d   : > { %672 = vmatmul.bf16.gmra.mxu2 %v1080_v38  ;;  %712 = vmatmul.bf16.gmra.mxu3 %v1088_v39 }
  0xa9   : > { %v558_v41 = vpop.f32.mrf.mxu0  ;;  %v598_v42 = vpop.f32.mrf.mxu1 }
  0xaa   : > { %v559_v43 = vadd.f32 %v1279_v40, %v558_v41  ;;  %v599_v44 = vadd.f32 %v1279_v40, %v598_v42 }
  0xac   : > { %718 = vst [vmem:[%s1284_s18] sm:$0xff] %v559_v43 }
  0xad   : > { %734 = vst [vmem:[%s1284_s18 + $0x80] sm:$0xff] %v599_v44 }
  0xb0   : > { %v638_v45 = vpop.f32.mrf.mxu2  ;;  %v678_v46 = vpop.f32.mrf.mxu3 }
  0xb1   : > { %v639_v47 = vadd.f32 %v1279_v40, %v638_v45  ;;  %v679_v48 = vadd.f32 %v1279_v40, %v678_v46  ;;  %v560_v49 = vpop.f32.mrf.mxu0  ;;  %v600_v50 = vpop.f32.mrf.mxu1 }
  0xb2   : > { %v561_v51 = vadd.f32 %v1279_v40, %v560_v49  ;;  %v601_v52 = vadd.f32 %v1279_v40, %v600_v50 }
  0xb3   : > { %750 = vst [vmem:[%s1284_s18 + $0x100] sm:$0xff] %v639_v47 }
  0xb4   : > { %766 = vst [vmem:[%s1284_s18 + $0x180] sm:$0xff] %v679_v48 }
  0xb5   : > { %719 = vst [vmem:[%s1284_s18 + $0x8] sm:$0xff] %v561_v51 }
  0xb6   : > { %735 = vst [vmem:[%s1284_s18 + $0x88] sm:$0xff] %v601_v52 }
  0xb8   : > { %v640_v53 = vpop.f32.mrf.mxu2  ;;  %v680_v54 = vpop.f32.mrf.mxu3 }
  0xb9   : > { %v641_v55 = vadd.f32 %v1279_v40, %v640_v53  ;;  %v681_v56 = vadd.f32 %v1279_v40, %v680_v54  ;;  %v563_v57 = vpop.f32.mrf.mxu0  ;;  %v603_v58 = vpop.f32.mrf.mxu1 }
  0xba   : > { %v564_v59 = vadd.f32 %v1279_v40, %v563_v57  ;;  %v604_v60 = vadd.f32 %v1279_v40, %v603_v58 }
  0xbb   : > { %751 = vst [vmem:[%s1284_s18 + $0x108] sm:$0xff] %v641_v55 }
  0xbc   : > { %767 = vst [vmem:[%s1284_s18 + $0x188] sm:$0xff] %v681_v56 }
  0xbd   : > { %720 = vst [vmem:[%s1284_s18 + $0x10] sm:$0xff] %v564_v59 }
  0xbe   : > { %736 = vst [vmem:[%s1284_s18 + $0x90] sm:$0xff] %v604_v60 }
  0xc0   : > { %v643_v61 = vpop.f32.mrf.mxu2  ;;  %v683_v62 = vpop.f32.mrf.mxu3 }
  0xc1   : > { %v644_v63 = vadd.f32 %v1279_v40, %v643_v61  ;;  %v684_v0 = vadd.f32 %v1279_v40, %v683_v62  ;;  %v565_v1 = vpop.f32.mrf.mxu0  ;;  %v605_v2 = vpop.f32.mrf.mxu1 }
  0xc2   : > { %v566_v3 = vadd.f32 %v1279_v40, %v565_v1  ;;  %v606_v4 = vadd.f32 %v1279_v40, %v605_v2 }
  0xc3   : > { %752 = vst [vmem:[%s1284_s18 + $0x110] sm:$0xff] %v644_v63 }
  0xc4   : > { %768 = vst [vmem:[%s1284_s18 + $0x190] sm:$0xff] %v684_v0 }
  0xc5   : > { %721 = vst [vmem:[%s1284_s18 + $0x18] sm:$0xff] %v566_v3 }
  0xc6   : > { %737 = vst [vmem:[%s1284_s18 + $0x98] sm:$0xff] %v606_v4 }
  0xc8   : > { %v645_v5 = vpop.f32.mrf.mxu2  ;;  %v685_v6 = vpop.f32.mrf.mxu3 }
  0xc9   : > { %v646_v7 = vadd.f32 %v1279_v40, %v645_v5  ;;  %v686_v8 = vadd.f32 %v1279_v40, %v685_v6  ;;  %v568_v9 = vpop.f32.mrf.mxu0  ;;  %v608_v10 = vpop.f32.mrf.mxu1 }
  0xca   : > { %v569_v11 = vadd.f32 %v1279_v40, %v568_v9  ;;  %v609_v12 = vadd.f32 %v1279_v40, %v608_v10 }
  0xcb   : > { %753 = vst [vmem:[%s1284_s18 + $0x118] sm:$0xff] %v646_v7 }
  0xcc   : > { %769 = vst [vmem:[%s1284_s18 + $0x198] sm:$0xff] %v686_v8 }
  0xcd   : > { %722 = vst [vmem:[%s1284_s18 + $0x20] sm:$0xff] %v569_v11 }
  0xce   : > { %738 = vst [vmem:[%s1284_s18 + $0xa0] sm:$0xff] %v609_v12 }
  0xd0   : > { %v648_v13 = vpop.f32.mrf.mxu2  ;;  %v688_v14 = vpop.f32.mrf.mxu3 }
  0xd1   : > { %v649_v15 = vadd.f32 %v1279_v40, %v648_v13  ;;  %v689_v16 = vadd.f32 %v1279_v40, %v688_v14  ;;  %v570_v17 = vpop.f32.mrf.mxu0  ;;  %v610_v18 = vpop.f32.mrf.mxu1 }
  0xd2   : > { %v571_v19 = vadd.f32 %v1279_v40, %v570_v17  ;;  %v611_v20 = vadd.f32 %v1279_v40, %v610_v18 }
  0xd3   : > { %754 = vst [vmem:[%s1284_s18 + $0x120] sm:$0xff] %v649_v15 }
  0xd4   : > { %770 = vst [vmem:[%s1284_s18 + $0x1a0] sm:$0xff] %v689_v16 }
  0xd5   : > { %723 = vst [vmem:[%s1284_s18 + $0x28] sm:$0xff] %v571_v19 }
  0xd6   : > { %739 = vst [vmem:[%s1284_s18 + $0xa8] sm:$0xff] %v611_v20 }
  0xd8   : > { %v650_v21 = vpop.f32.mrf.mxu2  ;;  %v690_v22 = vpop.f32.mrf.mxu3 }
  0xd9   : > { %v651_v23 = vadd.f32 %v1279_v40, %v650_v21  ;;  %v691_v24 = vadd.f32 %v1279_v40, %v690_v22  ;;  %v573_v25 = vpop.f32.mrf.mxu0  ;;  %v613_v26 = vpop.f32.mrf.mxu1 }
  0xda   : > { %v574_v27 = vadd.f32 %v1279_v40, %v573_v25  ;;  %v614_v28 = vadd.f32 %v1279_v40, %v613_v26 }
  0xdb   : > { %755 = vst [vmem:[%s1284_s18 + $0x128] sm:$0xff] %v651_v23 }
  0xdc   : > { %771 = vst [vmem:[%s1284_s18 + $0x1a8] sm:$0xff] %v691_v24 }
  0xdd   : > { %724 = vst [vmem:[%s1284_s18 + $0x30] sm:$0xff] %v574_v27 }
  0xde   : > { %740 = vst [vmem:[%s1284_s18 + $0xb0] sm:$0xff] %v614_v28 }
  0xe0   : > { %v653_v29 = vpop.f32.mrf.mxu2  ;;  %v693_v30 = vpop.f32.mrf.mxu3 }
  0xe1   : > { %v654_v31 = vadd.f32 %v1279_v40, %v653_v29  ;;  %v694_v32 = vadd.f32 %v1279_v40, %v693_v30  ;;  %v575_v33 = vpop.f32.mrf.mxu0  ;;  %v615_v34 = vpop.f32.mrf.mxu1 }
  0xe2   : > { %v576_v35 = vadd.f32 %v1279_v40, %v575_v33  ;;  %v616_v36 = vadd.f32 %v1279_v40, %v615_v34 }
  0xe3   : > { %756 = vst [vmem:[%s1284_s18 + $0x130] sm:$0xff] %v654_v31 }
  0xe4   : > { %772 = vst [vmem:[%s1284_s18 + $0x1b0] sm:$0xff] %v694_v32 }
  0xe5   : > { %725 = vst [vmem:[%s1284_s18 + $0x38] sm:$0xff] %v576_v35 }
  0xe6   : > { %741 = vst [vmem:[%s1284_s18 + $0xb8] sm:$0xff] %v616_v36 }
  0xe8   : > { %v655_v37 = vpop.f32.mrf.mxu2  ;;  %v695_v38 = vpop.f32.mrf.mxu3 }
  0xe9   : > { %v656_v39 = vadd.f32 %v1279_v40, %v655_v37  ;;  %v696_v41 = vadd.f32 %v1279_v40, %v695_v38  ;;  %v578_v42 = vpop.f32.mrf.mxu0  ;;  %v618_v43 = vpop.f32.mrf.mxu1 }
  0xea   : > { %v579_v44 = vadd.f32 %v1279_v40, %v578_v42  ;;  %v619_v45 = vadd.f32 %v1279_v40, %v618_v43 }
  0xeb   : > { %757 = vst [vmem:[%s1284_s18 + $0x138] sm:$0xff] %v656_v39 }
  0xec   : > { %773 = vst [vmem:[%s1284_s18 + $0x1b8] sm:$0xff] %v696_v41 }
  0xed   : > { %726 = vst [vmem:[%s1284_s18 + $0x40] sm:$0xff] %v579_v44 }
  0xee   : > { %742 = vst [vmem:[%s1284_s18 + $0xc0] sm:$0xff] %v619_v45 }
  0xf0   : > { %v658_v46 = vpop.f32.mrf.mxu2  ;;  %v698_v47 = vpop.f32.mrf.mxu3 }
  0xf1   : > { %v659_v48 = vadd.f32 %v1279_v40, %v658_v46  ;;  %v699_v49 = vadd.f32 %v1279_v40, %v698_v47  ;;  %v580_v50 = vpop.f32.mrf.mxu0  ;;  %v620_v51 = vpop.f32.mrf.mxu1 }
  0xf2   : > { %v581_v52 = vadd.f32 %v1279_v40, %v580_v50  ;;  %v621_v53 = vadd.f32 %v1279_v40, %v620_v51 }
  0xf3   : > { %758 = vst [vmem:[%s1284_s18 + $0x140] sm:$0xff] %v659_v48 }
  0xf4   : > { %774 = vst [vmem:[%s1284_s18 + $0x1c0] sm:$0xff] %v699_v49 }
  0xf5   : > { %727 = vst [vmem:[%s1284_s18 + $0x48] sm:$0xff] %v581_v52 }
  0xf6   : > { %743 = vst [vmem:[%s1284_s18 + $0xc8] sm:$0xff] %v621_v53 }
  0xf8   : > { %v660_v54 = vpop.f32.mrf.mxu2  ;;  %v700_v55 = vpop.f32.mrf.mxu3 }
  0xf9   : > { %v661_v56 = vadd.f32 %v1279_v40, %v660_v54  ;;  %v701_v57 = vadd.f32 %v1279_v40, %v700_v55  ;;  %v583_v58 = vpop.f32.mrf.mxu0  ;;  %v623_v59 = vpop.f32.mrf.mxu1 }
  0xfa   : > { %v584_v60 = vadd.f32 %v1279_v40, %v583_v58  ;;  %v624_v61 = vadd.f32 %v1279_v40, %v623_v59 }
  0xfb   : > { %759 = vst [vmem:[%s1284_s18 + $0x148] sm:$0xff] %v661_v56 }
  0xfc   : > { %775 = vst [vmem:[%s1284_s18 + $0x1c8] sm:$0xff] %v701_v57 }
  0xfd   : > { %728 = vst [vmem:[%s1284_s18 + $0x50] sm:$0xff] %v584_v60 }
  0xfe   : > { %744 = vst [vmem:[%s1284_s18 + $0xd0] sm:$0xff] %v624_v61 }
 0x100   : > { %v663_v62 = vpop.f32.mrf.mxu2  ;;  %v703_v63 = vpop.f32.mrf.mxu3 }
 0x101   : > { %v664_v0 = vadd.f32 %v1279_v40, %v663_v62  ;;  %v704_v1 = vadd.f32 %v1279_v40, %v703_v63  ;;  %v585_v2 = vpop.f32.mrf.mxu0  ;;  %v625_v3 = vpop.f32.mrf.mxu1 }
 0x102   : > { %v586_v4 = vadd.f32 %v1279_v40, %v585_v2  ;;  %v626_v5 = vadd.f32 %v1279_v40, %v625_v3 }
 0x103   : > { %760 = vst [vmem:[%s1284_s18 + $0x150] sm:$0xff] %v664_v0 }
 0x104   : > { %776 = vst [vmem:[%s1284_s18 + $0x1d0] sm:$0xff] %v704_v1 }
 0x105   : > { %729 = vst [vmem:[%s1284_s18 + $0x58] sm:$0xff] %v586_v4 }
 0x106   : > { %745 = vst [vmem:[%s1284_s18 + $0xd8] sm:$0xff] %v626_v5 }
 0x108   : > { %v665_v6 = vpop.f32.mrf.mxu2  ;;  %v705_v7 = vpop.f32.mrf.mxu3 }
 0x109   : > { %v666_v8 = vadd.f32 %v1279_v40, %v665_v6  ;;  %v706_v9 = vadd.f32 %v1279_v40, %v705_v7  ;;  %v588_v10 = vpop.f32.mrf.mxu0  ;;  %v628_v11 = vpop.f32.mrf.mxu1 }
 0x10a   : > { %v589_v12 = vadd.f32 %v1279_v40, %v588_v10  ;;  %v629_v13 = vadd.f32 %v1279_v40, %v628_v11 }
 0x10b   : > { %761 = vst [vmem:[%s1284_s18 + $0x158] sm:$0xff] %v666_v8 }
 0x10c   : > { %777 = vst [vmem:[%s1284_s18 + $0x1d8] sm:$0xff] %v706_v9 }
 0x10d   : > { %730 = vst [vmem:[%s1284_s18 + $0x60] sm:$0xff] %v589_v12 }
 0x10e   : > { %746 = vst [vmem:[%s1284_s18 + $0xe0] sm:$0xff] %v629_v13 }
 0x110   : > { %v668_v14 = vpop.f32.mrf.mxu2  ;;  %v708_v15 = vpop.f32.mrf.mxu3 }
 0x111   : > { %v669_v16 = vadd.f32 %v1279_v40, %v668_v14  ;;  %v709_v17 = vadd.f32 %v1279_v40, %v708_v15  ;;  %v590_v18 = vpop.f32.mrf.mxu0  ;;  %v630_v19 = vpop.f32.mrf.mxu1 }
 0x112   : > { %v591_v20 = vadd.f32 %v1279_v40, %v590_v18  ;;  %v631_v21 = vadd.f32 %v1279_v40, %v630_v19 }
 0x113   : > { %762 = vst [vmem:[%s1284_s18 + $0x160] sm:$0xff] %v669_v16 }
 0x114   : > { %778 = vst [vmem:[%s1284_s18 + $0x1e0] sm:$0xff] %v709_v17 }
 0x115   : > { %731 = vst [vmem:[%s1284_s18 + $0x68] sm:$0xff] %v591_v20 }
 0x116   : > { %747 = vst [vmem:[%s1284_s18 + $0xe8] sm:$0xff] %v631_v21 }
 0x118   : > { %v670_v22 = vpop.f32.mrf.mxu2  ;;  %v710_v23 = vpop.f32.mrf.mxu3 }
 0x119   : > { %v671_v24 = vadd.f32 %v1279_v40, %v670_v22  ;;  %v711_v25 = vadd.f32 %v1279_v40, %v710_v23  ;;  %v593_v26 = vpop.f32.mrf.mxu0  ;;  %v633_v27 = vpop.f32.mrf.mxu1 }
 0x11a   : > { %v594_v28 = vadd.f32 %v1279_v40, %v593_v26  ;;  %v634_v29 = vadd.f32 %v1279_v40, %v633_v27 }
 0x11b   : > { %763 = vst [vmem:[%s1284_s18 + $0x168] sm:$0xff] %v671_v24 }
 0x11c   : > { %779 = vst [vmem:[%s1284_s18 + $0x1e8] sm:$0xff] %v711_v25 }
 0x11d   : > { %732 = vst [vmem:[%s1284_s18 + $0x70] sm:$0xff] %v594_v28 }
 0x11e   : > { %748 = vst [vmem:[%s1284_s18 + $0xf0] sm:$0xff] %v634_v29 }
 0x120   : > { %v673_v30 = vpop.f32.mrf.mxu2  ;;  %v713_v31 = vpop.f32.mrf.mxu3 }
 0x121   : > { %v674_v32 = vadd.f32 %v1279_v40, %v673_v30  ;;  %v714_v33 = vadd.f32 %v1279_v40, %v713_v31  ;;  %v595_v34 = vpop.f32.mrf.mxu0  ;;  %v635_v35 = vpop.f32.mrf.mxu1 }
 0x122   : > { %v596_v36 = vadd.f32 %v1279_v40, %v595_v34  ;;  %v636_v37 = vadd.f32 %v1279_v40, %v635_v35 }
 0x123   : > { %764 = vst [vmem:[%s1284_s18 + $0x170] sm:$0xff] %v674_v32 }
 0x124   : > { %780 = vst [vmem:[%s1284_s18 + $0x1f0] sm:$0xff] %v714_v33 }
 0x125   : > { %733 = vst [vmem:[%s1284_s18 + $0x78] sm:$0xff] %v596_v36 }
 0x126   : > { %749 = vst [vmem:[%s1284_s18 + $0xf8] sm:$0xff] %v636_v37 }
 0x128   : > { %v675_v38 = vpop.f32.mrf.mxu2  ;;  %v715_v39 = vpop.f32.mrf.mxu3 }
 0x129   : > { %v676_v41 = vadd.f32 %v1279_v40, %v675_v38  ;;  %v716_v42 = vadd.f32 %v1279_v40, %v715_v39 }
 0x12b   : > { %765 = vst [vmem:[%s1284_s18 + $0x178] sm:$0xff] %v676_v41 }
 0x12c   : > { %781 = vst [vmem:[%s1284_s18 + $0x1f8] sm:$0xff] %v716_v42 }
 0x12d PF: > { %s13_s14 = sadd.s32 1, %s1168_s14   ;;  %s1427_s12 = smov %s1164_s13 }
 0x12e   : > { %p10_p5 = scmp.ge.s32.totalorder %s13_s14, 6   ;;  %s1428_s13 = smov %s1430_s15 }
 0x130   :  { %12 = sbr.rel (!%p10_p5) target bundleno = 2 (0x2), region = 68 }

</bundles_post_ra>
